<compile_context>
chip_gen: v7x
topology: tpu7x:2x2x1
jax: 0.10.0
libtpu: 0.0.40
codegen_flags: <defaults>
</compile_context>

<pallas_src>
import functools

import jax
import jax.numpy as jnp
from jax import lax
from jax.experimental import pallas as pl
from jax.experimental.pallas import tpu as pltpu

LANE = 128


def _round_up(x, m):
    return ((x + m - 1) // m) * m


def _pick_tile_m(M, cap):
    """Largest M tile <= cap, but forced to >=2 grid tiles (keeps both v7x TCs busy)."""
    tm = _round_up(max(1, -(-M // 2)), 8)
    return max(8, min(cap, tm))


# ----------------------------------------------------------------------------
# Kernel 1: tiled matmul + bias + ReLU (every conv via im2col uses this)
# ----------------------------------------------------------------------------
def _matmul_bias_kernel(x_ref, w_ref, b_ref, o_ref, *, relu):
    y = jnp.dot(x_ref[...], w_ref[...], preferred_element_type=jnp.float32)
    y = y + b_ref[...]
    if relu:
        y = jnp.maximum(y, 0.0)
    o_ref[...] = y.astype(o_ref.dtype)


def pallas_matmul_bias(x, w, b, *, relu, out_dtype, tile_m=1024):
    """y = relu?(x @ w + b); M tiled & pipelined ("parallel"), weights VMEM-resident."""
    M, K = x.shape
    N = w.shape[1]
    tm = _pick_tile_m(M, tile_m)
    return pl.pallas_call(
        functools.partial(_matmul_bias_kernel, relu=relu),
        out_shape=jax.ShapeDtypeStruct((M, N), out_dtype),
        grid=(pl.cdiv(M, tm),),
        in_specs=[
            pl.BlockSpec((tm, K), lambda i: (i, 0)),
            pl.BlockSpec((K, N), lambda i: (0, 0)),
            pl.BlockSpec((1, N), lambda i: (0, 0)),
        ],
        out_specs=pl.BlockSpec((tm, N), lambda i: (i, 0)),
        compiler_params=pltpu.CompilerParams(dimension_semantics=("parallel",)),
    )(x, w, b)


# ----------------------------------------------------------------------------
# Kernel 2: fused FC region + dueling head
#   fc1 adv||val concatenated along N, fc2 block-diagonal, hidden axis streamed as an
#   "arbitrary" grid axis into an f32 VMEM accumulator.  On the last hidden tile the
#   dueling combine + masked softmax over (padded) atoms + support expectation runs
#   in-kernel and only the tiny Q matrix is written to HBM.
# ----------------------------------------------------------------------------
def _fused_fc_head_kernel(feat_ref, w1_ref, b1_ref, w2_ref, b2_ref, sup_ref,
                          q_ref, acc_ref, *, n_actions, n_atoms, atom_pad):
    j = pl.program_id(1)

    @pl.when(j == 0)
    def _():
        acc_ref[...] = jnp.zeros_like(acc_ref)

    h = jnp.dot(feat_ref[...], w1_ref[...], preferred_element_type=jnp.float32)
    h = jnp.maximum(h + b1_ref[...], 0.0).astype(jnp.bfloat16)
    acc_ref[...] += jnp.dot(h, w2_ref[...], preferred_element_type=jnp.float32)

    @pl.when(j == pl.num_programs(1) - 1)
    def _():
        y = acc_ref[...] + b2_ref[...]                       # (tm, (A+1)*ZP) f32
        tm = y.shape[0]
        # lane-aligned 128-wide slices: one per action head + the value head
        advs = [y[:, a * atom_pad:(a + 1) * atom_pad] for a in range(n_actions)]
        val = y[:, n_actions * atom_pad:(n_actions + 1) * atom_pad]
        adv_sum = advs[0]
        for a in range(1, n_actions):
            adv_sum = adv_sum + advs[a]
        adv_mean = adv_sum * (1.0 / n_actions)

        atom_idx = lax.broadcasted_iota(jnp.int32, (tm, atom_pad), 1)
        atom_mask = atom_idx < n_atoms                       # mask lane padding of atoms
        sup = sup_ref[...]                                   # (1, ZP)

        out_lane = lax.broadcasted_iota(jnp.int32, (tm, q_ref.shape[1]), 1)
        q_cols = jnp.zeros((tm, q_ref.shape[1]), jnp.float32)
        for a in range(n_actions):
            qa = val + advs[a] - adv_mean
            qa = jnp.where(atom_mask, qa, -1e30)
            m = jnp.max(qa, axis=-1, keepdims=True)
            e = jnp.exp(qa - m)
            num = jnp.sum(e * sup, axis=-1, keepdims=True)
            den = jnp.sum(e, axis=-1, keepdims=True)
            q_a = num * pl.reciprocal(den, approx=True)      # (tm, 1)
            q_cols = jnp.where(out_lane == a, q_a, q_cols)
        q_ref[...] = q_cols                                  # lane-dense (tm, 128) store


def pallas_fused_fc_head(feat, w1, b1, w2, b2, support_row, *,
                         n_actions, n_atoms, tile_m=512, tile_h=256):
    M, K = feat.shape            # K = 7*7*64 = 3136
    H = w1.shape[1]              # 1024 = 512 adv + 512 val hidden
    N2 = w2.shape[1]             # (out_dim + 1) * 128
    ZP = support_row.shape[1]    # 128
    tm = _pick_tile_m(M, tile_m)
    q_pad = pl.pallas_call(
        functools.partial(_fused_fc_head_kernel, n_actions=n_actions,
                          n_atoms=n_atoms, atom_pad=ZP),
        out_shape=jax.ShapeDtypeStruct((M, LANE), jnp.float32),
        grid=(pl.cdiv(M, tm), H // tile_h),
        in_specs=[
            pl.BlockSpec((tm, K), lambda i, j: (i, 0)),
            pl.BlockSpec((K, tile_h), lambda i, j: (0, j)),
            pl.BlockSpec((1, tile_h), lambda i, j: (0, j)),
            pl.BlockSpec((tile_h, N2), lambda i, j: (j, 0)),
            pl.BlockSpec((1, N2), lambda i, j: (0, 0)),
            pl.BlockSpec((1, ZP), lambda i, j: (0, 0)),
        ],
        out_specs=pl.BlockSpec((tm, LANE), lambda i, j: (i, 0)),
        scratch_shapes=[pltpu.VMEM((tm, N2), jnp.float32)],
        compiler_params=pltpu.CompilerParams(
            dimension_semantics=("parallel", "arbitrary"),
            vmem_limit_bytes=32 * 1024 * 1024),
    )(feat, w1, b1, w2, b2, support_row)
    return q_pad[:, :n_actions]


# ----------------------------------------------------------------------------
# Conv = im2col (XLA strided slices, bf16, real channels) + Pallas matmul
# ----------------------------------------------------------------------------
def _im2col(x_nhwc, kh, kw, stride):
    B, H, W, C = x_nhwc.shape
    oh = (H - kh) // stride + 1
    ow = (W - kw) // stride + 1
    patches = []
    for i in range(kh):
        for j in range(kw):
            patches.append(
                x_nhwc[:, i:i + stride * (oh - 1) + 1:stride,
                       j:j + stride * (ow - 1) + 1:stride, :])
    p = jnp.stack(patches, axis=3)                    # (B, oh, ow, kh*kw, C)
    return p.reshape(B * oh * ow, kh * kw * C), oh, ow


def conv2d_pallas(x_nhwc, w_mat, b_row, *, kernel, stride):
    B = x_nhwc.shape[0]
    cols, oh, ow = _im2col(x_nhwc, kernel, kernel, stride)
    y = pallas_matmul_bias(cols, w_mat, b_row, relu=True, out_dtype=jnp.bfloat16)
    return y.reshape(B, oh, ow, w_mat.shape[1])


# ----------------------------------------------------------------------------
# Parameters: PyTorch-layout init + one-time repacking into kernel layout
# ----------------------------------------------------------------------------
def init_params(key, out_dim, atom_size):
    ks = jax.random.split(key, 14)

    def w(k, shape, s):
        return (s * jax.random.normal(k, shape)).astype(jnp.float32)

    return dict(
        conv1_w=w(ks[0], (32, 4, 8, 8), 0.05),   conv1_b=w(ks[1], (32,), 0.05),
        conv2_w=w(ks[2], (64, 32, 4, 4), 0.05),  conv2_b=w(ks[3], (64,), 0.05),
        conv3_w=w(ks[4], (64, 64, 3, 3), 0.05),  conv3_b=w(ks[5], (64,), 0.05),
        adv_fc1_w=w(ks[6], (7 * 7 * 64, 512), 0.02), adv_fc1_b=w(ks[7], (512,), 0.02),
        adv_fc2_w=w(ks[8], (512, out_dim * atom_size), 0.1),
        adv_fc2_b=w(ks[9], (out_dim * atom_size,), 0.1),
        val_fc1_w=w(ks[10], (7 * 7 * 64, 512), 0.02), val_fc1_b=w(ks[11], (512,), 0.02),
        val_fc2_w=w(ks[12], (512, atom_size), 0.1),  val_fc2_b=w(ks[13], (atom_size,), 0.1),
    )


def prepare_params(params, support, out_dim, atom_size):
    """Repack PyTorch-layout params: bf16, REAL channel counts everywhere, fc1 rows
    permuted to NHWC flatten order, 1/255 folded into conv1, fc branches fused and
    fc2 block-diagonalized with the atom axis padded to 128 (lane-dense accumulator)."""
    f32, bf16 = jnp.float32, jnp.bfloat16
    A, Z = out_dim, atom_size
    ZP = _round_up(Z, LANE)

    def pack_conv(w_oihw, bias, scale=1.0):
        oc, ic, kh, kw = w_oihw.shape
        w_khwc = jnp.transpose(w_oihw, (2, 3, 1, 0)) * scale          # (kh,kw,ic,oc)
        return (w_khwc.reshape(kh * kw * ic, oc).astype(bf16),
                bias[None, :].astype(f32))

    c1_w, c1_b = pack_conv(params["conv1_w"], params["conv1_b"], scale=1.0 / 255.0)
    c2_w, c2_b = pack_conv(params["conv2_w"], params["conv2_b"])
    c3_w, c3_b = pack_conv(params["conv3_w"], params["conv3_b"])

    # fc1: rows from PyTorch (C,H,W) flatten order -> NHWC flatten order (no padding).
    def fc1_rows(w):
        return jnp.transpose(w.reshape(64, 7, 7, 512), (1, 2, 0, 3)).reshape(7 * 7 * 64, 512)

    w1 = jnp.concatenate([fc1_rows(params["adv_fc1_w"]),
                          fc1_rows(params["val_fc1_w"])], axis=1).astype(bf16)
    b1 = jnp.concatenate([params["adv_fc1_b"], params["val_fc1_b"]])[None, :].astype(f32)

    # fc2: block-diagonal (adv rows use h[:, :512], val rows use h[:, 512:]),
    # atom axis padded Z -> ZP so the accumulator last dim is 128-aligned.
    w2 = jnp.zeros((1024, (A + 1) * ZP), f32)
    b2 = jnp.zeros((1, (A + 1) * ZP), f32)
    for a in range(A):
        w2 = w2.at[:512, a * ZP:a * ZP + Z].set(params["adv_fc2_w"][:, a * Z:(a + 1) * Z])
        b2 = b2.at[0, a * ZP:a * ZP + Z].set(params["adv_fc2_b"][a * Z:(a + 1) * Z])
    w2 = w2.at[512:, A * ZP:A * ZP + Z].set(params["val_fc2_w"])
    b2 = b2.at[0, A * ZP:A * ZP + Z].set(params["val_fc2_b"])

    support_row = jnp.zeros((1, ZP), f32).at[0, :Z].set(support)

    return dict(c1_w=c1_w, c1_b=c1_b, c2_w=c2_w, c2_b=c2_b, c3_w=c3_w, c3_b=c3_b,
                w1=w1, b1=b1, w2=w2.astype(bf16), b2=b2, support=support_row)


# ----------------------------------------------------------------------------
# Forward pass (3 conv kernels + 1 fused FC+head kernel = 4 pallas_calls)
# ----------------------------------------------------------------------------
def categorical_dueling_cnn_forward(packed, x_nchw, *, out_dim, atom_size):
    B = x_nchw.shape[0]
    x = jnp.transpose(x_nchw, (0, 2, 3, 1)).astype(jnp.bfloat16)              # NHWC bf16
    h = conv2d_pallas(x, packed["c1_w"], packed["c1_b"], kernel=8, stride=4)  # (B,20,20,32)
    h = conv2d_pallas(h, packed["c2_w"], packed["c2_b"], kernel=4, stride=2)  # (B, 9, 9,64)
    h = conv2d_pallas(h, packed["c3_w"], packed["c3_b"], kernel=3, stride=1)  # (B, 7, 7,64)
    feat = h.reshape(B, -1)                                # NHWC flatten (layout-free)
    return pallas_fused_fc_head(feat, packed["w1"], packed["b1"], packed["w2"],
                                packed["b2"], packed["support"],
                                n_actions=out_dim, n_atoms=atom_size)


# ----------------------------------------------------------------------------
# Pure-JAX f32 reference (semantics check)
# ----------------------------------------------------------------------------
def reference_forward(params, x_nchw, support, out_dim, atom_size):
    x = x_nchw.astype(jnp.float32) / 255.0

    def conv(h, w, b, s):
        y = lax.conv_general_dilated(h, w, (s, s), "VALID",
                                     dimension_numbers=("NCHW", "OIHW", "NCHW"),
                                     precision=lax.Precision.HIGHEST)
        return jax.nn.relu(y + b[None, :, None, None])

    h = conv(x, params["conv1_w"], params["conv1_b"], 4)
    h = conv(h, params["conv2_w"], params["conv2_b"], 2)
    h = conv(h, params["conv3_w"], params["conv3_b"], 1)
    feat = h.reshape(h.shape[0], -1)

    def lin(a, w, b, relu=False):
        y = jnp.dot(a, w, precision=lax.Precision.HIGHEST) + b
        return jax.nn.relu(y) if relu else y

    adv = lin(lin(feat, params["adv_fc1_w"], params["adv_fc1_b"], True),
              params["adv_fc2_w"], params["adv_fc2_b"])
    val = lin(lin(feat, params["val_fc1_w"], params["val_fc1_b"], True),
              params["val_fc2_w"], params["val_fc2_b"])
    adv = adv.reshape(-1, out_dim, atom_size)
    val = val.reshape(-1, 1, atom_size)
    q_atoms = val + adv - adv.mean(axis=1, keepdims=True)
    dist = jax.nn.softmax(q_atoms, axis=-1)
    return jnp.sum(dist * support[None, None, :], axis=2)


# ----------------------------------------------------------------------------
if __name__ == "__main__":
    out_dim, atom_size, batch = 6, 51, 2

    key = jax.random.PRNGKey(0)
    k_params, k_x = jax.random.split(key)
    params = init_params(k_params, out_dim, atom_size)
    support = jnp.linspace(0.0, 200.0, atom_size).astype(jnp.float32)
    packed = prepare_params(params, support, out_dim, atom_size)

    # The 7*7*64 flatten hard-coded in the module implies 84x84 Atari frames.
    x = jax.random.uniform(k_x, (batch, 4, 84, 84), minval=0.0, maxval=255.0,
                           dtype=jnp.float32)

    fwd = jax.jit(functools.partial(categorical_dueling_cnn_forward,
                                    out_dim=out_dim, atom_size=atom_size))
    q = jax.block_until_ready(fwd(packed, x))
    q_ref = jax.block_until_ready(
        reference_forward(params, x, support, out_dim, atom_size))

    assert q.shape == (batch, out_dim), q.shape
    max_diff = float(jnp.max(jnp.abs(q - q_ref)))
    if not max_diff < 2.0:   # bf16 matmul path vs f32 reference (q values ~O(100))
        raise AssertionError(f"mismatch vs f32 reference, max abs diff = {max_diff}")
    print("KERNEL_OK")
</pallas_src>

<mosaic_0001>
module attributes {stable_mosaic.version = 11 : i64} {
  func.func @_matmul_bias_kernel(%arg0: i32, %arg1: memref<400x256xbf16, #tpu.memory_space<vmem>>, %arg2: memref<256x32xbf16, #tpu.memory_space<vmem>>, %arg3: memref<1x32xf32, #tpu.memory_space<vmem>>, %arg4: memref<400x32xbf16, #tpu.memory_space<vmem>>) attributes {dimension_semantics = [#tpu.dimension_semantics<parallel>], iteration_bounds = array<i64: 2>, scalar_prefetch = 0 : i64, scratch_operands = 0 : i64, tpu.core_type = #tpu.core_type<tc>, window_params = [{transform_indices = @transform_0, window_bounds = array<i64: 400, 256>}, {pipeline_mode = #tpu.pipeline_mode<synchronous>, transform_indices = @transform_1, window_bounds = array<i64: 256, 32>}, {pipeline_mode = #tpu.pipeline_mode<synchronous>, transform_indices = @transform_2, window_bounds = array<i64: 1, 32>}, {transform_indices = @transform_3, window_bounds = array<i64: 400, 32>}]} {
    %c0 = arith.constant 0 : index
    %c0_0 = arith.constant 0 : index
    %0 = vector.load %arg1[%c0, %c0_0] : memref<400x256xbf16, #tpu.memory_space<vmem>>, vector<400x256xbf16>
    %c0_1 = arith.constant 0 : index
    %c0_2 = arith.constant 0 : index
    %1 = vector.load %arg2[%c0_1, %c0_2] : memref<256x32xbf16, #tpu.memory_space<vmem>>, vector<256x32xbf16>
    %cst = arith.constant dense<0.000000e+00> : vector<400x32xf32>
    %2 = tpu.matmul %0, %1, %cst {dimension_numbers = #tpu.dot_dimension_numbers<[1], [0], [0], [1], [0, 0, 1, 1], [], []>} : vector<400x256xbf16>, vector<256x32xbf16>, vector<400x32xf32> -> vector<400x32xf32>
    %c0_3 = arith.constant 0 : index
    %c0_4 = arith.constant 0 : index
    %3 = vector.load %arg3[%c0_3, %c0_4] : memref<1x32xf32, #tpu.memory_space<vmem>>, vector<1x32xf32>
    %4 = vector.broadcast %3 : vector<1x32xf32> to vector<400x32xf32>
    %5 = arith.addf %2, %4 : vector<400x32xf32>
    %cst_5 = arith.constant 0.000000e+00 : f32
    %6 = vector.broadcast %cst_5 : f32 to vector<400x32xf32>
    %7 = arith.maximumf %5, %6 : vector<400x32xf32>
    %8 = arith.truncf %7 : vector<400x32xf32> to vector<400x32xbf16>
    %c0_6 = arith.constant 0 : index
    %c0_7 = arith.constant 0 : index
    %9 = vector.load %arg4[%c0_6, %c0_7] : memref<400x32xbf16, #tpu.memory_space<vmem>>, vector<400x32xbf16>
    tpu.vector_store %arg4[%c0_6, %c0_7], %8 {strides = array<i32>} : memref<400x32xbf16, #tpu.memory_space<vmem>>, vector<400x32xbf16>,
    return
  }
  func.func @transform_0(%arg0: i32) -> (i32, i32) {
    %c0_i32 = arith.constant 0 : i32
    %c0_i32_0 = arith.constant 0 : i32
    return %arg0, %c0_i32 : i32, i32
  }
  func.func @transform_1(%arg0: i32) -> (i32, i32) {
    %c0_i32 = arith.constant 0 : i32
    %c0_i32_0 = arith.constant 0 : i32
    %c0_i32_1 = arith.constant 0 : i32
    return %c0_i32, %c0_i32_0 : i32, i32
  }
  func.func @transform_2(%arg0: i32) -> (i32, i32) {
    %c0_i32 = arith.constant 0 : i32
    %c0_i32_0 = arith.constant 0 : i32
    %c0_i32_1 = arith.constant 0 : i32
    return %c0_i32, %c0_i32_0 : i32, i32
  }
  func.func @transform_3(%arg0: i32) -> (i32, i32) {
    %c0_i32 = arith.constant 0 : i32
    %c0_i32_0 = arith.constant 0 : i32
    return %arg0, %c0_i32 : i32, i32
  }
}

module attributes {stable_mosaic.version = 11 : i64} {
  func.func @_matmul_bias_kernel(%arg0: i32, %arg1: memref<88x512xbf16, #tpu.memory_space<vmem>>, %arg2: memref<512x64xbf16, #tpu.memory_space<vmem>>, %arg3: memref<1x64xf32, #tpu.memory_space<vmem>>, %arg4: memref<88x64xbf16, #tpu.memory_space<vmem>>) attributes {dimension_semantics = [#tpu.dimension_semantics<parallel>], iteration_bounds = array<i64: 2>, scalar_prefetch = 0 : i64, scratch_operands = 0 : i64, tpu.core_type = #tpu.core_type<tc>, window_params = [{transform_indices = @transform_0, window_bounds = array<i64: 88, 512>}, {pipeline_mode = #tpu.pipeline_mode<synchronous>, transform_indices = @transform_1, window_bounds = array<i64: 512, 64>}, {pipeline_mode = #tpu.pipeline_mode<synchronous>, transform_indices = @transform_2, window_bounds = array<i64: 1, 64>}, {transform_indices = @transform_3, window_bounds = array<i64: 88, 64>}]} {
    %c0 = arith.constant 0 : index
    %c0_0 = arith.constant 0 : index
    %0 = vector.load %arg1[%c0, %c0_0] : memref<88x512xbf16, #tpu.memory_space<vmem>>, vector<88x512xbf16>
    %c0_1 = arith.constant 0 : index
    %c0_2 = arith.constant 0 : index
    %1 = vector.load %arg2[%c0_1, %c0_2] : memref<512x64xbf16, #tpu.memory_space<vmem>>, vector<512x64xbf16>
    %cst = arith.constant dense<0.000000e+00> : vector<88x64xf32>
    %2 = tpu.matmul %0, %1, %cst {dimension_numbers = #tpu.dot_dimension_numbers<[1], [0], [0], [1], [0, 0, 1, 1], [], []>} : vector<88x512xbf16>, vector<512x64xbf16>, vector<88x64xf32> -> vector<88x64xf32>
    %c0_3 = arith.constant 0 : index
    %c0_4 = arith.constant 0 : index
    %3 = vector.load %arg3[%c0_3, %c0_4] : memref<1x64xf32, #tpu.memory_space<vmem>>, vector<1x64xf32>
    %4 = vector.broadcast %3 : vector<1x64xf32> to vector<88x64xf32>
    %5 = arith.addf %2, %4 : vector<88x64xf32>
    %cst_5 = arith.constant 0.000000e+00 : f32
    %6 = vector.broadcast %cst_5 : f32 to vector<88x64xf32>
    %7 = arith.maximumf %5, %6 : vector<88x64xf32>
    %8 = arith.truncf %7 : vector<88x64xf32> to vector<88x64xbf16>
    %c0_6 = arith.constant 0 : index
    %c0_7 = arith.constant 0 : index
    %9 = vector.load %arg4[%c0_6, %c0_7] : memref<88x64xbf16, #tpu.memory_space<vmem>>, vector<88x64xbf16>
    tpu.vector_store %arg4[%c0_6, %c0_7], %8 {strides = array<i32>} : memref<88x64xbf16, #tpu.memory_space<vmem>>, vector<88x64xbf16>,
    return
  }
  func.func @transform_0(%arg0: i32) -> (i32, i32) {
    %c0_i32 = arith.constant 0 : i32
    %c0_i32_0 = arith.constant 0 : i32
    return %arg0, %c0_i32 : i32, i32
  }
  func.func @transform_1(%arg0: i32) -> (i32, i32) {
    %c0_i32 = arith.constant 0 : i32
    %c0_i32_0 = arith.constant 0 : i32
    %c0_i32_1 = arith.constant 0 : i32
    return %c0_i32, %c0_i32_0 : i32, i32
  }
  func.func @transform_2(%arg0: i32) -> (i32, i32) {
    %c0_i32 = arith.constant 0 : i32
    %c0_i32_0 = arith.constant 0 : i32
    %c0_i32_1 = arith.constant 0 : i32
    return %c0_i32, %c0_i32_0 : i32, i32
  }
  func.func @transform_3(%arg0: i32) -> (i32, i32) {
    %c0_i32 = arith.constant 0 : i32
    %c0_i32_0 = arith.constant 0 : i32
    return %arg0, %c0_i32 : i32, i32
  }
}

module attributes {stable_mosaic.version = 11 : i64} {
  func.func @_matmul_bias_kernel(%arg0: i32, %arg1: memref<56x576xbf16, #tpu.memory_space<vmem>>, %arg2: memref<576x64xbf16, #tpu.memory_space<vmem>>, %arg3: memref<1x64xf32, #tpu.memory_space<vmem>>, %arg4: memref<56x64xbf16, #tpu.memory_space<vmem>>) attributes {dimension_semantics = [#tpu.dimension_semantics<parallel>], iteration_bounds = array<i64: 2>, scalar_prefetch = 0 : i64, scratch_operands = 0 : i64, tpu.core_type = #tpu.core_type<tc>, window_params = [{transform_indices = @transform_0, window_bounds = array<i64: 56, 576>}, {pipeline_mode = #tpu.pipeline_mode<synchronous>, transform_indices = @transform_1, window_bounds = array<i64: 576, 64>}, {pipeline_mode = #tpu.pipeline_mode<synchronous>, transform_indices = @transform_2, window_bounds = array<i64: 1, 64>}, {transform_indices = @transform_3, window_bounds = array<i64: 56, 64>}]} {
    %c0 = arith.constant 0 : index
    %c0_0 = arith.constant 0 : index
    %0 = vector.load %arg1[%c0, %c0_0] : memref<56x576xbf16, #tpu.memory_space<vmem>>, vector<56x576xbf16>
    %c0_1 = arith.constant 0 : index
    %c0_2 = arith.constant 0 : index
    %1 = vector.load %arg2[%c0_1, %c0_2] : memref<576x64xbf16, #tpu.memory_space<vmem>>, vector<576x64xbf16>
    %cst = arith.constant dense<0.000000e+00> : vector<56x64xf32>
    %2 = tpu.matmul %0, %1, %cst {dimension_numbers = #tpu.dot_dimension_numbers<[1], [0], [0], [1], [0, 0, 1, 1], [], []>} : vector<56x576xbf16>, vector<576x64xbf16>, vector<56x64xf32> -> vector<56x64xf32>
    %c0_3 = arith.constant 0 : index
    %c0_4 = arith.constant 0 : index
    %3 = vector.load %arg3[%c0_3, %c0_4] : memref<1x64xf32, #tpu.memory_space<vmem>>, vector<1x64xf32>
    %4 = vector.broadcast %3 : vector<1x64xf32> to vector<56x64xf32>
    %5 = arith.addf %2, %4 : vector<56x64xf32>
    %cst_5 = arith.constant 0.000000e+00 : f32
    %6 = vector.broadcast %cst_5 : f32 to vector<56x64xf32>
    %7 = arith.maximumf %5, %6 : vector<56x64xf32>
    %8 = arith.truncf %7 : vector<56x64xf32> to vector<56x64xbf16>
    %c0_6 = arith.constant 0 : index
    %c0_7 = arith.constant 0 : index
    %9 = vector.load %arg4[%c0_6, %c0_7] : memref<56x64xbf16, #tpu.memory_space<vmem>>, vector<56x64xbf16>
    tpu.vector_store %arg4[%c0_6, %c0_7], %8 {strides = array<i32>} : memref<56x64xbf16, #tpu.memory_space<vmem>>, vector<56x64xbf16>,
    return
  }
  func.func @transform_0(%arg0: i32) -> (i32, i32) {
    %c0_i32 = arith.constant 0 : i32
    %c0_i32_0 = arith.constant 0 : i32
    return %arg0, %c0_i32 : i32, i32
  }
  func.func @transform_1(%arg0: i32) -> (i32, i32) {
    %c0_i32 = arith.constant 0 : i32
    %c0_i32_0 = arith.constant 0 : i32
    %c0_i32_1 = arith.constant 0 : i32
    return %c0_i32, %c0_i32_0 : i32, i32
  }
  func.func @transform_2(%arg0: i32) -> (i32, i32) {
    %c0_i32 = arith.constant 0 : i32
    %c0_i32_0 = arith.constant 0 : i32
    %c0_i32_1 = arith.constant 0 : i32
    return %c0_i32, %c0_i32_0 : i32, i32
  }
  func.func @transform_3(%arg0: i32) -> (i32, i32) {
    %c0_i32 = arith.constant 0 : i32
    %c0_i32_0 = arith.constant 0 : i32
    return %arg0, %c0_i32 : i32, i32
  }
}

module attributes {stable_mosaic.version = 11 : i64} {
  func.func @_fused_fc_head_kernel(%arg0: i32, %arg1: i32, %arg2: memref<8x3136xbf16, #tpu.memory_space<vmem>>, %arg3: memref<3136x256xbf16, #tpu.memory_space<vmem>>, %arg4: memref<1x256xf32, #tpu.memory_space<vmem>>, %arg5: memref<256x896xbf16, #tpu.memory_space<vmem>>, %arg6: memref<1x896xf32, #tpu.memory_space<vmem>>, %arg7: memref<1x128xf32, #tpu.memory_space<vmem>>, %arg8: memref<8x128xf32, #tpu.memory_space<vmem>>, %arg9: memref<8x896xf32, #tpu.memory_space<vmem>>) attributes {dimension_semantics = [#tpu.dimension_semantics<parallel>, #tpu.dimension_semantics<arbitrary>], iteration_bounds = array<i64: 1, 4>, scalar_prefetch = 0 : i64, scratch_operands = 1 : i64, tpu.core_type = #tpu.core_type<tc>, window_params = [{transform_indices = @transform_0, window_bounds = array<i64: 8, 3136>}, {transform_indices = @transform_1, window_bounds = array<i64: 3136, 256>}, {transform_indices = @transform_2, window_bounds = array<i64: 1, 256>}, {transform_indices = @transform_3, window_bounds = array<i64: 256, 896>}, {pipeline_mode = #tpu.pipeline_mode<synchronous>, transform_indices = @transform_4, window_bounds = array<i64: 1, 896>}, {pipeline_mode = #tpu.pipeline_mode<synchronous>, transform_indices = @transform_5, window_bounds = array<i64: 1, 128>}, {transform_indices = @transform_6, window_bounds = array<i64: 8, 128>}]} {
    %c0_i32 = arith.constant 0 : i32
    %0 = arith.cmpi eq, %arg1, %c0_i32 : i32
    %1 = arith.extui %0 : i1 to i32
    %c0_i32_0 = arith.constant 0 : i32
    %2 = arith.cmpi ne, %1, %c0_i32_0 : i32
    scf.if %2 {
      %cst_15 = arith.constant 0.000000e+00 : f32
      %20 = vector.broadcast %cst_15 : f32 to vector<8x896xf32>
      %c0_16 = arith.constant 0 : index
      %c0_17 = arith.constant 0 : index
      %21 = vector.load %arg9[%c0_16, %c0_17] : memref<8x896xf32, #tpu.memory_space<vmem>>, vector<8x896xf32>
      tpu.vector_store %arg9[%c0_16, %c0_17], %20 {strides = array<i32>} : memref<8x896xf32, #tpu.memory_space<vmem>>, vector<8x896xf32>,
    } else {
    }
    %c0 = arith.constant 0 : index
    %c0_1 = arith.constant 0 : index
    %3 = vector.load %arg2[%c0, %c0_1] : memref<8x3136xbf16, #tpu.memory_space<vmem>>, vector<8x3136xbf16>
    %c0_2 = arith.constant 0 : index
    %c0_3 = arith.constant 0 : index
    %4 = vector.load %arg3[%c0_2, %c0_3] : memref<3136x256xbf16, #tpu.memory_space<vmem>>, vector<3136x256xbf16>
    %cst = arith.constant dense<0.000000e+00> : vector<8x256xf32>
    %5 = tpu.matmul %3, %4, %cst {dimension_numbers = #tpu.dot_dimension_numbers<[1], [0], [0], [1], [0, 0, 1, 1], [], []>} : vector<8x3136xbf16>, vector<3136x256xbf16>, vector<8x256xf32> -> vector<8x256xf32>
    %c0_4 = arith.constant 0 : index
    %c0_5 = arith.constant 0 : index
    %6 = vector.load %arg4[%c0_4, %c0_5] : memref<1x256xf32, #tpu.memory_space<vmem>>, vector<1x256xf32>
    %7 = vector.broadcast %6 : vector<1x256xf32> to vector<8x256xf32>
    %8 = arith.addf %5, %7 : vector<8x256xf32>
    %cst_6 = arith.constant 0.000000e+00 : f32
    %9 = vector.broadcast %cst_6 : f32 to vector<8x256xf32>
    %10 = arith.maximumf %8, %9 : vector<8x256xf32>
    %11 = arith.truncf %10 : vector<8x256xf32> to vector<8x256xbf16>
    %c0_7 = arith.constant 0 : index
    %c0_8 = arith.constant 0 : index
    %12 = vector.load %arg9[%c0_7, %c0_8] : memref<8x896xf32, #tpu.memory_space<vmem>>, vector<8x896xf32>
    %c0_9 = arith.constant 0 : index
    %c0_10 = arith.constant 0 : index
    %13 = vector.load %arg5[%c0_9, %c0_10] : memref<256x896xbf16, #tpu.memory_space<vmem>>, vector<256x896xbf16>
    %cst_11 = arith.constant dense<0.000000e+00> : vector<8x896xf32>
    %14 = tpu.matmul %11, %13, %cst_11 {dimension_numbers = #tpu.dot_dimension_numbers<[1], [0], [0], [1], [0, 0, 1, 1], [], []>} : vector<8x256xbf16>, vector<256x896xbf16>, vector<8x896xf32> -> vector<8x896xf32>
    %15 = arith.addf %12, %14 : vector<8x896xf32>
    %c0_12 = arith.constant 0 : index
    %c0_13 = arith.constant 0 : index
    %16 = vector.load %arg9[%c0_12, %c0_13] : memref<8x896xf32, #tpu.memory_space<vmem>>, vector<8x896xf32>
    tpu.vector_store %arg9[%c0_12, %c0_13], %15 {strides = array<i32>} : memref<8x896xf32, #tpu.memory_space<vmem>>, vector<8x896xf32>,
    %c3_i32 = arith.constant 3 : i32
    %17 = arith.cmpi eq, %arg1, %c3_i32 : i32
    %18 = arith.extui %17 : i1 to i32
    %c0_i32_14 = arith.constant 0 : i32
    %19 = arith.cmpi ne, %18, %c0_i32_14 : i32
    scf.if %19 {
      %c0_15 = arith.constant 0 : index
      %c0_16 = arith.constant 0 : index
      %20 = vector.load %arg9[%c0_15, %c0_16] : memref<8x896xf32, #tpu.memory_space<vmem>>, vector<8x896xf32>
      %c0_17 = arith.constant 0 : index
      %c0_18 = arith.constant 0 : index
      %21 = vector.load %arg6[%c0_17, %c0_18] : memref<1x896xf32, #tpu.memory_space<vmem>>, vector<1x896xf32>
      %22 = vector.broadcast %21 : vector<1x896xf32> to vector<8x896xf32>
      %23 = arith.addf %20, %22 : vector<8x896xf32>
      %24 = vector.extract_strided_slice %23 {offsets = [0, 0], sizes = [8, 128], strides = [1, 1]} : vector<8x896xf32> to vector<8x128xf32>
      %25 = vector.extract_strided_slice %23 {offsets = [0, 128], sizes = [8, 128], strides = [1, 1]} : vector<8x896xf32> to vector<8x128xf32>
      %26 = vector.extract_strided_slice %23 {offsets = [0, 256], sizes = [8, 128], strides = [1, 1]} : vector<8x896xf32> to vector<8x128xf32>
      %27 = vector.extract_strided_slice %23 {offsets = [0, 384], sizes = [8, 128], strides = [1, 1]} : vector<8x896xf32> to vector<8x128xf32>
      %28 = vector.extract_strided_slice %23 {offsets = [0, 512], sizes = [8, 128], strides = [1, 1]} : vector<8x896xf32> to vector<8x128xf32>
      %29 = vector.extract_strided_slice %23 {offsets = [0, 640], sizes = [8, 128], strides = [1, 1]} : vector<8x896xf32> to vector<8x128xf32>
      %30 = vector.extract_strided_slice %23 {offsets = [0, 768], sizes = [8, 128], strides = [1, 1]} : vector<8x896xf32> to vector<8x128xf32>
      %31 = arith.addf %24, %25 : vector<8x128xf32>
      %32 = arith.addf %31, %26 : vector<8x128xf32>
      %33 = arith.addf %32, %27 : vector<8x128xf32>
      %34 = arith.addf %33, %28 : vector<8x128xf32>
      %35 = arith.addf %34, %29 : vector<8x128xf32>
      %cst_19 = arith.constant 0.166666672 : f32
      %36 = vector.broadcast %cst_19 : f32 to vector<8x128xf32>
      %37 = arith.mulf %35, %36 : vector<8x128xf32>
      %38 = tpu.iota {dimensions = array<i32: 1>} : vector<8x128xi32>
      %c51_i32 = arith.constant 51 : i32
      %39 = vector.broadcast %c51_i32 : i32 to vector<8x128xi32>
      %40 = arith.cmpi slt, %38, %39 : vector<8x128xi32>
      %c0_20 = arith.constant 0 : index
      %c0_21 = arith.constant 0 : index
      %41 = vector.load %arg7[%c0_20, %c0_21] : memref<1x128xf32, #tpu.memory_space<vmem>>, vector<1x128xf32>
      %42 = tpu.iota {dimensions = array<i32: 1>} : vector<8x128xi32>
      %cst_22 = arith.constant 0.000000e+00 : f32
      %43 = vector.broadcast %cst_22 : f32 to vector<8x128xf32>
      %44 = arith.addf %30, %24 : vector<8x128xf32>
      %45 = arith.subf %44, %37 : vector<8x128xf32>
      %cst_23 = arith.constant -1.000000e+30 : f32
      %46 = vector.broadcast %cst_23 : f32 to vector<8x128xf32>
      %47 = arith.select %40, %45, %46 : vector<8x128xi1>, vector<8x128xf32>
      %cst_24 = arith.constant dense<0xFF800000> : vector<8xf32>
      %48 = vector.multi_reduction <maximumf>, %47, %cst_24 [1] : vector<8x128xf32> to vector<8xf32>
      %49 = vector.shape_cast %48 : vector<8xf32> to vector<8x1xf32>
      %50 = vector.broadcast %49 : vector<8x1xf32> to vector<8x128xf32>
      %51 = arith.subf %47, %50 : vector<8x128xf32>
      %52 = math.exp %51 : vector<8x128xf32>
      %53 = vector.broadcast %41 : vector<1x128xf32> to vector<8x128xf32>
      %54 = arith.mulf %52, %53 : vector<8x128xf32>
      %cst_25 = arith.constant dense<0.000000e+00> : vector<8xf32>
      %55 = vector.multi_reduction <add>, %54, %cst_25 [1] : vector<8x128xf32> to vector<8xf32>
      %56 = vector.shape_cast %55 : vector<8xf32> to vector<8x1xf32>
      %cst_26 = arith.constant dense<0.000000e+00> : vector<8xf32>
      %57 = vector.multi_reduction <add>, %52, %cst_26 [1] : vector<8x128xf32> to vector<8xf32>
      %58 = vector.shape_cast %57 : vector<8xf32> to vector<8x1xf32>
      %59 = tpu.reciprocal %58 {approx = true} : vector<8x1xf32> -> vector<8x1xf32>
      %60 = arith.mulf %56, %59 : vector<8x1xf32>
      %c0_i32_27 = arith.constant 0 : i32
      %61 = vector.broadcast %c0_i32_27 : i32 to vector<8x128xi32>
      %62 = arith.cmpi eq, %42, %61 : vector<8x128xi32>
      %63 = vector.shape_cast %60 : vector<8x1xf32> to vector<8x1xf32>
      %64 = vector.broadcast %63 : vector<8x1xf32> to vector<8x128xf32>
      %65 = arith.select %62, %64, %43 : vector<8x128xi1>, vector<8x128xf32>
      %66 = arith.addf %30, %25 : vector<8x128xf32>
      %67 = arith.subf %66, %37 : vector<8x128xf32>
      %cst_28 = arith.constant -1.000000e+30 : f32
      %68 = vector.broadcast %cst_28 : f32 to vector<8x128xf32>
      %69 = arith.select %40, %67, %68 : vector<8x128xi1>, vector<8x128xf32>
      %cst_29 = arith.constant dense<0xFF800000> : vector<8xf32>
      %70 = vector.multi_reduction <maximumf>, %69, %cst_29 [1] : vector<8x128xf32> to vector<8xf32>
      %71 = vector.shape_cast %70 : vector<8xf32> to vector<8x1xf32>
      %72 = vector.broadcast %71 : vector<8x1xf32> to vector<8x128xf32>
      %73 = arith.subf %69, %72 : vector<8x128xf32>
      %74 = math.exp %73 : vector<8x128xf32>
      %75 = vector.broadcast %41 : vector<1x128xf32> to vector<8x128xf32>
      %76 = arith.mulf %74, %75 : vector<8x128xf32>
      %cst_30 = arith.constant dense<0.000000e+00> : vector<8xf32>
      %77 = vector.multi_reduction <add>, %76, %cst_30 [1] : vector<8x128xf32> to vector<8xf32>
      %78 = vector.shape_cast %77 : vector<8xf32> to vector<8x1xf32>
      %cst_31 = arith.constant dense<0.000000e+00> : vector<8xf32>
      %79 = vector.multi_reduction <add>, %74, %cst_31 [1] : vector<8x128xf32> to vector<8xf32>
      %80 = vector.shape_cast %79 : vector<8xf32> to vector<8x1xf32>
      %81 = tpu.reciprocal %80 {approx = true} : vector<8x1xf32> -> vector<8x1xf32>
      %82 = arith.mulf %78, %81 : vector<8x1xf32>
      %c1_i32 = arith.constant 1 : i32
      %83 = vector.broadcast %c1_i32 : i32 to vector<8x128xi32>
      %84 = arith.cmpi eq, %42, %83 : vector<8x128xi32>
      %85 = vector.shape_cast %82 : vector<8x1xf32> to vector<8x1xf32>
      %86 = vector.broadcast %85 : vector<8x1xf32> to vector<8x128xf32>
      %87 = arith.select %84, %86, %65 : vector<8x128xi1>, vector<8x128xf32>
      %88 = arith.addf %30, %26 : vector<8x128xf32>
      %89 = arith.subf %88, %37 : vector<8x128xf32>
      %cst_32 = arith.constant -1.000000e+30 : f32
      %90 = vector.broadcast %cst_32 : f32 to vector<8x128xf32>
      %91 = arith.select %40, %89, %90 : vector<8x128xi1>, vector<8x128xf32>
      %cst_33 = arith.constant dense<0xFF800000> : vector<8xf32>
      %92 = vector.multi_reduction <maximumf>, %91, %cst_33 [1] : vector<8x128xf32> to vector<8xf32>
      %93 = vector.shape_cast %92 : vector<8xf32> to vector<8x1xf32>
      %94 = vector.broadcast %93 : vector<8x1xf32> to vector<8x128xf32>
      %95 = arith.subf %91, %94 : vector<8x128xf32>
      %96 = math.exp %95 : vector<8x128xf32>
      %97 = vector.broadcast %41 : vector<1x128xf32> to vector<8x128xf32>
      %98 = arith.mulf %96, %97 : vector<8x128xf32>
      %cst_34 = arith.constant dense<0.000000e+00> : vector<8xf32>
      %99 = vector.multi_reduction <add>, %98, %cst_34 [1] : vector<8x128xf32> to vector<8xf32>
      %100 = vector.shape_cast %99 : vector<8xf32> to vector<8x1xf32>
      %cst_35 = arith.constant dense<0.000000e+00> : vector<8xf32>
      %101 = vector.multi_reduction <add>, %96, %cst_35 [1] : vector<8x128xf32> to vector<8xf32>
      %102 = vector.shape_cast %101 : vector<8xf32> to vector<8x1xf32>
      %103 = tpu.reciprocal %102 {approx = true} : vector<8x1xf32> -> vector<8x1xf32>
      %104 = arith.mulf %100, %103 : vector<8x1xf32>
      %c2_i32 = arith.constant 2 : i32
      %105 = vector.broadcast %c2_i32 : i32 to vector<8x128xi32>
      %106 = arith.cmpi eq, %42, %105 : vector<8x128xi32>
      %107 = vector.shape_cast %104 : vector<8x1xf32> to vector<8x1xf32>
      %108 = vector.broadcast %107 : vector<8x1xf32> to vector<8x128xf32>
      %109 = arith.select %106, %108, %87 : vector<8x128xi1>, vector<8x128xf32>
      %110 = arith.addf %30, %27 : vector<8x128xf32>
      %111 = arith.subf %110, %37 : vector<8x128xf32>
      %cst_36 = arith.constant -1.000000e+30 : f32
      %112 = vector.broadcast %cst_36 : f32 to vector<8x128xf32>
      %113 = arith.select %40, %111, %112 : vector<8x128xi1>, vector<8x128xf32>
      %cst_37 = arith.constant dense<0xFF800000> : vector<8xf32>
      %114 = vector.multi_reduction <maximumf>, %113, %cst_37 [1] : vector<8x128xf32> to vector<8xf32>
      %115 = vector.shape_cast %114 : vector<8xf32> to vector<8x1xf32>
      %116 = vector.broadcast %115 : vector<8x1xf32> to vector<8x128xf32>
      %117 = arith.subf %113, %116 : vector<8x128xf32>
      %118 = math.exp %117 : vector<8x128xf32>
      %119 = vector.broadcast %41 : vector<1x128xf32> to vector<8x128xf32>
      %120 = arith.mulf %118, %119 : vector<8x128xf32>
      %cst_38 = arith.constant dense<0.000000e+00> : vector<8xf32>
      %121 = vector.multi_reduction <add>, %120, %cst_38 [1] : vector<8x128xf32> to vector<8xf32>
      %122 = vector.shape_cast %121 : vector<8xf32> to vector<8x1xf32>
      %cst_39 = arith.constant dense<0.000000e+00> : vector<8xf32>
      %123 = vector.multi_reduction <add>, %118, %cst_39 [1] : vector<8x128xf32> to vector<8xf32>
      %124 = vector.shape_cast %123 : vector<8xf32> to vector<8x1xf32>
      %125 = tpu.reciprocal %124 {approx = true} : vector<8x1xf32> -> vector<8x1xf32>
      %126 = arith.mulf %122, %125 : vector<8x1xf32>
      %c3_i32_40 = arith.constant 3 : i32
      %127 = vector.broadcast %c3_i32_40 : i32 to vector<8x128xi32>
      %128 = arith.cmpi eq, %42, %127 : vector<8x128xi32>
      %129 = vector.shape_cast %126 : vector<8x1xf32> to vector<8x1xf32>
      %130 = vector.broadcast %129 : vector<8x1xf32> to vector<8x128xf32>
      %131 = arith.select %128, %130, %109 : vector<8x128xi1>, vector<8x128xf32>
      %132 = arith.addf %30, %28 : vector<8x128xf32>
      %133 = arith.subf %132, %37 : vector<8x128xf32>
      %cst_41 = arith.constant -1.000000e+30 : f32
      %134 = vector.broadcast %cst_41 : f32 to vector<8x128xf32>
      %135 = arith.select %40, %133, %134 : vector<8x128xi1>, vector<8x128xf32>
      %cst_42 = arith.constant dense<0xFF800000> : vector<8xf32>
      %136 = vector.multi_reduction <maximumf>, %135, %cst_42 [1] : vector<8x128xf32> to vector<8xf32>
      %137 = vector.shape_cast %136 : vector<8xf32> to vector<8x1xf32>
      %138 = vector.broadcast %137 : vector<8x1xf32> to vector<8x128xf32>
      %139 = arith.subf %135, %138 : vector<8x128xf32>
      %140 = math.exp %139 : vector<8x128xf32>
      %141 = vector.broadcast %41 : vector<1x128xf32> to vector<8x128xf32>
      %142 = arith.mulf %140, %141 : vector<8x128xf32>
      %cst_43 = arith.constant dense<0.000000e+00> : vector<8xf32>
      %143 = vector.multi_reduction <add>, %142, %cst_43 [1] : vector<8x128xf32> to vector<8xf32>
      %144 = vector.shape_cast %143 : vector<8xf32> to vector<8x1xf32>
      %cst_44 = arith.constant dense<0.000000e+00> : vector<8xf32>
      %145 = vector.multi_reduction <add>, %140, %cst_44 [1] : vector<8x128xf32> to vector<8xf32>
      %146 = vector.shape_cast %145 : vector<8xf32> to vector<8x1xf32>
      %147 = tpu.reciprocal %146 {approx = true} : vector<8x1xf32> -> vector<8x1xf32>
      %148 = arith.mulf %144, %147 : vector<8x1xf32>
      %c4_i32 = arith.constant 4 : i32
      %149 = vector.broadcast %c4_i32 : i32 to vector<8x128xi32>
      %150 = arith.cmpi eq, %42, %149 : vector<8x128xi32>
      %151 = vector.shape_cast %148 : vector<8x1xf32> to vector<8x1xf32>
      %152 = vector.broadcast %151 : vector<8x1xf32> to vector<8x128xf32>
      %153 = arith.select %150, %152, %131 : vector<8x128xi1>, vector<8x128xf32>
      %154 = arith.addf %30, %29 : vector<8x128xf32>
      %155 = arith.subf %154, %37 : vector<8x128xf32>
      %cst_45 = arith.constant -1.000000e+30 : f32
      %156 = vector.broadcast %cst_45 : f32 to vector<8x128xf32>
      %157 = arith.select %40, %155, %156 : vector<8x128xi1>, vector<8x128xf32>
      %cst_46 = arith.constant dense<0xFF800000> : vector<8xf32>
      %158 = vector.multi_reduction <maximumf>, %157, %cst_46 [1] : vector<8x128xf32> to vector<8xf32>
      %159 = vector.shape_cast %158 : vector<8xf32> to vector<8x1xf32>
      %160 = vector.broadcast %159 : vector<8x1xf32> to vector<8x128xf32>
      %161 = arith.subf %157, %160 : vector<8x128xf32>
      %162 = math.exp %161 : vector<8x128xf32>
      %163 = vector.broadcast %41 : vector<1x128xf32> to vector<8x128xf32>
      %164 = arith.mulf %162, %163 : vector<8x128xf32>
      %cst_47 = arith.constant dense<0.000000e+00> : vector<8xf32>
      %165 = vector.multi_reduction <add>, %164, %cst_47 [1] : vector<8x128xf32> to vector<8xf32>
      %166 = vector.shape_cast %165 : vector<8xf32> to vector<8x1xf32>
      %cst_48 = arith.constant dense<0.000000e+00> : vector<8xf32>
      %167 = vector.multi_reduction <add>, %162, %cst_48 [1] : vector<8x128xf32> to vector<8xf32>
      %168 = vector.shape_cast %167 : vector<8xf32> to vector<8x1xf32>
      %169 = tpu.reciprocal %168 {approx = true} : vector<8x1xf32> -> vector<8x1xf32>
      %170 = arith.mulf %166, %169 : vector<8x1xf32>
      %c5_i32 = arith.constant 5 : i32
      %171 = vector.broadcast %c5_i32 : i32 to vector<8x128xi32>
      %172 = arith.cmpi eq, %42, %171 : vector<8x128xi32>
      %173 = vector.shape_cast %170 : vector<8x1xf32> to vector<8x1xf32>
      %174 = vector.broadcast %173 : vector<8x1xf32> to vector<8x128xf32>
      %175 = arith.select %172, %174, %153 : vector<8x128xi1>, vector<8x128xf32>
      %c0_49 = arith.constant 0 : index
      %c0_50 = arith.constant 0 : index
      %176 = vector.load %arg8[%c0_49, %c0_50] : memref<8x128xf32, #tpu.memory_space<vmem>>, vector<8x128xf32>
      tpu.vector_store %arg8[%c0_49, %c0_50], %175 {strides = array<i32>} : memref<8x128xf32, #tpu.memory_space<vmem>>, vector<8x128xf32>,
    } else {
    }
    return
  }
  func.func @transform_0(%arg0: i32, %arg1: i32) -> (i32, i32) {
    %c0_i32 = arith.constant 0 : i32
    %c0_i32_0 = arith.constant 0 : i32
    return %arg0, %c0_i32 : i32, i32
  }
  func.func @transform_1(%arg0: i32, %arg1: i32) -> (i32, i32) {
    %c0_i32 = arith.constant 0 : i32
    %c0_i32_0 = arith.constant 0 : i32
    return %c0_i32, %arg1 : i32, i32
  }
  func.func @transform_2(%arg0: i32, %arg1: i32) -> (i32, i32) {
    %c0_i32 = arith.constant 0 : i32
    %c0_i32_0 = arith.constant 0 : i32
    return %c0_i32, %arg1 : i32, i32
  }
  func.func @transform_3(%arg0: i32, %arg1: i32) -> (i32, i32) {
    %c0_i32 = arith.constant 0 : i32
    %c0_i32_0 = arith.constant 0 : i32
    return %arg1, %c0_i32 : i32, i32
  }
  func.func @transform_4(%arg0: i32, %arg1: i32) -> (i32, i32) {
    %c0_i32 = arith.constant 0 : i32
    %c0_i32_0 = arith.constant 0 : i32
    %c0_i32_1 = arith.constant 0 : i32
    return %c0_i32, %c0_i32_0 : i32, i32
  }
  func.func @transform_5(%arg0: i32, %arg1: i32) -> (i32, i32) {
    %c0_i32 = arith.constant 0 : i32
    %c0_i32_0 = arith.constant 0 : i32
    %c0_i32_1 = arith.constant 0 : i32
    return %c0_i32, %c0_i32_0 : i32, i32
  }
  func.func @transform_6(%arg0: i32, %arg1: i32) -> (i32, i32) {
    %c0_i32 = arith.constant 0 : i32
    %c0_i32_0 = arith.constant 0 : i32
    return %arg0, %c0_i32 : i32, i32
  }
}

</mosaic_0001>

<bundles_post_ra>
// kernel: categorical_dueling_cnn_forward.4
= control target key start
LH: loop header
LB: loop body
LE: loop exit
PB: predicated region body
PF: predicated region fallthrough
CT: control target
= control target key end

     0   :  { %s1542_s12 = smov 0   ;;  %s1852_s0 = inlined_call_operand.vmem [shape: bf16[800,256], index: 0, kind: input, shape index: {}]   ;;  %s1853_s1 = inlined_call_operand.vmem [shape: bf16[256,32], index: 1, kind: input, shape index: {}]   ;;  %s1854_s2 = inlined_call_operand.vmem [shape: f32[1,32], index: 2, kind: input, shape index: {}]   ;;  %s1855_s3 = inlined_call_operand.vmem [shape: bf16[800,32], index: 3, kind: output, shape index: {}]  }
   0x1 LB: > { %s1203_s13 = sadd.s32 4294967295, %s1519_s12   ;;  %p1207_p0 = scmp.ge.s32.totalorder %s1519_s12, 1  ;;  %s1519_s12 = sphi %s1542_s12, %s13_s12  }
   0x2   : > { %p139_p1 = scmp.lt.s32.totalorder %s1519_s12, 3 }
   0x4   : > { %p140_p2 = pnand %p1207_p0, %p139_p1 }
   0x5   : > { %v1422_v0 = vld [vmem:[%s1853_s1] sm:$0xff] (!%p140_p2)   ;;  %v1521_v1 = vmov (!%p140_p2), 0   ;;  %s164_s16 = smul.u32 (!%p140_p2), 50, %s1203_s13  ;;  %v1423_v2 = vld [vmem:[%s1853_s1 + $0x8] sm:$0xff] (!%p140_p2)   ;;  %v1424_v3 = vld [vmem:[%s1853_s1 + $0x10] sm:$0xff] (!%p140_p2)   ;;  %vm1096_vm0 = vcmask (!%p140_p2), 257024  }
   0x6   : > { %143 = sbr.rel (%p140_p2) target bundleno = 387 (0x183), region = 32  ;;  %613 = vmatprep.subr.bf16.mxu0 (!%p140_p2), %v1521_v1  ;;  %1381 = vmatprep.subr.bf16.mxu1 (!%p140_p2), %v1521_v1  ;;  %v1425_v4 = vld [vmem:[%s1853_s1 + $0x18] sm:$0xff] (!%p140_p2)   ;;  %v1426_v5 = vld [vmem:[%s1853_s1 + $0x20] sm:$0xff] (!%p140_p2)   ;;  %v1427_v7 = vld [vmem:[%s1853_s1 + $0x28] sm:$0xff] (!%p140_p2)  }
   0x7   : > { %614 = vmatpush1.bf16.msra.mxu0 (!%p140_p2), %v1422_v0  ;;  %1397 = vmatpush1.bf16.msra.mxu1 (!%p140_p2), %v1422_v0  ;;  %p165_p3 = scmp.lt.s32.totalorder (!%p140_p2), %s164_s16, 99  ;;  %v1428_v9 = vld [vmem:[%s1853_s1 + $0x30] sm:$0xff] (!%p140_p2)   ;;  %v1429_v10 = vld [vmem:[%s1853_s1 + $0x38] sm:$0xff] (!%p140_p2)   ;;  %v1430_v11 = vld [vmem:[%s1853_s1 + $0x40] sm:$0xff] (!%p140_p2)  }
   0x8   : > { %615 = vmatprep.subr.bf16.mxu0 (!%p140_p2), %v1521_v1  ;;  %1382 = vmatprep.subr.bf16.mxu1 (!%p140_p2), %v1521_v1  ;;  %v1431_v12 = vld [vmem:[%s1853_s1 + $0x48] sm:$0xff] (!%p140_p2)   ;;  %v1432_v13 = vld [vmem:[%s1853_s1 + $0x50] sm:$0xff] (!%p140_p2)   ;;  %v1433_v14 = vld [vmem:[%s1853_s1 + $0x58] sm:$0xff] (!%p140_p2)  }
   0x9   : > { %v1434_v15 = vld [vmem:[%s1853_s1 + $0x60] sm:$0xff] (!%p140_p2)   ;;  %v1435_v16 = vld [vmem:[%s1853_s1 + $0x68] sm:$0xff] (!%p140_p2)   ;;  %v1436_v17 = vld [vmem:[%s1853_s1 + $0x70] sm:$0xff] (!%p140_p2)  }
   0xa   : > { %v1437_v18 = vld [vmem:[%s1853_s1 + $0x78] sm:$0xff] (!%p140_p2)  }
   0xb   : > { %616 = vmatpush1.bf16.msra.mxu0 (!%p140_p2), %v1423_v2  ;;  %1398 = vmatpush1.bf16.msra.mxu1 (!%p140_p2), %v1423_v2 }
   0xc   : > { %617 = vmatprep.subr.bf16.mxu0 (!%p140_p2), %v1521_v1  ;;  %1383 = vmatprep.subr.bf16.mxu1 (!%p140_p2), %v1521_v1 }
   0xd   : > { %s1857_s16 = smov (!%p165_p3, %s164_s16), 99 }
   0xe   : > { %s1330_s23 = sshll.u32 %s1857_s16, 3  ;;  %s1210_s29 = sshll.u32 %s1857_s16, 2 }
   0xf   : > { %618 = vmatpush1.bf16.msra.mxu0 %v1424_v3  ;;  %1399 = vmatpush1.bf16.msra.mxu1 %v1424_v3  ;;  %s1579_s28 = scalar_lea.vmem %s1852_s0, %s1330_s23  ;;  %v1691_v3 = vld [vmem:[%s1854_s2] ss:$0 sm:$0xff]  ;;  %s1701_s16 = scalar_lea.vmem %s1855_s3, %s1210_s29 }
  0x10   : > { %619 = vmatprep.subr.bf16.mxu0 %v1521_v1  ;;  %1384 = vmatprep.subr.bf16.mxu1 %v1521_v1  ;;  %v1440_v6 = vld [vmem:[%s1579_s28 + $0x4] ss:$8 sps:$4 sm:$0xff]   ;;  %v1443_v8 = vld [vmem:[%s1579_s28 + $0xd4] ss:$8 sps:$4 sm:$0xff]   ;;  %v1438_v19 = vld [vmem:[%s1579_s28] ss:$8 sps:$4 sm:$0xff]  }
  0x11   : > { %645 = vmatprep.mubr.bf16.mxu0 %v1440_v6  ;;  %749 = vmatprep.mubr.bf16.mxu1 %v1443_v8  ;;  %v1441_v20 = vld [vmem:[%s1579_s28 + $0xd0] ss:$8 sps:$4 sm:$0xff]   ;;  %v1444_v21 = vld [vmem:[%s1579_s28 + $0x14] ss:$8 sps:$4 sm:$0xff]   ;;  %v1447_v22 = vld [vmem:[%s1579_s28 + $0xe4] ss:$8 sps:$4 sm:$0xff]  }
  0x12   : > { %v1446_v23 = vld [vmem:[%s1579_s28 + $0x10] ss:$8 sps:$4 sm:$0xff]   ;;  %v1449_v24 = vld [vmem:[%s1579_s28 + $0xe0] ss:$8 sps:$4 sm:$0xff]   ;;  %v1450_v25 = vld [vmem:[%s1579_s28 + $0x24] ss:$8 sps:$4 sm:$0xff]  }
  0x13   : > { %620 = vmatpush1.bf16.msra.mxu0 %v1425_v4  ;;  %1400 = vmatpush1.bf16.msra.mxu1 %v1425_v4  ;;  %v1453_v26 = vld [vmem:[%s1579_s28 + $0xf4] ss:$8 sps:$4 sm:$0xff]   ;;  %v1452_v27 = vld [vmem:[%s1579_s28 + $0x20] ss:$8 sps:$4 sm:$0xff]   ;;  %v1455_v28 = vld [vmem:[%s1579_s28 + $0xf0] ss:$8 sps:$4 sm:$0xff]  }
  0x14   : > { %621 = vmatprep.subr.bf16.mxu0 %v1521_v1  ;;  %1385 = vmatprep.subr.bf16.mxu1 %v1521_v1  ;;  %v1456_v29 = vld [vmem:[%s1579_s28 + $0x34] ss:$8 sps:$4 sm:$0xff]   ;;  %v1459_v30 = vld [vmem:[%s1579_s28 + $0x104] ss:$8 sps:$4 sm:$0xff]   ;;  %v1458_v31 = vld [vmem:[%s1579_s28 + $0x30] ss:$8 sps:$4 sm:$0xff]  }
  0x15   : > { %v1461_v32 = vld [vmem:[%s1579_s28 + $0x100] ss:$8 sps:$4 sm:$0xff]   ;;  %v1462_v33 = vld [vmem:[%s1579_s28 + $0x44] ss:$8 sps:$4 sm:$0xff]   ;;  %v1465_v34 = vld [vmem:[%s1579_s28 + $0x114] ss:$8 sps:$4 sm:$0xff]  }
  0x16   : > { %v1464_v35 = vld [vmem:[%s1579_s28 + $0x40] ss:$8 sps:$4 sm:$0xff]   ;;  %v1467_v36 = vld [vmem:[%s1579_s28 + $0x110] ss:$8 sps:$4 sm:$0xff]   ;;  %v1468_v37 = vld [vmem:[%s1579_s28 + $0x54] ss:$8 sps:$4 sm:$0xff]  }
  0x17   : > { %622 = vmatpush1.bf16.msra.mxu0 %v1426_v5  ;;  %1401 = vmatpush1.bf16.msra.mxu1 %v1426_v5  ;;  %v1471_v38 = vld [vmem:[%s1579_s28 + $0x124] ss:$8 sps:$4 sm:$0xff]   ;;  %v1470_v39 = vld [vmem:[%s1579_s28 + $0x50] ss:$8 sps:$4 sm:$0xff]   ;;  %v1473_v40 = vld [vmem:[%s1579_s28 + $0x120] ss:$8 sps:$4 sm:$0xff]  }
  0x18   : > { %623 = vmatprep.subr.bf16.mxu0 %v1521_v1  ;;  %1386 = vmatprep.subr.bf16.mxu1 %v1521_v1  ;;  %v1474_v41 = vld [vmem:[%s1579_s28 + $0x64] ss:$8 sps:$4 sm:$0xff]   ;;  %v1477_v42 = vld [vmem:[%s1579_s28 + $0x134] ss:$8 sps:$4 sm:$0xff]   ;;  %v1476_v43 = vld [vmem:[%s1579_s28 + $0x60] ss:$8 sps:$4 sm:$0xff]  }
  0x19   : > { %v1479_v44 = vld [vmem:[%s1579_s28 + $0x130] ss:$8 sps:$4 sm:$0xff]   ;;  %v1480_v45 = vld [vmem:[%s1579_s28 + $0x74] ss:$8 sps:$4 sm:$0xff]   ;;  %v1483_v46 = vld [vmem:[%s1579_s28 + $0x144] ss:$8 sps:$4 sm:$0xff]  }
  0x1a   : > { %v1482_v47 = vld [vmem:[%s1579_s28 + $0x70] ss:$8 sps:$4 sm:$0xff]   ;;  %v1485_v48 = vld [vmem:[%s1579_s28 + $0x140] ss:$8 sps:$4 sm:$0xff]   ;;  %v1486_v49 = vld [vmem:[%s1579_s28 + $0x84] ss:$8 sps:$4 sm:$0xff]  }
  0x1b   : > { %624 = vmatpush1.bf16.msra.mxu0 %v1427_v7  ;;  %1402 = vmatpush1.bf16.msra.mxu1 %v1427_v7  ;;  %v1489_v50 = vld [vmem:[%s1579_s28 + $0x154] ss:$8 sps:$4 sm:$0xff]   ;;  %v1488_v51 = vld [vmem:[%s1579_s28 + $0x80] ss:$8 sps:$4 sm:$0xff]   ;;  %v1491_v52 = vld [vmem:[%s1579_s28 + $0x150] ss:$8 sps:$4 sm:$0xff]  }
  0x1c   : > { %625 = vmatprep.subr.bf16.mxu0 %v1521_v1  ;;  %1387 = vmatprep.subr.bf16.mxu1 %v1521_v1  ;;  %v1492_v53 = vld [vmem:[%s1579_s28 + $0x94] ss:$8 sps:$4 sm:$0xff]   ;;  %v1495_v54 = vld [vmem:[%s1579_s28 + $0x164] ss:$8 sps:$4 sm:$0xff]   ;;  %v1494_v55 = vld [vmem:[%s1579_s28 + $0x90] ss:$8 sps:$4 sm:$0xff]  }
  0x1d   : > { %v1497_v56 = vld [vmem:[%s1579_s28 + $0x160] ss:$8 sps:$4 sm:$0xff]   ;;  %v1498_v57 = vld [vmem:[%s1579_s28 + $0xa4] ss:$8 sps:$4 sm:$0xff]   ;;  %v1501_v58 = vld [vmem:[%s1579_s28 + $0x174] ss:$8 sps:$4 sm:$0xff]  }
  0x1e   : > { %v1500_v59 = vld [vmem:[%s1579_s28 + $0xa0] ss:$8 sps:$4 sm:$0xff]   ;;  %v1503_v60 = vld [vmem:[%s1579_s28 + $0x170] ss:$8 sps:$4 sm:$0xff]   ;;  %v1504_v61 = vld [vmem:[%s1579_s28 + $0xb4] ss:$8 sps:$4 sm:$0xff]  }
  0x1f   : > { %626 = vmatpush1.bf16.msra.mxu0 %v1428_v9  ;;  %1403 = vmatpush1.bf16.msra.mxu1 %v1428_v9  ;;  %v1507_v62 = vld [vmem:[%s1579_s28 + $0x184] ss:$8 sps:$4 sm:$0xff]   ;;  %v1506_v63 = vld [vmem:[%s1579_s28 + $0xb0] ss:$8 sps:$4 sm:$0xff]   ;;  %v1509_v0 = vld [vmem:[%s1579_s28 + $0x180] ss:$8 sps:$4 sm:$0xff]  }
  0x20   : > { %627 = vmatprep.subr.bf16.mxu0 %v1521_v1  ;;  %1388 = vmatprep.subr.bf16.mxu1 %v1521_v1  ;;  %v1512_v2 = vld [vmem:[%s1579_s28 + $0xc0] ss:$8 sps:$4 sm:$0xff]  }
  0x23   : > { %628 = vmatpush1.bf16.msra.mxu0 %v1429_v10  ;;  %1404 = vmatpush1.bf16.msra.mxu1 %v1429_v10 }
  0x24   : > { %629 = vmatprep.subr.bf16.mxu0 %v1521_v1  ;;  %1389 = vmatprep.subr.bf16.mxu1 %v1521_v1 }
  0x27   : > { %630 = vmatpush1.bf16.msra.mxu0 %v1430_v11  ;;  %1405 = vmatpush1.bf16.msra.mxu1 %v1430_v11 }
  0x28   : > { %631 = vmatprep.subr.bf16.mxu0 %v1521_v1  ;;  %1390 = vmatprep.subr.bf16.mxu1 %v1521_v1 }
  0x2b   : > { %632 = vmatpush1.bf16.msra.mxu0 %v1431_v12  ;;  %1406 = vmatpush1.bf16.msra.mxu1 %v1431_v12 }
  0x2c   : > { %633 = vmatprep.subr.bf16.mxu0 %v1521_v1  ;;  %1391 = vmatprep.subr.bf16.mxu1 %v1521_v1 }
  0x2f   : > { %634 = vmatpush1.bf16.msra.mxu0 %v1432_v13  ;;  %1407 = vmatpush1.bf16.msra.mxu1 %v1432_v13 }
  0x30   : > { %635 = vmatprep.subr.bf16.mxu0 %v1521_v1  ;;  %1392 = vmatprep.subr.bf16.mxu1 %v1521_v1 }
  0x33   : > { %636 = vmatpush1.bf16.msra.mxu0 %v1433_v14  ;;  %1408 = vmatpush1.bf16.msra.mxu1 %v1433_v14 }
  0x34   : > { %637 = vmatprep.subr.bf16.mxu0 %v1521_v1  ;;  %1393 = vmatprep.subr.bf16.mxu1 %v1521_v1 }
  0x37   : > { %638 = vmatpush1.bf16.msra.mxu0 %v1434_v15  ;;  %1409 = vmatpush1.bf16.msra.mxu1 %v1434_v15 }
  0x38   : > { %639 = vmatprep.subr.bf16.mxu0 %v1521_v1  ;;  %1394 = vmatprep.subr.bf16.mxu1 %v1521_v1 }
  0x3b   : > { %640 = vmatpush1.bf16.msra.mxu0 %v1435_v16  ;;  %1410 = vmatpush1.bf16.msra.mxu1 %v1435_v16 }
  0x3c   : > { %641 = vmatprep.subr.bf16.mxu0 %v1521_v1  ;;  %1395 = vmatprep.subr.bf16.mxu1 %v1521_v1 }
  0x3f   : > { %642 = vmatpush1.bf16.msra.mxu0 %v1436_v17  ;;  %1411 = vmatpush1.bf16.msra.mxu1 %v1436_v17 }
  0x40   : > { %643 = vmatprep.subr.bf16.mxu0 %v1521_v1  ;;  %1396 = vmatprep.subr.bf16.mxu1 %v1521_v1  ;;  %v1510_v1 = vld [vmem:[%s1579_s28 + $0xc4] ss:$8 sps:$4 sm:$0xff]  }
  0x43   : > { %644 = vmatpush1.bf16.msra.mxu0 %v1437_v18  ;;  %1412 = vmatpush1.bf16.msra.mxu1 %v1437_v18 }
  0x46   : > { %646 = vmatmul.mubr.bf16.vlgmr.msra.gmra.mrb[0].mxu0 %v1438_v19  ;;  %750 = vmatmul.mubr.bf16.vlgmr.msra.gmra.mrb[0].mxu1 %v1441_v20 }
  0x47   : > { %653 = vmatprep.mubr.bf16.mxu0 %v1444_v21  ;;  %757 = vmatprep.mubr.bf16.mxu1 %v1447_v22 }
  0x4e   : > { %654 = vmatmul.mubr.bf16.gmra.mrb[4].mxu0 %v1446_v23  ;;  %758 = vmatmul.mubr.bf16.gmra.mrb[4].mxu1 %v1449_v24 }
  0x4f   : > { %661 = vmatprep.mubr.bf16.mxu0 %v1450_v25  ;;  %765 = vmatprep.mubr.bf16.mxu1 %v1453_v26 }
  0x56   : > { %662 = vmatmul.mubr.bf16.gmra.mrb[8].mxu0 %v1452_v27  ;;  %766 = vmatmul.mubr.bf16.gmra.mrb[8].mxu1 %v1455_v28 }
  0x57   : > { %669 = vmatprep.mubr.bf16.mxu0 %v1456_v29  ;;  %773 = vmatprep.mubr.bf16.mxu1 %v1459_v30 }
  0x5e   : > { %670 = vmatmul.mubr.bf16.gmra.mrb[12].mxu0 %v1458_v31  ;;  %774 = vmatmul.mubr.bf16.gmra.mrb[12].mxu1 %v1461_v32 }
  0x5f   : > { %677 = vmatprep.mubr.bf16.mxu0 %v1462_v33  ;;  %781 = vmatprep.mubr.bf16.mxu1 %v1465_v34 }
  0x66   : > { %678 = vmatmul.mubr.bf16.gmra.mrb[16].mxu0 %v1464_v35  ;;  %782 = vmatmul.mubr.bf16.gmra.mrb[16].mxu1 %v1467_v36 }
  0x67   : > { %685 = vmatprep.mubr.bf16.mxu0 %v1468_v37  ;;  %789 = vmatprep.mubr.bf16.mxu1 %v1471_v38 }
  0x6e   : > { %686 = vmatmul.mubr.bf16.gmra.mrb[20].mxu0 %v1470_v39  ;;  %790 = vmatmul.mubr.bf16.gmra.mrb[20].mxu1 %v1473_v40 }
  0x6f   : > { %693 = vmatprep.mubr.bf16.mxu0 %v1474_v41  ;;  %797 = vmatprep.mubr.bf16.mxu1 %v1477_v42 }
  0x76   : > { %694 = vmatmul.mubr.bf16.gmra.mrb[24].mxu0 %v1476_v43  ;;  %798 = vmatmul.mubr.bf16.gmra.mrb[24].mxu1 %v1479_v44 }
  0x77   : > { %701 = vmatprep.mubr.bf16.mxu0 %v1480_v45  ;;  %805 = vmatprep.mubr.bf16.mxu1 %v1483_v46 }
  0x7e   : > { %702 = vmatmul.mubr.bf16.gmra.mrb[28].mxu0 %v1482_v47  ;;  %806 = vmatmul.mubr.bf16.gmra.mrb[28].mxu1 %v1485_v48 }
  0x7f   : > { %709 = vmatprep.mubr.bf16.mxu0 %v1486_v49  ;;  %813 = vmatprep.mubr.bf16.mxu1 %v1489_v50 }
  0x86   : > { %710 = vmatmul.mubr.bf16.gmra.mrb[32].mxu0 %v1488_v51  ;;  %814 = vmatmul.mubr.bf16.gmra.mrb[32].mxu1 %v1491_v52 }
  0x87   : > { %717 = vmatprep.mubr.bf16.mxu0 %v1492_v53  ;;  %821 = vmatprep.mubr.bf16.mxu1 %v1495_v54 }
  0x8e   : > { %718 = vmatmul.mubr.bf16.gmra.mrb[36].mxu0 %v1494_v55  ;;  %822 = vmatmul.mubr.bf16.gmra.mrb[36].mxu1 %v1497_v56 }
  0x8f   : > { %725 = vmatprep.mubr.bf16.mxu0 %v1498_v57  ;;  %829 = vmatprep.mubr.bf16.mxu1 %v1501_v58 }
  0x96   : > { %726 = vmatmul.mubr.bf16.gmra.mrb[40].mxu0 %v1500_v59  ;;  %830 = vmatmul.mubr.bf16.gmra.mrb[40].mxu1 %v1503_v60 }
  0x97   : > { %733 = vmatprep.mubr.bf16.mxu0 %v1504_v61  ;;  %837 = vmatprep.mubr.bf16.mxu1 %v1507_v62 }
  0x9e   : > { %734 = vmatmul.mubr.bf16.gmra.mrb[44].mxu0 %v1506_v63  ;;  %838 = vmatmul.mubr.bf16.gmra.mrb[44].mxu1 %v1509_v0 }
  0x9f   : > { %741 = vmatprep.mubr.bf16.mxu0 %v1510_v1 }
  0xa6   : > { %742 = vmatmul.mubr.bf16.gmra.mrb[48].mxu0 %v1512_v2 }
 0x119   : > { %v647_v4 = vpop.f32.mrb[0].mxu0  ;;  %v751_v5 = vpop.f32.mrb[0].mxu1 }
 0x11a   : > { %v648_v6 = vadd.f32 %v1691_v3, %v647_v4  ;;  %v649_v7 = vpop.f32.mrb[1].mxu0  ;;  %v752_v8 = vadd.f32 %v1691_v3, %v751_v5  ;;  %v753_v9 = vpop.f32.mrb[1].mxu1 }
 0x11b   : > { %v650_v10 = vpop.f32.mrb[2].mxu0  ;;  %v754_v11 = vpop.f32.mrb[2].mxu1 }
 0x11c   : > { %v846_v12 = vmax.f32 %v648_v6, 0.0  ;;  %v651_v13 = vadd.f32 %v1691_v3, %v650_v10  ;;  %v652_v14 = vpop.f32.mrb[3].mxu0  ;;  %v872_v15 = vmax.f32 %v752_v8, 0.0  ;;  %v755_v16 = vadd.f32 %v1691_v3, %v754_v11  ;;  %v756_v17 = vpop.f32.mrb[3].mxu1 }
 0x11e   : > { %v1331_v18 = vpack.c.bf16 %v846_v12, %v846_v12  ;;  %v847_v19 = vmax.f32 %v651_v13, 0.0  ;;  %v1357_v20 = vpack.c.bf16 %v872_v15, %v872_v15  ;;  %v873_v21 = vmax.f32 %v755_v16, 0.0 }
 0x120   : > { %1097 = vst.msk [vmem:[%s1701_s16] sm:$0xf] %vm1096_vm0, %v1331_v18  ;;  %v1332_v22 = vpack.c.bf16 %v847_v19, %v847_v19  ;;  %1123 = vst.msk [vmem:[%s1701_s16 + $0x68] sm:$0xf] %vm1096_vm0, %v1357_v20  ;;  %v1358_v23 = vpack.c.bf16 %v873_v21, %v873_v21 }
 0x121   : > { %v655_v24 = vpop.f32.mrb[4].mxu0  ;;  %v759_v25 = vpop.f32.mrb[4].mxu1 }
 0x122   : > { %1098 = vst.msk [vmem:[%s1701_s16 + $0x4] sm:$0xf] %vm1096_vm0, %v1332_v22  ;;  %1124 = vst.msk [vmem:[%s1701_s16 + $0x6c] sm:$0xf] %vm1096_vm0, %v1358_v23  ;;  %v656_v26 = vadd.f32 %v1691_v3, %v655_v24  ;;  %v657_v27 = vpop.f32.mrb[5].mxu0  ;;  %v760_v28 = vadd.f32 %v1691_v3, %v759_v25  ;;  %v761_v29 = vpop.f32.mrb[5].mxu1 }
 0x123   : > { %v658_v30 = vpop.f32.mrb[6].mxu0  ;;  %v762_v31 = vpop.f32.mrb[6].mxu1 }
 0x124   : > { %v848_v32 = vmax.f32 %v656_v26, 0.0  ;;  %v659_v33 = vadd.f32 %v1691_v3, %v658_v30  ;;  %v660_v34 = vpop.f32.mrb[7].mxu0  ;;  %v874_v35 = vmax.f32 %v760_v28, 0.0  ;;  %v763_v36 = vadd.f32 %v1691_v3, %v762_v31  ;;  %v764_v37 = vpop.f32.mrb[7].mxu1 }
 0x126   : > { %v1333_v38 = vpack.c.bf16 %v848_v32, %v848_v32  ;;  %v849_v39 = vmax.f32 %v659_v33, 0.0  ;;  %v1359_v40 = vpack.c.bf16 %v874_v35, %v874_v35  ;;  %v875_v41 = vmax.f32 %v763_v36, 0.0 }
 0x128   : > { %1099 = vst.msk [vmem:[%s1701_s16 + $0x8] sm:$0xf] %vm1096_vm0, %v1333_v38  ;;  %v1334_v42 = vpack.c.bf16 %v849_v39, %v849_v39  ;;  %1125 = vst.msk [vmem:[%s1701_s16 + $0x70] sm:$0xf] %vm1096_vm0, %v1359_v40  ;;  %v1360_v43 = vpack.c.bf16 %v875_v41, %v875_v41 }
 0x129   : > { %v663_v44 = vpop.f32.mrb[8].mxu0  ;;  %v767_v45 = vpop.f32.mrb[8].mxu1 }
 0x12a   : > { %1100 = vst.msk [vmem:[%s1701_s16 + $0xc] sm:$0xf] %vm1096_vm0, %v1334_v42  ;;  %1126 = vst.msk [vmem:[%s1701_s16 + $0x74] sm:$0xf] %vm1096_vm0, %v1360_v43  ;;  %v664_v46 = vadd.f32 %v1691_v3, %v663_v44  ;;  %v665_v47 = vpop.f32.mrb[9].mxu0  ;;  %v768_v48 = vadd.f32 %v1691_v3, %v767_v45  ;;  %v769_v49 = vpop.f32.mrb[9].mxu1 }
 0x12b   : > { %v666_v50 = vpop.f32.mrb[10].mxu0  ;;  %v770_v51 = vpop.f32.mrb[10].mxu1 }
 0x12c   : > { %v850_v52 = vmax.f32 %v664_v46, 0.0  ;;  %v667_v53 = vadd.f32 %v1691_v3, %v666_v50  ;;  %v668_v54 = vpop.f32.mrb[11].mxu0  ;;  %v876_v55 = vmax.f32 %v768_v48, 0.0  ;;  %v771_v56 = vadd.f32 %v1691_v3, %v770_v51  ;;  %v772_v57 = vpop.f32.mrb[11].mxu1 }
 0x12e   : > { %v1335_v58 = vpack.c.bf16 %v850_v52, %v850_v52  ;;  %v851_v59 = vmax.f32 %v667_v53, 0.0  ;;  %v1361_v60 = vpack.c.bf16 %v876_v55, %v876_v55  ;;  %v877_v61 = vmax.f32 %v771_v56, 0.0 }
 0x130   : > { %1101 = vst.msk [vmem:[%s1701_s16 + $0x10] sm:$0xf] %vm1096_vm0, %v1335_v58  ;;  %v1336_v62 = vpack.c.bf16 %v851_v59, %v851_v59  ;;  %1127 = vst.msk [vmem:[%s1701_s16 + $0x78] sm:$0xf] %vm1096_vm0, %v1361_v60  ;;  %v1362_v63 = vpack.c.bf16 %v877_v61, %v877_v61 }
 0x131   : > { %v671_v0 = vpop.f32.mrb[12].mxu0  ;;  %v775_v1 = vpop.f32.mrb[12].mxu1 }
 0x132   : > { %1102 = vst.msk [vmem:[%s1701_s16 + $0x14] sm:$0xf] %vm1096_vm0, %v1336_v62  ;;  %1128 = vst.msk [vmem:[%s1701_s16 + $0x7c] sm:$0xf] %vm1096_vm0, %v1362_v63  ;;  %v672_v2 = vadd.f32 %v1691_v3, %v671_v0  ;;  %v673_v4 = vpop.f32.mrb[13].mxu0  ;;  %v776_v5 = vadd.f32 %v1691_v3, %v775_v1  ;;  %v777_v6 = vpop.f32.mrb[13].mxu1 }
 0x133   : > { %v674_v7 = vpop.f32.mrb[14].mxu0  ;;  %v778_v8 = vpop.f32.mrb[14].mxu1 }
 0x134   : > { %v852_v9 = vmax.f32 %v672_v2, 0.0  ;;  %v675_v10 = vadd.f32 %v1691_v3, %v674_v7  ;;  %v676_v11 = vpop.f32.mrb[15].mxu0  ;;  %v878_v12 = vmax.f32 %v776_v5, 0.0  ;;  %v779_v13 = vadd.f32 %v1691_v3, %v778_v8  ;;  %v780_v14 = vpop.f32.mrb[15].mxu1 }
 0x136   : > { %v1337_v15 = vpack.c.bf16 %v852_v9, %v852_v9  ;;  %v853_v16 = vmax.f32 %v675_v10, 0.0  ;;  %v1363_v17 = vpack.c.bf16 %v878_v12, %v878_v12  ;;  %v879_v18 = vmax.f32 %v779_v13, 0.0 }
 0x138   : > { %1103 = vst.msk [vmem:[%s1701_s16 + $0x18] sm:$0xf] %vm1096_vm0, %v1337_v15  ;;  %v1338_v19 = vpack.c.bf16 %v853_v16, %v853_v16  ;;  %1129 = vst.msk [vmem:[%s1701_s16 + $0x80] sm:$0xf] %vm1096_vm0, %v1363_v17  ;;  %v1364_v20 = vpack.c.bf16 %v879_v18, %v879_v18 }
 0x139   : > { %v679_v21 = vpop.f32.mrb[16].mxu0  ;;  %v783_v22 = vpop.f32.mrb[16].mxu1 }
 0x13a   : > { %1104 = vst.msk [vmem:[%s1701_s16 + $0x1c] sm:$0xf] %vm1096_vm0, %v1338_v19  ;;  %1130 = vst.msk [vmem:[%s1701_s16 + $0x84] sm:$0xf] %vm1096_vm0, %v1364_v20  ;;  %v680_v23 = vadd.f32 %v1691_v3, %v679_v21  ;;  %v681_v24 = vpop.f32.mrb[17].mxu0  ;;  %v784_v25 = vadd.f32 %v1691_v3, %v783_v22  ;;  %v785_v26 = vpop.f32.mrb[17].mxu1 }
 0x13b   : > { %v682_v27 = vpop.f32.mrb[18].mxu0  ;;  %v786_v28 = vpop.f32.mrb[18].mxu1 }
 0x13c   : > { %v854_v29 = vmax.f32 %v680_v23, 0.0  ;;  %v683_v30 = vadd.f32 %v1691_v3, %v682_v27  ;;  %v684_v31 = vpop.f32.mrb[19].mxu0  ;;  %v880_v32 = vmax.f32 %v784_v25, 0.0  ;;  %v787_v33 = vadd.f32 %v1691_v3, %v786_v28  ;;  %v788_v34 = vpop.f32.mrb[19].mxu1 }
 0x13e   : > { %v1339_v35 = vpack.c.bf16 %v854_v29, %v854_v29  ;;  %v855_v36 = vmax.f32 %v683_v30, 0.0  ;;  %v1365_v37 = vpack.c.bf16 %v880_v32, %v880_v32  ;;  %v881_v38 = vmax.f32 %v787_v33, 0.0 }
 0x140   : > { %1105 = vst.msk [vmem:[%s1701_s16 + $0x20] sm:$0xf] %vm1096_vm0, %v1339_v35  ;;  %v1340_v39 = vpack.c.bf16 %v855_v36, %v855_v36  ;;  %1131 = vst.msk [vmem:[%s1701_s16 + $0x88] sm:$0xf] %vm1096_vm0, %v1365_v37  ;;  %v1366_v40 = vpack.c.bf16 %v881_v38, %v881_v38 }
 0x141   : > { %v687_v41 = vpop.f32.mrb[20].mxu0  ;;  %v791_v42 = vpop.f32.mrb[20].mxu1 }
 0x142   : > { %1106 = vst.msk [vmem:[%s1701_s16 + $0x24] sm:$0xf] %vm1096_vm0, %v1340_v39  ;;  %1132 = vst.msk [vmem:[%s1701_s16 + $0x8c] sm:$0xf] %vm1096_vm0, %v1366_v40  ;;  %v688_v43 = vadd.f32 %v1691_v3, %v687_v41  ;;  %v689_v44 = vpop.f32.mrb[21].mxu0  ;;  %v792_v45 = vadd.f32 %v1691_v3, %v791_v42  ;;  %v793_v46 = vpop.f32.mrb[21].mxu1 }
 0x143   : > { %v690_v47 = vpop.f32.mrb[22].mxu0  ;;  %v794_v48 = vpop.f32.mrb[22].mxu1 }
 0x144   : > { %v856_v49 = vmax.f32 %v688_v43, 0.0  ;;  %v691_v50 = vadd.f32 %v1691_v3, %v690_v47  ;;  %v692_v51 = vpop.f32.mrb[23].mxu0  ;;  %v882_v52 = vmax.f32 %v792_v45, 0.0  ;;  %v795_v53 = vadd.f32 %v1691_v3, %v794_v48  ;;  %v796_v54 = vpop.f32.mrb[23].mxu1 }
 0x146   : > { %v1341_v55 = vpack.c.bf16 %v856_v49, %v856_v49  ;;  %v857_v56 = vmax.f32 %v691_v50, 0.0  ;;  %v1367_v57 = vpack.c.bf16 %v882_v52, %v882_v52  ;;  %v883_v58 = vmax.f32 %v795_v53, 0.0 }
 0x148   : > { %1107 = vst.msk [vmem:[%s1701_s16 + $0x28] sm:$0xf] %vm1096_vm0, %v1341_v55  ;;  %v1342_v59 = vpack.c.bf16 %v857_v56, %v857_v56  ;;  %1133 = vst.msk [vmem:[%s1701_s16 + $0x90] sm:$0xf] %vm1096_vm0, %v1367_v57  ;;  %v1368_v60 = vpack.c.bf16 %v883_v58, %v883_v58 }
 0x149   : > { %v695_v61 = vpop.f32.mrb[24].mxu0  ;;  %v799_v62 = vpop.f32.mrb[24].mxu1 }
 0x14a   : > { %1108 = vst.msk [vmem:[%s1701_s16 + $0x2c] sm:$0xf] %vm1096_vm0, %v1342_v59  ;;  %1134 = vst.msk [vmem:[%s1701_s16 + $0x94] sm:$0xf] %vm1096_vm0, %v1368_v60  ;;  %v696_v63 = vadd.f32 %v1691_v3, %v695_v61  ;;  %v697_v0 = vpop.f32.mrb[25].mxu0  ;;  %v800_v1 = vadd.f32 %v1691_v3, %v799_v62  ;;  %v801_v2 = vpop.f32.mrb[25].mxu1 }
 0x14b   : > { %v698_v4 = vpop.f32.mrb[26].mxu0  ;;  %v802_v5 = vpop.f32.mrb[26].mxu1 }
 0x14c   : > { %v858_v6 = vmax.f32 %v696_v63, 0.0  ;;  %v699_v7 = vadd.f32 %v1691_v3, %v698_v4  ;;  %v700_v8 = vpop.f32.mrb[27].mxu0  ;;  %v884_v9 = vmax.f32 %v800_v1, 0.0  ;;  %v803_v10 = vadd.f32 %v1691_v3, %v802_v5  ;;  %v804_v11 = vpop.f32.mrb[27].mxu1 }
 0x14e   : > { %v1343_v12 = vpack.c.bf16 %v858_v6, %v858_v6  ;;  %v859_v13 = vmax.f32 %v699_v7, 0.0  ;;  %v1369_v14 = vpack.c.bf16 %v884_v9, %v884_v9  ;;  %v885_v15 = vmax.f32 %v803_v10, 0.0 }
 0x150   : > { %1109 = vst.msk [vmem:[%s1701_s16 + $0x30] sm:$0xf] %vm1096_vm0, %v1343_v12  ;;  %v1344_v16 = vpack.c.bf16 %v859_v13, %v859_v13  ;;  %1135 = vst.msk [vmem:[%s1701_s16 + $0x98] sm:$0xf] %vm1096_vm0, %v1369_v14  ;;  %v1370_v17 = vpack.c.bf16 %v885_v15, %v885_v15 }
 0x151   : > { %v703_v18 = vpop.f32.mrb[28].mxu0  ;;  %v807_v19 = vpop.f32.mrb[28].mxu1 }
 0x152   : > { %1110 = vst.msk [vmem:[%s1701_s16 + $0x34] sm:$0xf] %vm1096_vm0, %v1344_v16  ;;  %1136 = vst.msk [vmem:[%s1701_s16 + $0x9c] sm:$0xf] %vm1096_vm0, %v1370_v17  ;;  %v704_v20 = vadd.f32 %v1691_v3, %v703_v18  ;;  %v705_v21 = vpop.f32.mrb[29].mxu0  ;;  %v808_v22 = vadd.f32 %v1691_v3, %v807_v19  ;;  %v809_v23 = vpop.f32.mrb[29].mxu1 }
 0x153   : > { %v706_v24 = vpop.f32.mrb[30].mxu0  ;;  %v810_v25 = vpop.f32.mrb[30].mxu1 }
 0x154   : > { %v860_v26 = vmax.f32 %v704_v20, 0.0  ;;  %v707_v27 = vadd.f32 %v1691_v3, %v706_v24  ;;  %v708_v28 = vpop.f32.mrb[31].mxu0  ;;  %v886_v29 = vmax.f32 %v808_v22, 0.0  ;;  %v811_v30 = vadd.f32 %v1691_v3, %v810_v25  ;;  %v812_v31 = vpop.f32.mrb[31].mxu1 }
 0x156   : > { %v1345_v32 = vpack.c.bf16 %v860_v26, %v860_v26  ;;  %v861_v33 = vmax.f32 %v707_v27, 0.0  ;;  %v1371_v34 = vpack.c.bf16 %v886_v29, %v886_v29  ;;  %v887_v35 = vmax.f32 %v811_v30, 0.0 }
 0x158   : > { %1111 = vst.msk [vmem:[%s1701_s16 + $0x38] sm:$0xf] %vm1096_vm0, %v1345_v32  ;;  %v1346_v36 = vpack.c.bf16 %v861_v33, %v861_v33  ;;  %1137 = vst.msk [vmem:[%s1701_s16 + $0xa0] sm:$0xf] %vm1096_vm0, %v1371_v34  ;;  %v1372_v37 = vpack.c.bf16 %v887_v35, %v887_v35 }
 0x159   : > { %v711_v38 = vpop.f32.mrb[32].mxu0  ;;  %v815_v39 = vpop.f32.mrb[32].mxu1 }
 0x15a   : > { %1112 = vst.msk [vmem:[%s1701_s16 + $0x3c] sm:$0xf] %vm1096_vm0, %v1346_v36  ;;  %1138 = vst.msk [vmem:[%s1701_s16 + $0xa4] sm:$0xf] %vm1096_vm0, %v1372_v37  ;;  %v712_v40 = vadd.f32 %v1691_v3, %v711_v38  ;;  %v713_v41 = vpop.f32.mrb[33].mxu0  ;;  %v816_v42 = vadd.f32 %v1691_v3, %v815_v39  ;;  %v817_v43 = vpop.f32.mrb[33].mxu1 }
 0x15b   : > { %v714_v44 = vpop.f32.mrb[34].mxu0  ;;  %v818_v45 = vpop.f32.mrb[34].mxu1 }
 0x15c   : > { %v862_v46 = vmax.f32 %v712_v40, 0.0  ;;  %v715_v47 = vadd.f32 %v1691_v3, %v714_v44  ;;  %v716_v48 = vpop.f32.mrb[35].mxu0  ;;  %v888_v49 = vmax.f32 %v816_v42, 0.0  ;;  %v819_v50 = vadd.f32 %v1691_v3, %v818_v45  ;;  %v820_v51 = vpop.f32.mrb[35].mxu1 }
 0x15e   : > { %v1347_v52 = vpack.c.bf16 %v862_v46, %v862_v46  ;;  %v863_v53 = vmax.f32 %v715_v47, 0.0  ;;  %v1373_v54 = vpack.c.bf16 %v888_v49, %v888_v49  ;;  %v889_v55 = vmax.f32 %v819_v50, 0.0 }
 0x160   : > { %1113 = vst.msk [vmem:[%s1701_s16 + $0x40] sm:$0xf] %vm1096_vm0, %v1347_v52  ;;  %v1348_v56 = vpack.c.bf16 %v863_v53, %v863_v53  ;;  %1139 = vst.msk [vmem:[%s1701_s16 + $0xa8] sm:$0xf] %vm1096_vm0, %v1373_v54  ;;  %v1374_v57 = vpack.c.bf16 %v889_v55, %v889_v55 }
 0x161   : > { %v719_v58 = vpop.f32.mrb[36].mxu0  ;;  %v823_v59 = vpop.f32.mrb[36].mxu1 }
 0x162   : > { %1114 = vst.msk [vmem:[%s1701_s16 + $0x44] sm:$0xf] %vm1096_vm0, %v1348_v56  ;;  %1140 = vst.msk [vmem:[%s1701_s16 + $0xac] sm:$0xf] %vm1096_vm0, %v1374_v57  ;;  %v720_v60 = vadd.f32 %v1691_v3, %v719_v58  ;;  %v721_v61 = vpop.f32.mrb[37].mxu0  ;;  %v824_v62 = vadd.f32 %v1691_v3, %v823_v59  ;;  %v825_v63 = vpop.f32.mrb[37].mxu1 }
 0x163   : > { %v722_v0 = vpop.f32.mrb[38].mxu0  ;;  %v826_v1 = vpop.f32.mrb[38].mxu1 }
 0x164   : > { %v864_v2 = vmax.f32 %v720_v60, 0.0  ;;  %v723_v4 = vadd.f32 %v1691_v3, %v722_v0  ;;  %v724_v5 = vpop.f32.mrb[39].mxu0  ;;  %v890_v6 = vmax.f32 %v824_v62, 0.0  ;;  %v827_v7 = vadd.f32 %v1691_v3, %v826_v1  ;;  %v828_v8 = vpop.f32.mrb[39].mxu1 }
 0x166   : > { %v1349_v9 = vpack.c.bf16 %v864_v2, %v864_v2  ;;  %v865_v10 = vmax.f32 %v723_v4, 0.0  ;;  %v1375_v11 = vpack.c.bf16 %v890_v6, %v890_v6  ;;  %v891_v12 = vmax.f32 %v827_v7, 0.0 }
 0x168   : > { %1115 = vst.msk [vmem:[%s1701_s16 + $0x48] sm:$0xf] %vm1096_vm0, %v1349_v9  ;;  %v1350_v13 = vpack.c.bf16 %v865_v10, %v865_v10  ;;  %1141 = vst.msk [vmem:[%s1701_s16 + $0xb0] sm:$0xf] %vm1096_vm0, %v1375_v11  ;;  %v1376_v14 = vpack.c.bf16 %v891_v12, %v891_v12 }
 0x169   : > { %v727_v15 = vpop.f32.mrb[40].mxu0  ;;  %v831_v16 = vpop.f32.mrb[40].mxu1 }
 0x16a   : > { %1116 = vst.msk [vmem:[%s1701_s16 + $0x4c] sm:$0xf] %vm1096_vm0, %v1350_v13  ;;  %1142 = vst.msk [vmem:[%s1701_s16 + $0xb4] sm:$0xf] %vm1096_vm0, %v1376_v14  ;;  %v728_v17 = vadd.f32 %v1691_v3, %v727_v15  ;;  %v729_v18 = vpop.f32.mrb[41].mxu0  ;;  %v832_v19 = vadd.f32 %v1691_v3, %v831_v16  ;;  %v833_v20 = vpop.f32.mrb[41].mxu1 }
 0x16b   : > { %v730_v21 = vpop.f32.mrb[42].mxu0  ;;  %v834_v22 = vpop.f32.mrb[42].mxu1 }
 0x16c   : > { %v866_v23 = vmax.f32 %v728_v17, 0.0  ;;  %v731_v24 = vadd.f32 %v1691_v3, %v730_v21  ;;  %v732_v25 = vpop.f32.mrb[43].mxu0  ;;  %v892_v26 = vmax.f32 %v832_v19, 0.0  ;;  %v835_v27 = vadd.f32 %v1691_v3, %v834_v22  ;;  %v836_v28 = vpop.f32.mrb[43].mxu1 }
 0x16e   : > { %v1351_v29 = vpack.c.bf16 %v866_v23, %v866_v23  ;;  %v867_v30 = vmax.f32 %v731_v24, 0.0  ;;  %v1377_v31 = vpack.c.bf16 %v892_v26, %v892_v26  ;;  %v893_v32 = vmax.f32 %v835_v27, 0.0 }
 0x170   : > { %1117 = vst.msk [vmem:[%s1701_s16 + $0x50] sm:$0xf] %vm1096_vm0, %v1351_v29  ;;  %v1352_v33 = vpack.c.bf16 %v867_v30, %v867_v30  ;;  %1143 = vst.msk [vmem:[%s1701_s16 + $0xb8] sm:$0xf] %vm1096_vm0, %v1377_v31  ;;  %v1378_v34 = vpack.c.bf16 %v893_v32, %v893_v32 }
 0x171   : > { %v735_v35 = vpop.f32.mrb[44].mxu0  ;;  %v839_v36 = vpop.f32.mrb[44].mxu1 }
 0x172   : > { %1118 = vst.msk [vmem:[%s1701_s16 + $0x54] sm:$0xf] %vm1096_vm0, %v1352_v33  ;;  %1144 = vst.msk [vmem:[%s1701_s16 + $0xbc] sm:$0xf] %vm1096_vm0, %v1378_v34  ;;  %v736_v37 = vadd.f32 %v1691_v3, %v735_v35  ;;  %v737_v38 = vpop.f32.mrb[45].mxu0  ;;  %v840_v39 = vadd.f32 %v1691_v3, %v839_v36  ;;  %v841_v40 = vpop.f32.mrb[45].mxu1 }
 0x173   : > { %v738_v41 = vpop.f32.mrb[46].mxu0  ;;  %v842_v42 = vpop.f32.mrb[46].mxu1 }
 0x174   : > { %v868_v43 = vmax.f32 %v736_v37, 0.0  ;;  %v739_v44 = vadd.f32 %v1691_v3, %v738_v41  ;;  %v740_v45 = vpop.f32.mrb[47].mxu0  ;;  %v894_v46 = vmax.f32 %v840_v39, 0.0  ;;  %v843_v47 = vadd.f32 %v1691_v3, %v842_v42  ;;  %v844_v48 = vpop.f32.mrb[47].mxu1 }
 0x176   : > { %v1353_v49 = vpack.c.bf16 %v868_v43, %v868_v43  ;;  %v869_v50 = vmax.f32 %v739_v44, 0.0  ;;  %v1379_v51 = vpack.c.bf16 %v894_v46, %v894_v46  ;;  %v895_v52 = vmax.f32 %v843_v47, 0.0 }
 0x178   : > { %1119 = vst.msk [vmem:[%s1701_s16 + $0x58] sm:$0xf] %vm1096_vm0, %v1353_v49  ;;  %v1354_v53 = vpack.c.bf16 %v869_v50, %v869_v50  ;;  %1145 = vst.msk [vmem:[%s1701_s16 + $0xc0] sm:$0xf] %vm1096_vm0, %v1379_v51  ;;  %v1380_v54 = vpack.c.bf16 %v895_v52, %v895_v52 }
 0x179   : > { %v743_v55 = vpop.f32.mrb[48].mxu0 }
 0x17a   : > { %1120 = vst.msk [vmem:[%s1701_s16 + $0x5c] sm:$0xf] %vm1096_vm0, %v1354_v53  ;;  %1146 = vst.msk [vmem:[%s1701_s16 + $0xc4] sm:$0xf] %vm1096_vm0, %v1380_v54  ;;  %v744_v56 = vadd.f32 %v1691_v3, %v743_v55  ;;  %v745_v57 = vpop.f32.mrb[49].mxu0 }
 0x17b   : > { %v746_v58 = vpop.f32.mrb[50].mxu0 }
 0x17c   : > { %v870_v59 = vmax.f32 %v744_v56, 0.0  ;;  %v747_v60 = vadd.f32 %v1691_v3, %v746_v58  ;;  %v748_v61 = vpop.f32.mrb[51].mxu0 }
 0x17e   : > { %v1355_v62 = vpack.c.bf16 %v870_v59, %v870_v59  ;;  %v871_v63 = vmax.f32 %v747_v60, 0.0 }
 0x180   : > { %1121 = vst.msk [vmem:[%s1701_s16 + $0x60] sm:$0xf] %vm1096_vm0, %v1355_v62  ;;  %v1356_v0 = vpack.c.bf16 %v871_v63, %v871_v63 }
 0x182   : > { %1122 = vst.msk [vmem:[%s1701_s16 + $0x64] sm:$0xf] %vm1096_vm0, %v1356_v0 }
 0x183 PF: > { %s13_s12 = sadd.s32 1, %s1519_s12  }
 0x184   : > { %p10_p4 = scmp.ge.s32.totalorder %s13_s12, 4  }
 0x186   :  { %12 = sbr.rel (!%p10_p4) target bundleno = 1 (0x1), region = 62 }

// kernel: categorical_dueling_cnn_forward.5
= control target key start
LH: loop header
LB: loop body
LE: loop exit
PB: predicated region body
PF: predicated region fallthrough
CT: control target
= control target key end

     0   :  { %s1555_s12 = smov 0   ;;  %s1557_s13 = smov 0   ;;  %s1812_s0 = inlined_call_operand.vmem [shape: bf16[162,512], index: 0, kind: input, shape index: {}]   ;;  %s1813_s1 = inlined_call_operand.vmem [shape: bf16[512,64], index: 1, kind: input, shape index: {}]   ;;  %s1814_s2 = inlined_call_operand.vmem [shape: f32[1,64], index: 2, kind: input, shape index: {}]   ;;  %s1815_s3 = inlined_call_operand.vmem [shape: bf16[162,64], index: 3, kind: output, shape index: {}]  }
   0x1   :  { %s1559_s14 = smov 0  }
   0x2 LB: > { %s1568_s15 = sadd.s32 4294967295, %s1501_s14   ;;  %s1570_s16 = sadd.s32 1, %s1501_s14   ;;  %s1501_s14 = sphi %s1559_s14, %s1822_s14   ;;  %s1497_s13 = sphi %s1557_s13, %s1821_s13   ;;  %s1493_s12 = sphi %s1555_s12, %s1820_s12  }
   0x3   : > { %s85_s17 = ssub.s32 %s1501_s14, %s1570_s16  ;;  %s88_s18 = sadd.s32 1, %s1497_s13 }
   0x4   : > { %p86_p0 = scmp.eq.s32.totalorder %s85_s17, 0  ;;  %p98_p1 = scmp.ne.s32.totalorder %s1497_s13, %s1493_s12 }
   0x5   : > { %p99_p2 = scmp.eq.s32.totalorder %s1568_s15, 1  ;;  %p1087_p3 = scmp.ge.s32.totalorder %s1501_s14, 1 }
   0x6   : > { %s1578_s19 = scalar_select %p86_p0, %s1497_s13, %s88_s18  }
   0x7   : > { %p1580_p4 = por %p99_p2, %p98_p1  ;;  %p149_p5 = scmp.lt.s32.totalorder %s1501_s14, 3 }
   0x9   : > { %p150_p6 = pnand %p1087_p3, %p149_p5 }
   0xa   : > { %v1377_v0 = vld [vmem:[%s1813_s1 + $0x40] sm:$0xff] (!%p150_p6)   ;;  %v1381_v4 = vld [vmem:[%s1813_s1 + $0x48] sm:$0xff] (!%p150_p6)   ;;  %v1385_v8 = vld [vmem:[%s1813_s1 + $0x50] sm:$0xff] (!%p150_p6)   ;;  %s1630_s30 = smul.u32 (!%p150_p6), 11, %s1568_s15  ;;  %s175_s5 = sand.u32 (!%p150_p6), 1, %s1493_s12   ;;  %vm816_vm0 = vcmask (!%p150_p6), 519168  }
   0xb   : > { %153 = sbr.rel (%p150_p6) target bundleno = 377 (0x179), region = 32  ;;  %v1378_v1 = vld [vmem:[%s1813_s1 + $0xc0] sm:$0xff] (!%p150_p6)   ;;  %1183 = vmatprep.subr.bf16.mxu0 (!%p150_p6), %v1377_v0  ;;  %v1382_v5 = vld [vmem:[%s1813_s1 + $0xc8] sm:$0xff] (!%p150_p6)   ;;  %v1386_v9 = vld [vmem:[%s1813_s1 + $0xd0] sm:$0xff] (!%p150_p6)  }
   0xc   : > { %v1379_v2 = vld [vmem:[%s1813_s1] sm:$0xff] (!%p150_p6)   ;;  %1235 = vmatprep.subr.bf16.mxu1 (!%p150_p6), %v1378_v1  ;;  %v1383_v6 = vld [vmem:[%s1813_s1 + $0x8] sm:$0xff] (!%p150_p6)   ;;  %v1387_v10 = vld [vmem:[%s1813_s1 + $0x10] sm:$0xff] (!%p150_p6)   ;;  %p184_p7 = scmp.lt.s32.totalorder (!%p150_p6), %s1630_s30, 20  ;;  %s1287_s6 = smul.u32 (!%p150_p6), 44, %s175_s5 }
   0xd   : > { %v1380_v3 = vld [vmem:[%s1813_s1 + $0x80] sm:$0xff] (!%p150_p6)   ;;  %1184 = vmatpush3.bf16.msra.mxu0 (!%p150_p6), %v1379_v2  ;;  %v1384_v7 = vld [vmem:[%s1813_s1 + $0x88] sm:$0xff] (!%p150_p6)   ;;  %v1388_v11 = vld [vmem:[%s1813_s1 + $0x90] sm:$0xff] (!%p150_p6)  }
   0xe   : > { %1236 = vmatpush3.bf16.msra.mxu1 (!%p150_p6), %v1380_v3  ;;  %1185 = vmatprep.subr.bf16.mxu0 (!%p150_p6), %v1381_v4  ;;  %v1389_v12 = vld [vmem:[%s1813_s1 + $0x58] sm:$0xff] (!%p150_p6)   ;;  %v1393_v16 = vld [vmem:[%s1813_s1 + $0x60] sm:$0xff] (!%p150_p6)   ;;  %v1397_v20 = vld [vmem:[%s1813_s1 + $0x68] sm:$0xff] (!%p150_p6)   ;;  %s1720_s12 = scalar_lea.vmem (!%p150_p6), [#allocation2], %s1287_s6  }
   0xf   : > { %1237 = vmatprep.subr.bf16.mxu1 (!%p150_p6), %v1382_v5  ;;  %v1390_v13 = vld [vmem:[%s1813_s1 + $0xd8] sm:$0xff] (!%p150_p6)   ;;  %v1394_v17 = vld [vmem:[%s1813_s1 + $0xe0] sm:$0xff] (!%p150_p6)   ;;  %v1398_v21 = vld [vmem:[%s1813_s1 + $0xe8] sm:$0xff] (!%p150_p6)  }
  0x10   : > { %v1391_v14 = vld [vmem:[%s1813_s1 + $0x18] sm:$0xff] (!%p150_p6)   ;;  %v1395_v18 = vld [vmem:[%s1813_s1 + $0x20] sm:$0xff] (!%p150_p6)   ;;  %v1399_v22 = vld [vmem:[%s1813_s1 + $0x28] sm:$0xff] (!%p150_p6)  }
  0x11   : > { %1186 = vmatpush3.bf16.msra.mxu0 (!%p150_p6), %v1383_v6  ;;  %v1392_v15 = vld [vmem:[%s1813_s1 + $0x98] sm:$0xff] (!%p150_p6)   ;;  %v1396_v19 = vld [vmem:[%s1813_s1 + $0xa0] sm:$0xff] (!%p150_p6)   ;;  %v1400_v23 = vld [vmem:[%s1813_s1 + $0xa8] sm:$0xff] (!%p150_p6)  }
  0x12   : > { %1238 = vmatpush3.bf16.msra.mxu1 %v1384_v7  ;;  %1187 = vmatprep.subr.bf16.mxu0 %v1385_v8  ;;  %s185_s26 = scalar_select %p184_p7, %s1630_s30, 20  ;;  %v1401_v24 = vld [vmem:[%s1813_s1 + $0x70] sm:$0xff]   ;;  %v1405_v28 = vld [vmem:[%s1813_s1 + $0x78] sm:$0xff]   ;;  %v1715_v60 = vld [vmem:[%s1814_s2] ss:$0 sm:$0xff] }
  0x13   : > { %1239 = vmatprep.subr.bf16.mxu1 %v1386_v9  ;;  %v1402_v25 = vld [vmem:[%s1813_s1 + $0xf0] sm:$0xff]   ;;  %v1406_v29 = vld [vmem:[%s1813_s1 + $0xf8] sm:$0xff]   ;;  %s836_s7 = ssub.s32 (%p1580_p4), 21, %s1630_s30  ;;  %s1182_s8 = smul.u32 (%p1580_p4), 44, %s1568_s15 }
  0x14   : > { %v1403_v26 = vld [vmem:[%s1813_s1 + $0x30] sm:$0xff]   ;;  %s1170_s9 = sshll.u32 %s185_s26, 4  ;;  %v1407_v30 = vld [vmem:[%s1813_s1 + $0x38] sm:$0xff]   ;;  %p837_p8 = scmp.lt.s32.totalorder (%p1580_p4), %s836_s7, 11 }
  0x15   : > { %1188 = vmatpush3.bf16.msra.mxu0 %v1387_v10  ;;  %v1404_v27 = vld [vmem:[%s1813_s1 + $0xb0] sm:$0xff]   ;;  %s1682_s24 = scalar_lea.vmem %s1812_s0, %s1170_s9  ;;  %v1408_v31 = vld [vmem:[%s1813_s1 + $0xb8] sm:$0xff]   ;;  %s1760_s11 = scalar_lea.vmem (%p1580_p4), %s1815_s3, %s1182_s8  }
  0x16   : > { %1240 = vmatpush3.bf16.msra.mxu1 %v1388_v11  ;;  %1189 = vmatprep.subr.bf16.mxu0 %v1389_v12  ;;  %v1409_v32 = vld [vmem:[%s1682_s24] ss:$16 sps:$4 sm:$0xff]   ;;  %v1411_v33 = vld [vmem:[%s1682_s24 + $0x4] ss:$16 sps:$4 sm:$0xff]   ;;  %v1412_v34 = vld [vmem:[%s1682_s24 + $0x8] ss:$16 sps:$4 sm:$0xff]  }
  0x17   : > { %1241 = vmatprep.subr.bf16.mxu1 %v1390_v13  ;;  %v1414_v35 = vld [vmem:[%s1682_s24 + $0xc] ss:$16 sps:$4 sm:$0xff]   ;;  %632 = vmatprep.mubr.bf16.mxu0 %v1411_v33  ;;  %v1415_v36 = vld [vmem:[%s1682_s24 + $0x24] ss:$16 sps:$4 sm:$0xff]   ;;  %v1419_v38 = vld [vmem:[%s1682_s24 + $0x20] ss:$16 sps:$4 sm:$0xff]  }
  0x18   : > { %712 = vmatprep.mubr.bf16.mxu1 %v1414_v35  ;;  %v1417_v37 = vld [vmem:[%s1682_s24 + $0x2c] ss:$16 sps:$4 sm:$0xff]   ;;  %v1420_v39 = vld [vmem:[%s1682_s24 + $0x28] ss:$16 sps:$4 sm:$0xff]   ;;  %v1421_v40 = vld [vmem:[%s1682_s24 + $0x44] ss:$16 sps:$4 sm:$0xff]  }
  0x19   : > { %1190 = vmatpush3.bf16.msra.mxu0 %v1391_v14  ;;  %v1423_v41 = vld [vmem:[%s1682_s24 + $0x4c] ss:$16 sps:$4 sm:$0xff]   ;;  %v1425_v42 = vld [vmem:[%s1682_s24 + $0x40] ss:$16 sps:$4 sm:$0xff]   ;;  %v1426_v43 = vld [vmem:[%s1682_s24 + $0x48] ss:$16 sps:$4 sm:$0xff]  }
  0x1a   : > { %1242 = vmatpush3.bf16.msra.mxu1 %v1392_v15  ;;  %1191 = vmatprep.subr.bf16.mxu0 %v1393_v16  ;;  %v1427_v44 = vld [vmem:[%s1682_s24 + $0x64] ss:$16 sps:$4 sm:$0xff]   ;;  %v1429_v45 = vld [vmem:[%s1682_s24 + $0x6c] ss:$16 sps:$4 sm:$0xff]   ;;  %v1431_v46 = vld [vmem:[%s1682_s24 + $0x60] ss:$16 sps:$4 sm:$0xff]  }
  0x1b   : > { %1243 = vmatprep.subr.bf16.mxu1 %v1394_v17  ;;  %v1432_v47 = vld [vmem:[%s1682_s24 + $0x68] ss:$16 sps:$4 sm:$0xff]   ;;  %v1433_v48 = vld [vmem:[%s1682_s24 + $0x84] ss:$16 sps:$4 sm:$0xff]   ;;  %v1435_v49 = vld [vmem:[%s1682_s24 + $0x8c] ss:$16 sps:$4 sm:$0xff]  }
  0x1c   : > { %v221_v50 = vld [vmem:[%s1682_s24 + $0xa0] sm:$0xff]  ;;  %v222_v51 = vld [vmem:[%s1682_s24 + $0xa8] sm:$0xff] }
  0x1d   : > { %1192 = vmatpush3.bf16.msra.mxu0 %v1395_v18  ;;  %v1437_v52 = vld [vmem:[%s1682_s24 + $0x80] ss:$16 sps:$4 sm:$0xff]   ;;  %v1438_v53 = vld [vmem:[%s1682_s24 + $0x88] ss:$16 sps:$4 sm:$0xff]   ;;  %v1112_v54 = vcombine.high %v221_v50, %v221_v50  ;;  %v1114_v55 = vcombine.high %v222_v51, %v222_v51  ;;  %v1111_v56 = vcombine.low %v221_v50, %v221_v50  ;;  %v1113_v57 = vcombine.low %v222_v51, %v222_v51 }
  0x1e   : > { %1244 = vmatpush3.bf16.msra.mxu1 %v1396_v19  ;;  %1193 = vmatprep.subr.bf16.mxu0 %v1397_v20 }
  0x1f   : > { %1245 = vmatprep.subr.bf16.mxu1 %v1398_v21 }
  0x21   : > { %1194 = vmatpush3.bf16.msra.mxu0 %v1399_v22 }
  0x22   : > { %1246 = vmatpush3.bf16.msra.mxu1 %v1400_v23  ;;  %1195 = vmatprep.subr.bf16.mxu0 %v1401_v24 }
  0x23   : > { %1247 = vmatprep.subr.bf16.mxu1 %v1402_v25 }
  0x25   : > { %1196 = vmatpush3.bf16.msra.mxu0 %v1403_v26 }
  0x26   : > { %1248 = vmatpush3.bf16.msra.mxu1 %v1404_v27  ;;  %1197 = vmatprep.subr.bf16.mxu0 %v1405_v28 }
  0x27   : > { %1249 = vmatprep.subr.bf16.mxu1 %v1406_v29 }
  0x29   : > { %1198 = vmatpush3.bf16.msra.mxu0 %v1407_v30 }
  0x2a   : > { %1250 = vmatpush3.bf16.msra.mxu1 %v1408_v31 }
  0x2c   : > { %633 = vmatmul.mubr.bf16.vlgmr.msra.gmra.mrb[0].mxu0 %v1409_v32 }
  0x2d   : > { %713 = vmatmul.mubr.bf16.vlgmr.msra.gmra.mrb[0].mxu1 %v1412_v34  ;;  %640 = vmatprep.mubr.bf16.mxu0 %v1415_v36 }
  0x2e   : > { %720 = vmatprep.mubr.bf16.mxu1 %v1417_v37 }
  0x34   : > { %641 = vmatmul.mubr.bf16.gmra.mrb[4].mxu0 %v1419_v38 }
  0x35   : > { %721 = vmatmul.mubr.bf16.gmra.mrb[4].mxu1 %v1420_v39  ;;  %648 = vmatprep.mubr.bf16.mxu0 %v1421_v40 }
  0x36   : > { %728 = vmatprep.mubr.bf16.mxu1 %v1423_v41 }
  0x3c   : > { %649 = vmatmul.mubr.bf16.gmra.mrb[8].mxu0 %v1425_v42 }
  0x3d   : > { %729 = vmatmul.mubr.bf16.gmra.mrb[8].mxu1 %v1426_v43  ;;  %656 = vmatprep.mubr.bf16.mxu0 %v1427_v44 }
  0x3e   : > { %736 = vmatprep.mubr.bf16.mxu1 %v1429_v45 }
  0x44   : > { %657 = vmatmul.mubr.bf16.gmra.mrb[12].mxu0 %v1431_v46 }
  0x45   : > { %737 = vmatmul.mubr.bf16.gmra.mrb[12].mxu1 %v1432_v47  ;;  %664 = vmatprep.mubr.bf16.mxu0 %v1433_v48 }
  0x46   : > { %744 = vmatprep.mubr.bf16.mxu1 %v1435_v49 }
  0x4c   : > { %665 = vmatmul.mubr.bf16.gmra.mrb[16].mxu0 %v1437_v52 }
  0x4d   : > { %745 = vmatmul.mubr.bf16.gmra.mrb[16].mxu1 %v1438_v53  ;;  %672 = vmatprep.mubr.bf16.mxu0 %v1112_v54 }
  0x4e   : > { %752 = vmatprep.mubr.bf16.mxu1 %v1114_v55 }
  0x54   : > { %673 = vmatmul.mubr.bf16.gmra.mrb[20].mxu0 %v1111_v56 }
  0x55   : > { %753 = vmatmul.mubr.bf16.gmra.mrb[20].mxu1 %v1113_v57 }
  0xff   : > { %v1199_v58 = vpop.f32.mrb[0].mxu0 }
 0x100   : > { %v1251_v59 = vpop.f32.mrb[0].mxu1  ;;  %v1200_v61 = vpop.f32.mrb[1].mxu0 }
 0x101   : > { %v1201_v62 = vadd.f32 %v1200_v61, %v1199_v58  ;;  %v1252_v63 = vpop.f32.mrb[1].mxu1  ;;  %v1202_v0 = vpop.f32.mrb[2].mxu0 }
 0x102   : > { %v1253_v1 = vadd.f32 %v1252_v63, %v1251_v59  ;;  %v1254_v2 = vpop.f32.mrb[2].mxu1  ;;  %v1203_v3 = vpop.f32.mrb[3].mxu0 }
 0x103   : > { %v635_v4 = vadd.f32 %v1201_v62, %v1715_v60  ;;  %v1204_v5 = vadd.f32 %v1203_v3, %v1202_v0  ;;  %v1255_v6 = vpop.f32.mrb[3].mxu1 }
 0x104   : > { %v1256_v7 = vadd.f32 %v1255_v6, %v1254_v2 }
 0x105   : > { %v715_v8 = vadd.f32 %v1253_v1, %v635_v4  ;;  %v638_v9 = vadd.f32 %v1204_v5, %v1715_v60 }
 0x107   : > { %v760_v10 = vmax.f32 %v715_v8, 0.0  ;;  %v718_v11 = vadd.f32 %v1256_v7, %v638_v9  ;;  %v1205_v12 = vpop.f32.mrb[4].mxu0 }
 0x108   : > { %v1257_v13 = vpop.f32.mrb[4].mxu1  ;;  %v1206_v14 = vpop.f32.mrb[5].mxu0 }
 0x109   : > { %v1171_v15 = vpack.c.bf16 %v760_v10, %v760_v10  ;;  %v761_v16 = vmax.f32 %v718_v11, 0.0  ;;  %v1207_v17 = vadd.f32 %v1206_v14, %v1205_v12  ;;  %v1258_v18 = vpop.f32.mrb[5].mxu1  ;;  %v1208_v19 = vpop.f32.mrb[6].mxu0 }
 0x10a   : > { %v1259_v20 = vadd.f32 %v1258_v18, %v1257_v13  ;;  %v1260_v21 = vpop.f32.mrb[6].mxu1  ;;  %v1209_v22 = vpop.f32.mrb[7].mxu0 }
 0x10b   : > { %817 = vst.msk [vmem:[%s1720_s12] sm:$0xf] %vm816_vm0, %v1171_v15  ;;  %v1172_v23 = vpack.c.bf16 %v761_v16, %v761_v16  ;;  %v643_v24 = vadd.f32 %v1207_v17, %v1715_v60  ;;  %v1210_v25 = vadd.f32 %v1209_v22, %v1208_v19  ;;  %v1261_v26 = vpop.f32.mrb[7].mxu1 }
 0x10c   : > { %v1262_v27 = vadd.f32 %v1261_v26, %v1260_v21 }
 0x10d   : > { %818 = vst.msk [vmem:[%s1720_s12 + $0x4] sm:$0xf] %vm816_vm0, %v1172_v23  ;;  %v723_v28 = vadd.f32 %v1259_v20, %v643_v24  ;;  %v646_v29 = vadd.f32 %v1210_v25, %v1715_v60 }
 0x10f   : > { %v762_v30 = vmax.f32 %v723_v28, 0.0  ;;  %v726_v31 = vadd.f32 %v1262_v27, %v646_v29  ;;  %v1211_v32 = vpop.f32.mrb[8].mxu0 }
 0x110   : > { %v1263_v33 = vpop.f32.mrb[8].mxu1  ;;  %v1212_v34 = vpop.f32.mrb[9].mxu0 }
 0x111   : > { %v1173_v35 = vpack.c.bf16 %v762_v30, %v762_v30  ;;  %v763_v36 = vmax.f32 %v726_v31, 0.0  ;;  %v1213_v37 = vadd.f32 %v1212_v34, %v1211_v32  ;;  %v1264_v38 = vpop.f32.mrb[9].mxu1  ;;  %v1214_v39 = vpop.f32.mrb[10].mxu0 }
 0x112   : > { %v1265_v40 = vadd.f32 %v1264_v38, %v1263_v33  ;;  %v1266_v41 = vpop.f32.mrb[10].mxu1  ;;  %v1215_v42 = vpop.f32.mrb[11].mxu0 }
 0x113   : > { %819 = vst.msk [vmem:[%s1720_s12 + $0x8] sm:$0xf] %vm816_vm0, %v1173_v35  ;;  %v1174_v43 = vpack.c.bf16 %v763_v36, %v763_v36  ;;  %v651_v44 = vadd.f32 %v1213_v37, %v1715_v60  ;;  %v1216_v45 = vadd.f32 %v1215_v42, %v1214_v39  ;;  %v1267_v46 = vpop.f32.mrb[11].mxu1 }
 0x114   : > { %v1268_v47 = vadd.f32 %v1267_v46, %v1266_v41 }
 0x115   : > { %820 = vst.msk [vmem:[%s1720_s12 + $0xc] sm:$0xf] %vm816_vm0, %v1174_v43  ;;  %v731_v48 = vadd.f32 %v1265_v40, %v651_v44  ;;  %v654_v49 = vadd.f32 %v1216_v45, %v1715_v60 }
 0x117   : > { %v764_v50 = vmax.f32 %v731_v48, 0.0  ;;  %v734_v51 = vadd.f32 %v1268_v47, %v654_v49  ;;  %v1217_v52 = vpop.f32.mrb[12].mxu0 }
 0x118   : > { %v1269_v53 = vpop.f32.mrb[12].mxu1  ;;  %v1218_v54 = vpop.f32.mrb[13].mxu0 }
 0x119   : > { %v1175_v55 = vpack.c.bf16 %v764_v50, %v764_v50  ;;  %v765_v56 = vmax.f32 %v734_v51, 0.0  ;;  %v1219_v57 = vadd.f32 %v1218_v54, %v1217_v52  ;;  %v1270_v58 = vpop.f32.mrb[13].mxu1  ;;  %v1220_v59 = vpop.f32.mrb[14].mxu0 }
 0x11a   : > { %v1271_v61 = vadd.f32 %v1270_v58, %v1269_v53  ;;  %v1272_v62 = vpop.f32.mrb[14].mxu1  ;;  %v1221_v63 = vpop.f32.mrb[15].mxu0 }
 0x11b   : > { %821 = vst.msk [vmem:[%s1720_s12 + $0x10] sm:$0xf] %vm816_vm0, %v1175_v55  ;;  %v1176_v0 = vpack.c.bf16 %v765_v56, %v765_v56  ;;  %v659_v1 = vadd.f32 %v1219_v57, %v1715_v60  ;;  %v1222_v2 = vadd.f32 %v1221_v63, %v1220_v59  ;;  %v1273_v3 = vpop.f32.mrb[15].mxu1 }
 0x11c   : > { %v1274_v4 = vadd.f32 %v1273_v3, %v1272_v62 }
 0x11d   : > { %822 = vst.msk [vmem:[%s1720_s12 + $0x14] sm:$0xf] %vm816_vm0, %v1176_v0  ;;  %v739_v5 = vadd.f32 %v1271_v61, %v659_v1  ;;  %v662_v6 = vadd.f32 %v1222_v2, %v1715_v60 }
 0x11f   : > { %v766_v7 = vmax.f32 %v739_v5, 0.0  ;;  %v742_v8 = vadd.f32 %v1274_v4, %v662_v6  ;;  %v1223_v9 = vpop.f32.mrb[16].mxu0 }
 0x120   : > { %v1275_v10 = vpop.f32.mrb[16].mxu1  ;;  %v1224_v11 = vpop.f32.mrb[17].mxu0 }
 0x121   : > { %v1177_v12 = vpack.c.bf16 %v766_v7, %v766_v7  ;;  %v767_v13 = vmax.f32 %v742_v8, 0.0  ;;  %v1225_v14 = vadd.f32 %v1224_v11, %v1223_v9  ;;  %v1276_v15 = vpop.f32.mrb[17].mxu1  ;;  %v1226_v16 = vpop.f32.mrb[18].mxu0 }
 0x122   : > { %v1277_v17 = vadd.f32 %v1276_v15, %v1275_v10  ;;  %v1278_v18 = vpop.f32.mrb[18].mxu1  ;;  %v1227_v19 = vpop.f32.mrb[19].mxu0 }
 0x123   : > { %823 = vst.msk [vmem:[%s1720_s12 + $0x18] sm:$0xf] %vm816_vm0, %v1177_v12  ;;  %v1178_v20 = vpack.c.bf16 %v767_v13, %v767_v13  ;;  %v667_v21 = vadd.f32 %v1225_v14, %v1715_v60  ;;  %v1228_v22 = vadd.f32 %v1227_v19, %v1226_v16  ;;  %v1279_v23 = vpop.f32.mrb[19].mxu1 }
 0x124   : > { %v1280_v24 = vadd.f32 %v1279_v23, %v1278_v18 }
 0x125   : > { %824 = vst.msk [vmem:[%s1720_s12 + $0x1c] sm:$0xf] %vm816_vm0, %v1178_v20  ;;  %v747_v25 = vadd.f32 %v1277_v17, %v667_v21  ;;  %v670_v26 = vadd.f32 %v1228_v22, %v1715_v60 }
 0x127   : > { %v768_v27 = vmax.f32 %v747_v25, 0.0  ;;  %v750_v28 = vadd.f32 %v1280_v24, %v670_v26  ;;  %v1229_v29 = vpop.f32.mrb[20].mxu0 }
 0x128   : > { %v1281_v30 = vpop.f32.mrb[20].mxu1  ;;  %v1230_v31 = vpop.f32.mrb[21].mxu0 }
 0x129   : > { %v1179_v32 = vpack.c.bf16 %v768_v27, %v768_v27  ;;  %v769_v33 = vmax.f32 %v750_v28, 0.0  ;;  %v1231_v34 = vadd.f32 %v1230_v31, %v1229_v29  ;;  %v1282_v35 = vpop.f32.mrb[21].mxu1  ;;  %v1232_v36 = vpop.f32.mrb[22].mxu0 }
 0x12a   : > { %v1283_v37 = vadd.f32 %v1282_v35, %v1281_v30  ;;  %v1284_v38 = vpop.f32.mrb[22].mxu1  ;;  %v1233_v39 = vpop.f32.mrb[23].mxu0 }
 0x12b   : > { %825 = vst.msk [vmem:[%s1720_s12 + $0x20] sm:$0xf] %vm816_vm0, %v1179_v32  ;;  %v1180_v40 = vpack.c.bf16 %v769_v33, %v769_v33  ;;  %v675_v41 = vadd.f32 %v1231_v34, %v1715_v60  ;;  %v1285_v42 = vpop.f32.mrb[23].mxu1 }
 0x12d   : > { %826 = vst.msk [vmem:[%s1720_s12 + $0x24] sm:$0xf] %vm816_vm0, %v1180_v40  ;;  %v755_v43 = vadd.f32 %v1283_v37, %v675_v41  ;;  %834 = sbr.rel (!%p1580_p4) target bundleno = 377 (0x179), region = 36 }
 0x12f   : > { %v770_v44 = vmax.f32 %v755_v43, 0.0 }
 0x131   : > { %v1181_v45 = vpack.c.bf16 %v770_v44, %v770_v44 }
 0x133   : > { %827 = vst.msk [vmem:[%s1720_s12 + $0x28] sm:$0xf] %vm816_vm0, %v1181_v45 }
 0x134   : > { %s1824_s7 = smov (!%p837_p8, %s836_s7), 11 }
 0x135   : > { %s1158_s14 = sshll.u32 %s1824_s7, 6 }
 0x136   : > { %p1161_p9 = scmp.eq.s32.totalorder %s1158_s14, 0 }
 0x137   : > { %1443 = sdivrem.u32 (!%p1161_p9), %s1824_s7, 11 }
 0x138   : > { %845 = sbr.rel (%p1161_p9) target bundleno = 377 (0x179), region = 40 }
 0x140   : > { %s1766_s20 = spop.drf %1443 }
 0x141   : > { %p1162_p10 = scmp.le.s32.totalorder %s1766_s20, 0 }
 0x142   : > { %s1817_s15 = smov (!%p1162_p10), %s1760_s11  ;;  %s1818_s30 = smov (!%p1162_p10), %s1720_s12 }
 0x143   : > { %1040 = sbr.rel (%p1162_p10) target bundleno = 348 (0x15c), region = 112  ;;  %s1775_s17 = smov (!%p1162_p10), 0  }
 0x144   : > { %s1777_s18 = smov (!%p1162_p10), 0  }
 0x14a LB: >> { %v862_v60 = vld [vmem:[%s1509_s30] sm:$0xf]  ;;  %v864_v46 = vld [vmem:[%s1509_s30 + $0x4] sm:$0xf]  ;;  %v866_v47 = vld [vmem:[%s1509_s30 + $0x8] sm:$0xf]  ;;  %s1517_s18 = sphi %s1777_s18, %s856_s18   ;;  %s1513_s17 = sphi %s1775_s17, %s1819_s17   ;;  %s1509_s30 = sphi %s1818_s30, %s889_s30   ;;  %s1505_s15 = sphi %s1817_s15, %s890_s15  }
 0x14b   : >> { %863 = vst [vmem:[%s1505_s15] sm:$0xf] %v862_v60  ;;  %865 = vst [vmem:[%s1505_s15 + $0x4] sm:$0xf] %v864_v46  ;;  %v868_v48 = vld [vmem:[%s1509_s30 + $0xc] sm:$0xf]  ;;  %s884_s21 = sadd.s32 1, %s1513_s17 }
 0x14c   : >> { %867 = vst [vmem:[%s1505_s15 + $0x8] sm:$0xf] %v866_v47  ;;  %v870_v49 = vld [vmem:[%s1509_s30 + $0x10] sm:$0xf]  ;;  %v872_v50 = vld [vmem:[%s1509_s30 + $0x14] sm:$0xf]  ;;  %p885_p11 = scmp.ge.s32.totalorder %s884_s21, %s1766_s20 }
 0x14d   : >> { %869 = vst [vmem:[%s1505_s15 + $0xc] sm:$0xf] %v868_v48  ;;  %871 = vst [vmem:[%s1505_s15 + $0x10] sm:$0xf] %v870_v49  ;;  %v874_v51 = vld [vmem:[%s1509_s30 + $0x18] sm:$0xf] }
 0x14e   : >> { %873 = vst [vmem:[%s1505_s15 + $0x14] sm:$0xf] %v872_v50  ;;  %v876_v52 = vld [vmem:[%s1509_s30 + $0x1c] sm:$0xf]  ;;  %v878_v53 = vld [vmem:[%s1509_s30 + $0x20] sm:$0xf] }
 0x14f   : >> { %875 = vst [vmem:[%s1505_s15 + $0x18] sm:$0xf] %v874_v51  ;;  %877 = vst [vmem:[%s1505_s15 + $0x1c] sm:$0xf] %v876_v52  ;;  %v880_v54 = vld [vmem:[%s1509_s30 + $0x24] sm:$0xf] }
 0x150   : >> { %879 = vst [vmem:[%s1505_s15 + $0x20] sm:$0xf] %v878_v53  ;;  %v882_v55 = vld [vmem:[%s1509_s30 + $0x28] sm:$0xf]  ;;  %881 = vst [vmem:[%s1505_s15 + $0x24] sm:$0xf] %v880_v54 }
 0x151   : >> { %883 = vst [vmem:[%s1505_s15 + $0x28] sm:$0xf] %v882_v55  ;;  %s1826_s21 = smov (%p885_p11, %s884_s21), 0  ;;  %s856_s18 = sadd.s32 1, %s1517_s18  }
 0x152   : >> { %s887_s22 = smul.u32 44, %s1826_s21  ;;  %p855_p12 = scmp.ge.s32.totalorder %s856_s18, %s1766_s20 }
 0x153   : >> { %s1819_s17 = smov %s1826_s21 }
 0x154   : >> { %s889_s30 = scalar_lea.vmem %s1720_s12, %s887_s22 [#allocation2]   ;;  %s890_s15 = scalar_lea.vmem %s1760_s11, %s887_s22  }
 0x155   : > { %858 = sbr.rel (!%p855_p12) target bundleno = 330 (0x14a), region = 118 }
 0x15c PF: > { %1445 = sdivrem.u32 %s1824_s7, 11 }
 0x15d   : > { %s1163_s23 = smul.u32 44, %s1766_s20 }
 0x15f   : > { %s895_s24 = scalar_lea.vmem %s1720_s12, %s1163_s23 [#allocation2]   ;;  %s897_s25 = scalar_lea.vmem %s1760_s11, %s1163_s23  }
 0x165   : > { %s1446_s26 = spop.drf %1445 }
 0x166   : > { %p1165_p13 = scmp.le.s32.totalorder %s1446_s26, 0 }
 0x167   : > { %s1519_s27 = smov (!%p1165_p13), %s897_s25   ;;  %s1523_s28 = smov (!%p1165_p13), %s895_s24  }
 0x168   : > { %1054 = sbr.rel (%p1165_p13) target bundleno = 377 (0x179), region = 123  ;;  %s1527_s29 = smov (!%p1165_p13), 0  }
 0x169   : > { %s1531_s4 = smov (!%p1165_p13), 0  }
 0x16f LB: >> { %v907_v56 = vld [vmem:[%s1525_s28] sm:$0xf]  ;;  %s909_s5 = sadd.s32 1, %s1529_s29  ;;  %s901_s4 = sadd.s32 1, %s1533_s4   ;;  %s1533_s4 = sphi %s1531_s4, %s901_s4   ;;  %s1529_s29 = sphi %s1527_s29, %s1528_s29   ;;  %s1525_s28 = sphi %s1523_s28, %s914_s28   ;;  %s1521_s27 = sphi %s1519_s27, %s915_s27  }
 0x170   : >> { %908 = vst [vmem:[%s1521_s27] sm:$0xf] %v907_v56  ;;  %p910_p0 = scmp.ge.s32.totalorder %s909_s5, %s1446_s26  ;;  %p900_p1 = scmp.ge.s32.totalorder %s901_s4, %s1446_s26 }
 0x172   : >> { %s1828_s5 = smov (%p910_p0, %s909_s5), 0  ;;  %903 = sbr.rel (!%p900_p1) target bundleno = 367 (0x16f), region = 129 }
 0x173   : >> { %s1166_s6 = sshll.u32 %s1828_s5, 2  ;;  %s1528_s29 = smov %s1828_s5  }
 0x174   : >> { %s914_s28 = scalar_lea.vmem %s895_s24, %s1166_s6 [#allocation2]   ;;  %s915_s27 = scalar_lea.vmem %s897_s25, %s1166_s6  }
 0x179 PF: > { %p10_p2 = scmp.ge.s32.totalorder %s1570_s16, 4   ;;  %s1820_s12 = smov %s1497_s13 }
 0x17a   : > { %s1821_s13 = smov %s1578_s19  ;;  %s1822_s14 = smov %s1570_s16 }
 0x17b   :  { %12 = sbr.rel (!%p10_p2) target bundleno = 2 (0x2), region = 140 }

// kernel: categorical_dueling_cnn_forward.6
= control target key start
LH: loop header
LB: loop body
LE: loop exit
PB: predicated region body
PF: predicated region fallthrough
CT: control target
= control target key end

     0   :  { %s1568_s12 = smov 0   ;;  %s1570_s13 = smov 0   ;;  %s1809_s0 = inlined_call_operand.vmem [shape: bf16[98,576], index: 0, kind: input, shape index: {}]   ;;  %s1810_s1 = inlined_call_operand.vmem [shape: bf16[576,64], index: 1, kind: input, shape index: {}]   ;;  %s1811_s2 = inlined_call_operand.vmem [shape: f32[1,64], index: 2, kind: input, shape index: {}]   ;;  %s1812_s3 = inlined_call_operand.vmem [shape: bf16[98,64], index: 3, kind: output, shape index: {}]  }
   0x1   :  { %s1572_s14 = smov 0  }
   0x2 LB: > { %s1581_s15 = sadd.s32 4294967295, %s1514_s14   ;;  %s1583_s16 = sadd.s32 1, %s1514_s14   ;;  %s1514_s14 = sphi %s1572_s14, %s1819_s14   ;;  %s1510_s13 = sphi %s1570_s13, %s1818_s13   ;;  %s1506_s12 = sphi %s1568_s12, %s1817_s12  }
   0x3   : > { %s85_s17 = ssub.s32 %s1514_s14, %s1583_s16  ;;  %s88_s18 = sadd.s32 1, %s1510_s13 }
   0x4   : > { %p86_p0 = scmp.eq.s32.totalorder %s85_s17, 0  ;;  %p98_p1 = scmp.ne.s32.totalorder %s1510_s13, %s1506_s12 }
   0x5   : > { %p99_p2 = scmp.eq.s32.totalorder %s1581_s15, 1  ;;  %p1101_p3 = scmp.ge.s32.totalorder %s1514_s14, 1 }
   0x6   : > { %s1591_s19 = scalar_select %p86_p0, %s1510_s13, %s88_s18  }
   0x7   : > { %p1593_p4 = por %p99_p2, %p98_p1  ;;  %p149_p5 = scmp.lt.s32.totalorder %s1514_s14, 3 }
   0x9   : > { %p150_p6 = pnand %p1101_p3, %p149_p5 }
   0xa   : > { %v1394_v0 = vld [vmem:[%s1810_s1 + $0x40] sm:$0xff] (!%p150_p6)   ;;  %v1398_v4 = vld [vmem:[%s1810_s1 + $0x48] sm:$0xff] (!%p150_p6)   ;;  %v1402_v8 = vld [vmem:[%s1810_s1 + $0x50] sm:$0xff] (!%p150_p6)   ;;  %s1640_s28 = smul.u32 (!%p150_p6), 7, %s1581_s15  ;;  %vm609_vm0 = vcmask (!%p150_p6), 523264   ;;  %s175_s17 = sand.u32 (!%p150_p6), 1, %s1506_s12  }
   0xb   : > { %153 = sbr.rel (%p150_p6) target bundleno = 365 (0x16d), region = 32  ;;  %v1395_v1 = vld [vmem:[%s1810_s1 + $0xc0] sm:$0xff] (!%p150_p6)   ;;  %1191 = vmatprep.subr.bf16.mxu0 (!%p150_p6), %v1394_v0  ;;  %v1399_v5 = vld [vmem:[%s1810_s1 + $0xc8] sm:$0xff] (!%p150_p6)   ;;  %v1403_v9 = vld [vmem:[%s1810_s1 + $0xd0] sm:$0xff] (!%p150_p6)   ;;  %vm850_vm1 = vcmask (!%p150_p6), 519168  }
   0xc   : > { %v1396_v2 = vld [vmem:[%s1810_s1] sm:$0xff] (!%p150_p6)   ;;  %1231 = vmatprep.subr.bf16.mxu1 (!%p150_p6), %v1395_v1  ;;  %v1400_v6 = vld [vmem:[%s1810_s1 + $0x8] sm:$0xff] (!%p150_p6)   ;;  %v1404_v10 = vld [vmem:[%s1810_s1 + $0x10] sm:$0xff] (!%p150_p6)   ;;  %p184_p7 = scmp.lt.s32.totalorder (!%p150_p6), %s1640_s28, 12  ;;  %s1303_s18 = smul.u32 (!%p150_p6), 28, %s175_s17 }
   0xd   : > { %v1397_v3 = vld [vmem:[%s1810_s1 + $0x80] sm:$0xff] (!%p150_p6)   ;;  %1192 = vmatpush3.bf16.msra.mxu0 (!%p150_p6), %v1396_v2  ;;  %v1401_v7 = vld [vmem:[%s1810_s1 + $0x88] sm:$0xff] (!%p150_p6)   ;;  %v1405_v11 = vld [vmem:[%s1810_s1 + $0x90] sm:$0xff] (!%p150_p6)  }
   0xe   : > { %1232 = vmatpush3.bf16.msra.mxu1 (!%p150_p6), %v1397_v3  ;;  %1193 = vmatprep.subr.bf16.mxu0 (!%p150_p6), %v1398_v4  ;;  %v1406_v12 = vld [vmem:[%s1810_s1 + $0x58] sm:$0xff] (!%p150_p6)   ;;  %v1410_v16 = vld [vmem:[%s1810_s1 + $0x60] sm:$0xff] (!%p150_p6)   ;;  %v1414_v20 = vld [vmem:[%s1810_s1 + $0x68] sm:$0xff] (!%p150_p6)   ;;  %s1737_s12 = scalar_lea.vmem (!%p150_p6), [#allocation2], %s1303_s18  }
   0xf   : > { %1233 = vmatprep.subr.bf16.mxu1 (!%p150_p6), %v1399_v5  ;;  %v1407_v13 = vld [vmem:[%s1810_s1 + $0xd8] sm:$0xff] (!%p150_p6)   ;;  %v1411_v17 = vld [vmem:[%s1810_s1 + $0xe0] sm:$0xff] (!%p150_p6)   ;;  %v1415_v21 = vld [vmem:[%s1810_s1 + $0xe8] sm:$0xff] (!%p150_p6)  }
  0x10   : > { %v1408_v14 = vld [vmem:[%s1810_s1 + $0x18] sm:$0xff] (!%p150_p6)   ;;  %v1412_v18 = vld [vmem:[%s1810_s1 + $0x20] sm:$0xff] (!%p150_p6)   ;;  %v1416_v22 = vld [vmem:[%s1810_s1 + $0x28] sm:$0xff] (!%p150_p6)  }
  0x11   : > { %1194 = vmatpush3.bf16.msra.mxu0 (!%p150_p6), %v1400_v6  ;;  %v1409_v15 = vld [vmem:[%s1810_s1 + $0x98] sm:$0xff] (!%p150_p6)   ;;  %v1413_v19 = vld [vmem:[%s1810_s1 + $0xa0] sm:$0xff] (!%p150_p6)   ;;  %v1417_v23 = vld [vmem:[%s1810_s1 + $0xa8] sm:$0xff] (!%p150_p6)  }
  0x12   : > { %1234 = vmatpush3.bf16.msra.mxu1 %v1401_v7  ;;  %1195 = vmatprep.subr.bf16.mxu0 %v1402_v8  ;;  %s185_s24 = scalar_select %p184_p7, %s1640_s28, 12  ;;  %v1418_v24 = vld [vmem:[%s1810_s1 + $0x70] sm:$0xff]   ;;  %v1422_v28 = vld [vmem:[%s1810_s1 + $0x78] sm:$0xff]   ;;  %v1432_v36 = vld [vmem:[%s1810_s1 + $0x100] sm:$0xff]  }
  0x13   : > { %1235 = vmatprep.subr.bf16.mxu1 %v1403_v9  ;;  %v1419_v25 = vld [vmem:[%s1810_s1 + $0xf0] sm:$0xff]   ;;  %v1423_v29 = vld [vmem:[%s1810_s1 + $0xf8] sm:$0xff]   ;;  %v1439_v39 = vld [vmem:[%s1810_s1 + $0x108] sm:$0xff]   ;;  %s866_s21 = ssub.s32 (%p1593_p4), 13, %s1640_s28  ;;  %s1190_s22 = smul.u32 (%p1593_p4), 28, %s1581_s15 }
  0x14   : > { %s1304_s7 = smul.u32 20, %s185_s24  ;;  %v1420_v26 = vld [vmem:[%s1810_s1 + $0x30] sm:$0xff]   ;;  %v1424_v30 = vld [vmem:[%s1810_s1 + $0x38] sm:$0xff]   ;;  %v1103_v60 = vld [vmem:[%s1811_s2] ss:$0 sm:$0xff]  ;;  %p867_p8 = scmp.lt.s32.totalorder (%p1593_p4), %s866_s21, 7 }
  0x15   : > { %1196 = vmatpush3.bf16.msra.mxu0 %v1404_v10  ;;  %v1421_v27 = vld [vmem:[%s1810_s1 + $0xb0] sm:$0xff]   ;;  %v1425_v31 = vld [vmem:[%s1810_s1 + $0xb8] sm:$0xff]   ;;  %s1760_s25 = scalar_lea.vmem (%p1593_p4), %s1812_s3, %s1190_s22  }
  0x16   : > { %1236 = vmatpush3.bf16.msra.mxu1 %v1405_v11  ;;  %1197 = vmatprep.subr.bf16.mxu0 %v1406_v12  ;;  %s1695_s24 = scalar_lea.vmem %s1809_s0, %s1304_s7  ;;  %v1446_v44 = vld [vmem:[%s1810_s1 + $0x110] sm:$0xff]   ;;  %v1451_v45 = vld [vmem:[%s1810_s1 + $0x118] sm:$0xff]  }
  0x17   : > { %1237 = vmatprep.subr.bf16.mxu1 %v1407_v13  ;;  %v1426_v32 = vld [vmem:[%s1695_s24] ss:$20 sps:$4 sm:$0xff]   ;;  %v1428_v33 = vld [vmem:[%s1695_s24 + $0x4] ss:$20 sps:$4 sm:$0xff]   ;;  %v1429_v34 = vld [vmem:[%s1695_s24 + $0x8] ss:$20 sps:$4 sm:$0xff]  }
  0x18   : > { %v1431_v35 = vld [vmem:[%s1695_s24 + $0xc] ss:$20 sps:$4 sm:$0xff]   ;;  %654 = vmatprep.mubr.bf16.mxu0 %v1428_v33  ;;  %v1435_v38 = vld [vmem:[%s1695_s24 + $0x34] ss:$20 sps:$4 sm:$0xff]   ;;  %v1438_v41 = vld [vmem:[%s1695_s24 + $0x30] ss:$20 sps:$4 sm:$0xff]  }
  0x19   : > { %1198 = vmatpush3.bf16.msra.mxu0 %v1408_v14  ;;  %718 = vmatprep.mubr.bf16.mxu1 %v1431_v35  ;;  %v1433_v37 = vld [vmem:[%s1695_s24 + $0x2c] ss:$20 sps:$4 sm:$0xff]   ;;  %v1437_v40 = vld [vmem:[%s1695_s24 + $0x28] ss:$20 sps:$4 sm:$0xff]   ;;  %v1444_v48 = vld [vmem:[%s1695_s24 + $0x50] ss:$20 sps:$4 sm:$0xff]  }
  0x1a   : > { %1238 = vmatpush3.bf16.msra.mxu1 %v1409_v15  ;;  %1199 = vmatprep.subr.bf16.mxu0 %v1410_v16  ;;  %v1440_v42 = vld [vmem:[%s1695_s24 + $0x54] ss:$20 sps:$4 sm:$0xff]   ;;  %v1442_v43 = vld [vmem:[%s1695_s24 + $0x5c] ss:$20 sps:$4 sm:$0xff]   ;;  %v220_v47 = vld [vmem:[%s1695_s24 + $0x80] sm:$0xff] }
  0x1b   : > { %1239 = vmatprep.subr.bf16.mxu1 %v1411_v17  ;;  %v219_v46 = vld [vmem:[%s1695_s24 + $0x78] sm:$0xff]  ;;  %v1122_v51 = vcombine.high %v220_v47, %v220_v47  ;;  %v1121_v53 = vcombine.low %v220_v47, %v220_v47  ;;  %v1452_v54 = vld [vmem:[%s1695_s24 + $0x10] ss:$20 sps:$4 sm:$0xff]   ;;  %v1453_v55 = vld [vmem:[%s1695_s24 + $0x60] ss:$20 sps:$4 sm:$0xff]  }
  0x1c   : > { %v1445_v49 = vld [vmem:[%s1695_s24 + $0x58] ss:$20 sps:$4 sm:$0xff]   ;;  %v1120_v50 = vcombine.high %v219_v46, %v219_v46  ;;  %v1119_v52 = vcombine.low %v219_v46, %v219_v46  ;;  %v1455_v57 = vld [vmem:[%s1695_s24 + $0x88] ss:$0 sps:$4 sm:$0xff]  }
  0x1d   : > { %1200 = vmatpush3.bf16.msra.mxu0 %v1412_v18  ;;  %v1454_v56 = vld [vmem:[%s1695_s24 + $0x38] ss:$20 sps:$4 sm:$0xff]  }
  0x1e   : > { %1240 = vmatpush3.bf16.msra.mxu1 %v1413_v19  ;;  %1201 = vmatprep.subr.bf16.mxu0 %v1414_v20 }
  0x1f   : > { %1241 = vmatprep.subr.bf16.mxu1 %v1415_v21 }
  0x21   : > { %1202 = vmatpush3.bf16.msra.mxu0 %v1416_v22 }
  0x22   : > { %1242 = vmatpush3.bf16.msra.mxu1 %v1417_v23  ;;  %1203 = vmatprep.subr.bf16.mxu0 %v1418_v24 }
  0x23   : > { %1243 = vmatprep.subr.bf16.mxu1 %v1419_v25 }
  0x25   : > { %1204 = vmatpush3.bf16.msra.mxu0 %v1420_v26 }
  0x26   : > { %1244 = vmatpush3.bf16.msra.mxu1 %v1421_v27  ;;  %1205 = vmatprep.subr.bf16.mxu0 %v1422_v28 }
  0x27   : > { %1245 = vmatprep.subr.bf16.mxu1 %v1423_v29 }
  0x29   : > { %1206 = vmatpush3.bf16.msra.mxu0 %v1424_v30 }
  0x2a   : > { %1246 = vmatpush3.bf16.msra.mxu1 %v1425_v31  ;;  %1279 = vmatprep.subr.bf16.mxu0 %v1432_v36 }
  0x2b   : > { %1295 = vmatprep.subr.bf16.mxu1 %v1432_v36 }
  0x2c   : > { %655 = vmatmul.mubr.bf16.vlgmr.msra.gmra.mrb[0].mxu0 %v1426_v32 }
  0x2d   : > { %719 = vmatmul.mubr.bf16.vlgmr.msra.gmra.mrb[0].mxu1 %v1429_v34  ;;  %1280 = vmatpush3.bf16.msra.mxu0 %v1432_v36 }
  0x2e   : > { %1299 = vmatpush3.bf16.msra.mxu1 %v1432_v36  ;;  %662 = vmatprep.mubr.bf16.mxu0 %v1433_v37 }
  0x2f   : > { %726 = vmatprep.mubr.bf16.mxu1 %v1435_v38  ;;  %1281 = vmatprep.subr.bf16.mxu0 %v1439_v39 }
  0x30   : > { %1296 = vmatprep.subr.bf16.mxu1 %v1439_v39 }
  0x31   : > { %1282 = vmatpush3.bf16.msra.mxu0 %v1439_v39 }
  0x32   : > { %1300 = vmatpush3.bf16.msra.mxu1 %v1439_v39  ;;  %1283 = vmatprep.subr.bf16.mxu0 %v1446_v44 }
  0x33   : > { %1297 = vmatprep.subr.bf16.mxu1 %v1446_v44 }
  0x34   : > { %663 = vmatmul.mubr.bf16.gmra.mrb[4].mxu0 %v1437_v40 }
  0x35   : > { %727 = vmatmul.mubr.bf16.gmra.mrb[4].mxu1 %v1438_v41  ;;  %670 = vmatprep.mubr.bf16.mxu0 %v1440_v42 }
  0x36   : > { %734 = vmatprep.mubr.bf16.mxu1 %v1442_v43  ;;  %1284 = vmatpush3.bf16.msra.mxu0 %v1446_v44 }
  0x37   : > { %1301 = vmatpush3.bf16.msra.mxu1 %v1446_v44  ;;  %1285 = vmatprep.subr.bf16.mxu0 %v1451_v45 }
  0x38   : > { %1298 = vmatprep.subr.bf16.mxu1 %v1451_v45 }
  0x3a   : > { %1286 = vmatpush3.bf16.msra.mxu0 %v1451_v45 }
  0x3b   : > { %1302 = vmatpush3.bf16.msra.mxu1 %v1451_v45 }
  0x3c   : > { %671 = vmatmul.mubr.bf16.gmra.mrb[8].mxu0 %v1444_v48 }
  0x3d   : > { %735 = vmatmul.mubr.bf16.gmra.mrb[8].mxu1 %v1445_v49  ;;  %678 = vmatprep.mubr.bf16.mxu0 %v1120_v50 }
  0x3e   : > { %742 = vmatprep.mubr.bf16.mxu1 %v1122_v51 }
  0x44   : > { %679 = vmatmul.mubr.bf16.gmra.mrb[12].mxu0 %v1119_v52 }
  0x45   : > { %743 = vmatmul.mubr.bf16.gmra.mrb[12].mxu1 %v1121_v53  ;;  %1287 = vmatprep.mubr.msk.bf16.mxu0 %vm609_vm0, %v1452_v54 }
  0x46   : > { %1291 = vmatprep.mubr.msk.bf16.mxu1 %vm609_vm0, %v1453_v55 }
  0x4c   : > { %1288 = vmatmul.mubr.msk.bf16.vlgmr.msra.gmra.mrb[16].mxu0 %vm609_vm0, %v1454_v56 }
  0x4d   : > { %1292 = vmatmul.mubr.msk.bf16.vlgmr.msra.gmra.mrb[16].mxu1 %vm609_vm0, %v1455_v57 }
  0xff   : > { %v1207_v58 = vpop.f32.mrb[0].mxu0 }
 0x100   : > { %v1247_v59 = vpop.f32.mrb[0].mxu1  ;;  %v1208_v61 = vpop.f32.mrb[1].mxu0 }
 0x101   : > { %v1209_v62 = vadd.f32 %v1208_v61, %v1207_v58  ;;  %v1248_v63 = vpop.f32.mrb[1].mxu1  ;;  %v1210_v0 = vpop.f32.mrb[2].mxu0 }
 0x102   : > { %v1249_v1 = vadd.f32 %v1248_v63, %v1247_v59  ;;  %v1250_v2 = vpop.f32.mrb[2].mxu1  ;;  %v1211_v3 = vpop.f32.mrb[3].mxu0 }
 0x103   : > { %v657_v4 = vadd.f32 %v1209_v62, %v1103_v60  ;;  %v1212_v5 = vadd.f32 %v1211_v3, %v1210_v0  ;;  %v1251_v6 = vpop.f32.mrb[3].mxu1 }
 0x104   : > { %v1252_v7 = vadd.f32 %v1251_v6, %v1250_v2 }
 0x105   : > { %v660_v8 = vadd.f32 %v1212_v5, %v1103_v60  ;;  %v721_v9 = vadd.f32 %v1249_v1, %v657_v4 }
 0x107   : > { %v1213_v10 = vpop.f32.mrb[4].mxu0  ;;  %v724_v11 = vadd.f32 %v1252_v7, %v660_v8 }
 0x108   : > { %v1253_v12 = vpop.f32.mrb[4].mxu1  ;;  %v1214_v13 = vpop.f32.mrb[5].mxu0 }
 0x109   : > { %v1215_v14 = vadd.f32 %v1214_v13, %v1213_v10  ;;  %v1254_v15 = vpop.f32.mrb[5].mxu1  ;;  %v1216_v16 = vpop.f32.mrb[6].mxu0 }
 0x10a   : > { %v1255_v17 = vadd.f32 %v1254_v15, %v1253_v12  ;;  %v1256_v18 = vpop.f32.mrb[6].mxu1  ;;  %v1217_v19 = vpop.f32.mrb[7].mxu0 }
 0x10b   : > { %v665_v20 = vadd.f32 %v1215_v14, %v1103_v60  ;;  %v1218_v21 = vadd.f32 %v1217_v19, %v1216_v16  ;;  %v1257_v22 = vpop.f32.mrb[7].mxu1 }
 0x10c   : > { %v1258_v23 = vadd.f32 %v1257_v22, %v1256_v18 }
 0x10d   : > { %v668_v24 = vadd.f32 %v1218_v21, %v1103_v60  ;;  %v729_v25 = vadd.f32 %v1255_v17, %v665_v20 }
 0x10f   : > { %v1219_v26 = vpop.f32.mrb[8].mxu0  ;;  %v732_v27 = vadd.f32 %v1258_v23, %v668_v24 }
 0x110   : > { %v1259_v28 = vpop.f32.mrb[8].mxu1  ;;  %v1220_v29 = vpop.f32.mrb[9].mxu0 }
 0x111   : > { %v1221_v30 = vadd.f32 %v1220_v29, %v1219_v26  ;;  %v1260_v31 = vpop.f32.mrb[9].mxu1  ;;  %v1222_v32 = vpop.f32.mrb[10].mxu0 }
 0x112   : > { %v1261_v33 = vadd.f32 %v1260_v31, %v1259_v28  ;;  %v1262_v34 = vpop.f32.mrb[10].mxu1  ;;  %v1223_v35 = vpop.f32.mrb[11].mxu0 }
 0x113   : > { %v673_v36 = vadd.f32 %v1221_v30, %v1103_v60  ;;  %v1224_v37 = vadd.f32 %v1223_v35, %v1222_v32  ;;  %v1263_v38 = vpop.f32.mrb[11].mxu1 }
 0x114   : > { %v1264_v39 = vadd.f32 %v1263_v38, %v1262_v34 }
 0x115   : > { %v676_v40 = vadd.f32 %v1224_v37, %v1103_v60  ;;  %v737_v41 = vadd.f32 %v1261_v33, %v673_v36 }
 0x117   : > { %v1225_v42 = vpop.f32.mrb[12].mxu0  ;;  %v740_v43 = vadd.f32 %v1264_v39, %v676_v40 }
 0x118   : > { %v1265_v44 = vpop.f32.mrb[12].mxu1  ;;  %v1226_v45 = vpop.f32.mrb[13].mxu0 }
 0x119   : > { %v1227_v46 = vadd.f32 %v1226_v45, %v1225_v42  ;;  %v1266_v47 = vpop.f32.mrb[13].mxu1  ;;  %v1228_v48 = vpop.f32.mrb[14].mxu0 }
 0x11a   : > { %v1267_v49 = vadd.f32 %v1266_v47, %v1265_v44  ;;  %v1268_v50 = vpop.f32.mrb[14].mxu1  ;;  %v1229_v51 = vpop.f32.mrb[15].mxu0 }
 0x11b   : > { %v681_v52 = vadd.f32 %v1227_v46, %v1103_v60  ;;  %v1269_v53 = vpop.f32.mrb[15].mxu1 }
 0x11d   : > { %v745_v54 = vadd.f32 %v1267_v49, %v681_v52 }
 0x11f   : > { %v1289_v55 = vpop.f32.mrb[16].mxu0 }
 0x120   : > { %v793_v56 = vadd.f32 %v1289_v55, %v729_v25  ;;  %v1293_v57 = vpop.f32.mrb[16].mxu1  ;;  %v784_v58 = vpop.f32.mrb[17].mxu0 }
 0x121   : > { %v809_v59 = vadd.f32 %v1293_v57, %v745_v54  ;;  %v785_v61 = vadd.f32 %v784_v58, %v721_v9  ;;  %v800_v62 = vpop.f32.mrb[17].mxu1  ;;  %v1290_v63 = vpop.f32.mrb[18].mxu0 }
 0x122   : > { %v816_v0 = vmax.f32 %v793_v56, 0.0  ;;  %v801_v1 = vadd.f32 %v800_v62, %v737_v41  ;;  %v796_v2 = vadd.f32 %v1290_v63, %v732_v27  ;;  %v1294_v3 = vpop.f32.mrb[18].mxu1  ;;  %v787_v4 = vpop.f32.mrb[19].mxu0 }
 0x123   : > { %v820_v5 = vmax.f32 %v809_v59, 0.0  ;;  %v814_v60 = vmax.f32 %v785_v61, 0.0  ;;  %v788_v6 = vadd.f32 %v787_v4, %v724_v11  ;;  %v803_v7 = vpop.f32.mrb[19].mxu1 }
 0x124   : > { %v1185_v8 = vpack.c.bf16 %v816_v0, %v816_v0  ;;  %v818_v10 = vmax.f32 %v801_v1, 0.0  ;;  %v817_v12 = vmax.f32 %v796_v2, 0.0  ;;  %v804_v13 = vadd.f32 %v803_v7, %v740_v43  ;;  %864 = sbr.rel (!%p1593_p4) target bundleno = 365 (0x16d), region = 36 }
 0x125   : > { %v1189_v14 = vpack.c.bf16 %v820_v5, %v820_v5  ;;  %v1183_v15 = vpack.c.bf16 %v814_v60, %v814_v60  ;;  %v815_v16 = vmax.f32 %v788_v6, 0.0 }
 0x126   : > { %853 = vst.msk [vmem:[%s1737_s12 + $0x8] sm:$0xf] %vm850_vm1, %v1185_v8  ;;  %v1187_v9 = vpack.c.bf16 %v818_v10, %v818_v10  ;;  %v1186_v11 = vpack.c.bf16 %v817_v12, %v817_v12  ;;  %v819_v17 = vmax.f32 %v804_v13, 0.0 }
 0x127   : > { %857 = vst.msk [vmem:[%s1737_s12 + $0x18] sm:$0xf] %vm850_vm1, %v1189_v14  ;;  %851 = vst.msk [vmem:[%s1737_s12] sm:$0xf] %vm850_vm1, %v1183_v15  ;;  %v1184_v18 = vpack.c.bf16 %v815_v16, %v815_v16 }
 0x128   : > { %855 = vst.msk [vmem:[%s1737_s12 + $0x10] sm:$0xf] %vm850_vm1, %v1187_v9  ;;  %854 = vst.msk [vmem:[%s1737_s12 + $0xc] sm:$0xf] %vm850_vm1, %v1186_v11  ;;  %v1188_v19 = vpack.c.bf16 %v819_v17, %v819_v17 }
 0x129   : > { %852 = vst.msk [vmem:[%s1737_s12 + $0x4] sm:$0xf] %vm850_vm1, %v1184_v18 }
 0x12a   : > { %856 = vst.msk [vmem:[%s1737_s12 + $0x14] sm:$0xf] %vm850_vm1, %v1188_v19 }
 0x12b   : > { %s1821_s21 = smov (!%p867_p8, %s866_s21), 7 }
 0x12c   : > { %s1171_s26 = sshll.u32 %s1821_s21, 6 }
 0x12d   : > { %p1174_p9 = scmp.eq.s32.totalorder %s1171_s26, 0 }
 0x12e   : > { %1456 = sdivrem.u32 (!%p1174_p9), %s1821_s21, 7 }
 0x12f   : > { %875 = sbr.rel (%p1174_p9) target bundleno = 365 (0x16d), region = 40 }
 0x137   : > { %s1766_s20 = spop.drf %1456 }
 0x138   : > { %p1175_p10 = scmp.le.s32.totalorder %s1766_s20, 0 }
 0x139   : > { %s1814_s15 = smov (!%p1175_p10), %s1760_s25  ;;  %s1815_s28 = smov (!%p1175_p10), %s1737_s12 }
 0x13a   : > { %1054 = sbr.rel (%p1175_p10) target bundleno = 336 (0x150), region = 112  ;;  %s1775_s27 = smov (!%p1175_p10), 0  }
 0x13b   : > { %s1777_s29 = smov (!%p1175_p10), 0  }
 0x141 LB: >> { %v892_v20 = vld [vmem:[%s1522_s28] sm:$0xf]  ;;  %v894_v21 = vld [vmem:[%s1522_s28 + $0x4] sm:$0xf]  ;;  %v896_v22 = vld [vmem:[%s1522_s28 + $0x8] sm:$0xf]  ;;  %s1530_s29 = sphi %s1777_s29, %s886_s29   ;;  %s1526_s27 = sphi %s1775_s27, %s1816_s27   ;;  %s1522_s28 = sphi %s1815_s28, %s911_s28   ;;  %s1518_s15 = sphi %s1814_s15, %s912_s15  }
 0x142   : >> { %893 = vst [vmem:[%s1518_s15] sm:$0xf] %v892_v20  ;;  %895 = vst [vmem:[%s1518_s15 + $0x4] sm:$0xf] %v894_v21  ;;  %v898_v23 = vld [vmem:[%s1522_s28 + $0xc] sm:$0xf]  ;;  %s906_s30 = sadd.s32 1, %s1526_s27 }
 0x143   : >> { %897 = vst [vmem:[%s1518_s15 + $0x8] sm:$0xf] %v896_v22  ;;  %v900_v24 = vld [vmem:[%s1522_s28 + $0x10] sm:$0xf]  ;;  %v902_v25 = vld [vmem:[%s1522_s28 + $0x14] sm:$0xf]  ;;  %p907_p11 = scmp.ge.s32.totalorder %s906_s30, %s1766_s20 }
 0x144   : >> { %899 = vst [vmem:[%s1518_s15 + $0xc] sm:$0xf] %v898_v23  ;;  %901 = vst [vmem:[%s1518_s15 + $0x10] sm:$0xf] %v900_v24  ;;  %v904_v26 = vld [vmem:[%s1522_s28 + $0x18] sm:$0xf] }
 0x145   : >> { %903 = vst [vmem:[%s1518_s15 + $0x14] sm:$0xf] %v902_v25  ;;  %905 = vst [vmem:[%s1518_s15 + $0x18] sm:$0xf] %v904_v26  ;;  %s1823_s30 = smov (%p907_p11, %s906_s30), 0  ;;  %s886_s29 = sadd.s32 1, %s1530_s29  }
 0x146   : >> { %s909_s4 = smul.u32 28, %s1823_s30  ;;  %p885_p12 = scmp.ge.s32.totalorder %s886_s29, %s1766_s20 }
 0x147   : >> { %s1816_s27 = smov %s1823_s30 }
 0x148   : >> { %s911_s28 = scalar_lea.vmem %s1737_s12, %s909_s4 [#allocation2]   ;;  %s912_s15 = scalar_lea.vmem %s1760_s25, %s909_s4  }
 0x149   : > { %888 = sbr.rel (!%p885_p12) target bundleno = 321 (0x141), region = 118 }
 0x150 PF: > { %1458 = sdivrem.u32 %s1821_s21, 7 }
 0x151   : > { %s1176_s5 = smul.u32 28, %s1766_s20 }
 0x153   : > { %s917_s6 = scalar_lea.vmem %s1737_s12, %s1176_s5 [#allocation2]   ;;  %s919_s7 = scalar_lea.vmem %s1760_s25, %s1176_s5  }
 0x159   : > { %s1459_s8 = spop.drf %1458 }
 0x15a   : > { %p1178_p13 = scmp.le.s32.totalorder %s1459_s8, 0 }
 0x15b   : > { %s1532_s9 = smov (!%p1178_p13), %s919_s7   ;;  %s1536_s10 = smov (!%p1178_p13), %s917_s6  }
 0x15c   : > { %1068 = sbr.rel (%p1178_p13) target bundleno = 365 (0x16d), region = 123  ;;  %s1540_s11 = smov (!%p1178_p13), 0  }
 0x15d   : > { %s1544_s14 = smov (!%p1178_p13), 0  }
 0x163 LB: >> { %v929_v27 = vld [vmem:[%s1538_s10] sm:$0xf]  ;;  %s931_s17 = sadd.s32 1, %s1542_s11  ;;  %s923_s14 = sadd.s32 1, %s1546_s14   ;;  %s1546_s14 = sphi %s1544_s14, %s923_s14   ;;  %s1542_s11 = sphi %s1540_s11, %s1541_s11   ;;  %s1538_s10 = sphi %s1536_s10, %s936_s10   ;;  %s1534_s9 = sphi %s1532_s9, %s937_s9  }
 0x164   : >> { %930 = vst [vmem:[%s1534_s9] sm:$0xf] %v929_v27  ;;  %p932_p0 = scmp.ge.s32.totalorder %s931_s17, %s1459_s8  ;;  %p922_p1 = scmp.ge.s32.totalorder %s923_s14, %s1459_s8 }
 0x166   : >> { %s1825_s17 = smov (%p932_p0, %s931_s17), 0  ;;  %925 = sbr.rel (!%p922_p1) target bundleno = 355 (0x163), region = 129 }
 0x167   : >> { %s1179_s18 = sshll.u32 %s1825_s17, 2  ;;  %s1541_s11 = smov %s1825_s17  }
 0x168   : >> { %s936_s10 = scalar_lea.vmem %s917_s6, %s1179_s18 [#allocation2]   ;;  %s937_s9 = scalar_lea.vmem %s919_s7, %s1179_s18  }
 0x16d PF: > { %p10_p2 = scmp.ge.s32.totalorder %s1583_s16, 4   ;;  %s1817_s12 = smov %s1510_s13 }
 0x16e   : > { %s1818_s13 = smov %s1591_s19  ;;  %s1819_s14 = smov %s1583_s16 }
 0x16f   :  { %12 = sbr.rel (!%p10_p2) target bundleno = 2 (0x2), region = 140 }

// kernel: categorical_dueling_cnn_forward.7
= control target key start
LH: loop header
LB: loop body
LE: loop exit
PB: predicated region body
PF: predicated region fallthrough
CT: control target
= control target key end

     0   :  { %11 = vsyncpa [#allocation5], 0  ;;  %s7852_s21 = smov 0   ;;  %s7854_s22 = smov 0   ;;  %s9478_s0 = inlined_call_operand.vmem [shape: bf16[2,3136], index: 0, kind: input, shape index: {}]   ;;  %s9479_s1 = inlined_call_operand.vmem [shape: bf16[3136,1024], index: 1, kind: input, shape index: {}]   ;;  %s9480_s2 = inlined_call_operand.vmem [shape: f32[1,1024], index: 2, kind: input, shape index: {}]   ;;  %s9481_s3 = inlined_call_operand.vmem [shape: bf16[1024,896], index: 3, kind: input, shape index: {}]   ;;  %s9482_s4 = inlined_call_operand.vmem [shape: f32[1,896], index: 4, kind: input, shape index: {}]   ;;  %s9483_s5 = inlined_call_operand.vmem [shape: f32[1,128], index: 5, kind: input, shape index: {}]   ;;  %s9484_s6 = inlined_call_operand.hbm [shape: f32[2,128], index: 6, kind: output, shape index: {}]  }
   0x1   :  { %s7856_s23 = smov 0   ;;  %s7858_s24 = smov 0  }
   0x2   :  { %s7860_s25 = smov 0  }
   0x3 LB: > { %s6310_s26 = sadd.s32 4294967295, %s7809_s25   ;;  %s26_s27 = sadd.s32 1, %s7805_s24  ;;  %s7809_s25 = sphi %s7860_s25, %s17_s25   ;;  %s7805_s24 = sphi %s7858_s24, %s9488_s24   ;;  %s7801_s23 = sphi %s7856_s23, %s9487_s23   ;;  %s7797_s22 = sphi %s7854_s22, %s9486_s22   ;;  %s7793_s21 = sphi %s7852_s21, %s9485_s21  }
   0x4   : > { %p27_p0 = scmp.ge.s32.totalorder %s26_s27, 4  ;;  %p69_p1 = scmp.ne.s32.totalorder %s7797_s22, %s7793_s21 }
   0x5   : > { %p70_p2 = scmp.eq.s32.totalorder %s7809_s25, 0  ;;  %s62_s29 = sadd.s32 1, %s7797_s22 }
   0x6   : > { %s9490_s27 = smov (%p27_p0, %s26_s27), 0  ;;  %p6313_p5 = scmp.ge.s32.totalorder %s7809_s25, 4 }
   0x7   : > { %p71_p3 = por %p70_p2, %p69_p1  ;;  %s59_s28 = ssub.s32 %s7805_s24, %s9490_s27 }
   0x8   : > { %p60_p4 = scmp.eq.s32.totalorder %s59_s28, 0  ;;  %236 = sbr.rel (%p6313_p5) target bundleno = 411 (0x19b), region = 28 }
   0xa   : > { %s7888_s30 = scalar_select %p60_p4, %s7797_s22, %s62_s29  }
   0xf   : > { %239 = sbr.rel (!%p71_p3) target bundleno = 411 (0x19b), region = 32  ;;  %s241_s7 = sand.u32 (%p71_p3), 1, %s7797_s22  }
  0x10   : > { %s6832_s8 = sshll.u32 (%p71_p3), %s7805_s24, 3  ;;  %s6901_s9 = smul.u32 (%p71_p3), 3136, %s241_s7 }
  0x11   : > { %s7896_s12 = scalar_lea.vmem (%p71_p3), %s9479_s1, %s6832_s8 }
  0x12   : > { %v1056_v0 = vld [vmem:[%s7896_s12] sm:$0xff] (%p71_p3)  ;;  %s7904_s13 = scalar_lea.vmem (%p71_p3), [#allocation3], %s6901_s9 }
  0x13   : > { %v1058_v1 = vld [vmem:[%s7896_s12 + $0x20] sm:$0xff] (%p71_p3)  ;;  %1057 = vst [vmem:[%s7904_s13] sm:$0xff] (%p71_p3), %v1056_v0 }
  0x14   : > { %v1060_v2 = vld [vmem:[%s7896_s12 + $0x40] sm:$0xff] (%p71_p3)  ;;  %1059 = vst [vmem:[%s7904_s13 + $0x8] sm:$0xff] (%p71_p3), %v1058_v1 }
  0x15   : > { %v1062_v3 = vld [vmem:[%s7896_s12 + $0x60] sm:$0xff] (%p71_p3)  ;;  %1061 = vst [vmem:[%s7904_s13 + $0x10] sm:$0xff] (%p71_p3), %v1060_v2 }
  0x16   : > { %v1064_v4 = vld [vmem:[%s7896_s12 + $0x80] sm:$0xff]  ;;  %1063 = vst [vmem:[%s7904_s13 + $0x18] sm:$0xff] %v1062_v3 }
  0x17   : > { %v1066_v5 = vld [vmem:[%s7896_s12 + $0xa0] sm:$0xff]  ;;  %1065 = vst [vmem:[%s7904_s13 + $0x20] sm:$0xff] %v1064_v4 }
  0x18   : > { %1067 = vst [vmem:[%s7904_s13 + $0x28] sm:$0xff] %v1066_v5  ;;  %v1068_v6 = vld [vmem:[%s7896_s12 + $0xc0] sm:$0xff] }
  0x19   : > { %v1070_v7 = vld [vmem:[%s7896_s12 + $0xe0] sm:$0xff]  ;;  %1069 = vst [vmem:[%s7904_s13 + $0x30] sm:$0xff] %v1068_v6 }
  0x1a   : > { %v1072_v8 = vld [vmem:[%s7896_s12 + $0x100] sm:$0xff]  ;;  %1071 = vst [vmem:[%s7904_s13 + $0x38] sm:$0xff] %v1070_v7 }
  0x1b   : > { %1073 = vst [vmem:[%s7904_s13 + $0x40] sm:$0xff] %v1072_v8  ;;  %v1074_v9 = vld [vmem:[%s7896_s12 + $0x120] sm:$0xff] }
  0x1c   : > { %v1076_v10 = vld [vmem:[%s7896_s12 + $0x140] sm:$0xff]  ;;  %1075 = vst [vmem:[%s7904_s13 + $0x48] sm:$0xff] %v1074_v9 }
  0x1d   : > { %v1078_v11 = vld [vmem:[%s7896_s12 + $0x160] sm:$0xff]  ;;  %1077 = vst [vmem:[%s7904_s13 + $0x50] sm:$0xff] %v1076_v10 }
  0x1e   : > { %1079 = vst [vmem:[%s7904_s13 + $0x58] sm:$0xff] %v1078_v11  ;;  %v1080_v12 = vld [vmem:[%s7896_s12 + $0x180] sm:$0xff] }
  0x1f   : > { %v1082_v13 = vld [vmem:[%s7896_s12 + $0x1a0] sm:$0xff]  ;;  %1081 = vst [vmem:[%s7904_s13 + $0x60] sm:$0xff] %v1080_v12 }
  0x20   : > { %v1084_v14 = vld [vmem:[%s7896_s12 + $0x1c0] sm:$0xff]  ;;  %1083 = vst [vmem:[%s7904_s13 + $0x68] sm:$0xff] %v1082_v13 }
  0x21   : > { %1085 = vst [vmem:[%s7904_s13 + $0x70] sm:$0xff] %v1084_v14  ;;  %v1086_v15 = vld [vmem:[%s7896_s12 + $0x1e0] sm:$0xff] }
  0x22   : > { %v1088_v16 = vld [vmem:[%s7896_s12 + $0x200] sm:$0xff]  ;;  %1087 = vst [vmem:[%s7904_s13 + $0x78] sm:$0xff] %v1086_v15 }
  0x23   : > { %v1090_v17 = vld [vmem:[%s7896_s12 + $0x220] sm:$0xff]  ;;  %1089 = vst [vmem:[%s7904_s13 + $0x80] sm:$0xff] %v1088_v16 }
  0x24   : > { %1091 = vst [vmem:[%s7904_s13 + $0x88] sm:$0xff] %v1090_v17  ;;  %v1092_v18 = vld [vmem:[%s7896_s12 + $0x240] sm:$0xff] }
  0x25   : > { %v1094_v19 = vld [vmem:[%s7896_s12 + $0x260] sm:$0xff]  ;;  %1093 = vst [vmem:[%s7904_s13 + $0x90] sm:$0xff] %v1092_v18 }
  0x26   : > { %v1096_v20 = vld [vmem:[%s7896_s12 + $0x280] sm:$0xff]  ;;  %1095 = vst [vmem:[%s7904_s13 + $0x98] sm:$0xff] %v1094_v19 }
  0x27   : > { %1097 = vst [vmem:[%s7904_s13 + $0xa0] sm:$0xff] %v1096_v20  ;;  %v1098_v21 = vld [vmem:[%s7896_s12 + $0x2a0] sm:$0xff] }
  0x28   : > { %v1100_v22 = vld [vmem:[%s7896_s12 + $0x2c0] sm:$0xff]  ;;  %1099 = vst [vmem:[%s7904_s13 + $0xa8] sm:$0xff] %v1098_v21 }
  0x29   : > { %v1102_v23 = vld [vmem:[%s7896_s12 + $0x2e0] sm:$0xff]  ;;  %1101 = vst [vmem:[%s7904_s13 + $0xb0] sm:$0xff] %v1100_v22 }
  0x2a   : > { %1103 = vst [vmem:[%s7904_s13 + $0xb8] sm:$0xff] %v1102_v23  ;;  %v1104_v24 = vld [vmem:[%s7896_s12 + $0x300] sm:$0xff] }
  0x2b   : > { %v1106_v25 = vld [vmem:[%s7896_s12 + $0x320] sm:$0xff]  ;;  %1105 = vst [vmem:[%s7904_s13 + $0xc0] sm:$0xff] %v1104_v24 }
  0x2c   : > { %v1108_v26 = vld [vmem:[%s7896_s12 + $0x340] sm:$0xff]  ;;  %1107 = vst [vmem:[%s7904_s13 + $0xc8] sm:$0xff] %v1106_v25 }
  0x2d   : > { %1109 = vst [vmem:[%s7904_s13 + $0xd0] sm:$0xff] %v1108_v26  ;;  %v1110_v27 = vld [vmem:[%s7896_s12 + $0x360] sm:$0xff] }
  0x2e   : > { %v1112_v28 = vld [vmem:[%s7896_s12 + $0x380] sm:$0xff]  ;;  %1111 = vst [vmem:[%s7904_s13 + $0xd8] sm:$0xff] %v1110_v27 }
  0x2f   : > { %v1114_v29 = vld [vmem:[%s7896_s12 + $0x3a0] sm:$0xff]  ;;  %1113 = vst [vmem:[%s7904_s13 + $0xe0] sm:$0xff] %v1112_v28 }
  0x30   : > { %1115 = vst [vmem:[%s7904_s13 + $0xe8] sm:$0xff] %v1114_v29  ;;  %v1116_v30 = vld [vmem:[%s7896_s12 + $0x3c0] sm:$0xff] }
  0x31   : > { %v1118_v31 = vld [vmem:[%s7896_s12 + $0x3e0] sm:$0xff]  ;;  %1117 = vst [vmem:[%s7904_s13 + $0xf0] sm:$0xff] %v1116_v30 }
  0x32   : > { %v1120_v32 = vld [vmem:[%s7896_s12 + $0x400] sm:$0xff]  ;;  %1119 = vst [vmem:[%s7904_s13 + $0xf8] sm:$0xff] %v1118_v31 }
  0x33   : > { %1121 = vst [vmem:[%s7904_s13 + $0x100] sm:$0xff] %v1120_v32  ;;  %v1122_v33 = vld [vmem:[%s7896_s12 + $0x420] sm:$0xff] }
  0x34   : > { %v1124_v34 = vld [vmem:[%s7896_s12 + $0x440] sm:$0xff]  ;;  %1123 = vst [vmem:[%s7904_s13 + $0x108] sm:$0xff] %v1122_v33 }
  0x35   : > { %v1126_v35 = vld [vmem:[%s7896_s12 + $0x460] sm:$0xff]  ;;  %1125 = vst [vmem:[%s7904_s13 + $0x110] sm:$0xff] %v1124_v34 }
  0x36   : > { %1127 = vst [vmem:[%s7904_s13 + $0x118] sm:$0xff] %v1126_v35  ;;  %v1128_v36 = vld [vmem:[%s7896_s12 + $0x480] sm:$0xff] }
  0x37   : > { %v1130_v37 = vld [vmem:[%s7896_s12 + $0x4a0] sm:$0xff]  ;;  %1129 = vst [vmem:[%s7904_s13 + $0x120] sm:$0xff] %v1128_v36 }
  0x38   : > { %v1132_v38 = vld [vmem:[%s7896_s12 + $0x4c0] sm:$0xff]  ;;  %1131 = vst [vmem:[%s7904_s13 + $0x128] sm:$0xff] %v1130_v37 }
  0x39   : > { %1133 = vst [vmem:[%s7904_s13 + $0x130] sm:$0xff] %v1132_v38  ;;  %v1134_v39 = vld [vmem:[%s7896_s12 + $0x4e0] sm:$0xff] }
  0x3a   : > { %v1136_v40 = vld [vmem:[%s7896_s12 + $0x500] sm:$0xff]  ;;  %1135 = vst [vmem:[%s7904_s13 + $0x138] sm:$0xff] %v1134_v39 }
  0x3b   : > { %v1138_v41 = vld [vmem:[%s7896_s12 + $0x520] sm:$0xff]  ;;  %1137 = vst [vmem:[%s7904_s13 + $0x140] sm:$0xff] %v1136_v40 }
  0x3c   : > { %1139 = vst [vmem:[%s7904_s13 + $0x148] sm:$0xff] %v1138_v41  ;;  %v1140_v42 = vld [vmem:[%s7896_s12 + $0x540] sm:$0xff] }
  0x3d   : > { %v1142_v43 = vld [vmem:[%s7896_s12 + $0x560] sm:$0xff]  ;;  %1141 = vst [vmem:[%s7904_s13 + $0x150] sm:$0xff] %v1140_v42 }
  0x3e   : > { %v1144_v44 = vld [vmem:[%s7896_s12 + $0x580] sm:$0xff]  ;;  %1143 = vst [vmem:[%s7904_s13 + $0x158] sm:$0xff] %v1142_v43 }
  0x3f   : > { %1145 = vst [vmem:[%s7904_s13 + $0x160] sm:$0xff] %v1144_v44  ;;  %v1146_v45 = vld [vmem:[%s7896_s12 + $0x5a0] sm:$0xff] }
  0x40   : > { %v1148_v46 = vld [vmem:[%s7896_s12 + $0x5c0] sm:$0xff]  ;;  %1147 = vst [vmem:[%s7904_s13 + $0x168] sm:$0xff] %v1146_v45 }
  0x41   : > { %v1150_v47 = vld [vmem:[%s7896_s12 + $0x5e0] sm:$0xff]  ;;  %1149 = vst [vmem:[%s7904_s13 + $0x170] sm:$0xff] %v1148_v46 }
  0x42   : > { %1151 = vst [vmem:[%s7904_s13 + $0x178] sm:$0xff] %v1150_v47  ;;  %v1152_v48 = vld [vmem:[%s7896_s12 + $0x600] sm:$0xff] }
  0x43   : > { %v1154_v49 = vld [vmem:[%s7896_s12 + $0x620] sm:$0xff]  ;;  %1153 = vst [vmem:[%s7904_s13 + $0x180] sm:$0xff] %v1152_v48 }
  0x44   : > { %v1156_v50 = vld [vmem:[%s7896_s12 + $0x640] sm:$0xff]  ;;  %1155 = vst [vmem:[%s7904_s13 + $0x188] sm:$0xff] %v1154_v49 }
  0x45   : > { %1157 = vst [vmem:[%s7904_s13 + $0x190] sm:$0xff] %v1156_v50  ;;  %v1158_v51 = vld [vmem:[%s7896_s12 + $0x660] sm:$0xff] }
  0x46   : > { %v1160_v52 = vld [vmem:[%s7896_s12 + $0x680] sm:$0xff]  ;;  %1159 = vst [vmem:[%s7904_s13 + $0x198] sm:$0xff] %v1158_v51 }
  0x47   : > { %v1162_v53 = vld [vmem:[%s7896_s12 + $0x6a0] sm:$0xff]  ;;  %1161 = vst [vmem:[%s7904_s13 + $0x1a0] sm:$0xff] %v1160_v52 }
  0x48   : > { %1163 = vst [vmem:[%s7904_s13 + $0x1a8] sm:$0xff] %v1162_v53  ;;  %v1164_v54 = vld [vmem:[%s7896_s12 + $0x6c0] sm:$0xff] }
  0x49   : > { %v1166_v55 = vld [vmem:[%s7896_s12 + $0x6e0] sm:$0xff]  ;;  %1165 = vst [vmem:[%s7904_s13 + $0x1b0] sm:$0xff] %v1164_v54 }
  0x4a   : > { %v1168_v56 = vld [vmem:[%s7896_s12 + $0x700] sm:$0xff]  ;;  %1167 = vst [vmem:[%s7904_s13 + $0x1b8] sm:$0xff] %v1166_v55 }
  0x4b   : > { %1169 = vst [vmem:[%s7904_s13 + $0x1c0] sm:$0xff] %v1168_v56  ;;  %v1170_v57 = vld [vmem:[%s7896_s12 + $0x720] sm:$0xff] }
  0x4c   : > { %v1172_v58 = vld [vmem:[%s7896_s12 + $0x740] sm:$0xff]  ;;  %1171 = vst [vmem:[%s7904_s13 + $0x1c8] sm:$0xff] %v1170_v57 }
  0x4d   : > { %v1174_v59 = vld [vmem:[%s7896_s12 + $0x760] sm:$0xff]  ;;  %1173 = vst [vmem:[%s7904_s13 + $0x1d0] sm:$0xff] %v1172_v58 }
  0x4e   : > { %1175 = vst [vmem:[%s7904_s13 + $0x1d8] sm:$0xff] %v1174_v59  ;;  %v1176_v60 = vld [vmem:[%s7896_s12 + $0x780] sm:$0xff] }
  0x4f   : > { %v1178_v61 = vld [vmem:[%s7896_s12 + $0x7a0] sm:$0xff]  ;;  %1177 = vst [vmem:[%s7904_s13 + $0x1e0] sm:$0xff] %v1176_v60 }
  0x50   : > { %v1180_v62 = vld [vmem:[%s7896_s12 + $0x7c0] sm:$0xff]  ;;  %1179 = vst [vmem:[%s7904_s13 + $0x1e8] sm:$0xff] %v1178_v61 }
  0x51   : > { %1181 = vst [vmem:[%s7904_s13 + $0x1f0] sm:$0xff] %v1180_v62  ;;  %v1182_v63 = vld [vmem:[%s7896_s12 + $0x7e0] sm:$0xff] }
  0x52   : > { %v1184_v0 = vld [vmem:[%s7896_s12 + $0x800] sm:$0xff]  ;;  %1183 = vst [vmem:[%s7904_s13 + $0x1f8] sm:$0xff] %v1182_v63 }
  0x53   : > { %v1186_v1 = vld [vmem:[%s7896_s12 + $0x820] sm:$0xff]  ;;  %1185 = vst [vmem:[%s7904_s13 + $0x200] sm:$0xff] %v1184_v0 }
  0x54   : > { %1187 = vst [vmem:[%s7904_s13 + $0x208] sm:$0xff] %v1186_v1  ;;  %v1188_v2 = vld [vmem:[%s7896_s12 + $0x840] sm:$0xff] }
  0x55   : > { %v1190_v3 = vld [vmem:[%s7896_s12 + $0x860] sm:$0xff]  ;;  %1189 = vst [vmem:[%s7904_s13 + $0x210] sm:$0xff] %v1188_v2 }
  0x56   : > { %v1192_v4 = vld [vmem:[%s7896_s12 + $0x880] sm:$0xff]  ;;  %1191 = vst [vmem:[%s7904_s13 + $0x218] sm:$0xff] %v1190_v3 }
  0x57   : > { %1193 = vst [vmem:[%s7904_s13 + $0x220] sm:$0xff] %v1192_v4  ;;  %v1194_v5 = vld [vmem:[%s7896_s12 + $0x8a0] sm:$0xff] }
  0x58   : > { %v1196_v6 = vld [vmem:[%s7896_s12 + $0x8c0] sm:$0xff]  ;;  %1195 = vst [vmem:[%s7904_s13 + $0x228] sm:$0xff] %v1194_v5 }
  0x59   : > { %v1198_v7 = vld [vmem:[%s7896_s12 + $0x8e0] sm:$0xff]  ;;  %1197 = vst [vmem:[%s7904_s13 + $0x230] sm:$0xff] %v1196_v6 }
  0x5a   : > { %1199 = vst [vmem:[%s7904_s13 + $0x238] sm:$0xff] %v1198_v7  ;;  %v1200_v8 = vld [vmem:[%s7896_s12 + $0x900] sm:$0xff] }
  0x5b   : > { %v1202_v9 = vld [vmem:[%s7896_s12 + $0x920] sm:$0xff]  ;;  %1201 = vst [vmem:[%s7904_s13 + $0x240] sm:$0xff] %v1200_v8 }
  0x5c   : > { %v1204_v10 = vld [vmem:[%s7896_s12 + $0x940] sm:$0xff]  ;;  %1203 = vst [vmem:[%s7904_s13 + $0x248] sm:$0xff] %v1202_v9 }
  0x5d   : > { %1205 = vst [vmem:[%s7904_s13 + $0x250] sm:$0xff] %v1204_v10  ;;  %v1206_v11 = vld [vmem:[%s7896_s12 + $0x960] sm:$0xff] }
  0x5e   : > { %v1208_v12 = vld [vmem:[%s7896_s12 + $0x980] sm:$0xff]  ;;  %1207 = vst [vmem:[%s7904_s13 + $0x258] sm:$0xff] %v1206_v11 }
  0x5f   : > { %v1210_v13 = vld [vmem:[%s7896_s12 + $0x9a0] sm:$0xff]  ;;  %1209 = vst [vmem:[%s7904_s13 + $0x260] sm:$0xff] %v1208_v12 }
  0x60   : > { %1211 = vst [vmem:[%s7904_s13 + $0x268] sm:$0xff] %v1210_v13  ;;  %v1212_v14 = vld [vmem:[%s7896_s12 + $0x9c0] sm:$0xff] }
  0x61   : > { %v1214_v15 = vld [vmem:[%s7896_s12 + $0x9e0] sm:$0xff]  ;;  %1213 = vst [vmem:[%s7904_s13 + $0x270] sm:$0xff] %v1212_v14 }
  0x62   : > { %v1216_v16 = vld [vmem:[%s7896_s12 + $0xa00] sm:$0xff]  ;;  %1215 = vst [vmem:[%s7904_s13 + $0x278] sm:$0xff] %v1214_v15 }
  0x63   : > { %1217 = vst [vmem:[%s7904_s13 + $0x280] sm:$0xff] %v1216_v16  ;;  %v1218_v17 = vld [vmem:[%s7896_s12 + $0xa20] sm:$0xff] }
  0x64   : > { %v1220_v18 = vld [vmem:[%s7896_s12 + $0xa40] sm:$0xff]  ;;  %1219 = vst [vmem:[%s7904_s13 + $0x288] sm:$0xff] %v1218_v17 }
  0x65   : > { %v1222_v19 = vld [vmem:[%s7896_s12 + $0xa60] sm:$0xff]  ;;  %1221 = vst [vmem:[%s7904_s13 + $0x290] sm:$0xff] %v1220_v18 }
  0x66   : > { %1223 = vst [vmem:[%s7904_s13 + $0x298] sm:$0xff] %v1222_v19  ;;  %v1224_v20 = vld [vmem:[%s7896_s12 + $0xa80] sm:$0xff] }
  0x67   : > { %v1226_v21 = vld [vmem:[%s7896_s12 + $0xaa0] sm:$0xff]  ;;  %1225 = vst [vmem:[%s7904_s13 + $0x2a0] sm:$0xff] %v1224_v20 }
  0x68   : > { %v1228_v22 = vld [vmem:[%s7896_s12 + $0xac0] sm:$0xff]  ;;  %1227 = vst [vmem:[%s7904_s13 + $0x2a8] sm:$0xff] %v1226_v21 }
  0x69   : > { %1229 = vst [vmem:[%s7904_s13 + $0x2b0] sm:$0xff] %v1228_v22  ;;  %v1230_v23 = vld [vmem:[%s7896_s12 + $0xae0] sm:$0xff] }
  0x6a   : > { %v1232_v24 = vld [vmem:[%s7896_s12 + $0xb00] sm:$0xff]  ;;  %1231 = vst [vmem:[%s7904_s13 + $0x2b8] sm:$0xff] %v1230_v23 }
  0x6b   : > { %v1234_v25 = vld [vmem:[%s7896_s12 + $0xb20] sm:$0xff]  ;;  %1233 = vst [vmem:[%s7904_s13 + $0x2c0] sm:$0xff] %v1232_v24 }
  0x6c   : > { %1235 = vst [vmem:[%s7904_s13 + $0x2c8] sm:$0xff] %v1234_v25  ;;  %v1236_v26 = vld [vmem:[%s7896_s12 + $0xb40] sm:$0xff] }
  0x6d   : > { %v1238_v27 = vld [vmem:[%s7896_s12 + $0xb60] sm:$0xff]  ;;  %1237 = vst [vmem:[%s7904_s13 + $0x2d0] sm:$0xff] %v1236_v26 }
  0x6e   : > { %v1240_v28 = vld [vmem:[%s7896_s12 + $0xb80] sm:$0xff]  ;;  %1239 = vst [vmem:[%s7904_s13 + $0x2d8] sm:$0xff] %v1238_v27 }
  0x6f   : > { %1241 = vst [vmem:[%s7904_s13 + $0x2e0] sm:$0xff] %v1240_v28  ;;  %v1242_v29 = vld [vmem:[%s7896_s12 + $0xba0] sm:$0xff] }
  0x70   : > { %v1244_v30 = vld [vmem:[%s7896_s12 + $0xbc0] sm:$0xff]  ;;  %1243 = vst [vmem:[%s7904_s13 + $0x2e8] sm:$0xff] %v1242_v29 }
  0x71   : > { %v1246_v31 = vld [vmem:[%s7896_s12 + $0xbe0] sm:$0xff]  ;;  %1245 = vst [vmem:[%s7904_s13 + $0x2f0] sm:$0xff] %v1244_v30 }
  0x72   : > { %1247 = vst [vmem:[%s7904_s13 + $0x2f8] sm:$0xff] %v1246_v31  ;;  %v1248_v32 = vld [vmem:[%s7896_s12 + $0xc00] sm:$0xff] }
  0x73   : > { %v1250_v33 = vld [vmem:[%s7896_s12 + $0xc20] sm:$0xff]  ;;  %1249 = vst [vmem:[%s7904_s13 + $0x300] sm:$0xff] %v1248_v32 }
  0x74   : > { %v1252_v34 = vld [vmem:[%s7896_s12 + $0xc40] sm:$0xff]  ;;  %1251 = vst [vmem:[%s7904_s13 + $0x308] sm:$0xff] %v1250_v33 }
  0x75   : > { %1253 = vst [vmem:[%s7904_s13 + $0x310] sm:$0xff] %v1252_v34  ;;  %v1254_v35 = vld [vmem:[%s7896_s12 + $0xc60] sm:$0xff] }
  0x76   : > { %v1256_v36 = vld [vmem:[%s7896_s12 + $0xc80] sm:$0xff]  ;;  %1255 = vst [vmem:[%s7904_s13 + $0x318] sm:$0xff] %v1254_v35 }
  0x77   : > { %v1258_v37 = vld [vmem:[%s7896_s12 + $0xca0] sm:$0xff]  ;;  %1257 = vst [vmem:[%s7904_s13 + $0x320] sm:$0xff] %v1256_v36 }
  0x78   : > { %1259 = vst [vmem:[%s7904_s13 + $0x328] sm:$0xff] %v1258_v37  ;;  %v1260_v38 = vld [vmem:[%s7896_s12 + $0xcc0] sm:$0xff] }
  0x79   : > { %v1262_v39 = vld [vmem:[%s7896_s12 + $0xce0] sm:$0xff]  ;;  %1261 = vst [vmem:[%s7904_s13 + $0x330] sm:$0xff] %v1260_v38 }
  0x7a   : > { %v1264_v40 = vld [vmem:[%s7896_s12 + $0xd00] sm:$0xff]  ;;  %1263 = vst [vmem:[%s7904_s13 + $0x338] sm:$0xff] %v1262_v39 }
  0x7b   : > { %1265 = vst [vmem:[%s7904_s13 + $0x340] sm:$0xff] %v1264_v40  ;;  %v1266_v41 = vld [vmem:[%s7896_s12 + $0xd20] sm:$0xff] }
  0x7c   : > { %v1268_v42 = vld [vmem:[%s7896_s12 + $0xd40] sm:$0xff]  ;;  %1267 = vst [vmem:[%s7904_s13 + $0x348] sm:$0xff] %v1266_v41 }
  0x7d   : > { %v1270_v43 = vld [vmem:[%s7896_s12 + $0xd60] sm:$0xff]  ;;  %1269 = vst [vmem:[%s7904_s13 + $0x350] sm:$0xff] %v1268_v42 }
  0x7e   : > { %1271 = vst [vmem:[%s7904_s13 + $0x358] sm:$0xff] %v1270_v43  ;;  %v1272_v44 = vld [vmem:[%s7896_s12 + $0xd80] sm:$0xff] }
  0x7f   : > { %v1274_v45 = vld [vmem:[%s7896_s12 + $0xda0] sm:$0xff]  ;;  %1273 = vst [vmem:[%s7904_s13 + $0x360] sm:$0xff] %v1272_v44 }
  0x80   : > { %v1276_v46 = vld [vmem:[%s7896_s12 + $0xdc0] sm:$0xff]  ;;  %1275 = vst [vmem:[%s7904_s13 + $0x368] sm:$0xff] %v1274_v45 }
  0x81   : > { %1277 = vst [vmem:[%s7904_s13 + $0x370] sm:$0xff] %v1276_v46  ;;  %v1278_v47 = vld [vmem:[%s7896_s12 + $0xde0] sm:$0xff] }
  0x82   : > { %v1280_v48 = vld [vmem:[%s7896_s12 + $0xe00] sm:$0xff]  ;;  %1279 = vst [vmem:[%s7904_s13 + $0x378] sm:$0xff] %v1278_v47 }
  0x83   : > { %v1282_v49 = vld [vmem:[%s7896_s12 + $0xe20] sm:$0xff]  ;;  %1281 = vst [vmem:[%s7904_s13 + $0x380] sm:$0xff] %v1280_v48 }
  0x84   : > { %1283 = vst [vmem:[%s7904_s13 + $0x388] sm:$0xff] %v1282_v49  ;;  %v1284_v50 = vld [vmem:[%s7896_s12 + $0xe40] sm:$0xff] }
  0x85   : > { %v1286_v51 = vld [vmem:[%s7896_s12 + $0xe60] sm:$0xff]  ;;  %1285 = vst [vmem:[%s7904_s13 + $0x390] sm:$0xff] %v1284_v50 }
  0x86   : > { %v1288_v52 = vld [vmem:[%s7896_s12 + $0xe80] sm:$0xff]  ;;  %1287 = vst [vmem:[%s7904_s13 + $0x398] sm:$0xff] %v1286_v51 }
  0x87   : > { %1289 = vst [vmem:[%s7904_s13 + $0x3a0] sm:$0xff] %v1288_v52  ;;  %v1290_v53 = vld [vmem:[%s7896_s12 + $0xea0] sm:$0xff] }
  0x88   : > { %v1292_v54 = vld [vmem:[%s7896_s12 + $0xec0] sm:$0xff]  ;;  %1291 = vst [vmem:[%s7904_s13 + $0x3a8] sm:$0xff] %v1290_v53 }
  0x89   : > { %v1294_v55 = vld [vmem:[%s7896_s12 + $0xee0] sm:$0xff]  ;;  %1293 = vst [vmem:[%s7904_s13 + $0x3b0] sm:$0xff] %v1292_v54 }
  0x8a   : > { %1295 = vst [vmem:[%s7904_s13 + $0x3b8] sm:$0xff] %v1294_v55  ;;  %v1296_v56 = vld [vmem:[%s7896_s12 + $0xf00] sm:$0xff] }
  0x8b   : > { %v1298_v57 = vld [vmem:[%s7896_s12 + $0xf20] sm:$0xff]  ;;  %1297 = vst [vmem:[%s7904_s13 + $0x3c0] sm:$0xff] %v1296_v56 }
  0x8c   : > { %v1300_v58 = vld [vmem:[%s7896_s12 + $0xf40] sm:$0xff]  ;;  %1299 = vst [vmem:[%s7904_s13 + $0x3c8] sm:$0xff] %v1298_v57 }
  0x8d   : > { %1301 = vst [vmem:[%s7904_s13 + $0x3d0] sm:$0xff] %v1300_v58  ;;  %v1302_v59 = vld [vmem:[%s7896_s12 + $0xf60] sm:$0xff] }
  0x8e   : > { %v1304_v60 = vld [vmem:[%s7896_s12 + $0xf80] sm:$0xff]  ;;  %1303 = vst [vmem:[%s7904_s13 + $0x3d8] sm:$0xff] %v1302_v59 }
  0x8f   : > { %v1306_v61 = vld [vmem:[%s7896_s12 + $0xfa0] sm:$0xff]  ;;  %1305 = vst [vmem:[%s7904_s13 + $0x3e0] sm:$0xff] %v1304_v60 }
  0x90   : > { %1307 = vst [vmem:[%s7904_s13 + $0x3e8] sm:$0xff] %v1306_v61  ;;  %v1308_v62 = vld [vmem:[%s7896_s12 + $0xfc0] sm:$0xff] }
  0x91   : > { %v1310_v63 = vld [vmem:[%s7896_s12 + $0xfe0] sm:$0xff]  ;;  %1309 = vst [vmem:[%s7904_s13 + $0x3f0] sm:$0xff] %v1308_v62 }
  0x92   : > { %v1312_v0 = vld [vmem:[%s7896_s12 + $0x1000] sm:$0xff]  ;;  %1311 = vst [vmem:[%s7904_s13 + $0x3f8] sm:$0xff] %v1310_v63 }
  0x93   : > { %1313 = vst [vmem:[%s7904_s13 + $0x400] sm:$0xff] %v1312_v0  ;;  %v1314_v1 = vld [vmem:[%s7896_s12 + $0x1020] sm:$0xff] }
  0x94   : > { %v1316_v2 = vld [vmem:[%s7896_s12 + $0x1040] sm:$0xff]  ;;  %1315 = vst [vmem:[%s7904_s13 + $0x408] sm:$0xff] %v1314_v1 }
  0x95   : > { %v1318_v3 = vld [vmem:[%s7896_s12 + $0x1060] sm:$0xff]  ;;  %1317 = vst [vmem:[%s7904_s13 + $0x410] sm:$0xff] %v1316_v2 }
  0x96   : > { %1319 = vst [vmem:[%s7904_s13 + $0x418] sm:$0xff] %v1318_v3  ;;  %v1320_v4 = vld [vmem:[%s7896_s12 + $0x1080] sm:$0xff] }
  0x97   : > { %v1322_v5 = vld [vmem:[%s7896_s12 + $0x10a0] sm:$0xff]  ;;  %1321 = vst [vmem:[%s7904_s13 + $0x420] sm:$0xff] %v1320_v4 }
  0x98   : > { %v1324_v6 = vld [vmem:[%s7896_s12 + $0x10c0] sm:$0xff]  ;;  %1323 = vst [vmem:[%s7904_s13 + $0x428] sm:$0xff] %v1322_v5 }
  0x99   : > { %1325 = vst [vmem:[%s7904_s13 + $0x430] sm:$0xff] %v1324_v6  ;;  %v1326_v7 = vld [vmem:[%s7896_s12 + $0x10e0] sm:$0xff] }
  0x9a   : > { %v1328_v8 = vld [vmem:[%s7896_s12 + $0x1100] sm:$0xff]  ;;  %1327 = vst [vmem:[%s7904_s13 + $0x438] sm:$0xff] %v1326_v7 }
  0x9b   : > { %v1330_v9 = vld [vmem:[%s7896_s12 + $0x1120] sm:$0xff]  ;;  %1329 = vst [vmem:[%s7904_s13 + $0x440] sm:$0xff] %v1328_v8 }
  0x9c   : > { %1331 = vst [vmem:[%s7904_s13 + $0x448] sm:$0xff] %v1330_v9  ;;  %v1332_v10 = vld [vmem:[%s7896_s12 + $0x1140] sm:$0xff] }
  0x9d   : > { %v1334_v11 = vld [vmem:[%s7896_s12 + $0x1160] sm:$0xff]  ;;  %1333 = vst [vmem:[%s7904_s13 + $0x450] sm:$0xff] %v1332_v10 }
  0x9e   : > { %v1336_v12 = vld [vmem:[%s7896_s12 + $0x1180] sm:$0xff]  ;;  %1335 = vst [vmem:[%s7904_s13 + $0x458] sm:$0xff] %v1334_v11 }
  0x9f   : > { %1337 = vst [vmem:[%s7904_s13 + $0x460] sm:$0xff] %v1336_v12  ;;  %v1338_v13 = vld [vmem:[%s7896_s12 + $0x11a0] sm:$0xff] }
  0xa0   : > { %v1340_v14 = vld [vmem:[%s7896_s12 + $0x11c0] sm:$0xff]  ;;  %1339 = vst [vmem:[%s7904_s13 + $0x468] sm:$0xff] %v1338_v13 }
  0xa1   : > { %v1342_v15 = vld [vmem:[%s7896_s12 + $0x11e0] sm:$0xff]  ;;  %1341 = vst [vmem:[%s7904_s13 + $0x470] sm:$0xff] %v1340_v14 }
  0xa2   : > { %1343 = vst [vmem:[%s7904_s13 + $0x478] sm:$0xff] %v1342_v15  ;;  %v1344_v16 = vld [vmem:[%s7896_s12 + $0x1200] sm:$0xff] }
  0xa3   : > { %v1346_v17 = vld [vmem:[%s7896_s12 + $0x1220] sm:$0xff]  ;;  %1345 = vst [vmem:[%s7904_s13 + $0x480] sm:$0xff] %v1344_v16 }
  0xa4   : > { %v1348_v18 = vld [vmem:[%s7896_s12 + $0x1240] sm:$0xff]  ;;  %1347 = vst [vmem:[%s7904_s13 + $0x488] sm:$0xff] %v1346_v17 }
  0xa5   : > { %1349 = vst [vmem:[%s7904_s13 + $0x490] sm:$0xff] %v1348_v18  ;;  %v1350_v19 = vld [vmem:[%s7896_s12 + $0x1260] sm:$0xff] }
  0xa6   : > { %v1352_v20 = vld [vmem:[%s7896_s12 + $0x1280] sm:$0xff]  ;;  %1351 = vst [vmem:[%s7904_s13 + $0x498] sm:$0xff] %v1350_v19 }
  0xa7   : > { %v1354_v21 = vld [vmem:[%s7896_s12 + $0x12a0] sm:$0xff]  ;;  %1353 = vst [vmem:[%s7904_s13 + $0x4a0] sm:$0xff] %v1352_v20 }
  0xa8   : > { %1355 = vst [vmem:[%s7904_s13 + $0x4a8] sm:$0xff] %v1354_v21  ;;  %v1356_v22 = vld [vmem:[%s7896_s12 + $0x12c0] sm:$0xff] }
  0xa9   : > { %v1358_v23 = vld [vmem:[%s7896_s12 + $0x12e0] sm:$0xff]  ;;  %1357 = vst [vmem:[%s7904_s13 + $0x4b0] sm:$0xff] %v1356_v22 }
  0xaa   : > { %v1360_v24 = vld [vmem:[%s7896_s12 + $0x1300] sm:$0xff]  ;;  %1359 = vst [vmem:[%s7904_s13 + $0x4b8] sm:$0xff] %v1358_v23 }
  0xab   : > { %1361 = vst [vmem:[%s7904_s13 + $0x4c0] sm:$0xff] %v1360_v24  ;;  %v1362_v25 = vld [vmem:[%s7896_s12 + $0x1320] sm:$0xff] }
  0xac   : > { %v1364_v26 = vld [vmem:[%s7896_s12 + $0x1340] sm:$0xff]  ;;  %1363 = vst [vmem:[%s7904_s13 + $0x4c8] sm:$0xff] %v1362_v25 }
  0xad   : > { %v1366_v27 = vld [vmem:[%s7896_s12 + $0x1360] sm:$0xff]  ;;  %1365 = vst [vmem:[%s7904_s13 + $0x4d0] sm:$0xff] %v1364_v26 }
  0xae   : > { %1367 = vst [vmem:[%s7904_s13 + $0x4d8] sm:$0xff] %v1366_v27  ;;  %v1368_v28 = vld [vmem:[%s7896_s12 + $0x1380] sm:$0xff] }
  0xaf   : > { %v1370_v29 = vld [vmem:[%s7896_s12 + $0x13a0] sm:$0xff]  ;;  %1369 = vst [vmem:[%s7904_s13 + $0x4e0] sm:$0xff] %v1368_v28 }
  0xb0   : > { %v1372_v30 = vld [vmem:[%s7896_s12 + $0x13c0] sm:$0xff]  ;;  %1371 = vst [vmem:[%s7904_s13 + $0x4e8] sm:$0xff] %v1370_v29 }
  0xb1   : > { %1373 = vst [vmem:[%s7904_s13 + $0x4f0] sm:$0xff] %v1372_v30  ;;  %v1374_v31 = vld [vmem:[%s7896_s12 + $0x13e0] sm:$0xff] }
  0xb2   : > { %v1376_v32 = vld [vmem:[%s7896_s12 + $0x1400] sm:$0xff]  ;;  %1375 = vst [vmem:[%s7904_s13 + $0x4f8] sm:$0xff] %v1374_v31 }
  0xb3   : > { %v1378_v33 = vld [vmem:[%s7896_s12 + $0x1420] sm:$0xff]  ;;  %1377 = vst [vmem:[%s7904_s13 + $0x500] sm:$0xff] %v1376_v32 }
  0xb4   : > { %1379 = vst [vmem:[%s7904_s13 + $0x508] sm:$0xff] %v1378_v33  ;;  %v1380_v34 = vld [vmem:[%s7896_s12 + $0x1440] sm:$0xff] }
  0xb5   : > { %v1382_v35 = vld [vmem:[%s7896_s12 + $0x1460] sm:$0xff]  ;;  %1381 = vst [vmem:[%s7904_s13 + $0x510] sm:$0xff] %v1380_v34 }
  0xb6   : > { %v1384_v36 = vld [vmem:[%s7896_s12 + $0x1480] sm:$0xff]  ;;  %1383 = vst [vmem:[%s7904_s13 + $0x518] sm:$0xff] %v1382_v35 }
  0xb7   : > { %1385 = vst [vmem:[%s7904_s13 + $0x520] sm:$0xff] %v1384_v36  ;;  %v1386_v37 = vld [vmem:[%s7896_s12 + $0x14a0] sm:$0xff] }
  0xb8   : > { %v1388_v38 = vld [vmem:[%s7896_s12 + $0x14c0] sm:$0xff]  ;;  %1387 = vst [vmem:[%s7904_s13 + $0x528] sm:$0xff] %v1386_v37 }
  0xb9   : > { %v1390_v39 = vld [vmem:[%s7896_s12 + $0x14e0] sm:$0xff]  ;;  %1389 = vst [vmem:[%s7904_s13 + $0x530] sm:$0xff] %v1388_v38 }
  0xba   : > { %1391 = vst [vmem:[%s7904_s13 + $0x538] sm:$0xff] %v1390_v39  ;;  %v1392_v40 = vld [vmem:[%s7896_s12 + $0x1500] sm:$0xff] }
  0xbb   : > { %v1394_v41 = vld [vmem:[%s7896_s12 + $0x1520] sm:$0xff]  ;;  %1393 = vst [vmem:[%s7904_s13 + $0x540] sm:$0xff] %v1392_v40 }
  0xbc   : > { %v1396_v42 = vld [vmem:[%s7896_s12 + $0x1540] sm:$0xff]  ;;  %1395 = vst [vmem:[%s7904_s13 + $0x548] sm:$0xff] %v1394_v41 }
  0xbd   : > { %1397 = vst [vmem:[%s7904_s13 + $0x550] sm:$0xff] %v1396_v42  ;;  %v1398_v43 = vld [vmem:[%s7896_s12 + $0x1560] sm:$0xff] }
  0xbe   : > { %v1400_v44 = vld [vmem:[%s7896_s12 + $0x1580] sm:$0xff]  ;;  %1399 = vst [vmem:[%s7904_s13 + $0x558] sm:$0xff] %v1398_v43 }
  0xbf   : > { %v1402_v45 = vld [vmem:[%s7896_s12 + $0x15a0] sm:$0xff]  ;;  %1401 = vst [vmem:[%s7904_s13 + $0x560] sm:$0xff] %v1400_v44 }
  0xc0   : > { %1403 = vst [vmem:[%s7904_s13 + $0x568] sm:$0xff] %v1402_v45  ;;  %v1404_v46 = vld [vmem:[%s7896_s12 + $0x15c0] sm:$0xff] }
  0xc1   : > { %v1406_v47 = vld [vmem:[%s7896_s12 + $0x15e0] sm:$0xff]  ;;  %1405 = vst [vmem:[%s7904_s13 + $0x570] sm:$0xff] %v1404_v46 }
  0xc2   : > { %v1408_v48 = vld [vmem:[%s7896_s12 + $0x1600] sm:$0xff]  ;;  %1407 = vst [vmem:[%s7904_s13 + $0x578] sm:$0xff] %v1406_v47 }
  0xc3   : > { %1409 = vst [vmem:[%s7904_s13 + $0x580] sm:$0xff] %v1408_v48  ;;  %v1410_v49 = vld [vmem:[%s7896_s12 + $0x1620] sm:$0xff] }
  0xc4   : > { %v1412_v50 = vld [vmem:[%s7896_s12 + $0x1640] sm:$0xff]  ;;  %1411 = vst [vmem:[%s7904_s13 + $0x588] sm:$0xff] %v1410_v49 }
  0xc5   : > { %v1414_v51 = vld [vmem:[%s7896_s12 + $0x1660] sm:$0xff]  ;;  %1413 = vst [vmem:[%s7904_s13 + $0x590] sm:$0xff] %v1412_v50 }
  0xc6   : > { %1415 = vst [vmem:[%s7904_s13 + $0x598] sm:$0xff] %v1414_v51  ;;  %v1416_v52 = vld [vmem:[%s7896_s12 + $0x1680] sm:$0xff] }
  0xc7   : > { %v1418_v53 = vld [vmem:[%s7896_s12 + $0x16a0] sm:$0xff]  ;;  %1417 = vst [vmem:[%s7904_s13 + $0x5a0] sm:$0xff] %v1416_v52 }
  0xc8   : > { %v1420_v54 = vld [vmem:[%s7896_s12 + $0x16c0] sm:$0xff]  ;;  %1419 = vst [vmem:[%s7904_s13 + $0x5a8] sm:$0xff] %v1418_v53 }
  0xc9   : > { %1421 = vst [vmem:[%s7904_s13 + $0x5b0] sm:$0xff] %v1420_v54  ;;  %v1422_v55 = vld [vmem:[%s7896_s12 + $0x16e0] sm:$0xff] }
  0xca   : > { %v1424_v56 = vld [vmem:[%s7896_s12 + $0x1700] sm:$0xff]  ;;  %1423 = vst [vmem:[%s7904_s13 + $0x5b8] sm:$0xff] %v1422_v55 }
  0xcb   : > { %v1426_v57 = vld [vmem:[%s7896_s12 + $0x1720] sm:$0xff]  ;;  %1425 = vst [vmem:[%s7904_s13 + $0x5c0] sm:$0xff] %v1424_v56 }
  0xcc   : > { %1427 = vst [vmem:[%s7904_s13 + $0x5c8] sm:$0xff] %v1426_v57  ;;  %v1428_v58 = vld [vmem:[%s7896_s12 + $0x1740] sm:$0xff] }
  0xcd   : > { %v1430_v59 = vld [vmem:[%s7896_s12 + $0x1760] sm:$0xff]  ;;  %1429 = vst [vmem:[%s7904_s13 + $0x5d0] sm:$0xff] %v1428_v58 }
  0xce   : > { %v1432_v60 = vld [vmem:[%s7896_s12 + $0x1780] sm:$0xff]  ;;  %1431 = vst [vmem:[%s7904_s13 + $0x5d8] sm:$0xff] %v1430_v59 }
  0xcf   : > { %1433 = vst [vmem:[%s7904_s13 + $0x5e0] sm:$0xff] %v1432_v60  ;;  %v1434_v61 = vld [vmem:[%s7896_s12 + $0x17a0] sm:$0xff] }
  0xd0   : > { %v1436_v62 = vld [vmem:[%s7896_s12 + $0x17c0] sm:$0xff]  ;;  %1435 = vst [vmem:[%s7904_s13 + $0x5e8] sm:$0xff] %v1434_v61 }
  0xd1   : > { %v1438_v63 = vld [vmem:[%s7896_s12 + $0x17e0] sm:$0xff]  ;;  %1437 = vst [vmem:[%s7904_s13 + $0x5f0] sm:$0xff] %v1436_v62 }
  0xd2   : > { %1439 = vst [vmem:[%s7904_s13 + $0x5f8] sm:$0xff] %v1438_v63  ;;  %v1440_v0 = vld [vmem:[%s7896_s12 + $0x1800] sm:$0xff] }
  0xd3   : > { %v1442_v1 = vld [vmem:[%s7896_s12 + $0x1820] sm:$0xff]  ;;  %1441 = vst [vmem:[%s7904_s13 + $0x600] sm:$0xff] %v1440_v0 }
  0xd4   : > { %v1444_v2 = vld [vmem:[%s7896_s12 + $0x1840] sm:$0xff]  ;;  %1443 = vst [vmem:[%s7904_s13 + $0x608] sm:$0xff] %v1442_v1 }
  0xd5   : > { %1445 = vst [vmem:[%s7904_s13 + $0x610] sm:$0xff] %v1444_v2  ;;  %v1446_v3 = vld [vmem:[%s7896_s12 + $0x1860] sm:$0xff] }
  0xd6   : > { %v1448_v4 = vld [vmem:[%s7896_s12 + $0x1880] sm:$0xff]  ;;  %1447 = vst [vmem:[%s7904_s13 + $0x618] sm:$0xff] %v1446_v3 }
  0xd7   : > { %v1450_v5 = vld [vmem:[%s7896_s12 + $0x18a0] sm:$0xff]  ;;  %1449 = vst [vmem:[%s7904_s13 + $0x620] sm:$0xff] %v1448_v4 }
  0xd8   : > { %1451 = vst [vmem:[%s7904_s13 + $0x628] sm:$0xff] %v1450_v5  ;;  %v1452_v6 = vld [vmem:[%s7896_s12 + $0x18c0] sm:$0xff] }
  0xd9   : > { %v1454_v7 = vld [vmem:[%s7896_s12 + $0x18e0] sm:$0xff]  ;;  %1453 = vst [vmem:[%s7904_s13 + $0x630] sm:$0xff] %v1452_v6 }
  0xda   : > { %v1456_v8 = vld [vmem:[%s7896_s12 + $0x1900] sm:$0xff]  ;;  %1455 = vst [vmem:[%s7904_s13 + $0x638] sm:$0xff] %v1454_v7 }
  0xdb   : > { %1457 = vst [vmem:[%s7904_s13 + $0x640] sm:$0xff] %v1456_v8  ;;  %v1458_v9 = vld [vmem:[%s7896_s12 + $0x1920] sm:$0xff] }
  0xdc   : > { %v1460_v10 = vld [vmem:[%s7896_s12 + $0x1940] sm:$0xff]  ;;  %1459 = vst [vmem:[%s7904_s13 + $0x648] sm:$0xff] %v1458_v9 }
  0xdd   : > { %v1462_v11 = vld [vmem:[%s7896_s12 + $0x1960] sm:$0xff]  ;;  %1461 = vst [vmem:[%s7904_s13 + $0x650] sm:$0xff] %v1460_v10 }
  0xde   : > { %1463 = vst [vmem:[%s7904_s13 + $0x658] sm:$0xff] %v1462_v11  ;;  %v1464_v12 = vld [vmem:[%s7896_s12 + $0x1980] sm:$0xff] }
  0xdf   : > { %v1466_v13 = vld [vmem:[%s7896_s12 + $0x19a0] sm:$0xff]  ;;  %1465 = vst [vmem:[%s7904_s13 + $0x660] sm:$0xff] %v1464_v12 }
  0xe0   : > { %v1468_v14 = vld [vmem:[%s7896_s12 + $0x19c0] sm:$0xff]  ;;  %1467 = vst [vmem:[%s7904_s13 + $0x668] sm:$0xff] %v1466_v13 }
  0xe1   : > { %1469 = vst [vmem:[%s7904_s13 + $0x670] sm:$0xff] %v1468_v14  ;;  %v1470_v15 = vld [vmem:[%s7896_s12 + $0x19e0] sm:$0xff] }
  0xe2   : > { %v1472_v16 = vld [vmem:[%s7896_s12 + $0x1a00] sm:$0xff]  ;;  %1471 = vst [vmem:[%s7904_s13 + $0x678] sm:$0xff] %v1470_v15 }
  0xe3   : > { %v1474_v17 = vld [vmem:[%s7896_s12 + $0x1a20] sm:$0xff]  ;;  %1473 = vst [vmem:[%s7904_s13 + $0x680] sm:$0xff] %v1472_v16 }
  0xe4   : > { %1475 = vst [vmem:[%s7904_s13 + $0x688] sm:$0xff] %v1474_v17  ;;  %v1476_v18 = vld [vmem:[%s7896_s12 + $0x1a40] sm:$0xff] }
  0xe5   : > { %v1478_v19 = vld [vmem:[%s7896_s12 + $0x1a60] sm:$0xff]  ;;  %1477 = vst [vmem:[%s7904_s13 + $0x690] sm:$0xff] %v1476_v18 }
  0xe6   : > { %v1480_v20 = vld [vmem:[%s7896_s12 + $0x1a80] sm:$0xff]  ;;  %1479 = vst [vmem:[%s7904_s13 + $0x698] sm:$0xff] %v1478_v19 }
  0xe7   : > { %1481 = vst [vmem:[%s7904_s13 + $0x6a0] sm:$0xff] %v1480_v20  ;;  %v1482_v21 = vld [vmem:[%s7896_s12 + $0x1aa0] sm:$0xff] }
  0xe8   : > { %v1484_v22 = vld [vmem:[%s7896_s12 + $0x1ac0] sm:$0xff]  ;;  %1483 = vst [vmem:[%s7904_s13 + $0x6a8] sm:$0xff] %v1482_v21 }
  0xe9   : > { %v1486_v23 = vld [vmem:[%s7896_s12 + $0x1ae0] sm:$0xff]  ;;  %1485 = vst [vmem:[%s7904_s13 + $0x6b0] sm:$0xff] %v1484_v22 }
  0xea   : > { %1487 = vst [vmem:[%s7904_s13 + $0x6b8] sm:$0xff] %v1486_v23  ;;  %v1488_v24 = vld [vmem:[%s7896_s12 + $0x1b00] sm:$0xff] }
  0xeb   : > { %v1490_v25 = vld [vmem:[%s7896_s12 + $0x1b20] sm:$0xff]  ;;  %1489 = vst [vmem:[%s7904_s13 + $0x6c0] sm:$0xff] %v1488_v24 }
  0xec   : > { %v1492_v26 = vld [vmem:[%s7896_s12 + $0x1b40] sm:$0xff]  ;;  %1491 = vst [vmem:[%s7904_s13 + $0x6c8] sm:$0xff] %v1490_v25 }
  0xed   : > { %1493 = vst [vmem:[%s7904_s13 + $0x6d0] sm:$0xff] %v1492_v26  ;;  %v1494_v27 = vld [vmem:[%s7896_s12 + $0x1b60] sm:$0xff] }
  0xee   : > { %v1496_v28 = vld [vmem:[%s7896_s12 + $0x1b80] sm:$0xff]  ;;  %1495 = vst [vmem:[%s7904_s13 + $0x6d8] sm:$0xff] %v1494_v27 }
  0xef   : > { %v1498_v29 = vld [vmem:[%s7896_s12 + $0x1ba0] sm:$0xff]  ;;  %1497 = vst [vmem:[%s7904_s13 + $0x6e0] sm:$0xff] %v1496_v28 }
  0xf0   : > { %1499 = vst [vmem:[%s7904_s13 + $0x6e8] sm:$0xff] %v1498_v29  ;;  %v1500_v30 = vld [vmem:[%s7896_s12 + $0x1bc0] sm:$0xff] }
  0xf1   : > { %v1502_v31 = vld [vmem:[%s7896_s12 + $0x1be0] sm:$0xff]  ;;  %1501 = vst [vmem:[%s7904_s13 + $0x6f0] sm:$0xff] %v1500_v30 }
  0xf2   : > { %v1504_v32 = vld [vmem:[%s7896_s12 + $0x1c00] sm:$0xff]  ;;  %1503 = vst [vmem:[%s7904_s13 + $0x6f8] sm:$0xff] %v1502_v31 }
  0xf3   : > { %1505 = vst [vmem:[%s7904_s13 + $0x700] sm:$0xff] %v1504_v32  ;;  %v1506_v33 = vld [vmem:[%s7896_s12 + $0x1c20] sm:$0xff] }
  0xf4   : > { %v1508_v34 = vld [vmem:[%s7896_s12 + $0x1c40] sm:$0xff]  ;;  %1507 = vst [vmem:[%s7904_s13 + $0x708] sm:$0xff] %v1506_v33 }
  0xf5   : > { %v1510_v35 = vld [vmem:[%s7896_s12 + $0x1c60] sm:$0xff]  ;;  %1509 = vst [vmem:[%s7904_s13 + $0x710] sm:$0xff] %v1508_v34 }
  0xf6   : > { %1511 = vst [vmem:[%s7904_s13 + $0x718] sm:$0xff] %v1510_v35  ;;  %v1512_v36 = vld [vmem:[%s7896_s12 + $0x1c80] sm:$0xff] }
  0xf7   : > { %v1514_v37 = vld [vmem:[%s7896_s12 + $0x1ca0] sm:$0xff]  ;;  %1513 = vst [vmem:[%s7904_s13 + $0x720] sm:$0xff] %v1512_v36 }
  0xf8   : > { %v1516_v38 = vld [vmem:[%s7896_s12 + $0x1cc0] sm:$0xff]  ;;  %1515 = vst [vmem:[%s7904_s13 + $0x728] sm:$0xff] %v1514_v37 }
  0xf9   : > { %1517 = vst [vmem:[%s7904_s13 + $0x730] sm:$0xff] %v1516_v38  ;;  %v1518_v39 = vld [vmem:[%s7896_s12 + $0x1ce0] sm:$0xff] }
  0xfa   : > { %v1520_v40 = vld [vmem:[%s7896_s12 + $0x1d00] sm:$0xff]  ;;  %1519 = vst [vmem:[%s7904_s13 + $0x738] sm:$0xff] %v1518_v39 }
  0xfb   : > { %v1522_v41 = vld [vmem:[%s7896_s12 + $0x1d20] sm:$0xff]  ;;  %1521 = vst [vmem:[%s7904_s13 + $0x740] sm:$0xff] %v1520_v40 }
  0xfc   : > { %1523 = vst [vmem:[%s7904_s13 + $0x748] sm:$0xff] %v1522_v41  ;;  %v1524_v42 = vld [vmem:[%s7896_s12 + $0x1d40] sm:$0xff] }
  0xfd   : > { %v1526_v43 = vld [vmem:[%s7896_s12 + $0x1d60] sm:$0xff]  ;;  %1525 = vst [vmem:[%s7904_s13 + $0x750] sm:$0xff] %v1524_v42 }
  0xfe   : > { %v1528_v44 = vld [vmem:[%s7896_s12 + $0x1d80] sm:$0xff]  ;;  %1527 = vst [vmem:[%s7904_s13 + $0x758] sm:$0xff] %v1526_v43 }
  0xff   : > { %1529 = vst [vmem:[%s7904_s13 + $0x760] sm:$0xff] %v1528_v44  ;;  %v1530_v45 = vld [vmem:[%s7896_s12 + $0x1da0] sm:$0xff] }
 0x100   : > { %v1532_v46 = vld [vmem:[%s7896_s12 + $0x1dc0] sm:$0xff]  ;;  %1531 = vst [vmem:[%s7904_s13 + $0x768] sm:$0xff] %v1530_v45 }
 0x101   : > { %v1534_v47 = vld [vmem:[%s7896_s12 + $0x1de0] sm:$0xff]  ;;  %1533 = vst [vmem:[%s7904_s13 + $0x770] sm:$0xff] %v1532_v46 }
 0x102   : > { %1535 = vst [vmem:[%s7904_s13 + $0x778] sm:$0xff] %v1534_v47  ;;  %v1536_v48 = vld [vmem:[%s7896_s12 + $0x1e00] sm:$0xff] }
 0x103   : > { %v1538_v49 = vld [vmem:[%s7896_s12 + $0x1e20] sm:$0xff]  ;;  %1537 = vst [vmem:[%s7904_s13 + $0x780] sm:$0xff] %v1536_v48 }
 0x104   : > { %v1540_v50 = vld [vmem:[%s7896_s12 + $0x1e40] sm:$0xff]  ;;  %1539 = vst [vmem:[%s7904_s13 + $0x788] sm:$0xff] %v1538_v49 }
 0x105   : > { %1541 = vst [vmem:[%s7904_s13 + $0x790] sm:$0xff] %v1540_v50  ;;  %v1542_v51 = vld [vmem:[%s7896_s12 + $0x1e60] sm:$0xff] }
 0x106   : > { %v1544_v52 = vld [vmem:[%s7896_s12 + $0x1e80] sm:$0xff]  ;;  %1543 = vst [vmem:[%s7904_s13 + $0x798] sm:$0xff] %v1542_v51 }
 0x107   : > { %v1546_v53 = vld [vmem:[%s7896_s12 + $0x1ea0] sm:$0xff]  ;;  %1545 = vst [vmem:[%s7904_s13 + $0x7a0] sm:$0xff] %v1544_v52 }
 0x108   : > { %1547 = vst [vmem:[%s7904_s13 + $0x7a8] sm:$0xff] %v1546_v53  ;;  %v1548_v54 = vld [vmem:[%s7896_s12 + $0x1ec0] sm:$0xff] }
 0x109   : > { %v1550_v55 = vld [vmem:[%s7896_s12 + $0x1ee0] sm:$0xff]  ;;  %1549 = vst [vmem:[%s7904_s13 + $0x7b0] sm:$0xff] %v1548_v54 }
 0x10a   : > { %v1552_v56 = vld [vmem:[%s7896_s12 + $0x1f00] sm:$0xff]  ;;  %1551 = vst [vmem:[%s7904_s13 + $0x7b8] sm:$0xff] %v1550_v55 }
 0x10b   : > { %1553 = vst [vmem:[%s7904_s13 + $0x7c0] sm:$0xff] %v1552_v56  ;;  %v1554_v57 = vld [vmem:[%s7896_s12 + $0x1f20] sm:$0xff] }
 0x10c   : > { %v1556_v58 = vld [vmem:[%s7896_s12 + $0x1f40] sm:$0xff]  ;;  %1555 = vst [vmem:[%s7904_s13 + $0x7c8] sm:$0xff] %v1554_v57 }
 0x10d   : > { %v1558_v59 = vld [vmem:[%s7896_s12 + $0x1f60] sm:$0xff]  ;;  %1557 = vst [vmem:[%s7904_s13 + $0x7d0] sm:$0xff] %v1556_v58 }
 0x10e   : > { %1559 = vst [vmem:[%s7904_s13 + $0x7d8] sm:$0xff] %v1558_v59  ;;  %v1560_v60 = vld [vmem:[%s7896_s12 + $0x1f80] sm:$0xff] }
 0x10f   : > { %v1562_v61 = vld [vmem:[%s7896_s12 + $0x1fa0] sm:$0xff]  ;;  %1561 = vst [vmem:[%s7904_s13 + $0x7e0] sm:$0xff] %v1560_v60 }
 0x110   : > { %v1564_v62 = vld [vmem:[%s7896_s12 + $0x1fc0] sm:$0xff]  ;;  %1563 = vst [vmem:[%s7904_s13 + $0x7e8] sm:$0xff] %v1562_v61 }
 0x111   : > { %1565 = vst [vmem:[%s7904_s13 + $0x7f0] sm:$0xff] %v1564_v62  ;;  %v1566_v63 = vld [vmem:[%s7896_s12 + $0x1fe0] sm:$0xff] }
 0x112   : > { %v1568_v0 = vld [vmem:[%s7896_s12 + $0x2000] sm:$0xff]  ;;  %1567 = vst [vmem:[%s7904_s13 + $0x7f8] sm:$0xff] %v1566_v63 }
 0x113   : > { %v1570_v1 = vld [vmem:[%s7896_s12 + $0x2020] sm:$0xff]  ;;  %1569 = vst [vmem:[%s7904_s13 + $0x800] sm:$0xff] %v1568_v0 }
 0x114   : > { %1571 = vst [vmem:[%s7904_s13 + $0x808] sm:$0xff] %v1570_v1  ;;  %v1572_v2 = vld [vmem:[%s7896_s12 + $0x2040] sm:$0xff] }
 0x115   : > { %v1574_v3 = vld [vmem:[%s7896_s12 + $0x2060] sm:$0xff]  ;;  %1573 = vst [vmem:[%s7904_s13 + $0x810] sm:$0xff] %v1572_v2 }
 0x116   : > { %v1576_v4 = vld [vmem:[%s7896_s12 + $0x2080] sm:$0xff]  ;;  %1575 = vst [vmem:[%s7904_s13 + $0x818] sm:$0xff] %v1574_v3 }
 0x117   : > { %1577 = vst [vmem:[%s7904_s13 + $0x820] sm:$0xff] %v1576_v4  ;;  %v1578_v5 = vld [vmem:[%s7896_s12 + $0x20a0] sm:$0xff] }
 0x118   : > { %v1580_v6 = vld [vmem:[%s7896_s12 + $0x20c0] sm:$0xff]  ;;  %1579 = vst [vmem:[%s7904_s13 + $0x828] sm:$0xff] %v1578_v5 }
 0x119   : > { %v1582_v7 = vld [vmem:[%s7896_s12 + $0x20e0] sm:$0xff]  ;;  %1581 = vst [vmem:[%s7904_s13 + $0x830] sm:$0xff] %v1580_v6 }
 0x11a   : > { %1583 = vst [vmem:[%s7904_s13 + $0x838] sm:$0xff] %v1582_v7  ;;  %v1584_v8 = vld [vmem:[%s7896_s12 + $0x2100] sm:$0xff] }
 0x11b   : > { %v1586_v9 = vld [vmem:[%s7896_s12 + $0x2120] sm:$0xff]  ;;  %1585 = vst [vmem:[%s7904_s13 + $0x840] sm:$0xff] %v1584_v8 }
 0x11c   : > { %v1588_v10 = vld [vmem:[%s7896_s12 + $0x2140] sm:$0xff]  ;;  %1587 = vst [vmem:[%s7904_s13 + $0x848] sm:$0xff] %v1586_v9 }
 0x11d   : > { %1589 = vst [vmem:[%s7904_s13 + $0x850] sm:$0xff] %v1588_v10  ;;  %v1590_v11 = vld [vmem:[%s7896_s12 + $0x2160] sm:$0xff] }
 0x11e   : > { %v1592_v12 = vld [vmem:[%s7896_s12 + $0x2180] sm:$0xff]  ;;  %1591 = vst [vmem:[%s7904_s13 + $0x858] sm:$0xff] %v1590_v11 }
 0x11f   : > { %v1594_v13 = vld [vmem:[%s7896_s12 + $0x21a0] sm:$0xff]  ;;  %1593 = vst [vmem:[%s7904_s13 + $0x860] sm:$0xff] %v1592_v12 }
 0x120   : > { %1595 = vst [vmem:[%s7904_s13 + $0x868] sm:$0xff] %v1594_v13  ;;  %v1596_v14 = vld [vmem:[%s7896_s12 + $0x21c0] sm:$0xff] }
 0x121   : > { %v1598_v15 = vld [vmem:[%s7896_s12 + $0x21e0] sm:$0xff]  ;;  %1597 = vst [vmem:[%s7904_s13 + $0x870] sm:$0xff] %v1596_v14 }
 0x122   : > { %v1600_v16 = vld [vmem:[%s7896_s12 + $0x2200] sm:$0xff]  ;;  %1599 = vst [vmem:[%s7904_s13 + $0x878] sm:$0xff] %v1598_v15 }
 0x123   : > { %1601 = vst [vmem:[%s7904_s13 + $0x880] sm:$0xff] %v1600_v16  ;;  %v1602_v17 = vld [vmem:[%s7896_s12 + $0x2220] sm:$0xff] }
 0x124   : > { %v1604_v18 = vld [vmem:[%s7896_s12 + $0x2240] sm:$0xff]  ;;  %1603 = vst [vmem:[%s7904_s13 + $0x888] sm:$0xff] %v1602_v17 }
 0x125   : > { %v1606_v19 = vld [vmem:[%s7896_s12 + $0x2260] sm:$0xff]  ;;  %1605 = vst [vmem:[%s7904_s13 + $0x890] sm:$0xff] %v1604_v18 }
 0x126   : > { %1607 = vst [vmem:[%s7904_s13 + $0x898] sm:$0xff] %v1606_v19  ;;  %v1608_v20 = vld [vmem:[%s7896_s12 + $0x2280] sm:$0xff] }
 0x127   : > { %v1610_v21 = vld [vmem:[%s7896_s12 + $0x22a0] sm:$0xff]  ;;  %1609 = vst [vmem:[%s7904_s13 + $0x8a0] sm:$0xff] %v1608_v20 }
 0x128   : > { %v1612_v22 = vld [vmem:[%s7896_s12 + $0x22c0] sm:$0xff]  ;;  %1611 = vst [vmem:[%s7904_s13 + $0x8a8] sm:$0xff] %v1610_v21 }
 0x129   : > { %1613 = vst [vmem:[%s7904_s13 + $0x8b0] sm:$0xff] %v1612_v22  ;;  %v1614_v23 = vld [vmem:[%s7896_s12 + $0x22e0] sm:$0xff] }
 0x12a   : > { %v1616_v24 = vld [vmem:[%s7896_s12 + $0x2300] sm:$0xff]  ;;  %1615 = vst [vmem:[%s7904_s13 + $0x8b8] sm:$0xff] %v1614_v23 }
 0x12b   : > { %v1618_v25 = vld [vmem:[%s7896_s12 + $0x2320] sm:$0xff]  ;;  %1617 = vst [vmem:[%s7904_s13 + $0x8c0] sm:$0xff] %v1616_v24 }
 0x12c   : > { %1619 = vst [vmem:[%s7904_s13 + $0x8c8] sm:$0xff] %v1618_v25  ;;  %v1620_v26 = vld [vmem:[%s7896_s12 + $0x2340] sm:$0xff] }
 0x12d   : > { %v1622_v27 = vld [vmem:[%s7896_s12 + $0x2360] sm:$0xff]  ;;  %1621 = vst [vmem:[%s7904_s13 + $0x8d0] sm:$0xff] %v1620_v26 }
 0x12e   : > { %v1624_v28 = vld [vmem:[%s7896_s12 + $0x2380] sm:$0xff]  ;;  %1623 = vst [vmem:[%s7904_s13 + $0x8d8] sm:$0xff] %v1622_v27 }
 0x12f   : > { %1625 = vst [vmem:[%s7904_s13 + $0x8e0] sm:$0xff] %v1624_v28  ;;  %v1626_v29 = vld [vmem:[%s7896_s12 + $0x23a0] sm:$0xff] }
 0x130   : > { %v1628_v30 = vld [vmem:[%s7896_s12 + $0x23c0] sm:$0xff]  ;;  %1627 = vst [vmem:[%s7904_s13 + $0x8e8] sm:$0xff] %v1626_v29 }
 0x131   : > { %v1630_v31 = vld [vmem:[%s7896_s12 + $0x23e0] sm:$0xff]  ;;  %1629 = vst [vmem:[%s7904_s13 + $0x8f0] sm:$0xff] %v1628_v30 }
 0x132   : > { %1631 = vst [vmem:[%s7904_s13 + $0x8f8] sm:$0xff] %v1630_v31  ;;  %v1632_v32 = vld [vmem:[%s7896_s12 + $0x2400] sm:$0xff] }
 0x133   : > { %v1634_v33 = vld [vmem:[%s7896_s12 + $0x2420] sm:$0xff]  ;;  %1633 = vst [vmem:[%s7904_s13 + $0x900] sm:$0xff] %v1632_v32 }
 0x134   : > { %v1636_v34 = vld [vmem:[%s7896_s12 + $0x2440] sm:$0xff]  ;;  %1635 = vst [vmem:[%s7904_s13 + $0x908] sm:$0xff] %v1634_v33 }
 0x135   : > { %1637 = vst [vmem:[%s7904_s13 + $0x910] sm:$0xff] %v1636_v34  ;;  %v1638_v35 = vld [vmem:[%s7896_s12 + $0x2460] sm:$0xff] }
 0x136   : > { %v1640_v36 = vld [vmem:[%s7896_s12 + $0x2480] sm:$0xff]  ;;  %1639 = vst [vmem:[%s7904_s13 + $0x918] sm:$0xff] %v1638_v35 }
 0x137   : > { %v1642_v37 = vld [vmem:[%s7896_s12 + $0x24a0] sm:$0xff]  ;;  %1641 = vst [vmem:[%s7904_s13 + $0x920] sm:$0xff] %v1640_v36 }
 0x138   : > { %1643 = vst [vmem:[%s7904_s13 + $0x928] sm:$0xff] %v1642_v37  ;;  %v1644_v38 = vld [vmem:[%s7896_s12 + $0x24c0] sm:$0xff] }
 0x139   : > { %v1646_v39 = vld [vmem:[%s7896_s12 + $0x24e0] sm:$0xff]  ;;  %1645 = vst [vmem:[%s7904_s13 + $0x930] sm:$0xff] %v1644_v38 }
 0x13a   : > { %v1648_v40 = vld [vmem:[%s7896_s12 + $0x2500] sm:$0xff]  ;;  %1647 = vst [vmem:[%s7904_s13 + $0x938] sm:$0xff] %v1646_v39 }
 0x13b   : > { %1649 = vst [vmem:[%s7904_s13 + $0x940] sm:$0xff] %v1648_v40  ;;  %v1650_v41 = vld [vmem:[%s7896_s12 + $0x2520] sm:$0xff] }
 0x13c   : > { %v1652_v42 = vld [vmem:[%s7896_s12 + $0x2540] sm:$0xff]  ;;  %1651 = vst [vmem:[%s7904_s13 + $0x948] sm:$0xff] %v1650_v41 }
 0x13d   : > { %v1654_v43 = vld [vmem:[%s7896_s12 + $0x2560] sm:$0xff]  ;;  %1653 = vst [vmem:[%s7904_s13 + $0x950] sm:$0xff] %v1652_v42 }
 0x13e   : > { %1655 = vst [vmem:[%s7904_s13 + $0x958] sm:$0xff] %v1654_v43  ;;  %v1656_v44 = vld [vmem:[%s7896_s12 + $0x2580] sm:$0xff] }
 0x13f   : > { %v1658_v45 = vld [vmem:[%s7896_s12 + $0x25a0] sm:$0xff]  ;;  %1657 = vst [vmem:[%s7904_s13 + $0x960] sm:$0xff] %v1656_v44 }
 0x140   : > { %v1660_v46 = vld [vmem:[%s7896_s12 + $0x25c0] sm:$0xff]  ;;  %1659 = vst [vmem:[%s7904_s13 + $0x968] sm:$0xff] %v1658_v45 }
 0x141   : > { %1661 = vst [vmem:[%s7904_s13 + $0x970] sm:$0xff] %v1660_v46  ;;  %v1662_v47 = vld [vmem:[%s7896_s12 + $0x25e0] sm:$0xff] }
 0x142   : > { %v1664_v48 = vld [vmem:[%s7896_s12 + $0x2600] sm:$0xff]  ;;  %1663 = vst [vmem:[%s7904_s13 + $0x978] sm:$0xff] %v1662_v47 }
 0x143   : > { %v1666_v49 = vld [vmem:[%s7896_s12 + $0x2620] sm:$0xff]  ;;  %1665 = vst [vmem:[%s7904_s13 + $0x980] sm:$0xff] %v1664_v48 }
 0x144   : > { %1667 = vst [vmem:[%s7904_s13 + $0x988] sm:$0xff] %v1666_v49  ;;  %v1668_v50 = vld [vmem:[%s7896_s12 + $0x2640] sm:$0xff] }
 0x145   : > { %v1670_v51 = vld [vmem:[%s7896_s12 + $0x2660] sm:$0xff]  ;;  %1669 = vst [vmem:[%s7904_s13 + $0x990] sm:$0xff] %v1668_v50 }
 0x146   : > { %v1672_v52 = vld [vmem:[%s7896_s12 + $0x2680] sm:$0xff]  ;;  %1671 = vst [vmem:[%s7904_s13 + $0x998] sm:$0xff] %v1670_v51 }
 0x147   : > { %1673 = vst [vmem:[%s7904_s13 + $0x9a0] sm:$0xff] %v1672_v52  ;;  %v1674_v53 = vld [vmem:[%s7896_s12 + $0x26a0] sm:$0xff] }
 0x148   : > { %v1676_v54 = vld [vmem:[%s7896_s12 + $0x26c0] sm:$0xff]  ;;  %1675 = vst [vmem:[%s7904_s13 + $0x9a8] sm:$0xff] %v1674_v53 }
 0x149   : > { %v1678_v55 = vld [vmem:[%s7896_s12 + $0x26e0] sm:$0xff]  ;;  %1677 = vst [vmem:[%s7904_s13 + $0x9b0] sm:$0xff] %v1676_v54 }
 0x14a   : > { %1679 = vst [vmem:[%s7904_s13 + $0x9b8] sm:$0xff] %v1678_v55  ;;  %v1680_v56 = vld [vmem:[%s7896_s12 + $0x2700] sm:$0xff] }
 0x14b   : > { %v1682_v57 = vld [vmem:[%s7896_s12 + $0x2720] sm:$0xff]  ;;  %1681 = vst [vmem:[%s7904_s13 + $0x9c0] sm:$0xff] %v1680_v56 }
 0x14c   : > { %v1684_v58 = vld [vmem:[%s7896_s12 + $0x2740] sm:$0xff]  ;;  %1683 = vst [vmem:[%s7904_s13 + $0x9c8] sm:$0xff] %v1682_v57 }
 0x14d   : > { %1685 = vst [vmem:[%s7904_s13 + $0x9d0] sm:$0xff] %v1684_v58  ;;  %v1686_v59 = vld [vmem:[%s7896_s12 + $0x2760] sm:$0xff] }
 0x14e   : > { %v1688_v60 = vld [vmem:[%s7896_s12 + $0x2780] sm:$0xff]  ;;  %1687 = vst [vmem:[%s7904_s13 + $0x9d8] sm:$0xff] %v1686_v59 }
 0x14f   : > { %v1690_v61 = vld [vmem:[%s7896_s12 + $0x27a0] sm:$0xff]  ;;  %1689 = vst [vmem:[%s7904_s13 + $0x9e0] sm:$0xff] %v1688_v60 }
 0x150   : > { %1691 = vst [vmem:[%s7904_s13 + $0x9e8] sm:$0xff] %v1690_v61  ;;  %v1692_v62 = vld [vmem:[%s7896_s12 + $0x27c0] sm:$0xff] }
 0x151   : > { %v1694_v63 = vld [vmem:[%s7896_s12 + $0x27e0] sm:$0xff]  ;;  %1693 = vst [vmem:[%s7904_s13 + $0x9f0] sm:$0xff] %v1692_v62 }
 0x152   : > { %v1696_v0 = vld [vmem:[%s7896_s12 + $0x2800] sm:$0xff]  ;;  %1695 = vst [vmem:[%s7904_s13 + $0x9f8] sm:$0xff] %v1694_v63 }
 0x153   : > { %1697 = vst [vmem:[%s7904_s13 + $0xa00] sm:$0xff] %v1696_v0  ;;  %v1698_v1 = vld [vmem:[%s7896_s12 + $0x2820] sm:$0xff] }
 0x154   : > { %v1700_v2 = vld [vmem:[%s7896_s12 + $0x2840] sm:$0xff]  ;;  %1699 = vst [vmem:[%s7904_s13 + $0xa08] sm:$0xff] %v1698_v1 }
 0x155   : > { %v1702_v3 = vld [vmem:[%s7896_s12 + $0x2860] sm:$0xff]  ;;  %1701 = vst [vmem:[%s7904_s13 + $0xa10] sm:$0xff] %v1700_v2 }
 0x156   : > { %1703 = vst [vmem:[%s7904_s13 + $0xa18] sm:$0xff] %v1702_v3  ;;  %v1704_v4 = vld [vmem:[%s7896_s12 + $0x2880] sm:$0xff] }
 0x157   : > { %v1706_v5 = vld [vmem:[%s7896_s12 + $0x28a0] sm:$0xff]  ;;  %1705 = vst [vmem:[%s7904_s13 + $0xa20] sm:$0xff] %v1704_v4 }
 0x158   : > { %v1708_v6 = vld [vmem:[%s7896_s12 + $0x28c0] sm:$0xff]  ;;  %1707 = vst [vmem:[%s7904_s13 + $0xa28] sm:$0xff] %v1706_v5 }
 0x159   : > { %1709 = vst [vmem:[%s7904_s13 + $0xa30] sm:$0xff] %v1708_v6  ;;  %v1710_v7 = vld [vmem:[%s7896_s12 + $0x28e0] sm:$0xff] }
 0x15a   : > { %v1712_v8 = vld [vmem:[%s7896_s12 + $0x2900] sm:$0xff]  ;;  %1711 = vst [vmem:[%s7904_s13 + $0xa38] sm:$0xff] %v1710_v7 }
 0x15b   : > { %v1714_v9 = vld [vmem:[%s7896_s12 + $0x2920] sm:$0xff]  ;;  %1713 = vst [vmem:[%s7904_s13 + $0xa40] sm:$0xff] %v1712_v8 }
 0x15c   : > { %1715 = vst [vmem:[%s7904_s13 + $0xa48] sm:$0xff] %v1714_v9  ;;  %v1716_v10 = vld [vmem:[%s7896_s12 + $0x2940] sm:$0xff] }
 0x15d   : > { %v1718_v11 = vld [vmem:[%s7896_s12 + $0x2960] sm:$0xff]  ;;  %1717 = vst [vmem:[%s7904_s13 + $0xa50] sm:$0xff] %v1716_v10 }
 0x15e   : > { %v1720_v12 = vld [vmem:[%s7896_s12 + $0x2980] sm:$0xff]  ;;  %1719 = vst [vmem:[%s7904_s13 + $0xa58] sm:$0xff] %v1718_v11 }
 0x15f   : > { %1721 = vst [vmem:[%s7904_s13 + $0xa60] sm:$0xff] %v1720_v12  ;;  %v1722_v13 = vld [vmem:[%s7896_s12 + $0x29a0] sm:$0xff] }
 0x160   : > { %v1724_v14 = vld [vmem:[%s7896_s12 + $0x29c0] sm:$0xff]  ;;  %1723 = vst [vmem:[%s7904_s13 + $0xa68] sm:$0xff] %v1722_v13 }
 0x161   : > { %v1726_v15 = vld [vmem:[%s7896_s12 + $0x29e0] sm:$0xff]  ;;  %1725 = vst [vmem:[%s7904_s13 + $0xa70] sm:$0xff] %v1724_v14 }
 0x162   : > { %1727 = vst [vmem:[%s7904_s13 + $0xa78] sm:$0xff] %v1726_v15  ;;  %v1728_v16 = vld [vmem:[%s7896_s12 + $0x2a00] sm:$0xff] }
 0x163   : > { %v1730_v17 = vld [vmem:[%s7896_s12 + $0x2a20] sm:$0xff]  ;;  %1729 = vst [vmem:[%s7904_s13 + $0xa80] sm:$0xff] %v1728_v16 }
 0x164   : > { %v1732_v18 = vld [vmem:[%s7896_s12 + $0x2a40] sm:$0xff]  ;;  %1731 = vst [vmem:[%s7904_s13 + $0xa88] sm:$0xff] %v1730_v17 }
 0x165   : > { %1733 = vst [vmem:[%s7904_s13 + $0xa90] sm:$0xff] %v1732_v18  ;;  %v1734_v19 = vld [vmem:[%s7896_s12 + $0x2a60] sm:$0xff] }
 0x166   : > { %v1736_v20 = vld [vmem:[%s7896_s12 + $0x2a80] sm:$0xff]  ;;  %1735 = vst [vmem:[%s7904_s13 + $0xa98] sm:$0xff] %v1734_v19 }
 0x167   : > { %v1738_v21 = vld [vmem:[%s7896_s12 + $0x2aa0] sm:$0xff]  ;;  %1737 = vst [vmem:[%s7904_s13 + $0xaa0] sm:$0xff] %v1736_v20 }
 0x168   : > { %1739 = vst [vmem:[%s7904_s13 + $0xaa8] sm:$0xff] %v1738_v21  ;;  %v1740_v22 = vld [vmem:[%s7896_s12 + $0x2ac0] sm:$0xff] }
 0x169   : > { %v1742_v23 = vld [vmem:[%s7896_s12 + $0x2ae0] sm:$0xff]  ;;  %1741 = vst [vmem:[%s7904_s13 + $0xab0] sm:$0xff] %v1740_v22 }
 0x16a   : > { %v1744_v24 = vld [vmem:[%s7896_s12 + $0x2b00] sm:$0xff]  ;;  %1743 = vst [vmem:[%s7904_s13 + $0xab8] sm:$0xff] %v1742_v23 }
 0x16b   : > { %1745 = vst [vmem:[%s7904_s13 + $0xac0] sm:$0xff] %v1744_v24  ;;  %v1746_v25 = vld [vmem:[%s7896_s12 + $0x2b20] sm:$0xff] }
 0x16c   : > { %v1748_v26 = vld [vmem:[%s7896_s12 + $0x2b40] sm:$0xff]  ;;  %1747 = vst [vmem:[%s7904_s13 + $0xac8] sm:$0xff] %v1746_v25 }
 0x16d   : > { %v1750_v27 = vld [vmem:[%s7896_s12 + $0x2b60] sm:$0xff]  ;;  %1749 = vst [vmem:[%s7904_s13 + $0xad0] sm:$0xff] %v1748_v26 }
 0x16e   : > { %1751 = vst [vmem:[%s7904_s13 + $0xad8] sm:$0xff] %v1750_v27  ;;  %v1752_v28 = vld [vmem:[%s7896_s12 + $0x2b80] sm:$0xff] }
 0x16f   : > { %v1754_v29 = vld [vmem:[%s7896_s12 + $0x2ba0] sm:$0xff]  ;;  %1753 = vst [vmem:[%s7904_s13 + $0xae0] sm:$0xff] %v1752_v28 }
 0x170   : > { %v1756_v30 = vld [vmem:[%s7896_s12 + $0x2bc0] sm:$0xff]  ;;  %1755 = vst [vmem:[%s7904_s13 + $0xae8] sm:$0xff] %v1754_v29 }
 0x171   : > { %1757 = vst [vmem:[%s7904_s13 + $0xaf0] sm:$0xff] %v1756_v30  ;;  %v1758_v31 = vld [vmem:[%s7896_s12 + $0x2be0] sm:$0xff] }
 0x172   : > { %v1760_v32 = vld [vmem:[%s7896_s12 + $0x2c00] sm:$0xff]  ;;  %1759 = vst [vmem:[%s7904_s13 + $0xaf8] sm:$0xff] %v1758_v31 }
 0x173   : > { %v1762_v33 = vld [vmem:[%s7896_s12 + $0x2c20] sm:$0xff]  ;;  %1761 = vst [vmem:[%s7904_s13 + $0xb00] sm:$0xff] %v1760_v32 }
 0x174   : > { %1763 = vst [vmem:[%s7904_s13 + $0xb08] sm:$0xff] %v1762_v33  ;;  %v1764_v34 = vld [vmem:[%s7896_s12 + $0x2c40] sm:$0xff] }
 0x175   : > { %v1766_v35 = vld [vmem:[%s7896_s12 + $0x2c60] sm:$0xff]  ;;  %1765 = vst [vmem:[%s7904_s13 + $0xb10] sm:$0xff] %v1764_v34 }
 0x176   : > { %v1768_v36 = vld [vmem:[%s7896_s12 + $0x2c80] sm:$0xff]  ;;  %1767 = vst [vmem:[%s7904_s13 + $0xb18] sm:$0xff] %v1766_v35 }
 0x177   : > { %1769 = vst [vmem:[%s7904_s13 + $0xb20] sm:$0xff] %v1768_v36  ;;  %v1770_v37 = vld [vmem:[%s7896_s12 + $0x2ca0] sm:$0xff] }
 0x178   : > { %v1772_v38 = vld [vmem:[%s7896_s12 + $0x2cc0] sm:$0xff]  ;;  %1771 = vst [vmem:[%s7904_s13 + $0xb28] sm:$0xff] %v1770_v37 }
 0x179   : > { %v1774_v39 = vld [vmem:[%s7896_s12 + $0x2ce0] sm:$0xff]  ;;  %1773 = vst [vmem:[%s7904_s13 + $0xb30] sm:$0xff] %v1772_v38 }
 0x17a   : > { %1775 = vst [vmem:[%s7904_s13 + $0xb38] sm:$0xff] %v1774_v39  ;;  %v1776_v40 = vld [vmem:[%s7896_s12 + $0x2d00] sm:$0xff] }
 0x17b   : > { %v1778_v41 = vld [vmem:[%s7896_s12 + $0x2d20] sm:$0xff]  ;;  %1777 = vst [vmem:[%s7904_s13 + $0xb40] sm:$0xff] %v1776_v40 }
 0x17c   : > { %v1780_v42 = vld [vmem:[%s7896_s12 + $0x2d40] sm:$0xff]  ;;  %1779 = vst [vmem:[%s7904_s13 + $0xb48] sm:$0xff] %v1778_v41 }
 0x17d   : > { %1781 = vst [vmem:[%s7904_s13 + $0xb50] sm:$0xff] %v1780_v42  ;;  %v1782_v43 = vld [vmem:[%s7896_s12 + $0x2d60] sm:$0xff] }
 0x17e   : > { %v1784_v44 = vld [vmem:[%s7896_s12 + $0x2d80] sm:$0xff]  ;;  %1783 = vst [vmem:[%s7904_s13 + $0xb58] sm:$0xff] %v1782_v43 }
 0x17f   : > { %v1786_v45 = vld [vmem:[%s7896_s12 + $0x2da0] sm:$0xff]  ;;  %1785 = vst [vmem:[%s7904_s13 + $0xb60] sm:$0xff] %v1784_v44 }
 0x180   : > { %1787 = vst [vmem:[%s7904_s13 + $0xb68] sm:$0xff] %v1786_v45  ;;  %v1788_v46 = vld [vmem:[%s7896_s12 + $0x2dc0] sm:$0xff] }
 0x181   : > { %v1790_v47 = vld [vmem:[%s7896_s12 + $0x2de0] sm:$0xff]  ;;  %1789 = vst [vmem:[%s7904_s13 + $0xb70] sm:$0xff] %v1788_v46 }
 0x182   : > { %v1792_v48 = vld [vmem:[%s7896_s12 + $0x2e00] sm:$0xff]  ;;  %1791 = vst [vmem:[%s7904_s13 + $0xb78] sm:$0xff] %v1790_v47 }
 0x183   : > { %1793 = vst [vmem:[%s7904_s13 + $0xb80] sm:$0xff] %v1792_v48  ;;  %v1794_v49 = vld [vmem:[%s7896_s12 + $0x2e20] sm:$0xff] }
 0x184   : > { %v1796_v50 = vld [vmem:[%s7896_s12 + $0x2e40] sm:$0xff]  ;;  %1795 = vst [vmem:[%s7904_s13 + $0xb88] sm:$0xff] %v1794_v49 }
 0x185   : > { %v1798_v51 = vld [vmem:[%s7896_s12 + $0x2e60] sm:$0xff]  ;;  %1797 = vst [vmem:[%s7904_s13 + $0xb90] sm:$0xff] %v1796_v50 }
 0x186   : > { %1799 = vst [vmem:[%s7904_s13 + $0xb98] sm:$0xff] %v1798_v51  ;;  %v1800_v52 = vld [vmem:[%s7896_s12 + $0x2e80] sm:$0xff] }
 0x187   : > { %v1802_v53 = vld [vmem:[%s7896_s12 + $0x2ea0] sm:$0xff]  ;;  %1801 = vst [vmem:[%s7904_s13 + $0xba0] sm:$0xff] %v1800_v52 }
 0x188   : > { %v1804_v54 = vld [vmem:[%s7896_s12 + $0x2ec0] sm:$0xff]  ;;  %1803 = vst [vmem:[%s7904_s13 + $0xba8] sm:$0xff] %v1802_v53 }
 0x189   : > { %1805 = vst [vmem:[%s7904_s13 + $0xbb0] sm:$0xff] %v1804_v54  ;;  %v1806_v55 = vld [vmem:[%s7896_s12 + $0x2ee0] sm:$0xff] }
 0x18a   : > { %v1808_v56 = vld [vmem:[%s7896_s12 + $0x2f00] sm:$0xff]  ;;  %1807 = vst [vmem:[%s7904_s13 + $0xbb8] sm:$0xff] %v1806_v55 }
 0x18b   : > { %v1810_v57 = vld [vmem:[%s7896_s12 + $0x2f20] sm:$0xff]  ;;  %1809 = vst [vmem:[%s7904_s13 + $0xbc0] sm:$0xff] %v1808_v56 }
 0x18c   : > { %1811 = vst [vmem:[%s7904_s13 + $0xbc8] sm:$0xff] %v1810_v57  ;;  %v1812_v58 = vld [vmem:[%s7896_s12 + $0x2f40] sm:$0xff] }
 0x18d   : > { %v1814_v59 = vld [vmem:[%s7896_s12 + $0x2f60] sm:$0xff]  ;;  %1813 = vst [vmem:[%s7904_s13 + $0xbd0] sm:$0xff] %v1812_v58 }
 0x18e   : > { %v1816_v60 = vld [vmem:[%s7896_s12 + $0x2f80] sm:$0xff]  ;;  %1815 = vst [vmem:[%s7904_s13 + $0xbd8] sm:$0xff] %v1814_v59 }
 0x18f   : > { %1817 = vst [vmem:[%s7904_s13 + $0xbe0] sm:$0xff] %v1816_v60  ;;  %v1818_v61 = vld [vmem:[%s7896_s12 + $0x2fa0] sm:$0xff] }
 0x190   : > { %v1820_v62 = vld [vmem:[%s7896_s12 + $0x2fc0] sm:$0xff]  ;;  %1819 = vst [vmem:[%s7904_s13 + $0xbe8] sm:$0xff] %v1818_v61 }
 0x191   : > { %v1822_v63 = vld [vmem:[%s7896_s12 + $0x2fe0] sm:$0xff]  ;;  %1821 = vst [vmem:[%s7904_s13 + $0xbf0] sm:$0xff] %v1820_v62 }
 0x192   : > { %1823 = vst [vmem:[%s7904_s13 + $0xbf8] sm:$0xff] %v1822_v63  ;;  %v1824_v0 = vld [vmem:[%s7896_s12 + $0x3000] sm:$0xff] }
 0x193   : > { %v1826_v1 = vld [vmem:[%s7896_s12 + $0x3020] sm:$0xff]  ;;  %1825 = vst [vmem:[%s7904_s13 + $0xc00] sm:$0xff] %v1824_v0 }
 0x194   : > { %v1828_v2 = vld [vmem:[%s7896_s12 + $0x3040] sm:$0xff]  ;;  %1827 = vst [vmem:[%s7904_s13 + $0xc08] sm:$0xff] %v1826_v1 }
 0x195   : > { %1829 = vst [vmem:[%s7904_s13 + $0xc10] sm:$0xff] %v1828_v2  ;;  %v1830_v3 = vld [vmem:[%s7896_s12 + $0x3060] sm:$0xff] }
 0x196   : > { %v1832_v4 = vld [vmem:[%s7896_s12 + $0x3080] sm:$0xff]  ;;  %1831 = vst [vmem:[%s7904_s13 + $0xc18] sm:$0xff] %v1830_v3 }
 0x197   : > { %v1834_v5 = vld [vmem:[%s7896_s12 + $0x30a0] sm:$0xff]  ;;  %1833 = vst [vmem:[%s7904_s13 + $0xc20] sm:$0xff] %v1832_v4 }
 0x198   : > { %1835 = vst [vmem:[%s7904_s13 + $0xc28] sm:$0xff] %v1834_v5  ;;  %v1836_v6 = vld [vmem:[%s7896_s12 + $0x30c0] sm:$0xff] }
 0x199   : > { %v1838_v7 = vld [vmem:[%s7896_s12 + $0x30e0] sm:$0xff]  ;;  %1837 = vst [vmem:[%s7904_s13 + $0xc30] sm:$0xff] %v1836_v6 }
 0x19a   : > { %1839 = vst [vmem:[%s7904_s13 + $0xc38] sm:$0xff] %v1838_v7 }
 0x19b PF: > { %p6316_p6 = scmp.ge.s32.totalorder %s7809_s25, 1  ;;  %p1862_p7 = scmp.lt.s32.totalorder %s7809_s25, 5 }
 0x19d   : > { %p1863_p8 = pnand %p6316_p6, %p1862_p7 }
 0x19e   : > { %s1869_s14 = sand.u32 (!%p1863_p8), 1, %s7793_s21   ;;  %s6317_s15 = sshll.u32 (!%p1863_p8), %s7801_s23, 1 }
 0x19f   : > { %1866 = sbr.rel (%p1863_p8) target bundleno = 1917 (0x77d), region = 78  ;;  %p1925_p9 = scmp.lt.s32.totalorder (!%p1863_p8), %s6317_s15, 7 }
 0x1a0   : > { %s6902_s16 = smul.u32 (!%p1863_p8), 3136, %s1869_s14  ;;  %s6318_s17 = sshll.u32 (!%p1863_p8), %s7801_s23, 5 }
 0x1a1   : > { %p1930_p10 = scmp.lt.s32.totalorder (!%p1863_p8), %s6318_s17, 127  ;;  %p6320_p11 = scmp.ne.s32.totalorder (!%p1863_p8), %s7801_s23, 0 }
 0x1a2   : > { %s8700_s21 = scalar_lea.vmem (!%p1863_p8), [#allocation3], %s6902_s16 }
 0x1a6   : > { %s9492_s15 = smov (!%p1925_p9, %s6317_s15), 7  ;;  %s9494_s17 = smov (!%p1930_p10, %s6318_s17), 127 }
 0x1a7   : > { %s1927_s20 = scalar_lea.vmem %s9480_s2, %s9492_s15  ;;  %s6903_s28 = smul.u32 28, %s9494_s17  ;;  %v7811_v8 = vmov (!%p6320_p11), 0.0  }
 0x1a8   : > { %1943 = sbr.rel (%p6320_p11) target bundleno = 431 (0x1af), region = 86  ;;  %1944 = vst [vmem:[#allocation2] sm:$0xff] (!%p6320_p11), %v7811_v8  ;;  %1945 = vst [vmem:[#allocation2 + $0x8] sm:$0xff] (!%p6320_p11), %v7811_v8 }
 0x1a9   : > { %s8698_s8 = scalar_lea.vmem %s9481_s3, %s6903_s28  ;;  %1946 = vst [vmem:[#allocation2 + $0x10] sm:$0xff] (!%p6320_p11), %v7811_v8  ;;  %1947 = vst [vmem:[#allocation2 + $0x18] sm:$0xff] (!%p6320_p11), %v7811_v8 }
 0x1aa   : > { %1948 = vst [vmem:[#allocation2 + $0x20] sm:$0xff] (!%p6320_p11), %v7811_v8  ;;  %1949 = vst [vmem:[#allocation2 + $0x28] sm:$0xff] (!%p6320_p11), %v7811_v8 }
 0x1ab   : > { %1950 = vst [vmem:[#allocation2 + $0x30] sm:$0xff] (!%p6320_p11), %v7811_v8 }
 0x1af PF: > { %v6953_v9 = vld [vmem:[%s8700_s21 + $0x404] ss:$8 sps:$4 sm:$0xff]   ;;  %v6955_v10 = vld [vmem:[%s8700_s21 + $0x400] ss:$8 sps:$4 sm:$0xff]   ;;  %v6956_v11 = vld [vmem:[%s8700_s21 + $0x414] ss:$8 sps:$4 sm:$0xff]   ;;  %v2361_v24 = vlaneseq }
 0x1b0   : > { %4767 = vmatprep.subr.bf16.mxu0 %v6953_v9  ;;  %v6958_v12 = vld [vmem:[%s8700_s21 + $0x410] ss:$8 sps:$4 sm:$0xff]   ;;  %v6959_v13 = vld [vmem:[%s8700_s21 + $0x424] ss:$8 sps:$4 sm:$0xff]   ;;  %v6961_v14 = vld [vmem:[%s8700_s21 + $0x420] ss:$8 sps:$4 sm:$0xff]  }
 0x1b1   : > { %4768 = vmatpush1.bf16.msra.mxu0 %v6955_v10  ;;  %v6962_v15 = vld [vmem:[%s8700_s21 + $0x434] ss:$8 sps:$4 sm:$0xff]   ;;  %v6964_v16 = vld [vmem:[%s8700_s21 + $0x430] ss:$8 sps:$4 sm:$0xff]   ;;  %v6965_v17 = vld [vmem:[%s8700_s21 + $0x444] ss:$8 sps:$4 sm:$0xff]  }
 0x1b2   : > { %4769 = vmatprep.subr.bf16.mxu0 %v6956_v11  ;;  %v6967_v18 = vld [vmem:[%s8700_s21 + $0x440] ss:$8 sps:$4 sm:$0xff]   ;;  %v6968_v19 = vld [vmem:[%s8700_s21 + $0x454] ss:$8 sps:$4 sm:$0xff]   ;;  %v6989_v20 = vld [vmem:[%s8700_s21 + $0x4] ss:$8 sps:$4 sm:$0xff]  }
 0x1b3   : > { %v6970_v21 = vld [vmem:[%s8700_s21 + $0x450] ss:$8 sps:$4 sm:$0xff]   ;;  %4603 = vmatprep.subr.bf16.mxu1 %v6989_v20  ;;  %v6993_v22 = vld [vmem:[%s8700_s21] ss:$8 sps:$4 sm:$0xff]   ;;  %v6995_v23 = vld [vmem:[%s8700_s21 + $0x14] ss:$8 sps:$4 sm:$0xff]  }
 0x1b4   : > { %v7812_v25 = vmov 1966171168   ;;  %v6971_v27 = vld [vmem:[%s8700_s21 + $0x464] ss:$8 sps:$4 sm:$0xff]   ;;  %4604 = vmatpush1.bf16.msra.mxu1 %v6993_v22  ;;  %v6999_v28 = vld [vmem:[%s8700_s21 + $0x10] ss:$8 sps:$4 sm:$0xff]  }
 0x1b5   : > { %4770 = vmatpush1.bf16.msra.mxu0 %v6958_v12  ;;  %v2392_v26 = vunpack.c.l.s4 %v7812_v25  ;;  %4605 = vmatprep.subr.bf16.mxu1 %v6995_v23  ;;  %v7001_v29 = vld [vmem:[%s8700_s21 + $0x24] ss:$8 sps:$4 sm:$0xff]   ;;  %v6973_v30 = vld [vmem:[%s8700_s21 + $0x460] ss:$8 sps:$4 sm:$0xff]   ;;  %v6974_v31 = vld [vmem:[%s8700_s21 + $0x474] ss:$8 sps:$4 sm:$0xff]  }
 0x1b6   : > { %4771 = vmatprep.subr.bf16.mxu0 %v6959_v13  ;;  %v8724_v32 = vshrl.u32 %v2361_v24, 7  ;;  %v7005_v34 = vld [vmem:[%s8700_s21 + $0x20] ss:$8 sps:$4 sm:$0xff]   ;;  %v7007_v35 = vld [vmem:[%s8700_s21 + $0x34] ss:$8 sps:$4 sm:$0xff]   ;;  %vm4599_vm0 = vcmask 523264  }
 0x1b7   : > { %v2393_v33 = vunpack.c.0.s8 %v2392_v26  ;;  %v6976_v36 = vld [vmem:[%s8700_s21 + $0x470] ss:$8 sps:$4 sm:$0xff]   ;;  %v6977_v37 = vld [vmem:[%s8700_s21 + $0x484] ss:$8 sps:$4 sm:$0xff]   ;;  %v6979_v43 = vld [vmem:[%s8700_s21 + $0x480] ss:$8 sps:$4 sm:$0xff]  }
 0x1b8   : > { %4606 = vmatpush1.bf16.msra.mxu1 %v6999_v28  ;;  %v7011_v38 = vld [vmem:[%s8700_s21 + $0x30] ss:$8 sps:$4 sm:$0xff]   ;;  %v7013_v40 = vld [vmem:[%s8700_s21 + $0x44] ss:$8 sps:$4 sm:$0xff]   ;;  %v6980_v44 = vld [vmem:[%s8700_s21 + $0x494] ss:$8 sps:$4 sm:$0xff]  }
 0x1b9   : > { %4772 = vmatpush1.bf16.msra.mxu0 %v6961_v14  ;;  %4607 = vmatprep.subr.bf16.mxu1 %v7001_v29  ;;  %v8732_v39 = vsub.s32 %v2393_v33, %v8724_v32  ;;  %v7015_v41 = vld [vmem:[%s9478_s0 + $0x8] ss:$25 sps:$4 sm:$0xff]   ;;  %v7018_v42 = vld [vmem:[%s9478_s0 + $0x3a] ss:$25 sps:$4 sm:$0xff]   ;;  %p6826_p12 = scmp.ne.s32.totalorder %s7801_s23, 3 }
 0x1ba   : > { %4773 = vmatprep.subr.bf16.mxu0 %v6962_v15  ;;  %v7024_v47 = vld [vmem:[%s8700_s21 + $0x40] ss:$8 sps:$4 sm:$0xff]   ;;  %v7025_v49 = vld [vmem:[%s8700_s21 + $0x54] ss:$8 sps:$4 sm:$0xff]   ;;  %v6982_v50 = vld [vmem:[%s8700_s21 + $0x490] ss:$8 sps:$4 sm:$0xff]  }
 0x1bb   : > { %v8744_v45 = vrot.slane %v7015_v41, %v8732_v39  ;;  %v8747_v46 = vrot.slane %v7018_v42, %v8732_v39  ;;  %v6983_v52 = vld [vmem:[%s8700_s21 + $0x4a4] ss:$8 sps:$4 sm:$0xff]   ;;  %v7030_v53 = vld [vmem:[%s8700_s21 + $0x50] ss:$8 sps:$4 sm:$0xff]   ;;  %v6985_v55 = vld [vmem:[%s8700_s21 + $0x4a0] ss:$8 sps:$4 sm:$0xff]  }
 0x1bc   : > { %4608 = vmatpush1.bf16.msra.mxu1 %v7005_v34  ;;  %v7031_v54 = vld [vmem:[%s8700_s21 + $0x64] ss:$8 sps:$4 sm:$0xff]   ;;  %v6986_v56 = vld [vmem:[%s8700_s21 + $0x4b4] ss:$8 sps:$4 sm:$0xff]   ;;  %v7036_v57 = vld [vmem:[%s8700_s21 + $0x60] ss:$8 sps:$4 sm:$0xff]  }
 0x1bd   : > { %4774 = vmatpush1.bf16.msra.mxu0 %v6964_v16  ;;  %4609 = vmatprep.subr.bf16.mxu1 %v7007_v35  ;;  %v2488_v48 = vcombine.high %v8744_v45, %v8747_v46  ;;  %v7037_v58 = vld [vmem:[%s8700_s21 + $0x74] ss:$8 sps:$4 sm:$0xff]   ;;  %v6988_v59 = vld [vmem:[%s8700_s21 + $0x4b0] ss:$8 sps:$4 sm:$0xff]   ;;  %v6991_v60 = vld [vmem:[%s8700_s21 + $0x4c4] ss:$8 sps:$4 sm:$0xff]   ;;  %v2487_v13 = vcombine.low %v8744_v45, %v8747_v46 }
 0x1be   : > { %4775 = vmatprep.subr.bf16.mxu0 %v6965_v17  ;;  %v7042_v61 = vld [vmem:[%s8700_s21 + $0x70] ss:$8 sps:$4 sm:$0xff]   ;;  %v7043_v62 = vld [vmem:[%s8700_s21 + $0x84] ss:$8 sps:$4 sm:$0xff]   ;;  %v6994_v63 = vld [vmem:[%s8700_s21 + $0x4c0] ss:$8 sps:$4 sm:$0xff]  }
 0x1bf   : > { %v8755_v51 = vrot.slane %v2488_v48, %v8732_v39  ;;  %v6997_v0 = vld [vmem:[%s8700_s21 + $0x4d4] ss:$8 sps:$4 sm:$0xff]   ;;  %v7048_v1 = vld [vmem:[%s8700_s21 + $0x80] ss:$8 sps:$4 sm:$0xff]   ;;  %v7000_v3 = vld [vmem:[%s8700_s21 + $0x4d0] ss:$8 sps:$4 sm:$0xff]   ;;  %v8800_v20 = vrot.slane %v2487_v13, %v8732_v39 }
 0x1c0   : > { %4610 = vmatpush1.bf16.msra.mxu1 %v7011_v38  ;;  %v7049_v2 = vld [vmem:[%s8700_s21 + $0x94] ss:$8 sps:$4 sm:$0xff]   ;;  %v7003_v4 = vld [vmem:[%s8700_s21 + $0x4e4] ss:$8 sps:$4 sm:$0xff]   ;;  %v7054_v5 = vld [vmem:[%s8700_s21 + $0x90] ss:$8 sps:$4 sm:$0xff]  }
 0x1c1   : > { %4776 = vmatpush1.bf16.msra.mxu0 %v6967_v18  ;;  %4611 = vmatprep.subr.bf16.mxu1 %v7013_v40  ;;  %v7055_v6 = vld [vmem:[%s8700_s21 + $0xa4] ss:$8 sps:$4 sm:$0xff]   ;;  %v7006_v7 = vld [vmem:[%s8700_s21 + $0x4e0] ss:$8 sps:$4 sm:$0xff]   ;;  %v7009_v8 = vld [vmem:[%s8700_s21 + $0x4f4] ss:$8 sps:$4 sm:$0xff]   ;;  %v2521_v22 = vcombine.high %v8755_v51, %v8755_v51 }
 0x1c2   : > { %4777 = vmatprep.subr.bf16.mxu0 %v6968_v19  ;;  %4799 = vmatprep.mubr.bf16.mxu0 %v8755_v51  ;;  %v7017_v9 = vld [vmem:[%s9478_s0 + $0xc] ss:$25 sps:$4 sm:$0xff]   ;;  %v7020_v10 = vld [vmem:[%s9478_s0 + $0x3e] ss:$25 sps:$4 sm:$0xff]  }
 0x1c3   : > { %v7060_v11 = vld [vmem:[%s8700_s21 + $0xa0] ss:$8 sps:$4 sm:$0xff]   ;;  %v7061_v12 = vld [vmem:[%s8700_s21 + $0xb4] ss:$8 sps:$4 sm:$0xff]   ;;  %v7012_v14 = vld [vmem:[%s8700_s21 + $0x4f0] ss:$8 sps:$4 sm:$0xff]   ;;  %v8793_v17 = vrot.slane %v7017_v9, %v8732_v39  ;;  %v8796_v18 = vrot.slane %v7020_v10, %v8732_v39 }
 0x1c4   : > { %4612 = vmatpush1.bf16.msra.mxu1 %v7024_v47  ;;  %v7023_v15 = vld [vmem:[%s8700_s21 + $0x504] ss:$8 sps:$4 sm:$0xff]   ;;  %v7066_v16 = vld [vmem:[%s8700_s21 + $0xb0] ss:$8 sps:$4 sm:$0xff]   ;;  %v7021_v23 = vld [vmem:[%s8700_s21 + $0x500] ss:$8 sps:$4 sm:$0xff]  }
 0x1c5   : > { %4778 = vmatpush1.bf16.msra.mxu0 %v6970_v21  ;;  %4613 = vmatprep.subr.bf16.mxu1 %v7025_v49  ;;  %v7067_v19 = vld [vmem:[%s8700_s21 + $0xc4] ss:$8 sps:$4 sm:$0xff]   ;;  %v7029_v25 = vld [vmem:[%s8700_s21 + $0x514] ss:$8 sps:$4 sm:$0xff]   ;;  %v7072_v28 = vld [vmem:[%s8700_s21 + $0xc0] ss:$8 sps:$4 sm:$0xff]  }
 0x1c6   : > { %4779 = vmatprep.subr.bf16.mxu0 %v6971_v27  ;;  %v7091_v21 = vld [vmem:[%s9478_s0] ss:$25 sps:$4 sm:$0xff]   ;;  %v7094_v26 = vld [vmem:[%s9478_s0 + $0x32] ss:$25 sps:$4 sm:$0xff]   ;;  %v2489_v27 = vcombine.low %v8793_v17, %v8796_v18 }
 0x1c7   : > { %v2397_v29 = vrot.slane %v7091_v21, %v8732_v39  ;;  %v7027_v33 = vld [vmem:[%s8700_s21 + $0x510] ss:$8 sps:$4 sm:$0xff]   ;;  %v7035_v34 = vld [vmem:[%s8700_s21 + $0x524] ss:$8 sps:$4 sm:$0xff]   ;;  %v7033_v40 = vld [vmem:[%s8700_s21 + $0x520] ss:$8 sps:$4 sm:$0xff]  }
 0x1c8   : > { %4614 = vmatpush1.bf16.msra.mxu1 %v7030_v53  ;;  %v7041_v41 = vld [vmem:[%s8700_s21 + $0x534] ss:$8 sps:$4 sm:$0xff]   ;;  %v7084_v42 = vld [vmem:[%s8700_s21 + $0xe0] ss:$8 sps:$4 sm:$0xff]   ;;  %v7047_v45 = vld [vmem:[%s8700_s21 + $0x544] ss:$8 sps:$4 sm:$0xff]  }
 0x1c9   : > { %4780 = vmatpush1.bf16.msra.mxu0 %v6973_v30  ;;  %4615 = vmatprep.subr.bf16.mxu1 %v7031_v54  ;;  %v7073_v30 = vld [vmem:[%s8700_s21 + $0xd4] ss:$8 sps:$4 sm:$0xff]   ;;  %v7090_v47 = vld [vmem:[%s8700_s21 + $0xf0] ss:$8 sps:$4 sm:$0xff]   ;;  %v7099_v48 = vld [vmem:[%s8700_s21 + $0x104] ss:$8 sps:$4 sm:$0xff]  }
 0x1ca   : > { %4781 = vmatprep.subr.bf16.mxu0 %v6974_v31  ;;  %v2411_v31 = vrot.slane %v7094_v26, %v8732_v39  ;;  %v7045_v49 = vld [vmem:[%s8700_s21 + $0x540] ss:$8 sps:$4 sm:$0xff]   ;;  %v7105_v54 = vld [vmem:[%s8700_s21 + $0x114] ss:$8 sps:$4 sm:$0xff]   ;;  %v7127_v9 = vld [vmem:[%s8700_s21 + $0x150] ss:$8 sps:$4 sm:$0xff]  }
 0x1cb   : > { %v7135_v10 = vld [vmem:[%s8700_s21 + $0x164] ss:$8 sps:$4 sm:$0xff]   ;;  %v7133_v13 = vld [vmem:[%s8700_s21 + $0x160] ss:$8 sps:$4 sm:$0xff]   ;;  %v7153_v26 = vld [vmem:[%s8700_s21 + $0x194] ss:$8 sps:$4 sm:$0xff]  }
 0x1cc   : > { %4616 = vmatpush1.bf16.msra.mxu1 %v7036_v57  ;;  %v2420_v35 = vcombine.high %v2397_v29, %v2411_v31  ;;  %v2419_v46 = vcombine.low %v2397_v29, %v2411_v31  ;;  %v7103_v57 = vld [vmem:[%s8700_s21 + $0x110] ss:$8 sps:$4 sm:$0xff]   ;;  %v7147_v21 = vld [vmem:[%s8700_s21 + $0x184] ss:$8 sps:$4 sm:$0xff]  }
 0x1cd   : > { %4782 = vmatpush1.bf16.msra.mxu0 %v6976_v36  ;;  %4617 = vmatprep.subr.bf16.mxu1 %v7037_v58  ;;  %v7078_v36 = vld [vmem:[%s8700_s21 + $0xd0] ss:$8 sps:$4 sm:$0xff]   ;;  %v7111_v58 = vld [vmem:[%s8700_s21 + $0x124] ss:$8 sps:$4 sm:$0xff]  }
 0x1ce   : > { %4783 = vmatprep.subr.bf16.mxu0 %v6977_v37  ;;  %v7079_v37 = vld [vmem:[%s8700_s21 + $0xe4] ss:$8 sps:$4 sm:$0xff]   ;;  %v2443_v38 = vrot.slane %v2420_v35, %v8732_v39  ;;  %v8835_v51 = vrot.slane %v2419_v46, %v8732_v39  ;;  %v7157_v35 = vld [vmem:[%s8700_s21 + $0x1a0] ss:$8 sps:$4 sm:$0xff]  }
 0x1cf   : > { %v7114_v29 = vld [vmem:[%s8700_s21 + $0x5e4] ss:$8 sps:$4 sm:$0xff]  }
 0x1d0   : > { %4618 = vmatpush1.bf16.msra.mxu1 %v7042_v61  ;;  %4635 = vmatprep.mubr.bf16.mxu1 %v2443_v38  ;;  %v2453_v53 = vcombine.high %v2443_v38, %v2443_v38  ;;  %v7109_v61 = vld [vmem:[%s8700_s21 + $0x120] ss:$8 sps:$4 sm:$0xff]   ;;  %v7159_v31 = vld [vmem:[%s8700_s21 + $0x1a4] ss:$8 sps:$4 sm:$0xff]  }
 0x1d1   : > { %4784 = vmatpush1.bf16.msra.mxu0 %v6979_v43  ;;  %4619 = vmatprep.subr.bf16.mxu1 %v7043_v62  ;;  %v7085_v43 = vld [vmem:[%s8700_s21 + $0xf4] ss:$8 sps:$4 sm:$0xff]   ;;  %v7126_v38 = vld [vmem:[%s8700_s21 + $0x604] ss:$8 sps:$4 sm:$0xff]  }
 0x1d2   : > { %4785 = vmatprep.subr.bf16.mxu0 %v6980_v44  ;;  %v7039_v44 = vld [vmem:[%s8700_s21 + $0x530] ss:$8 sps:$4 sm:$0xff]   ;;  %v7117_v62 = vld [vmem:[%s8700_s21 + $0x134] ss:$8 sps:$4 sm:$0xff]  }
 0x1d4   : > { %4620 = vmatpush1.bf16.msra.mxu1 %v7048_v1  ;;  %v7115_v1 = vld [vmem:[%s8700_s21 + $0x130] ss:$8 sps:$4 sm:$0xff]  }
 0x1d5   : > { %4786 = vmatpush1.bf16.msra.mxu0 %v6982_v50  ;;  %4621 = vmatprep.subr.bf16.mxu1 %v7049_v2  ;;  %v7053_v50 = vld [vmem:[%s8700_s21 + $0x554] ss:$8 sps:$4 sm:$0xff]   ;;  %v7123_v2 = vld [vmem:[%s8700_s21 + $0x144] ss:$8 sps:$4 sm:$0xff]  }
 0x1d6   : > { %4787 = vmatprep.subr.bf16.mxu0 %v6983_v52  ;;  %v7097_v52 = vld [vmem:[%s8700_s21 + $0x100] ss:$8 sps:$4 sm:$0xff]  }
 0x1d8   : > { %4622 = vmatpush1.bf16.msra.mxu1 %v7054_v5  ;;  %v7121_v5 = vld [vmem:[%s8700_s21 + $0x140] ss:$8 sps:$4 sm:$0xff]  }
 0x1d9   : > { %4788 = vmatpush1.bf16.msra.mxu0 %v6985_v55  ;;  %4623 = vmatprep.subr.bf16.mxu1 %v7055_v6  ;;  %v7051_v55 = vld [vmem:[%s8700_s21 + $0x550] ss:$8 sps:$4 sm:$0xff]   ;;  %v7129_v6 = vld [vmem:[%s8700_s21 + $0x154] ss:$8 sps:$4 sm:$0xff]  }
 0x1da   : > { %4789 = vmatprep.subr.bf16.mxu0 %v6986_v56  ;;  %v7059_v56 = vld [vmem:[%s8700_s21 + $0x564] ss:$8 sps:$4 sm:$0xff]  }
 0x1dc   : > { %4624 = vmatpush1.bf16.msra.mxu1 %v7060_v11  ;;  %v7081_v11 = vld [vmem:[%s8700_s21 + $0x5a0] ss:$8 sps:$4 sm:$0xff]  }
 0x1dd   : > { %4790 = vmatpush1.bf16.msra.mxu0 %v6988_v59  ;;  %4625 = vmatprep.subr.bf16.mxu1 %v7061_v12  ;;  %v7057_v59 = vld [vmem:[%s8700_s21 + $0x560] ss:$8 sps:$4 sm:$0xff]   ;;  %v7089_v12 = vld [vmem:[%s8700_s21 + $0x5b4] ss:$8 sps:$4 sm:$0xff]  }
 0x1de   : > { %4791 = vmatprep.subr.bf16.mxu0 %v6991_v60  ;;  %v7065_v60 = vld [vmem:[%s8700_s21 + $0x574] ss:$8 sps:$4 sm:$0xff]  }
 0x1e0   : > { %4626 = vmatpush1.bf16.msra.mxu1 %v7066_v16  ;;  %v7102_v16 = vld [vmem:[%s8700_s21 + $0x5c4] ss:$8 sps:$4 sm:$0xff]  }
 0x1e1   : > { %4792 = vmatpush1.bf16.msra.mxu0 %v6994_v63  ;;  %4627 = vmatprep.subr.bf16.mxu1 %v7067_v19  ;;  %v7063_v63 = vld [vmem:[%s8700_s21 + $0x570] ss:$8 sps:$4 sm:$0xff]  }
 0x1e2   : > { %4793 = vmatprep.subr.bf16.mxu0 %v6997_v0  ;;  %v7071_v0 = vld [vmem:[%s8700_s21 + $0x584] ss:$8 sps:$4 sm:$0xff]   ;;  %v7139_v19 = vld [vmem:[%s8700_s21 + $0x170] ss:$8 sps:$4 sm:$0xff]  }
 0x1e4   : > { %4628 = vmatpush1.bf16.msra.mxu1 %v7072_v28  ;;  %v7106_v28 = vld [vmem:[%s8700_s21 + $0x5d0] ss:$8 sps:$4 sm:$0xff]  }
 0x1e5   : > { %4794 = vmatpush1.bf16.msra.mxu0 %v7000_v3  ;;  %4629 = vmatprep.subr.bf16.mxu1 %v7073_v30  ;;  %v7069_v3 = vld [vmem:[%s8700_s21 + $0x580] ss:$8 sps:$4 sm:$0xff]   ;;  %v7151_v30 = vld [vmem:[%s8700_s21 + $0x190] ss:$8 sps:$4 sm:$0xff]  }
 0x1e6   : > { %4795 = vmatprep.subr.bf16.mxu0 %v7003_v4  ;;  %v7077_v4 = vld [vmem:[%s8700_s21 + $0x594] ss:$8 sps:$4 sm:$0xff]  }
 0x1e8   : > { %4630 = vmatpush1.bf16.msra.mxu1 %v7078_v36  ;;  %v7165_v36 = vld [vmem:[%s8700_s21 + $0x1b4] ss:$8 sps:$4 sm:$0xff]  }
 0x1e9   : > { %4796 = vmatpush1.bf16.msra.mxu0 %v7006_v7  ;;  %4631 = vmatprep.subr.bf16.mxu1 %v7079_v37  ;;  %v7075_v7 = vld [vmem:[%s8700_s21 + $0x590] ss:$8 sps:$4 sm:$0xff]  }
 0x1ea   : > { %4797 = vmatprep.subr.bf16.mxu0 %v7009_v8  ;;  %v7083_v8 = vld [vmem:[%s8700_s21 + $0x5a4] ss:$8 sps:$4 sm:$0xff]   ;;  %v7118_v37 = vld [vmem:[%s8700_s21 + $0x5f0] ss:$8 sps:$4 sm:$0xff]  }
 0x1ec   : > { %4632 = vmatpush1.bf16.msra.mxu1 %v7084_v42  ;;  %v7171_v42 = vld [vmem:[%s8700_s21 + $0x1c4] ss:$8 sps:$4 sm:$0xff]  }
 0x1ed   : > { %4798 = vmatpush1.bf16.msra.mxu0 %v7012_v14  ;;  %4633 = vmatprep.subr.bf16.mxu1 %v7085_v43  ;;  %v7141_v14 = vld [vmem:[%s8700_s21 + $0x174] ss:$8 sps:$4 sm:$0xff]   ;;  %v2519_v43 = vcombine.high %v8800_v20, %v8800_v20 }
 0x1ee   : > { %4808 = vmatprep.subr.bf16.mxu0 %v7023_v15  ;;  %v7087_v15 = vld [vmem:[%s8700_s21 + $0x5b0] ss:$8 sps:$4 sm:$0xff]  }
 0x1f0   : > { %4800 = vmatmul.mubr.bf16.vlgmr.msra.gmra.mrb[0].mxu0 %v8800_v20  ;;  %4634 = vmatpush1.bf16.msra.mxu1 %v7090_v47  ;;  %v7169_v47 = vld [vmem:[%s8700_s21 + $0x1c0] ss:$8 sps:$4 sm:$0xff]  }
 0x1f1   : > { %4809 = vmatpush1.bf16.msra.mxu0 %v7021_v23  ;;  %4840 = vmatprep.mubr.bf16.mxu0 %v2521_v22  ;;  %v7100_v22 = vld [vmem:[%s8700_s21 + $0x5c0] ss:$8 sps:$4 sm:$0xff]   ;;  %v7108_v23 = vld [vmem:[%s8700_s21 + $0x5d4] ss:$8 sps:$4 sm:$0xff]  }
 0x1f2   : > { %4810 = vmatprep.subr.bf16.mxu0 %v7029_v25  ;;  %4644 = vmatprep.subr.bf16.mxu1 %v7099_v48  ;;  %v7145_v25 = vld [vmem:[%s8700_s21 + $0x180] ss:$8 sps:$4 sm:$0xff]   ;;  %v7177_v48 = vld [vmem:[%s8700_s21 + $0x1d4] ss:$8 sps:$4 sm:$0xff]  }
 0x1f3   : > { %4636 = vmatmul.mubr.bf16.vlgmr.msra.gmra.mrb[0].mxu1 %v8835_v51  ;;  %v7093_v20 = vld [vmem:[%s9478_s0 + $0x4] ss:$25 sps:$4 sm:$0xff]  }
 0x1f4   : > { %4645 = vmatpush1.bf16.msra.mxu1 %v7097_v52  ;;  %4676 = vmatprep.mubr.bf16.mxu1 %v2453_v53  ;;  %v7138_v52 = vld [vmem:[%s8700_s21 + $0x624] ss:$8 sps:$4 sm:$0xff]   ;;  %v7175_v53 = vld [vmem:[%s8700_s21 + $0x1d0] ss:$8 sps:$4 sm:$0xff]  }
 0x1f5   : > { %4811 = vmatpush1.bf16.msra.mxu0 %v7027_v33  ;;  %4646 = vmatprep.subr.bf16.mxu1 %v7105_v54  ;;  %v7112_v33 = vld [vmem:[%s8700_s21 + $0x5e0] ss:$8 sps:$4 sm:$0xff]   ;;  %v7183_v54 = vld [vmem:[%s8700_s21 + $0x1e4] ss:$8 sps:$4 sm:$0xff]  }
 0x1f6   : > { %4812 = vmatprep.subr.bf16.mxu0 %v7035_v34  ;;  %v7120_v34 = vld [vmem:[%s8700_s21 + $0x5f4] ss:$8 sps:$4 sm:$0xff]  }
 0x1f8   : > { %4647 = vmatpush1.bf16.msra.mxu1 %v7103_v57  ;;  %v7181_v57 = vld [vmem:[%s8700_s21 + $0x1e0] ss:$8 sps:$4 sm:$0xff]  }
 0x1f9   : > { %4813 = vmatpush1.bf16.msra.mxu0 %v7033_v40  ;;  %4648 = vmatprep.subr.bf16.mxu1 %v7111_v58  ;;  %v2490_v40 = vcombine.high %v8793_v17, %v8796_v18  ;;  %v7189_v58 = vld [vmem:[%s8700_s21 + $0x1f4] ss:$8 sps:$4 sm:$0xff]   ;;  %v7226_v17 = vld [vmem:[%s8700_s21 + $0x710] ss:$8 sps:$4 sm:$0xff]   ;;  %v7234_v18 = vld [vmem:[%s8700_s21 + $0x724] ss:$8 sps:$4 sm:$0xff]  }
 0x1fa   : > { %4814 = vmatprep.subr.bf16.mxu0 %v7041_v41  ;;  %v7163_v41 = vld [vmem:[%s8700_s21 + $0x1b0] ss:$8 sps:$4 sm:$0xff]  }
 0x1fb   : > { %v8891_v46 = vrot.slane %v2490_v40, %v8732_v39  ;;  %v7235_v40 = vld [vmem:[%s8700_s21 + $0x270] ss:$8 sps:$4 sm:$0xff]  }
 0x1fc   : > { %4649 = vmatpush1.bf16.msra.mxu1 %v7109_v61  ;;  %v7142_v61 = vld [vmem:[%s8700_s21 + $0x630] ss:$8 sps:$4 sm:$0xff]  }
 0x1fd   : > { %4815 = vmatpush1.bf16.msra.mxu0 %v7039_v44  ;;  %4650 = vmatprep.subr.bf16.mxu1 %v7117_v62  ;;  %v7124_v44 = vld [vmem:[%s8700_s21 + $0x600] ss:$8 sps:$4 sm:$0xff]   ;;  %v7150_v62 = vld [vmem:[%s8700_s21 + $0x644] ss:$8 sps:$4 sm:$0xff]  }
 0x1fe   : > { %4816 = vmatprep.subr.bf16.mxu0 %v7047_v45  ;;  %v7132_v45 = vld [vmem:[%s8700_s21 + $0x614] ss:$8 sps:$4 sm:$0xff]  }
 0x200   : > { %4651 = vmatpush1.bf16.msra.mxu1 %v7115_v1 }
 0x201   : > { %4817 = vmatpush1.bf16.msra.mxu0 %v7045_v49  ;;  %4652 = vmatprep.subr.bf16.mxu1 %v7123_v2  ;;  %v7096_v49 = vld [vmem:[%s9478_s0 + $0x36] ss:$25 sps:$4 sm:$0xff]   ;;  %v2451_v2 = vcombine.high %v8835_v51, %v8835_v51  ;;  %v7162_v51 = vld [vmem:[%s8700_s21 + $0x664] ss:$8 sps:$4 sm:$0xff]  }
 0x202   : > { %4818 = vmatprep.subr.bf16.mxu0 %v7053_v50  ;;  %v7130_v50 = vld [vmem:[%s8700_s21 + $0x610] ss:$8 sps:$4 sm:$0xff]  }
 0x204   : > { %4653 = vmatpush1.bf16.msra.mxu1 %v7121_v5  ;;  %v7193_v5 = vld [vmem:[%s8700_s21 + $0x200] ss:$8 sps:$4 sm:$0xff]  }
 0x205   : > { %4819 = vmatpush1.bf16.msra.mxu0 %v7051_v55  ;;  %4654 = vmatprep.subr.bf16.mxu1 %v7129_v6  ;;  %v7136_v55 = vld [vmem:[%s8700_s21 + $0x620] ss:$8 sps:$4 sm:$0xff]   ;;  %v7201_v6 = vld [vmem:[%s8700_s21 + $0x214] ss:$8 sps:$4 sm:$0xff]  }
 0x206   : > { %4820 = vmatprep.subr.bf16.mxu0 %v7059_v56  ;;  %v7144_v56 = vld [vmem:[%s8700_s21 + $0x634] ss:$8 sps:$4 sm:$0xff]  }
 0x208   : > { %4655 = vmatpush1.bf16.msra.mxu1 %v7127_v9  ;;  %v7199_v9 = vld [vmem:[%s8700_s21 + $0x210] ss:$8 sps:$4 sm:$0xff]  }
 0x209   : > { %4821 = vmatpush1.bf16.msra.mxu0 %v7057_v59  ;;  %4656 = vmatprep.subr.bf16.mxu1 %v7135_v10  ;;  %v8911_v59 = vrot.slane %v7093_v20, %v8732_v39  ;;  %v7207_v10 = vld [vmem:[%s8700_s21 + $0x224] ss:$8 sps:$4 sm:$0xff]   ;;  %v7247_v20 = vld [vmem:[%s8700_s21 + $0x290] ss:$8 sps:$4 sm:$0xff]  }
 0x20a   : > { %4822 = vmatprep.subr.bf16.mxu0 %v7065_v60  ;;  %v8914_v60 = vrot.slane %v7096_v49, %v8732_v39  ;;  %v7255_v49 = vld [vmem:[%s8700_s21 + $0x2a4] ss:$8 sps:$4 sm:$0xff]  }
 0x20c   : > { %4657 = vmatpush1.bf16.msra.mxu1 %v7133_v13  ;;  %v2422_v1 = vcombine.high %v8911_v59, %v8914_v60  ;;  %v7205_v13 = vld [vmem:[%s8700_s21 + $0x220] ss:$8 sps:$4 sm:$0xff]  }
 0x20d   : > { %4823 = vmatpush1.bf16.msra.mxu0 %v7063_v63  ;;  %4658 = vmatprep.subr.bf16.mxu1 %v7141_v14  ;;  %v7187_v63 = vld [vmem:[%s8700_s21 + $0x1f0] ss:$8 sps:$4 sm:$0xff]   ;;  %v7213_v14 = vld [vmem:[%s8700_s21 + $0x234] ss:$8 sps:$4 sm:$0xff]  }
 0x20e   : > { %4824 = vmatprep.subr.bf16.mxu0 %v7071_v0  ;;  %v7195_v0 = vld [vmem:[%s8700_s21 + $0x204] ss:$8 sps:$4 sm:$0xff]  }
 0x210   : > { %4659 = vmatpush1.bf16.msra.mxu1 %v7139_v19  ;;  %v7211_v19 = vld [vmem:[%s8700_s21 + $0x230] ss:$8 sps:$4 sm:$0xff]  }
 0x211   : > { %4825 = vmatpush1.bf16.msra.mxu0 %v7069_v3  ;;  %4660 = vmatprep.subr.bf16.mxu1 %v7147_v21  ;;  %v7148_v3 = vld [vmem:[%s8700_s21 + $0x640] ss:$8 sps:$4 sm:$0xff]   ;;  %v7219_v21 = vld [vmem:[%s8700_s21 + $0x244] ss:$8 sps:$4 sm:$0xff]  }
 0x212   : > { %4826 = vmatprep.subr.bf16.mxu0 %v7077_v4  ;;  %v7156_v4 = vld [vmem:[%s8700_s21 + $0x654] ss:$8 sps:$4 sm:$0xff]  }
 0x214   : > { %4661 = vmatpush1.bf16.msra.mxu1 %v7145_v25  ;;  %v7217_v25 = vld [vmem:[%s8700_s21 + $0x240] ss:$8 sps:$4 sm:$0xff]  }
 0x215   : > { %4827 = vmatpush1.bf16.msra.mxu0 %v7075_v7  ;;  %4662 = vmatprep.subr.bf16.mxu1 %v7153_v26  ;;  %v8929_v7 = vrot.slane %v2422_v1, %v8732_v39  ;;  %v7225_v26 = vld [vmem:[%s8700_s21 + $0x254] ss:$8 sps:$4 sm:$0xff]   ;;  %v7265_v1 = vld [vmem:[%s8700_s21 + $0x2c0] ss:$8 sps:$4 sm:$0xff]  }
 0x216   : > { %4828 = vmatprep.subr.bf16.mxu0 %v7083_v8  ;;  %v7154_v8 = vld [vmem:[%s8700_s21 + $0x650] ss:$8 sps:$4 sm:$0xff]  }
 0x218   : > { %4663 = vmatpush1.bf16.msra.mxu1 %v7151_v30  ;;  %v7223_v30 = vld [vmem:[%s8700_s21 + $0x250] ss:$8 sps:$4 sm:$0xff]  }
 0x219   : > { %4829 = vmatpush1.bf16.msra.mxu0 %v7081_v11  ;;  %4664 = vmatprep.subr.bf16.mxu1 %v7159_v31  ;;  %v7160_v11 = vld [vmem:[%s8700_s21 + $0x660] ss:$8 sps:$4 sm:$0xff]   ;;  %v7231_v31 = vld [vmem:[%s8700_s21 + $0x264] ss:$8 sps:$4 sm:$0xff]  }
 0x21a   : > { %4830 = vmatprep.subr.bf16.mxu0 %v7089_v12  ;;  %v7168_v12 = vld [vmem:[%s8700_s21 + $0x674] ss:$8 sps:$4 sm:$0xff]  }
 0x21c   : > { %4665 = vmatpush1.bf16.msra.mxu1 %v7157_v35  ;;  %v7229_v35 = vld [vmem:[%s8700_s21 + $0x260] ss:$8 sps:$4 sm:$0xff]  }
 0x21d   : > { %4831 = vmatpush1.bf16.msra.mxu0 %v7087_v15  ;;  %4666 = vmatprep.subr.bf16.mxu1 %v7165_v36  ;;  %v7166_v15 = vld [vmem:[%s8700_s21 + $0x670] ss:$8 sps:$4 sm:$0xff]   ;;  %v7237_v36 = vld [vmem:[%s8700_s21 + $0x274] ss:$8 sps:$4 sm:$0xff]  }
 0x21e   : > { %4832 = vmatprep.subr.bf16.mxu0 %v7102_v16  ;;  %v7174_v16 = vld [vmem:[%s8700_s21 + $0x684] ss:$8 sps:$4 sm:$0xff]  }
 0x220   : > { %4667 = vmatpush1.bf16.msra.mxu1 %v7163_v41  ;;  %v7243_v41 = vld [vmem:[%s8700_s21 + $0x284] ss:$8 sps:$4 sm:$0xff]  }
 0x221   : > { %4833 = vmatpush1.bf16.msra.mxu0 %v7100_v22  ;;  %4668 = vmatprep.subr.bf16.mxu1 %v7171_v42  ;;  %v7172_v22 = vld [vmem:[%s8700_s21 + $0x680] ss:$8 sps:$4 sm:$0xff]  }
 0x222   : > { %4834 = vmatprep.subr.bf16.mxu0 %v7108_v23  ;;  %v7180_v23 = vld [vmem:[%s8700_s21 + $0x694] ss:$8 sps:$4 sm:$0xff]   ;;  %v7196_v42 = vld [vmem:[%s8700_s21 + $0x6c0] ss:$8 sps:$4 sm:$0xff]  }
 0x224   : > { %4669 = vmatpush1.bf16.msra.mxu1 %v7169_v47  ;;  %v7202_v47 = vld [vmem:[%s8700_s21 + $0x6d0] ss:$8 sps:$4 sm:$0xff]  }
 0x225   : > { %4835 = vmatpush1.bf16.msra.mxu0 %v7106_v28  ;;  %4670 = vmatprep.subr.bf16.mxu1 %v7177_v48  ;;  %v7178_v28 = vld [vmem:[%s8700_s21 + $0x690] ss:$8 sps:$4 sm:$0xff]   ;;  %v7210_v48 = vld [vmem:[%s8700_s21 + $0x6e4] ss:$8 sps:$4 sm:$0xff]  }
 0x226   : > { %4836 = vmatprep.subr.bf16.mxu0 %v7114_v29  ;;  %v7186_v29 = vld [vmem:[%s8700_s21 + $0x6a4] ss:$8 sps:$4 sm:$0xff]  }
 0x228   : > { %4671 = vmatpush1.bf16.msra.mxu1 %v7175_v53  ;;  %v7253_v53 = vld [vmem:[%s8700_s21 + $0x2a0] ss:$8 sps:$4 sm:$0xff]  }
 0x229   : > { %4837 = vmatpush1.bf16.msra.mxu0 %v7112_v33  ;;  %4672 = vmatprep.subr.bf16.mxu1 %v7183_v54  ;;  %v7184_v33 = vld [vmem:[%s8700_s21 + $0x6a0] ss:$8 sps:$4 sm:$0xff]   ;;  %v7261_v54 = vld [vmem:[%s8700_s21 + $0x2b4] ss:$8 sps:$4 sm:$0xff]  }
 0x22a   : > { %4838 = vmatprep.subr.bf16.mxu0 %v7120_v34  ;;  %v7192_v34 = vld [vmem:[%s8700_s21 + $0x6b4] ss:$8 sps:$4 sm:$0xff]  }
 0x22c   : > { %4673 = vmatpush1.bf16.msra.mxu1 %v7181_v57  ;;  %v7259_v57 = vld [vmem:[%s8700_s21 + $0x2b0] ss:$8 sps:$4 sm:$0xff]  }
 0x22d   : > { %4839 = vmatpush1.bf16.msra.mxu0 %v7118_v37  ;;  %4674 = vmatprep.subr.bf16.mxu1 %v7189_v58  ;;  %v7190_v37 = vld [vmem:[%s8700_s21 + $0x6b0] ss:$8 sps:$4 sm:$0xff]   ;;  %v7267_v58 = vld [vmem:[%s8700_s21 + $0x2c4] ss:$8 sps:$4 sm:$0xff]  }
 0x22e   : > { %4849 = vmatprep.subr.bf16.mxu0 %v7126_v38  ;;  %v7198_v38 = vld [vmem:[%s8700_s21 + $0x6c4] ss:$8 sps:$4 sm:$0xff]  }
 0x230   : > { %4841 = vmatmul.mubr.bf16.vlgmr.msra.gmra.mrb[0].mxu0 %v2519_v43  ;;  %4675 = vmatpush1.bf16.msra.mxu1 %v7187_v63  ;;  %v7204_v43 = vld [vmem:[%s8700_s21 + $0x6d4] ss:$8 sps:$4 sm:$0xff]  }
 0x231   : > { %4850 = vmatpush1.bf16.msra.mxu0 %v7124_v44  ;;  %4881 = vmatprep.mubr.bf16.mxu0 %v8891_v46  ;;  %v7241_v44 = vld [vmem:[%s8700_s21 + $0x280] ss:$8 sps:$4 sm:$0xff]   ;;  %v7228_v63 = vld [vmem:[%s8700_s21 + $0x714] ss:$8 sps:$4 sm:$0xff]  }
 0x232   : > { %4851 = vmatprep.subr.bf16.mxu0 %v7132_v45  ;;  %4685 = vmatprep.subr.bf16.mxu1 %v7195_v0  ;;  %v7249_v45 = vld [vmem:[%s8700_s21 + $0x294] ss:$8 sps:$4 sm:$0xff]   ;;  %v2522_v0 = vcombine.high %v8891_v46, %v8891_v46  ;;  %v7232_v46 = vld [vmem:[%s8700_s21 + $0x720] ss:$8 sps:$4 sm:$0xff]  }
 0x233   : > { %4677 = vmatmul.mubr.bf16.vlgmr.msra.gmra.mrb[0].mxu1 %v2451_v2  ;;  %v7273_v2 = vld [vmem:[%s8700_s21 + $0x2d4] ss:$8 sps:$4 sm:$0xff]  }
 0x234   : > { %4686 = vmatpush1.bf16.msra.mxu1 %v7193_v5  ;;  %4717 = vmatprep.mubr.bf16.mxu1 %v8929_v7  ;;  %v7399_v5 = vld [vmem:[%s9478_s0 + $0x42] ss:$25 sps:$4 sm:$0xff]  }
 0x235   : > { %4852 = vmatpush1.bf16.msra.mxu0 %v7130_v50  ;;  %4687 = vmatprep.subr.bf16.mxu1 %v7201_v6  ;;  %v7208_v50 = vld [vmem:[%s8700_s21 + $0x6e0] ss:$8 sps:$4 sm:$0xff]   ;;  %v7240_v6 = vld [vmem:[%s8700_s21 + $0x734] ss:$8 sps:$4 sm:$0xff]  }
 0x236   : > { %4853 = vmatprep.subr.bf16.mxu0 %v7138_v52  ;;  %v7216_v52 = vld [vmem:[%s8700_s21 + $0x6f4] ss:$8 sps:$4 sm:$0xff]  }
 0x238   : > { %4688 = vmatpush1.bf16.msra.mxu1 %v7199_v9  ;;  %v7285_v9 = vld [vmem:[%s8700_s21 + $0x2f4] ss:$8 sps:$4 sm:$0xff]  }
 0x239   : > { %4854 = vmatpush1.bf16.msra.mxu0 %v7136_v55  ;;  %4689 = vmatprep.subr.bf16.mxu1 %v7207_v10  ;;  %v7214_v55 = vld [vmem:[%s8700_s21 + $0x6f0] ss:$8 sps:$4 sm:$0xff]   ;;  %v9007_v10 = vrot.slane %v7399_v5, %v8732_v39 }
 0x23a   : > { %4855 = vmatprep.subr.bf16.mxu0 %v7144_v56  ;;  %v7222_v56 = vld [vmem:[%s8700_s21 + $0x704] ss:$8 sps:$4 sm:$0xff]   ;;  %v7355_v5 = vld [vmem:[%s8700_s21 + $0x3b0] ss:$8 sps:$4 sm:$0xff]  }
 0x23c   : > { %4690 = vmatpush1.bf16.msra.mxu1 %v7205_v13  ;;  %v2421_v13 = vcombine.low %v8911_v59, %v8914_v60  ;;  %v7297_v59 = vld [vmem:[%s8700_s21 + $0x314] ss:$8 sps:$4 sm:$0xff]   ;;  %v7250_v60 = vld [vmem:[%s8700_s21 + $0x750] ss:$8 sps:$4 sm:$0xff]  }
 0x23d   : > { %4856 = vmatpush1.bf16.msra.mxu0 %v7142_v61  ;;  %4691 = vmatprep.subr.bf16.mxu1 %v7213_v14  ;;  %v8980_v61 = vrot.slane %v2489_v27, %v8732_v39  ;;  %v7271_v27 = vld [vmem:[%s8700_s21 + $0x2d0] ss:$8 sps:$4 sm:$0xff]  }
 0x23e   : > { %4857 = vmatprep.subr.bf16.mxu0 %v7150_v62  ;;  %v7220_v62 = vld [vmem:[%s8700_s21 + $0x700] ss:$8 sps:$4 sm:$0xff]  }
 0x240   : > { %4692 = vmatpush1.bf16.msra.mxu1 %v7211_v19  ;;  %v7244_v19 = vld [vmem:[%s8700_s21 + $0x740] ss:$8 sps:$4 sm:$0xff]  }
 0x241   : > { %4858 = vmatpush1.bf16.msra.mxu0 %v7148_v3  ;;  %4693 = vmatprep.subr.bf16.mxu1 %v7219_v21  ;;  %v7279_v3 = vld [vmem:[%s8700_s21 + $0x2e4] ss:$8 sps:$4 sm:$0xff]   ;;  %v7252_v21 = vld [vmem:[%s8700_s21 + $0x754] ss:$8 sps:$4 sm:$0xff]  }
 0x242   : > { %4859 = vmatprep.subr.bf16.mxu0 %v7156_v4  ;;  %v7397_v4 = vld [vmem:[%s9478_s0 + $0x10] ss:$25 sps:$4 sm:$0xff]  }
 0x244   : > { %4694 = vmatpush1.bf16.msra.mxu1 %v7217_v25  ;;  %v2454_v25 = vcombine.high %v8929_v7, %v8929_v7  ;;  %v7301_v7 = vld [vmem:[%s8700_s21 + $0x320] ss:$8 sps:$4 sm:$0xff]  }
 0x245   : > { %4860 = vmatpush1.bf16.msra.mxu0 %v7154_v8  ;;  %4695 = vmatprep.subr.bf16.mxu1 %v7225_v26  ;;  %v7277_v8 = vld [vmem:[%s8700_s21 + $0x2e0] ss:$8 sps:$4 sm:$0xff]   ;;  %v7258_v26 = vld [vmem:[%s8700_s21 + $0x764] ss:$8 sps:$4 sm:$0xff]  }
 0x246   : > { %4861 = vmatprep.subr.bf16.mxu0 %v7162_v51  ;;  %v9003_v51 = vrot.slane %v7397_v4, %v8732_v39  ;;  %v7318_v4 = vld [vmem:[%s8700_s21 + $0x804] ss:$8 sps:$4 sm:$0xff]  }
 0x248   : > { %4696 = vmatpush1.bf16.msra.mxu1 %v7223_v30  ;;  %v2555_v14 = vcombine.low %v9003_v51, %v9007_v10  ;;  %v7256_v30 = vld [vmem:[%s8700_s21 + $0x760] ss:$8 sps:$4 sm:$0xff]  }
 0x249   : > { %4862 = vmatpush1.bf16.msra.mxu0 %v7160_v11  ;;  %4697 = vmatprep.subr.bf16.mxu1 %v7231_v31  ;;  %v7238_v11 = vld [vmem:[%s8700_s21 + $0x730] ss:$8 sps:$4 sm:$0xff]   ;;  %v7264_v31 = vld [vmem:[%s8700_s21 + $0x774] ss:$8 sps:$4 sm:$0xff]  }
 0x24a   : > { %4863 = vmatprep.subr.bf16.mxu0 %v7168_v12  ;;  %v7246_v12 = vld [vmem:[%s8700_s21 + $0x744] ss:$8 sps:$4 sm:$0xff]  }
 0x24c   : > { %4698 = vmatpush1.bf16.msra.mxu1 %v7229_v35  ;;  %v7270_v35 = vld [vmem:[%s8700_s21 + $0x784] ss:$8 sps:$4 sm:$0xff]  }
 0x24d   : > { %4864 = vmatpush1.bf16.msra.mxu0 %v7166_v15  ;;  %4699 = vmatprep.subr.bf16.mxu1 %v7237_v36  ;;  %v7283_v15 = vld [vmem:[%s8700_s21 + $0x2f0] ss:$8 sps:$4 sm:$0xff]  }
 0x24e   : > { %4865 = vmatprep.subr.bf16.mxu0 %v7174_v16  ;;  %v7291_v16 = vld [vmem:[%s8700_s21 + $0x304] ss:$8 sps:$4 sm:$0xff]   ;;  %v7307_v36 = vld [vmem:[%s8700_s21 + $0x330] ss:$8 sps:$4 sm:$0xff]  }
 0x250   : > { %4700 = vmatpush1.bf16.msra.mxu1 %v7235_v40  ;;  %v7276_v40 = vld [vmem:[%s8700_s21 + $0x794] ss:$8 sps:$4 sm:$0xff]  }
 0x251   : > { %4866 = vmatpush1.bf16.msra.mxu0 %v7172_v22  ;;  %4701 = vmatprep.subr.bf16.mxu1 %v7243_v41  ;;  %v7289_v22 = vld [vmem:[%s8700_s21 + $0x300] ss:$8 sps:$4 sm:$0xff]  }
 0x252   : > { %4867 = vmatprep.subr.bf16.mxu0 %v7180_v23  ;;  %v9021_v23 = vrot.slane %v2421_v13, %v8732_v39  ;;  %v7313_v41 = vld [vmem:[%s8700_s21 + $0x340] ss:$8 sps:$4 sm:$0xff]  }
 0x253   : > { %v7361_v13 = vld [vmem:[%s8700_s21 + $0x3c0] ss:$8 sps:$4 sm:$0xff]  }
 0x254   : > { %4702 = vmatpush1.bf16.msra.mxu1 %v7241_v44  ;;  %v7282_v44 = vld [vmem:[%s8700_s21 + $0x7a4] ss:$8 sps:$4 sm:$0xff]  }
 0x255   : > { %4868 = vmatpush1.bf16.msra.mxu0 %v7178_v28  ;;  %4703 = vmatprep.subr.bf16.mxu1 %v7249_v45  ;;  %v7295_v28 = vld [vmem:[%s8700_s21 + $0x310] ss:$8 sps:$4 sm:$0xff]  }
 0x256   : > { %4869 = vmatprep.subr.bf16.mxu0 %v7186_v29  ;;  %v7303_v29 = vld [vmem:[%s8700_s21 + $0x324] ss:$8 sps:$4 sm:$0xff]   ;;  %v7319_v45 = vld [vmem:[%s8700_s21 + $0x350] ss:$8 sps:$4 sm:$0xff]  }
 0x258   : > { %4704 = vmatpush1.bf16.msra.mxu1 %v7247_v20  ;;  %v7288_v20 = vld [vmem:[%s8700_s21 + $0x7b4] ss:$8 sps:$4 sm:$0xff]  }
 0x259   : > { %4870 = vmatpush1.bf16.msra.mxu0 %v7184_v33  ;;  %4705 = vmatprep.subr.bf16.mxu1 %v7255_v49  ;;  %v7309_v33 = vld [vmem:[%s8700_s21 + $0x334] ss:$8 sps:$4 sm:$0xff]   ;;  %v7325_v49 = vld [vmem:[%s8700_s21 + $0x360] ss:$8 sps:$4 sm:$0xff]  }
 0x25a   : > { %4871 = vmatprep.subr.bf16.mxu0 %v7192_v34  ;;  %v7262_v34 = vld [vmem:[%s8700_s21 + $0x770] ss:$8 sps:$4 sm:$0xff]  }
 0x25c   : > { %4706 = vmatpush1.bf16.msra.mxu1 %v7253_v53  ;;  %v7294_v53 = vld [vmem:[%s8700_s21 + $0x7c4] ss:$8 sps:$4 sm:$0xff]  }
 0x25d   : > { %4872 = vmatpush1.bf16.msra.mxu0 %v7190_v37  ;;  %4707 = vmatprep.subr.bf16.mxu1 %v7261_v54  ;;  %v7315_v37 = vld [vmem:[%s8700_s21 + $0x344] ss:$8 sps:$4 sm:$0xff]   ;;  %v7331_v54 = vld [vmem:[%s8700_s21 + $0x370] ss:$8 sps:$4 sm:$0xff]  }
 0x25e   : > { %4873 = vmatprep.subr.bf16.mxu0 %v7198_v38  ;;  %v7268_v38 = vld [vmem:[%s8700_s21 + $0x780] ss:$8 sps:$4 sm:$0xff]  }
 0x260   : > { %4708 = vmatpush1.bf16.msra.mxu1 %v7259_v57  ;;  %v7300_v57 = vld [vmem:[%s8700_s21 + $0x7d4] ss:$8 sps:$4 sm:$0xff]  }
 0x261   : > { %4874 = vmatpush1.bf16.msra.mxu0 %v7196_v42  ;;  %4709 = vmatprep.subr.bf16.mxu1 %v7267_v58  ;;  %v7321_v42 = vld [vmem:[%s8700_s21 + $0x354] ss:$8 sps:$4 sm:$0xff]   ;;  %v7337_v58 = vld [vmem:[%s8700_s21 + $0x380] ss:$8 sps:$4 sm:$0xff]  }
 0x262   : > { %4875 = vmatprep.subr.bf16.mxu0 %v7204_v43  ;;  %v7274_v43 = vld [vmem:[%s8700_s21 + $0x790] ss:$8 sps:$4 sm:$0xff]  }
 0x264   : > { %4710 = vmatpush1.bf16.msra.mxu1 %v7265_v1  ;;  %v7343_v1 = vld [vmem:[%s8700_s21 + $0x390] ss:$8 sps:$4 sm:$0xff]  }
 0x265   : > { %4876 = vmatpush1.bf16.msra.mxu0 %v7202_v47  ;;  %4711 = vmatprep.subr.bf16.mxu1 %v7273_v2  ;;  %v7327_v47 = vld [vmem:[%s8700_s21 + $0x364] ss:$8 sps:$4 sm:$0xff]  }
 0x266   : > { %4877 = vmatprep.subr.bf16.mxu0 %v7210_v48  ;;  %v7280_v48 = vld [vmem:[%s8700_s21 + $0x7a0] ss:$8 sps:$4 sm:$0xff]   ;;  %v7351_v2 = vld [vmem:[%s8700_s21 + $0x3a4] ss:$8 sps:$4 sm:$0xff]  }
 0x268   : > { %4712 = vmatpush1.bf16.msra.mxu1 %v7271_v27  ;;  %v7349_v27 = vld [vmem:[%s8700_s21 + $0x3a0] ss:$8 sps:$4 sm:$0xff]  }
 0x269   : > { %4878 = vmatpush1.bf16.msra.mxu0 %v7208_v50  ;;  %4713 = vmatprep.subr.bf16.mxu1 %v7279_v3  ;;  %v7333_v50 = vld [vmem:[%s8700_s21 + $0x374] ss:$8 sps:$4 sm:$0xff]   ;;  %v7310_v3 = vld [vmem:[%s8700_s21 + $0x7f0] ss:$8 sps:$4 sm:$0xff]  }
 0x26a   : > { %4879 = vmatprep.subr.bf16.mxu0 %v7216_v52  ;;  %v7286_v52 = vld [vmem:[%s8700_s21 + $0x7b0] ss:$8 sps:$4 sm:$0xff]  }
 0x26c   : > { %4714 = vmatpush1.bf16.msra.mxu1 %v7277_v8  ;;  %v2556_v8 = vcombine.high %v9003_v51, %v9007_v10  ;;  %v7404_v51 = vld [vmem:[%s8700_s21 + $0x910] ss:$8 sps:$4 sm:$0xff]   ;;  %v7409_v10 = vld [vmem:[%s8700_s21 + $0x924] ss:$8 sps:$4 sm:$0xff]  }
 0x26d   : > { %4880 = vmatpush1.bf16.msra.mxu0 %v7214_v55  ;;  %4715 = vmatprep.subr.bf16.mxu1 %v7285_v9  ;;  %v7339_v55 = vld [vmem:[%s8700_s21 + $0x384] ss:$8 sps:$4 sm:$0xff]   ;;  %v7316_v9 = vld [vmem:[%s8700_s21 + $0x800] ss:$8 sps:$4 sm:$0xff]  }
 0x26e   : > { %4890 = vmatprep.subr.bf16.mxu0 %v7222_v56  ;;  %v7292_v56 = vld [vmem:[%s8700_s21 + $0x7c0] ss:$8 sps:$4 sm:$0xff]  }
 0x270   : > { %4882 = vmatmul.mubr.bf16.vlgmr.msra.gmra.mrb[0].mxu0 %v8980_v61  ;;  %4716 = vmatpush1.bf16.msra.mxu1 %v7283_v15  ;;  %v7369_v15 = vld [vmem:[%s8700_s21 + $0x3d4] ss:$8 sps:$4 sm:$0xff]  }
 0x271   : > { %4891 = vmatpush1.bf16.msra.mxu0 %v7220_v62  ;;  %4922 = vmatprep.mubr.bf16.mxu0 %v2522_v0  ;;  %v7345_v62 = vld [vmem:[%s8700_s21 + $0x394] ss:$8 sps:$4 sm:$0xff]   ;;  %v7306_v0 = vld [vmem:[%s8700_s21 + $0x7e4] ss:$8 sps:$4 sm:$0xff]  }
 0x272   : > { %4892 = vmatprep.subr.bf16.mxu0 %v7228_v63  ;;  %4726 = vmatprep.subr.bf16.mxu1 %v7291_v16  ;;  %v7298_v63 = vld [vmem:[%s8700_s21 + $0x7d0] ss:$8 sps:$4 sm:$0xff]   ;;  %v9080_v16 = vrot.slane %v2556_v8, %v8732_v39  ;;  %v7421_v8 = vld [vmem:[%s8700_s21 + $0x964] ss:$8 sps:$4 sm:$0xff]  }
 0x273   : > { %4718 = vmatmul.mubr.bf16.vlgmr.msra.gmra.mrb[0].mxu1 %v9021_v23 }
 0x274   : > { %4727 = vmatpush1.bf16.msra.mxu1 %v7289_v22  ;;  %4758 = vmatprep.mubr.bf16.mxu1 %v2454_v25  ;;  %v7375_v22 = vld [vmem:[%s8700_s21 + $0x3e4] ss:$8 sps:$4 sm:$0xff]   ;;  %v7373_v25 = vld [vmem:[%s8700_s21 + $0x3e0] ss:$8 sps:$4 sm:$0xff]  }
 0x275   : > { %4893 = vmatpush1.bf16.msra.mxu0 %v7226_v17  ;;  %4728 = vmatprep.subr.bf16.mxu1 %v7297_v59  ;;  %v7304_v17 = vld [vmem:[%s8700_s21 + $0x7e0] ss:$8 sps:$4 sm:$0xff]  }
 0x276   : > { %4894 = vmatprep.subr.bf16.mxu0 %v7234_v18  ;;  %v7312_v18 = vld [vmem:[%s8700_s21 + $0x7f4] ss:$8 sps:$4 sm:$0xff]   ;;  %v7328_v59 = vld [vmem:[%s8700_s21 + $0x820] ss:$8 sps:$4 sm:$0xff]  }
 0x278   : > { %4729 = vmatpush1.bf16.msra.mxu1 %v7295_v28  ;;  %v7334_v28 = vld [vmem:[%s8700_s21 + $0x830] ss:$8 sps:$4 sm:$0xff]  }
 0x279   : > { %4895 = vmatpush1.bf16.msra.mxu0 %v7232_v46  ;;  %4730 = vmatprep.subr.bf16.mxu1 %v7303_v29  ;;  %v7357_v46 = vld [vmem:[%s8700_s21 + $0x3b4] ss:$8 sps:$4 sm:$0xff]   ;;  %v7342_v29 = vld [vmem:[%s8700_s21 + $0x844] ss:$8 sps:$4 sm:$0xff]  }
 0x27a   : > { %4896 = vmatprep.subr.bf16.mxu0 %v7240_v6  ;;  %v7363_v6 = vld [vmem:[%s8700_s21 + $0x3c4] ss:$8 sps:$4 sm:$0xff]  }
 0x27c   : > { %4731 = vmatpush1.bf16.msra.mxu1 %v7301_v7  ;;  %v7348_v7 = vld [vmem:[%s8700_s21 + $0x854] ss:$8 sps:$4 sm:$0xff]  }
 0x27d   : > { %4897 = vmatpush1.bf16.msra.mxu0 %v7238_v11  ;;  %4732 = vmatprep.subr.bf16.mxu1 %v7309_v33  ;;  %v2520_v11 = vcombine.high %v8980_v61, %v8980_v61  ;;  %v7367_v61 = vld [vmem:[%s8700_s21 + $0x3d0] ss:$8 sps:$4 sm:$0xff]   ;;  %v2452_v33 = vcombine.high %v9021_v23, %v9021_v23  ;;  %v7366_v23 = vld [vmem:[%s8700_s21 + $0x884] ss:$8 sps:$4 sm:$0xff]  }
 0x27e   : > { %4898 = vmatprep.subr.bf16.mxu0 %v7246_v12  ;;  %v7324_v12 = vld [vmem:[%s8700_s21 + $0x814] ss:$8 sps:$4 sm:$0xff]  }
 0x280   : > { %4733 = vmatpush1.bf16.msra.mxu1 %v7307_v36  ;;  %v7352_v36 = vld [vmem:[%s8700_s21 + $0x860] ss:$8 sps:$4 sm:$0xff]  }
 0x281   : > { %4899 = vmatpush1.bf16.msra.mxu0 %v7244_v19  ;;  %4734 = vmatprep.subr.bf16.mxu1 %v7315_v37  ;;  %v7322_v19 = vld [vmem:[%s8700_s21 + $0x810] ss:$8 sps:$4 sm:$0xff]   ;;  %v7360_v37 = vld [vmem:[%s8700_s21 + $0x874] ss:$8 sps:$4 sm:$0xff]  }
 0x282   : > { %4900 = vmatprep.subr.bf16.mxu0 %v7252_v21  ;;  %v7330_v21 = vld [vmem:[%s8700_s21 + $0x824] ss:$8 sps:$4 sm:$0xff]  }
 0x284   : > { %4735 = vmatpush1.bf16.msra.mxu1 %v7313_v41  ;;  %v7372_v41 = vld [vmem:[%s8700_s21 + $0x894] ss:$8 sps:$4 sm:$0xff]  }
 0x285   : > { %4901 = vmatpush1.bf16.msra.mxu0 %v7250_v60  ;;  %4736 = vmatprep.subr.bf16.mxu1 %v7321_v42  ;;  %v7336_v60 = vld [vmem:[%s8700_s21 + $0x834] ss:$8 sps:$4 sm:$0xff]   ;;  %v7370_v42 = vld [vmem:[%s8700_s21 + $0x890] ss:$8 sps:$4 sm:$0xff]  }
 0x286   : > { %4902 = vmatprep.subr.bf16.mxu0 %v7258_v26  ;;  %v7381_v26 = vld [vmem:[%s8700_s21 + $0x3f4] ss:$8 sps:$4 sm:$0xff]  }
 0x288   : > { %4737 = vmatpush1.bf16.msra.mxu1 %v7319_v45  ;;  %v7384_v45 = vld [vmem:[%s8700_s21 + $0x8b4] ss:$8 sps:$4 sm:$0xff]  }
 0x289   : > { %4903 = vmatpush1.bf16.msra.mxu0 %v7256_v30  ;;  %4738 = vmatprep.subr.bf16.mxu1 %v7327_v47  ;;  %v7379_v30 = vld [vmem:[%s8700_s21 + $0x3f0] ss:$8 sps:$4 sm:$0xff]  }
 0x28a   : > { %4904 = vmatprep.subr.bf16.mxu0 %v7264_v31  ;;  %v7340_v31 = vld [vmem:[%s8700_s21 + $0x840] ss:$8 sps:$4 sm:$0xff]   ;;  %v7382_v47 = vld [vmem:[%s8700_s21 + $0x8b0] ss:$8 sps:$4 sm:$0xff]  }
 0x28c   : > { %4739 = vmatpush1.bf16.msra.mxu1 %v7325_v49  ;;  %v7390_v49 = vld [vmem:[%s8700_s21 + $0x8d4] ss:$8 sps:$4 sm:$0xff]  }
 0x28d   : > { %4905 = vmatpush1.bf16.msra.mxu0 %v7262_v34  ;;  %4740 = vmatprep.subr.bf16.mxu1 %v7333_v50  ;;  %v7346_v34 = vld [vmem:[%s8700_s21 + $0x850] ss:$8 sps:$4 sm:$0xff]  }
 0x28e   : > { %4906 = vmatprep.subr.bf16.mxu0 %v7270_v35  ;;  %v7354_v35 = vld [vmem:[%s8700_s21 + $0x864] ss:$8 sps:$4 sm:$0xff]   ;;  %v7388_v50 = vld [vmem:[%s8700_s21 + $0x8d0] ss:$8 sps:$4 sm:$0xff]  }
 0x290   : > { %4741 = vmatpush1.bf16.msra.mxu1 %v7331_v54  ;;  %v7396_v54 = vld [vmem:[%s8700_s21 + $0x8f4] ss:$8 sps:$4 sm:$0xff]  }
 0x291   : > { %4907 = vmatpush1.bf16.msra.mxu0 %v7268_v38  ;;  %4742 = vmatprep.subr.bf16.mxu1 %v7339_v55  ;;  %v7358_v38 = vld [vmem:[%s8700_s21 + $0x870] ss:$8 sps:$4 sm:$0xff]  }
 0x292   : > { %4908 = vmatprep.subr.bf16.mxu0 %v7276_v40  ;;  %v7364_v40 = vld [vmem:[%s8700_s21 + $0x880] ss:$8 sps:$4 sm:$0xff]   ;;  %v7497_v55 = vld [vmem:[%s9478_s0 + $0x14] ss:$25 sps:$4 sm:$0xff]  }
 0x294   : > { %4743 = vmatpush1.bf16.msra.mxu1 %v7337_v58  ;;  %v7403_v58 = vld [vmem:[%s8700_s21 + $0x904] ss:$8 sps:$4 sm:$0xff]  }
 0x295   : > { %4909 = vmatpush1.bf16.msra.mxu0 %v7274_v43  ;;  %4744 = vmatprep.subr.bf16.mxu1 %v7345_v62  ;;  %v7378_v43 = vld [vmem:[%s8700_s21 + $0x8a4] ss:$8 sps:$4 sm:$0xff]   ;;  %v9127_v62 = vrot.slane %v7497_v55, %v8732_v39 }
 0x296   : > { %4910 = vmatprep.subr.bf16.mxu0 %v7282_v44  ;;  %v7376_v44 = vld [vmem:[%s8700_s21 + $0x8a0] ss:$8 sps:$4 sm:$0xff]  }
 0x297   : > { %v7561_v55 = vld [vmem:[%s8698_s8] ss:$28 sps:$4 sm:$0xff]  }
 0x298   : > { %4745 = vmatpush1.bf16.msra.mxu1 %v7343_v1  ;;  %v7401_v1 = vld [vmem:[%s8700_s21 + $0x900] ss:$8 sps:$4 sm:$0xff]  }
 0x299   : > { %4911 = vmatpush1.bf16.msra.mxu0 %v7280_v48  ;;  %4746 = vmatprep.subr.bf16.mxu1 %v7351_v2  ;;  %v7387_v48 = vld [vmem:[%s8700_s21 + $0x8c4] ss:$8 sps:$4 sm:$0xff]   ;;  %v2589_v2 = vcombine.high %v9080_v16, %v9080_v16 }
 0x29a   : > { %4912 = vmatprep.subr.bf16.mxu0 %v7288_v20  ;;  %v7385_v20 = vld [vmem:[%s8700_s21 + $0x8c0] ss:$8 sps:$4 sm:$0xff]  }
 0x29c   : > { %4747 = vmatpush1.bf16.msra.mxu1 %v7349_v27  ;;  %v7412_v27 = vld [vmem:[%s8700_s21 + $0x934] ss:$8 sps:$4 sm:$0xff]  }
 0x29d   : > { %4913 = vmatpush1.bf16.msra.mxu0 %v7286_v52  ;;  %4748 = vmatprep.subr.bf16.mxu1 %v7357_v46  ;;  %v7393_v52 = vld [vmem:[%s8700_s21 + $0x8e4] ss:$8 sps:$4 sm:$0xff]   ;;  %v7410_v46 = vld [vmem:[%s8700_s21 + $0x930] ss:$8 sps:$4 sm:$0xff]  }
 0x29e   : > { %4914 = vmatprep.subr.bf16.mxu0 %v7294_v53  ;;  %v7391_v53 = vld [vmem:[%s8700_s21 + $0x8e0] ss:$8 sps:$4 sm:$0xff]  }
 0x2a0   : > { %4749 = vmatpush1.bf16.msra.mxu1 %v7355_v5  ;;  %v7418_v5 = vld [vmem:[%s8700_s21 + $0x954] ss:$8 sps:$4 sm:$0xff]  }
 0x2a1   : > { %4915 = vmatpush1.bf16.msra.mxu0 %v7292_v56  ;;  %4750 = vmatprep.subr.bf16.mxu1 %v7363_v6  ;;  %v7498_v56 = vld [vmem:[%s9478_s0 + $0x46] ss:$25 sps:$4 sm:$0xff]  }
 0x2a2   : > { %4916 = vmatprep.subr.bf16.mxu0 %v7300_v57  ;;  %v7394_v57 = vld [vmem:[%s8700_s21 + $0x8f0] ss:$8 sps:$4 sm:$0xff]  }
 0x2a3   : > { %v7416_v6 = vld [vmem:[%s8700_s21 + $0x950] ss:$8 sps:$4 sm:$0xff]  }
 0x2a4   : > { %4751 = vmatpush1.bf16.msra.mxu1 %v7361_v13  ;;  %v7427_v13 = vld [vmem:[%s8700_s21 + $0x984] ss:$8 sps:$4 sm:$0xff]  }
 0x2a5   : > { %4917 = vmatpush1.bf16.msra.mxu0 %v7298_v63  ;;  %4752 = vmatprep.subr.bf16.mxu1 %v7369_v15  ;;  %v9130_v63 = vrot.slane %v7498_v56, %v8732_v39  ;;  %v7425_v15 = vld [vmem:[%s8700_s21 + $0x980] ss:$8 sps:$4 sm:$0xff]   ;;  %v7452_v56 = vld [vmem:[%s8700_s21 + $0xa10] ss:$8 sps:$4 sm:$0xff]  }
 0x2a6   : > { %4918 = vmatprep.subr.bf16.mxu0 %v7306_v0  ;;  %v9136_v0 = vrot.slane %v2555_v14, %v8732_v39  ;;  %v7407_v14 = vld [vmem:[%s8700_s21 + $0x920] ss:$8 sps:$4 sm:$0xff]  }
 0x2a8   : > { %4753 = vmatpush1.bf16.msra.mxu1 %v7367_v61  ;;  %v7431_v61 = vld [vmem:[%s8700_s21 + $0x9a0] ss:$8 sps:$4 sm:$0xff]  }
 0x2a9   : > { %4919 = vmatpush1.bf16.msra.mxu0 %v7304_v17  ;;  %4754 = vmatprep.subr.bf16.mxu1 %v7375_v22  ;;  %v2557_v17 = vcombine.low %v9127_v62, %v9130_v63  ;;  %v7436_v22 = vld [vmem:[%s8700_s21 + $0x9b4] ss:$8 sps:$4 sm:$0xff]  }
 0x2aa   : > { %4920 = vmatprep.subr.bf16.mxu0 %v7312_v18  ;;  %v7406_v18 = vld [vmem:[%s8700_s21 + $0x914] ss:$8 sps:$4 sm:$0xff]  }
 0x2ac   : > { %4755 = vmatpush1.bf16.msra.mxu1 %v7373_v25  ;;  %v7437_v25 = vld [vmem:[%s8700_s21 + $0x9c0] ss:$8 sps:$4 sm:$0xff]  }
 0x2ad   : > { %4921 = vmatpush1.bf16.msra.mxu0 %v7310_v3  ;;  %4756 = vmatprep.subr.bf16.mxu1 %v7381_v26  ;;  %v7415_v3 = vld [vmem:[%s8700_s21 + $0x944] ss:$8 sps:$4 sm:$0xff]   ;;  %v7535_v26 = vld [vmem:[%s8700_s21 + $0xc00] ss:$8 sps:$4 sm:$0xff]  }
 0x2ae   : > { %4931 = vmatprep.subr.bf16.mxu0 %v7318_v4  ;;  %v7413_v4 = vld [vmem:[%s8700_s21 + $0x940] ss:$8 sps:$4 sm:$0xff]  }
 0x2b0   : > { %4923 = vmatmul.mubr.bf16.vlgmr.msra.gmra.mrb[0].mxu0 %v2520_v11  ;;  %4757 = vmatpush1.bf16.msra.mxu1 %v7379_v30  ;;  %v7424_v11 = vld [vmem:[%s8700_s21 + $0x974] ss:$8 sps:$4 sm:$0xff]   ;;  %v7440_v30 = vld [vmem:[%s8700_s21 + $0x9d0] ss:$8 sps:$4 sm:$0xff]  }
 0x2b1   : > { %4932 = vmatpush1.bf16.msra.mxu0 %v7316_v9  ;;  %4963 = vmatprep.mubr.bf16.mxu0 %v9080_v16  ;;  %v7419_v9 = vld [vmem:[%s8700_s21 + $0x960] ss:$8 sps:$4 sm:$0xff]   ;;  %v7430_v16 = vld [vmem:[%s8700_s21 + $0x994] ss:$8 sps:$4 sm:$0xff]  }
 0x2b2   : > { %4933 = vmatprep.subr.bf16.mxu0 %v7324_v12  ;;  %v7422_v12 = vld [vmem:[%s8700_s21 + $0x970] ss:$8 sps:$4 sm:$0xff]  }
 0x2b3   : > { %4759 = vmatmul.mubr.bf16.vlgmr.msra.gmra.mrb[0].mxu1 %v2452_v33  ;;  %v7445_v33 = vld [vmem:[%s8700_s21 + $0x9e4] ss:$8 sps:$4 sm:$0xff]  }
 0x2b5   : > { %4934 = vmatpush1.bf16.msra.mxu0 %v7322_v19  ;;  %v7428_v19 = vld [vmem:[%s8700_s21 + $0x990] ss:$8 sps:$4 sm:$0xff]  }
 0x2b6   : > { %4935 = vmatprep.subr.bf16.mxu0 %v7330_v21  ;;  %v7433_v21 = vld [vmem:[%s8700_s21 + $0x9a4] ss:$8 sps:$4 sm:$0xff]  }
 0x2b9   : > { %4936 = vmatpush1.bf16.msra.mxu0 %v7328_v59  ;;  %v7434_v59 = vld [vmem:[%s8700_s21 + $0x9b0] ss:$8 sps:$4 sm:$0xff]  }
 0x2ba   : > { %4937 = vmatprep.subr.bf16.mxu0 %v7336_v60  ;;  %v7439_v60 = vld [vmem:[%s8700_s21 + $0x9c4] ss:$8 sps:$4 sm:$0xff]  }
 0x2bd   : > { %4938 = vmatpush1.bf16.msra.mxu0 %v7334_v28  ;;  %v7537_v28 = vld [vmem:[%s8700_s21 + $0xc04] ss:$8 sps:$4 sm:$0xff]  }
 0x2be   : > { %4939 = vmatprep.subr.bf16.mxu0 %v7342_v29  ;;  %v7442_v29 = vld [vmem:[%s8700_s21 + $0x9d4] ss:$8 sps:$4 sm:$0xff]   ;;  %5095 = vmatprep.subr.bf16.mxu1 %v7537_v28 }
 0x2bf   : > { %5096 = vmatpush1.bf16.msra.mxu1 %v7535_v26  ;;  %v7587_v26 = vld [vmem:[%s8698_s8 + $0x1c4] ss:$28 sps:$4 sm:$0xff]   ;;  %v7478_v28 = vld [vmem:[%s8700_s21 + $0xa94] ss:$8 sps:$4 sm:$0xff]  }
 0x2c1   : > { %4940 = vmatpush1.bf16.msra.mxu0 %v7340_v31  ;;  %v7541_v31 = vld [vmem:[%s8700_s21 + $0xc10] ss:$8 sps:$4 sm:$0xff]  }
 0x2c2   : > { %4941 = vmatprep.subr.bf16.mxu0 %v7348_v7  ;;  %v7543_v7 = vld [vmem:[%s8700_s21 + $0xc14] ss:$8 sps:$4 sm:$0xff]  }
 0x2c3   : > { %5097 = vmatprep.subr.bf16.mxu1 %v7543_v7  ;;  %v7481_v7 = vld [vmem:[%s8700_s21 + $0xaa4] ss:$8 sps:$4 sm:$0xff]  }
 0x2c4   : > { %5098 = vmatpush1.bf16.msra.mxu1 %v7541_v31  ;;  %v7590_v31 = vld [vmem:[%s8698_s8 + $0x1fc] ss:$28 sps:$4 sm:$0xff]  }
 0x2c5   : > { %4942 = vmatpush1.bf16.msra.mxu0 %v7346_v34  ;;  %v7443_v34 = vld [vmem:[%s8700_s21 + $0x9e0] ss:$8 sps:$4 sm:$0xff]  }
 0x2c6   : > { %4943 = vmatprep.subr.bf16.mxu0 %v7354_v35  ;;  %v7547_v35 = vld [vmem:[%s8700_s21 + $0xc20] ss:$8 sps:$4 sm:$0xff]  }
 0x2c9   : > { %4944 = vmatpush1.bf16.msra.mxu0 %v7352_v36  ;;  %v7549_v36 = vld [vmem:[%s8700_s21 + $0xc24] ss:$8 sps:$4 sm:$0xff]  }
 0x2ca   : > { %4945 = vmatprep.subr.bf16.mxu0 %v7360_v37  ;;  %v7448_v37 = vld [vmem:[%s8700_s21 + $0x9f4] ss:$8 sps:$4 sm:$0xff]   ;;  %5099 = vmatprep.subr.bf16.mxu1 %v7549_v36 }
 0x2cb   : > { %5100 = vmatpush1.bf16.msra.mxu1 %v7547_v35  ;;  %v7593_v35 = vld [vmem:[%s8698_s8 + $0x234] ss:$28 sps:$4 sm:$0xff]  }
 0x2cc   : > { %v7484_v36 = vld [vmem:[%s8700_s21 + $0xab4] ss:$8 sps:$4 sm:$0xff]  }
 0x2cd   : > { %4946 = vmatpush1.bf16.msra.mxu0 %v7358_v38  ;;  %v7559_v38 = vld [vmem:[%s9478_s0 + $0x18] ss:$25 sps:$4 sm:$0x11]  }
 0x2ce   : > { %4947 = vmatprep.subr.bf16.mxu0 %v7366_v23  ;;  %v7560_v23 = vld [vmem:[%s9478_s0 + $0x4a] ss:$25 sps:$4 sm:$0x11]  }
 0x2d1   : > { %4948 = vmatpush1.bf16.msra.mxu0 %v7364_v40  ;;  %v7446_v40 = vld [vmem:[%s8700_s21 + $0x9f0] ss:$8 sps:$4 sm:$0xff]  }
 0x2d2   : > { %4949 = vmatprep.subr.bf16.mxu0 %v7372_v41  ;;  %v2558_v41 = vcombine.high %v9127_v62, %v9130_v63  ;;  %v7505_v62 = vld [vmem:[%s8700_s21 + $0xb20] ss:$8 sps:$4 sm:$0xff]   ;;  %v7510_v63 = vld [vmem:[%s8700_s21 + $0xb34] ss:$8 sps:$4 sm:$0xff]  }
 0x2d5   : > { %4950 = vmatpush1.bf16.msra.mxu0 %v7370_v42  ;;  %v7553_v42 = vld [vmem:[%s8700_s21 + $0xc30] ss:$8 sps:$4 sm:$0xff]  }
 0x2d6   : > { %4951 = vmatprep.subr.bf16.mxu0 %v7378_v43  ;;  %v7555_v43 = vld [vmem:[%s8700_s21 + $0xc34] ss:$8 sps:$4 sm:$0xff]  }
 0x2d7   : > { %5101 = vmatprep.subr.bf16.mxu1 %v7555_v43  ;;  %v7599_v43 = vld [vmem:[%s8698_s8 + $0x2a4] ss:$28 sps:$4 sm:$0xff]  }
 0x2d8   : > { %5102 = vmatpush1.bf16.msra.mxu1 %v7553_v42  ;;  %v7485_v42 = vld [vmem:[%s8700_s21 + $0xac0] ss:$8 sps:$4 sm:$0xff]  }
 0x2d9   : > { %4952 = vmatpush1.bf16.msra.mxu0 %v7376_v44  ;;  %v2599_v44 = vrot.slane %v7559_v38, %v8732_v39  ;;  %v7482_v38 = vld [vmem:[%s8700_s21 + $0xab0] ss:$8 sps:$4 sm:$0xff]  }
 0x2da   : > { %4953 = vmatprep.subr.bf16.mxu0 %v7384_v45  ;;  %v2606_v45 = vrot.slane %v7560_v23, %v8732_v39  ;;  %v7596_v23 = vld [vmem:[%s8698_s8 + $0x26c] ss:$28 sps:$4 sm:$0xff]  }
 0x2dd   : > { %4954 = vmatpush1.bf16.msra.mxu0 %v7382_v47  ;;  %v7451_v47 = vld [vmem:[%s8700_s21 + $0xa04] ss:$8 sps:$4 sm:$0xff]  }
 0x2de   : > { %4955 = vmatprep.subr.bf16.mxu0 %v7387_v48  ;;  %v2607_v48 = vcombine.low %v2599_v44, %v2606_v45  ;;  %v7490_v44 = vld [vmem:[%s8700_s21 + $0xad4] ss:$8 sps:$4 sm:$0xff]   ;;  %v7597_v45 = vld [vmem:[%s8698_s8 + $0x2a0] ss:$28 sps:$4 sm:$0xff]  }
 0x2e1   : > { %4956 = vmatpush1.bf16.msra.mxu0 %v7385_v20  ;;  %v2587_v20 = vcombine.high %v9136_v0, %v9136_v0 }
 0x2e2   : > { %4957 = vmatprep.subr.bf16.mxu0 %v7390_v49  ;;  %v7449_v49 = vld [vmem:[%s8700_s21 + $0xa00] ss:$8 sps:$4 sm:$0xff]  }
 0x2e5   : > { %4958 = vmatpush1.bf16.msra.mxu0 %v7388_v50  ;;  %v9197_v50 = vrot.slane %v2558_v41, %v8732_v39  ;;  %v7594_v41 = vld [vmem:[%s8698_s8 + $0x268] ss:$28 sps:$4 sm:$0xff]  }
 0x2e6   : > { %4959 = vmatprep.subr.bf16.mxu0 %v7393_v52  ;;  %v2614_v52 = vrot.slane %v2607_v48, %v8732_v39  ;;  %v7602_v48 = vld [vmem:[%s8698_s8 + $0x2dc] ss:$28 sps:$4 sm:$0xff]  }
 0x2e9   : > { %4960 = vmatpush1.bf16.msra.mxu0 %v7391_v53  ;;  %v7454_v53 = vld [vmem:[%s8700_s21 + $0xa14] ss:$8 sps:$4 sm:$0xff]  }
 0x2ea   : > { %4961 = vmatprep.subr.bf16.mxu0 %v7396_v54  ;;  %v7813_v54 = vmov 0  }
 0x2eb   : > { %5127 = vmatprep.mubr.bf16.mxu1 %v7813_v54  ;;  %v7494_v54 = vld [vmem:[%s8700_s21 + $0xaf0] ss:$8 sps:$4 sm:$0xff]  }
 0x2ec   : > { %6713 = vmatmul.mubr.msk.bf16.vlgmr.msra.gmra.mrb[4].mxu1 %vm4599_vm0, %v2614_v52  ;;  %v7491_v52 = vld [vmem:[%s8700_s21 + $0xae0] ss:$8 sps:$4 sm:$0xff]  }
 0x2ed   : > { %4962 = vmatpush1.bf16.msra.mxu0 %v7394_v57  ;;  %v7563_v57 = vld [vmem:[%s8698_s8 + $0x4] ss:$28 sps:$4 sm:$0xff]  }
 0x2ee   : > { %4972 = vmatprep.subr.bf16.mxu0 %v7403_v58  ;;  %v7566_v58 = vld [vmem:[%s8698_s8 + $0x3c] ss:$28 sps:$4 sm:$0xff]   ;;  %5851 = vmatprep.subr.bf16.mxu1 %v7563_v57 }
 0x2ef   : > { %5852 = vmatpush1.bf16.msra.mxu1 %v7561_v55  ;;  %v7501_v55 = vld [vmem:[%s8700_s21 + $0xb04] ss:$8 sps:$4 sm:$0xff]   ;;  %v7499_v57 = vld [vmem:[%s8700_s21 + $0xb00] ss:$8 sps:$4 sm:$0xff]  }
 0x2f0   : > { %4964 = vmatmul.mubr.bf16.vlgmr.msra.gmra.mrb[0].mxu0 %v9136_v0  ;;  %v7457_v0 = vld [vmem:[%s8700_s21 + $0xa24] ss:$8 sps:$4 sm:$0xff]   ;;  %5853 = vmatprep.subr.bf16.mxu1 %v7566_v58  ;;  %v2590_v58 = vcombine.high %v9197_v50, %v9197_v50 }
 0x2f1   : > { %4973 = vmatpush1.bf16.msra.mxu0 %v7401_v1  ;;  %5004 = vmatprep.mubr.bf16.mxu0 %v2589_v2  ;;  %v7564_v1 = vld [vmem:[%s8698_s8 + $0x38] ss:$28 sps:$4 sm:$0xff]  }
 0x2f2   : > { %4974 = vmatprep.subr.bf16.mxu0 %v7406_v18  ;;  %v7455_v2 = vld [vmem:[%s8700_s21 + $0xa20] ss:$8 sps:$4 sm:$0xff]   ;;  %v7569_v18 = vld [vmem:[%s8698_s8 + $0x74] ss:$28 sps:$4 sm:$0xff]  }
 0x2f3   : > { %5854 = vmatpush1.bf16.msra.mxu1 %v7564_v1  ;;  %v7502_v1 = vld [vmem:[%s8700_s21 + $0xb10] ss:$8 sps:$4 sm:$0xff]  }
 0x2f4   : > { %5855 = vmatprep.subr.bf16.mxu1 %v7569_v18  ;;  %v7516_v18 = vld [vmem:[%s8700_s21 + $0xb54] ss:$8 sps:$4 sm:$0xff]  }
 0x2f5   : > { %4975 = vmatpush1.bf16.msra.mxu0 %v7404_v51  ;;  %v7460_v51 = vld [vmem:[%s8700_s21 + $0xa34] ss:$8 sps:$4 sm:$0xff]  }
 0x2f6   : > { %4976 = vmatprep.subr.bf16.mxu0 %v7409_v10  ;;  %v7567_v10 = vld [vmem:[%s8698_s8 + $0x70] ss:$28 sps:$4 sm:$0xff]  }
 0x2f7   : > { %5856 = vmatpush1.bf16.msra.mxu1 %v7567_v10  ;;  %v7519_v10 = vld [vmem:[%s8700_s21 + $0xb64] ss:$8 sps:$4 sm:$0xff]  }
 0x2f9   : > { %4977 = vmatpush1.bf16.msra.mxu0 %v7407_v14  ;;  %v7458_v14 = vld [vmem:[%s8700_s21 + $0xa30] ss:$8 sps:$4 sm:$0xff]  }
 0x2fa   : > { %4978 = vmatprep.subr.bf16.mxu0 %v7412_v27  ;;  %v7572_v27 = vld [vmem:[%s8698_s8 + $0xac] ss:$28 sps:$4 sm:$0xff]  }
 0x2fb   : > { %5857 = vmatprep.subr.bf16.mxu1 %v7572_v27  ;;  %v7522_v27 = vld [vmem:[%s8700_s21 + $0xb74] ss:$8 sps:$4 sm:$0xff]  }
 0x2fd   : > { %4979 = vmatpush1.bf16.msra.mxu0 %v7410_v46  ;;  %v7463_v46 = vld [vmem:[%s8700_s21 + $0xa44] ss:$8 sps:$4 sm:$0xff]  }
 0x2fe   : > { %4980 = vmatprep.subr.bf16.mxu0 %v7415_v3  ;;  %v7570_v3 = vld [vmem:[%s8698_s8 + $0xa8] ss:$28 sps:$4 sm:$0xff]  }
 0x2ff   : > { %5858 = vmatpush1.bf16.msra.mxu1 %v7570_v3  ;;  %v7525_v3 = vld [vmem:[%s8700_s21 + $0xb84] ss:$8 sps:$4 sm:$0xff]  }
 0x301   : > { %4981 = vmatpush1.bf16.msra.mxu0 %v7413_v4  ;;  %v7461_v4 = vld [vmem:[%s8700_s21 + $0xa40] ss:$8 sps:$4 sm:$0xff]  }
 0x302   : > { %4982 = vmatprep.subr.bf16.mxu0 %v7418_v5  ;;  %v7575_v5 = vld [vmem:[%s8698_s8 + $0xe4] ss:$28 sps:$4 sm:$0xff]  }
 0x303   : > { %5859 = vmatprep.subr.bf16.mxu1 %v7575_v5  ;;  %v7528_v5 = vld [vmem:[%s8700_s21 + $0xb94] ss:$8 sps:$4 sm:$0xff]  }
 0x305   : > { %4983 = vmatpush1.bf16.msra.mxu0 %v7416_v6  ;;  %v7466_v6 = vld [vmem:[%s8700_s21 + $0xa54] ss:$8 sps:$4 sm:$0xff]  }
 0x306   : > { %4984 = vmatprep.subr.bf16.mxu0 %v7421_v8  ;;  %v7573_v8 = vld [vmem:[%s8698_s8 + $0xe0] ss:$28 sps:$4 sm:$0xff]  }
 0x307   : > { %5860 = vmatpush1.bf16.msra.mxu1 %v7573_v8  ;;  %v7531_v8 = vld [vmem:[%s8700_s21 + $0xba4] ss:$8 sps:$4 sm:$0xff]  }
 0x309   : > { %4985 = vmatpush1.bf16.msra.mxu0 %v7419_v9  ;;  %v7464_v9 = vld [vmem:[%s8700_s21 + $0xa50] ss:$8 sps:$4 sm:$0xff]  }
 0x30a   : > { %4986 = vmatprep.subr.bf16.mxu0 %v7424_v11  ;;  %v7578_v11 = vld [vmem:[%s8698_s8 + $0x11c] ss:$28 sps:$4 sm:$0xff]  }
 0x30b   : > { %5861 = vmatprep.subr.bf16.mxu1 %v7578_v11  ;;  %v7529_v11 = vld [vmem:[%s8700_s21 + $0xba0] ss:$8 sps:$4 sm:$0xff]  }
 0x30d   : > { %4987 = vmatpush1.bf16.msra.mxu0 %v7422_v12  ;;  %v7469_v12 = vld [vmem:[%s8700_s21 + $0xa64] ss:$8 sps:$4 sm:$0xff]  }
 0x30e   : > { %4988 = vmatprep.subr.bf16.mxu0 %v7427_v13  ;;  %v7576_v13 = vld [vmem:[%s8698_s8 + $0x118] ss:$28 sps:$4 sm:$0xff]  }
 0x30f   : > { %5862 = vmatpush1.bf16.msra.mxu1 %v7576_v13  ;;  %v7534_v13 = vld [vmem:[%s8700_s21 + $0xbb4] ss:$8 sps:$4 sm:$0xff]  }
 0x311   : > { %4989 = vmatpush1.bf16.msra.mxu0 %v7425_v15  ;;  %v7467_v15 = vld [vmem:[%s8700_s21 + $0xa60] ss:$8 sps:$4 sm:$0xff]  }
 0x312   : > { %4990 = vmatprep.subr.bf16.mxu0 %v7430_v16  ;;  %v7581_v16 = vld [vmem:[%s8698_s8 + $0x154] ss:$28 sps:$4 sm:$0xff]  }
 0x313   : > { %5863 = vmatprep.subr.bf16.mxu1 %v7581_v16 }
 0x315   : > { %4991 = vmatpush1.bf16.msra.mxu0 %v7428_v19  ;;  %v7472_v19 = vld [vmem:[%s8700_s21 + $0xa74] ss:$8 sps:$4 sm:$0xff]  }
 0x316   : > { %4992 = vmatprep.subr.bf16.mxu0 %v7433_v21  ;;  %v7579_v21 = vld [vmem:[%s8698_s8 + $0x150] ss:$28 sps:$4 sm:$0xff]  }
 0x317   : > { %5864 = vmatpush1.bf16.msra.mxu1 %v7579_v21  ;;  %v7540_v21 = vld [vmem:[%s8700_s21 + $0xbc4] ss:$8 sps:$4 sm:$0xff]  }
 0x319   : > { %4993 = vmatpush1.bf16.msra.mxu0 %v7431_v61  ;;  %v7470_v61 = vld [vmem:[%s8700_s21 + $0xa70] ss:$8 sps:$4 sm:$0xff]  }
 0x31a   : > { %4994 = vmatprep.subr.bf16.mxu0 %v7436_v22  ;;  %v7584_v22 = vld [vmem:[%s8698_s8 + $0x18c] ss:$28 sps:$4 sm:$0xff]  }
 0x31b   : > { %5865 = vmatprep.subr.bf16.mxu1 %v7584_v22  ;;  %v7546_v22 = vld [vmem:[%s8700_s21 + $0xbd4] ss:$8 sps:$4 sm:$0xff]  }
 0x31d   : > { %4995 = vmatpush1.bf16.msra.mxu0 %v7434_v59  ;;  %v7475_v59 = vld [vmem:[%s8700_s21 + $0xa84] ss:$8 sps:$4 sm:$0xff]  }
 0x31e   : > { %4996 = vmatprep.subr.bf16.mxu0 %v7439_v60  ;;  %v7582_v60 = vld [vmem:[%s8698_s8 + $0x188] ss:$28 sps:$4 sm:$0xff]  }
 0x31f   : > { %5866 = vmatpush1.bf16.msra.mxu1 %v7582_v60  ;;  %v7552_v60 = vld [vmem:[%s8700_s21 + $0xbe4] ss:$8 sps:$4 sm:$0xff]  }
 0x320   : > { %5867 = vmatprep.subr.bf16.mxu1 %v7587_v26  ;;  %v7558_v26 = vld [vmem:[%s8700_s21 + $0xbf4] ss:$8 sps:$4 sm:$0xff]  }
 0x321   : > { %4997 = vmatpush1.bf16.msra.mxu0 %v7437_v25  ;;  %v7473_v25 = vld [vmem:[%s8700_s21 + $0xa80] ss:$8 sps:$4 sm:$0xff]  }
 0x322   : > { %4998 = vmatprep.subr.bf16.mxu0 %v7442_v29  ;;  %v7585_v29 = vld [vmem:[%s8698_s8 + $0x1c0] ss:$28 sps:$4 sm:$0xff]  }
 0x323   : > { %5868 = vmatpush1.bf16.msra.mxu1 %v7585_v29 }
 0x324   : > { %5869 = vmatprep.subr.bf16.mxu1 %v7590_v31 }
 0x325   : > { %4999 = vmatpush1.bf16.msra.mxu0 %v7440_v30  ;;  %v7476_v30 = vld [vmem:[%s8700_s21 + $0xa90] ss:$8 sps:$4 sm:$0xff]  }
 0x326   : > { %5000 = vmatprep.subr.bf16.mxu0 %v7445_v33  ;;  %v7588_v33 = vld [vmem:[%s8698_s8 + $0x1f8] ss:$28 sps:$4 sm:$0xff]  }
 0x327   : > { %5870 = vmatpush1.bf16.msra.mxu1 %v7588_v33 }
 0x328   : > { %5871 = vmatprep.subr.bf16.mxu1 %v7593_v35 }
 0x329   : > { %5001 = vmatpush1.bf16.msra.mxu0 %v7443_v34  ;;  %v7479_v34 = vld [vmem:[%s8700_s21 + $0xaa0] ss:$8 sps:$4 sm:$0xff]  }
 0x32a   : > { %5002 = vmatprep.subr.bf16.mxu0 %v7448_v37  ;;  %v7591_v37 = vld [vmem:[%s8698_s8 + $0x230] ss:$28 sps:$4 sm:$0xff]  }
 0x32b   : > { %5872 = vmatpush1.bf16.msra.mxu1 %v7591_v37  ;;  %v7606_v37 = vld [vmem:[%s8698_s8 + $0x348] ss:$28 sps:$4 sm:$0xff]  }
 0x32c   : > { %5873 = vmatprep.subr.bf16.mxu1 %v7596_v23  ;;  %v2363_v23 = vsub.s32 0, %v8724_v32 }
 0x32d   : > { %5003 = vmatpush1.bf16.msra.mxu0 %v7446_v40  ;;  %v7487_v40 = vld [vmem:[%s8700_s21 + $0xac4] ss:$8 sps:$4 sm:$0xff]  }
 0x32e   : > { %5013 = vmatprep.subr.bf16.mxu0 %v7451_v47  ;;  %v7488_v47 = vld [vmem:[%s8700_s21 + $0xad0] ss:$8 sps:$4 sm:$0xff]  }
 0x32f   : > { %5874 = vmatpush1.bf16.msra.mxu1 %v7594_v41  ;;  %v2367_v41 = vsub.s32 1, %v8724_v32 }
 0x330   : > { %5005 = vmatmul.mubr.bf16.vlgmr.msra.gmra.mrb[0].mxu0 %v2587_v20  ;;  %5875 = vmatprep.subr.bf16.mxu1 %v7599_v43  ;;  %v7493_v20 = vld [vmem:[%s8700_s21 + $0xae4] ss:$8 sps:$4 sm:$0xff]  }
 0x331   : > { %5014 = vmatpush1.bf16.msra.mxu0 %v7449_v49  ;;  %5045 = vmatprep.mubr.bf16.mxu0 %v9197_v50  ;;  %v7600_v49 = vld [vmem:[%s8698_s8 + $0x2d8] ss:$28 sps:$4 sm:$0xff]   ;;  %v7513_v50 = vld [vmem:[%s8700_s21 + $0xb44] ss:$8 sps:$4 sm:$0xff]  }
 0x332   : > { %5015 = vmatprep.subr.bf16.mxu0 %v7454_v53  ;;  %v7496_v53 = vld [vmem:[%s8700_s21 + $0xaf4] ss:$8 sps:$4 sm:$0xff]  }
 0x333   : > { %5876 = vmatpush1.bf16.msra.mxu1 %v7597_v45 }
 0x334   : > { %5877 = vmatprep.subr.bf16.mxu1 %v7602_v48 }
 0x335   : > { %5016 = vmatpush1.bf16.msra.mxu0 %v7452_v56  ;;  %v9264_v56 = vrot.slane %v2557_v17, %v8732_v39  ;;  %v7507_v39 = vld [vmem:[%s8700_s21 + $0xb24] ss:$8 sps:$4 sm:$0xff]   ;;  %v7508_v17 = vld [vmem:[%s8700_s21 + $0xb30] ss:$8 sps:$4 sm:$0xff]  }
 0x336   : > { %5017 = vmatprep.subr.bf16.mxu0 %v7457_v0  ;;  %v7504_v0 = vld [vmem:[%s8700_s21 + $0xb14] ss:$8 sps:$4 sm:$0xff]  }
 0x337   : > { %5878 = vmatpush1.bf16.msra.mxu1 %v7600_v49  ;;  %v2588_v29 = vcombine.high %v9264_v56, %v9264_v56 }
 0x339   : > { %5018 = vmatpush1.bf16.msra.mxu0 %v7455_v2  ;;  %v7511_v2 = vld [vmem:[%s8700_s21 + $0xb40] ss:$8 sps:$4 sm:$0xff]  }
 0x33a   : > { %5019 = vmatprep.subr.bf16.mxu0 %v7460_v51  ;;  %v7514_v51 = vld [vmem:[%s8700_s21 + $0xb50] ss:$8 sps:$4 sm:$0xff]  }
 0x33d   : > { %5020 = vmatpush1.bf16.msra.mxu0 %v7458_v14  ;;  %v7517_v14 = vld [vmem:[%s8700_s21 + $0xb60] ss:$8 sps:$4 sm:$0xff]  }
 0x33e   : > { %5021 = vmatprep.subr.bf16.mxu0 %v7463_v46  ;;  %v7520_v46 = vld [vmem:[%s8700_s21 + $0xb70] ss:$8 sps:$4 sm:$0xff]  }
 0x341   : > { %5022 = vmatpush1.bf16.msra.mxu0 %v7461_v4  ;;  %v7523_v4 = vld [vmem:[%s8700_s21 + $0xb80] ss:$8 sps:$4 sm:$0xff]  }
 0x342   : > { %5023 = vmatprep.subr.bf16.mxu0 %v7466_v6  ;;  %v7526_v6 = vld [vmem:[%s8700_s21 + $0xb90] ss:$8 sps:$4 sm:$0xff]  }
 0x345   : > { %5024 = vmatpush1.bf16.msra.mxu0 %v7464_v9 }
 0x346   : > { %5025 = vmatprep.subr.bf16.mxu0 %v7469_v12 }
 0x349   : > { %5026 = vmatpush1.bf16.msra.mxu0 %v7467_v15 }
 0x34a   : > { %5027 = vmatprep.subr.bf16.mxu0 %v7472_v19  ;;  %v7532_v19 = vld [vmem:[%s8700_s21 + $0xbb0] ss:$8 sps:$4 sm:$0xff]  }
 0x34d   : > { %5028 = vmatpush1.bf16.msra.mxu0 %v7470_v61  ;;  %v7538_v61 = vld [vmem:[%s8700_s21 + $0xbc0] ss:$8 sps:$4 sm:$0xff]  }
 0x34e   : > { %5029 = vmatprep.subr.bf16.mxu0 %v7475_v59  ;;  %v7544_v59 = vld [vmem:[%s8700_s21 + $0xbd0] ss:$8 sps:$4 sm:$0xff]  }
 0x351   : > { %5030 = vmatpush1.bf16.msra.mxu0 %v7473_v25  ;;  %v7550_v25 = vld [vmem:[%s8700_s21 + $0xbe0] ss:$8 sps:$4 sm:$0xff]  }
 0x352   : > { %5031 = vmatprep.subr.bf16.mxu0 %v7478_v28  ;;  %v7556_v28 = vld [vmem:[%s8700_s21 + $0xbf0] ss:$8 sps:$4 sm:$0xff]  }
 0x355   : > { %5032 = vmatpush1.bf16.msra.mxu0 %v7476_v30 }
 0x356   : > { %5033 = vmatprep.subr.bf16.mxu0 %v7481_v7  ;;  %v7605_v7 = vld [vmem:[%s8698_s8 + $0x314] ss:$28 sps:$4 sm:$0xff]  }
 0x357   : > { %5879 = vmatprep.subr.bf16.mxu1 %v7605_v7  ;;  %v7663_v7 = vld [vmem:[%s8698_s8 + $0x80] ss:$28 sps:$4 sm:$0xff]  }
 0x359   : > { %5034 = vmatpush1.bf16.msra.mxu0 %v7479_v34  ;;  %v7603_v34 = vld [vmem:[%s8698_s8 + $0x310] ss:$28 sps:$4 sm:$0xff]  }
 0x35a   : > { %5035 = vmatprep.subr.bf16.mxu0 %v7484_v36  ;;  %5880 = vmatpush1.bf16.msra.mxu1 %v7603_v34  ;;  %v7608_v36 = vld [vmem:[%s8698_s8 + $0x34c] ss:$28 sps:$4 sm:$0xff]   ;;  %v7666_v34 = vld [vmem:[%s8698_s8 + $0xb8] ss:$28 sps:$4 sm:$0xff]  }
 0x35b   : > { %5881 = vmatprep.subr.bf16.mxu1 %v7608_v36  ;;  %v7669_v36 = vld [vmem:[%s8698_s8 + $0xf0] ss:$28 sps:$4 sm:$0xff]  }
 0x35d   : > { %5036 = vmatpush1.bf16.msra.mxu0 %v7482_v38  ;;  %v7611_v38 = vld [vmem:[%s8698_s8 + $0xc] ss:$28 sps:$4 sm:$0xff]  }
 0x35e   : > { %5037 = vmatprep.subr.bf16.mxu0 %v7487_v40  ;;  %5882 = vmatpush1.bf16.msra.mxu1 %v7606_v37  ;;  %v2359_v40 = vld [vmem:[%s1927_s20] sm:$0x3]  ;;  %v7674_v37 = vld [vmem:[%s8698_s8 + $0x12c] ss:$28 sps:$4 sm:$0xff]  }
 0x35f   : > { %5892 = vmatprep.subr.bf16.mxu1 %v7611_v38  ;;  %v2368_v43 = vrot.slane %v2359_v40, %v2367_v41  ;;  %v7672_v38 = vld [vmem:[%s8698_s8 + $0x128] ss:$28 sps:$4 sm:$0xff]  }
 0x361   : > { %5038 = vmatpush1.bf16.msra.mxu0 %v7485_v42  ;;  %v2364_v42 = vrot.slane %v2359_v40, %v2363_v23  ;;  %v7677_v40 = vld [vmem:[%s8698_s8 + $0x164] ss:$28 sps:$4 sm:$0xff]  }
 0x362   : > { %5039 = vmatprep.subr.bf16.mxu0 %v7490_v44 }
 0x365   : > { %5040 = vmatpush1.bf16.msra.mxu0 %v7488_v47 }
 0x366   : > { %5041 = vmatprep.subr.bf16.mxu0 %v7493_v20 }
 0x369   : > { %5042 = vmatpush1.bf16.msra.mxu0 %v7491_v52 }
 0x36a   : > { %5043 = vmatprep.subr.bf16.mxu0 %v7496_v53 }
 0x36d   : > { %5044 = vmatpush1.bf16.msra.mxu0 %v7494_v54 }
 0x36e   : > { %5054 = vmatprep.subr.bf16.mxu0 %v7501_v55 }
 0x370   : > { %5046 = vmatmul.mubr.bf16.vlgmr.msra.gmra.mrb[0].mxu0 %v9264_v56 }
 0x371   : > { %5055 = vmatpush1.bf16.msra.mxu0 %v7499_v57  ;;  %5086 = vmatprep.mubr.bf16.mxu0 %v2590_v58 }
 0x372   : > { %5056 = vmatprep.subr.bf16.mxu0 %v7504_v0  ;;  %v7609_v0 = vld [vmem:[%s8698_s8 + $0x8] ss:$28 sps:$4 sm:$0xff]  }
 0x375   : > { %5057 = vmatpush1.bf16.msra.mxu0 %v7502_v1 }
 0x376   : > { %5058 = vmatprep.subr.bf16.mxu0 %v7507_v39  ;;  %v7614_v39 = vld [vmem:[%s8698_s8 + $0x44] ss:$28 sps:$4 sm:$0xff]  }
 0x379   : > { %5059 = vmatpush1.bf16.msra.mxu0 %v7505_v62  ;;  %v7612_v62 = vld [vmem:[%s8698_s8 + $0x40] ss:$28 sps:$4 sm:$0xff]  }
 0x37a   : > { %5060 = vmatprep.subr.bf16.mxu0 %v7510_v63  ;;  %v7617_v63 = vld [vmem:[%s8698_s8 + $0x7c] ss:$28 sps:$4 sm:$0xff]  }
 0x37d   : > { %5061 = vmatpush1.bf16.msra.mxu0 %v7508_v17  ;;  %v7615_v17 = vld [vmem:[%s8698_s8 + $0x78] ss:$28 sps:$4 sm:$0xff]  }
 0x37e   : > { %5062 = vmatprep.subr.bf16.mxu0 %v7513_v50  ;;  %v7620_v50 = vld [vmem:[%s8698_s8 + $0xb4] ss:$28 sps:$4 sm:$0xff]  }
 0x381   : > { %5063 = vmatpush1.bf16.msra.mxu0 %v7511_v2  ;;  %v7618_v2 = vld [vmem:[%s8698_s8 + $0xb0] ss:$28 sps:$4 sm:$0xff]  }
 0x382   : > { %5064 = vmatprep.subr.bf16.mxu0 %v7516_v18  ;;  %v7623_v18 = vld [vmem:[%s8698_s8 + $0xec] ss:$28 sps:$4 sm:$0xff]  }
 0x385   : > { %5065 = vmatpush1.bf16.msra.mxu0 %v7514_v51  ;;  %v7621_v51 = vld [vmem:[%s8698_s8 + $0xe8] ss:$28 sps:$4 sm:$0xff]  }
 0x386   : > { %5066 = vmatprep.subr.bf16.mxu0 %v7519_v10  ;;  %v4760_v9 = vpop.f32.mrb[0].mxu1  ;;  %v7626_v10 = vld [vmem:[%s8698_s8 + $0x124] ss:$28 sps:$4 sm:$0xff]  }
 0x387   : > { %v4762_v12 = vpop.f32.mrb[1].mxu1  ;;  %v6855_v44 = vadd.f32 %v4760_v9, %v2364_v42  ;;  %v7636_v9 = vld [vmem:[%s8698_s8 + $0x200] ss:$28 sps:$4 sm:$0xff]  }
 0x388   : > { %v4764_v15 = vpop.f32.mrb[2].mxu1  ;;  %v6858_v45 = vadd.f32 %v4762_v12, %v2368_v43  ;;  %v7639_v12 = vld [vmem:[%s8698_s8 + $0x238] ss:$28 sps:$4 sm:$0xff]   ;;  %v7675_v42 = vld [vmem:[%s8698_s8 + $0x160] ss:$28 sps:$4 sm:$0xff]  }
 0x389   : > { %5067 = vmatpush1.bf16.msra.mxu0 %v7517_v14  ;;  %v4765_v16 = vpop.f32.mrb[3].mxu1  ;;  %v7624_v14 = vld [vmem:[%s8698_s8 + $0x120] ss:$28 sps:$4 sm:$0xff]   ;;  %v7642_v15 = vld [vmem:[%s8698_s8 + $0x270] ss:$28 sps:$4 sm:$0xff]  }
 0x38a   : > { %5068 = vmatprep.subr.bf16.mxu0 %v7522_v27  ;;  %v7629_v27 = vld [vmem:[%s8698_s8 + $0x15c] ss:$28 sps:$4 sm:$0xff]   ;;  %v7647_v16 = vld [vmem:[%s8698_s8 + $0x2ac] ss:$28 sps:$4 sm:$0xff]  }
 0x38b   : > { %v7680_v43 = vld [vmem:[%s8698_s8 + $0x19c] ss:$28 sps:$4 sm:$0xff]  }
 0x38d   : > { %5069 = vmatpush1.bf16.msra.mxu0 %v7520_v46  ;;  %v7627_v46 = vld [vmem:[%s8698_s8 + $0x158] ss:$28 sps:$4 sm:$0xff]  }
 0x38e   : > { %5070 = vmatprep.subr.bf16.mxu0 %v7525_v3  ;;  %v7632_v3 = vld [vmem:[%s8698_s8 + $0x194] ss:$28 sps:$4 sm:$0xff]  }
 0x391   : > { %5071 = vmatpush1.bf16.msra.mxu0 %v7523_v4  ;;  %v7630_v4 = vld [vmem:[%s8698_s8 + $0x190] ss:$28 sps:$4 sm:$0xff]  }
 0x392   : > { %5072 = vmatprep.subr.bf16.mxu0 %v7528_v5  ;;  %v7635_v5 = vld [vmem:[%s8698_s8 + $0x1cc] ss:$28 sps:$4 sm:$0xff]  }
 0x395   : > { %5073 = vmatpush1.bf16.msra.mxu0 %v7526_v6  ;;  %v7633_v6 = vld [vmem:[%s8698_s8 + $0x1c8] ss:$28 sps:$4 sm:$0xff]  }
 0x396   : > { %5074 = vmatprep.subr.bf16.mxu0 %v7531_v8  ;;  %v7638_v8 = vld [vmem:[%s8698_s8 + $0x204] ss:$28 sps:$4 sm:$0xff]  }
 0x399   : > { %5075 = vmatpush1.bf16.msra.mxu0 %v7529_v11  ;;  %v7641_v11 = vld [vmem:[%s8698_s8 + $0x23c] ss:$28 sps:$4 sm:$0xff]  }
 0x39a   : > { %5076 = vmatprep.subr.bf16.mxu0 %v7534_v13  ;;  %v7644_v13 = vld [vmem:[%s8698_s8 + $0x274] ss:$28 sps:$4 sm:$0xff]  }
 0x39d   : > { %5077 = vmatpush1.bf16.msra.mxu0 %v7532_v19  ;;  %v7645_v19 = vld [vmem:[%s8698_s8 + $0x2a8] ss:$28 sps:$4 sm:$0xff]  }
 0x39e   : > { %5078 = vmatprep.subr.bf16.mxu0 %v7540_v21  ;;  %v7650_v21 = vld [vmem:[%s8698_s8 + $0x2e4] ss:$28 sps:$4 sm:$0xff]  }
 0x3a1   : > { %5079 = vmatpush1.bf16.msra.mxu0 %v7538_v61  ;;  %v7648_v61 = vld [vmem:[%s8698_s8 + $0x2e0] ss:$28 sps:$4 sm:$0xff]  }
 0x3a2   : > { %5080 = vmatprep.subr.bf16.mxu0 %v7546_v22  ;;  %v7653_v22 = vld [vmem:[%s8698_s8 + $0x31c] ss:$28 sps:$4 sm:$0xff]  }
 0x3a5   : > { %5081 = vmatpush1.bf16.msra.mxu0 %v7544_v59  ;;  %v7651_v59 = vld [vmem:[%s8698_s8 + $0x318] ss:$28 sps:$4 sm:$0xff]  }
 0x3a6   : > { %5082 = vmatprep.subr.bf16.mxu0 %v7552_v60  ;;  %v7656_v60 = vld [vmem:[%s8698_s8 + $0x354] ss:$28 sps:$4 sm:$0xff]  }
 0x3a9   : > { %5083 = vmatpush1.bf16.msra.mxu0 %v7550_v25  ;;  %v7654_v25 = vld [vmem:[%s8698_s8 + $0x350] ss:$28 sps:$4 sm:$0xff]  }
 0x3aa   : > { %5084 = vmatprep.subr.bf16.mxu0 %v7558_v26  ;;  %v7659_v26 = vld [vmem:[%s8698_s8 + $0x14] ss:$28 sps:$4 sm:$0xff]  }
 0x3ad   : > { %5085 = vmatpush1.bf16.msra.mxu0 %v7556_v28  ;;  %v7657_v28 = vld [vmem:[%s8698_s8 + $0x10] ss:$28 sps:$4 sm:$0xff]  }
 0x3b0   : > { %5087 = vmatmul.mubr.bf16.vlgmr.msra.gmra.mrb[0].mxu0 %v2588_v29  ;;  %v7662_v29 = vld [vmem:[%s8698_s8 + $0x4c] ss:$28 sps:$4 sm:$0xff]  }
 0x3bf   : > { %v5129_v30 = vpop.f32.mrb[4].mxu1 }
 0x3c0   : > { %v5131_v31 = vpop.f32.mrb[5].mxu1 }
 0x3c1   : > { %v5133_v33 = vpop.f32.mrb[6].mxu1 }
 0x3c2   : > { %v5134_v35 = vpop.f32.mrb[7].mxu1  ;;  %v7668_v33 = vld [vmem:[%s8698_s8 + $0xbc] ss:$28 sps:$4 sm:$0xff]  }
 0x3c3   : > { %v7671_v35 = vld [vmem:[%s8698_s8 + $0xf4] ss:$28 sps:$4 sm:$0xff]  }
 0x483   : > { %v5088_v47 = vpop.f32.mrb[0].mxu0 }
 0x484   : > { %v6856_v48 = vadd.f32 %v6855_v44, %v5088_v47  ;;  %v5090_v20 = vpop.f32.mrb[1].mxu0  ;;  %v7678_v44 = vld [vmem:[%s8698_s8 + $0x198] ss:$28 sps:$4 sm:$0xff]   ;;  %v7681_v47 = vld [vmem:[%s8698_s8 + $0x1d0] ss:$28 sps:$4 sm:$0xff]  }
 0x485   : > { %v6859_v49 = vadd.f32 %v6858_v45, %v5090_v20  ;;  %v5092_v52 = vpop.f32.mrb[2].mxu0  ;;  %v7683_v45 = vld [vmem:[%s8698_s8 + $0x1d4] ss:$28 sps:$4 sm:$0xff]   ;;  %v7684_v20 = vld [vmem:[%s8698_s8 + $0x208] ss:$28 sps:$4 sm:$0xff]  }
 0x486   : > { %v6857_v53 = vadd.f32 %v6856_v48, %v5129_v30  ;;  %v5093_v54 = vpop.f32.mrb[3].mxu0  ;;  %v7660_v30 = vld [vmem:[%s8698_s8 + $0x48] ss:$28 sps:$4 sm:$0xff]   ;;  %v7687_v52 = vld [vmem:[%s8698_s8 + $0x240] ss:$28 sps:$4 sm:$0xff]  }
 0x487   : > { %v6860_v55 = vadd.f32 %v6859_v49, %v5131_v31  ;;  %v7665_v31 = vld [vmem:[%s8698_s8 + $0x84] ss:$28 sps:$4 sm:$0xff]   ;;  %v7686_v48 = vld [vmem:[%s8698_s8 + $0x20c] ss:$28 sps:$4 sm:$0xff]   ;;  %v7690_v54 = vld [vmem:[%s8698_s8 + $0x278] ss:$28 sps:$4 sm:$0xff]  }
 0x488   : > { %v5136_v56 = vmax.f32 %v6857_v53, 0.0  ;;  %v7689_v49 = vld [vmem:[%s8698_s8 + $0x244] ss:$28 sps:$4 sm:$0xff]   ;;  %v7692_v53 = vld [vmem:[%s8698_s8 + $0x27c] ss:$28 sps:$4 sm:$0xff]  }
 0x489   : > { %v5137_v57 = vmax.f32 %v6860_v55, 0.0  ;;  %v7695_v55 = vld [vmem:[%s8698_s8 + $0x2b4] ss:$28 sps:$4 sm:$0xff]  }
 0x48a   : > { %v9321_v1 = vpack.c.bf16 %v5136_v56, %v5136_v56  ;;  %v7693_v56 = vld [vmem:[%s8698_s8 + $0x2b0] ss:$28 sps:$4 sm:$0xff]  }
 0x48b   : > { %v9318_v58 = vpack.c.bf16 %v5137_v57, %v5137_v57  ;;  %v7698_v57 = vld [vmem:[%s8698_s8 + $0x2ec] ss:$28 sps:$4 sm:$0xff]  }
 0x48d   : > { %5883 = vmatprep.mubr.bf16.mxu1 %v9318_v58 }
 0x48e   : > { %5884 = vmatmul.mubr.bf16.vlgmr.msra.gmra.mrb[8].mxu1 %v9321_v1 }
 0x48f   : > { %5893 = vmatpush1.bf16.msra.mxu1 %v7609_v0  ;;  %5924 = vmatprep.mubr.bf16.mxu1 %v9318_v58  ;;  %v7696_v0 = vld [vmem:[%s8698_s8 + $0x2e8] ss:$28 sps:$4 sm:$0xff]  }
 0x490   : > { %5894 = vmatprep.subr.bf16.mxu1 %v7614_v39  ;;  %v7701_v39 = vld [vmem:[%s8698_s8 + $0x324] ss:$28 sps:$4 sm:$0xff]  }
 0x493   : > { %5895 = vmatpush1.bf16.msra.mxu1 %v7612_v62  ;;  %v7699_v62 = vld [vmem:[%s8698_s8 + $0x320] ss:$28 sps:$4 sm:$0xff]  }
 0x494   : > { %5896 = vmatprep.subr.bf16.mxu1 %v7617_v63  ;;  %v7704_v63 = vld [vmem:[%s8698_s8 + $0x35c] ss:$28 sps:$4 sm:$0xff]  }
 0x497   : > { %5897 = vmatpush1.bf16.msra.mxu1 %v7615_v17  ;;  %v7702_v17 = vld [vmem:[%s8698_s8 + $0x358] ss:$28 sps:$4 sm:$0xff]  }
 0x498   : > { %5898 = vmatprep.subr.bf16.mxu1 %v7620_v50  ;;  %v7705_v50 = vld [vmem:[%s8698_s8 + $0x1d8] ss:$28 sps:$4 sm:$0xff]  }
 0x49b   : > { %5899 = vmatpush1.bf16.msra.mxu1 %v7618_v2  ;;  %v7706_v2 = vld [vmem:[%s8698_s8 + $0x18] ss:$28 sps:$4 sm:$0xff]  }
 0x49c   : > { %5900 = vmatprep.subr.bf16.mxu1 %v7623_v18  ;;  %v7707_v18 = vld [vmem:[%s8698_s8 + $0x210] ss:$28 sps:$4 sm:$0xff]  }
 0x49f   : > { %5901 = vmatpush1.bf16.msra.mxu1 %v7621_v51  ;;  %v7708_v51 = vld [vmem:[%s8698_s8 + $0x50] ss:$28 sps:$4 sm:$0xff]  }
 0x4a0   : > { %5902 = vmatprep.subr.bf16.mxu1 %v7626_v10  ;;  %v7709_v10 = vld [vmem:[%s8698_s8 + $0x248] ss:$28 sps:$4 sm:$0xff]  }
 0x4a3   : > { %5903 = vmatpush1.bf16.msra.mxu1 %v7624_v14  ;;  %v7710_v14 = vld [vmem:[%s8698_s8 + $0x88] ss:$28 sps:$4 sm:$0xff]  }
 0x4a4   : > { %5904 = vmatprep.subr.bf16.mxu1 %v7629_v27  ;;  %v7711_v27 = vld [vmem:[%s8698_s8 + $0x280] ss:$28 sps:$4 sm:$0xff]  }
 0x4a7   : > { %5905 = vmatpush1.bf16.msra.mxu1 %v7627_v46  ;;  %v7712_v46 = vld [vmem:[%s8698_s8 + $0xc0] ss:$28 sps:$4 sm:$0xff]  }
 0x4a8   : > { %5906 = vmatprep.subr.bf16.mxu1 %v7632_v3  ;;  %v7713_v3 = vld [vmem:[%s8698_s8 + $0x2b8] ss:$28 sps:$4 sm:$0xff]  }
 0x4ab   : > { %5907 = vmatpush1.bf16.msra.mxu1 %v7630_v4  ;;  %v7714_v4 = vld [vmem:[%s8698_s8 + $0xf8] ss:$28 sps:$4 sm:$0xff]  }
 0x4ac   : > { %5908 = vmatprep.subr.bf16.mxu1 %v7635_v5  ;;  %v7716_v5 = vld [vmem:[%s8698_s8 + $0x130] ss:$28 sps:$4 sm:$0xff]  }
 0x4af   : > { %5909 = vmatpush1.bf16.msra.mxu1 %v7633_v6  ;;  %v7717_v6 = vld [vmem:[%s8698_s8 + $0x328] ss:$28 sps:$4 sm:$0xff]  }
 0x4b0   : > { %5910 = vmatprep.subr.bf16.mxu1 %v7638_v8  ;;  %v7718_v8 = vld [vmem:[%s8698_s8 + $0x168] ss:$28 sps:$4 sm:$0xff]  }
 0x4b3   : > { %5911 = vmatpush1.bf16.msra.mxu1 %v7636_v9  ;;  %v7719_v9 = vld [vmem:[%s8698_s8 + $0x360] ss:$28 sps:$4 sm:$0xff]  }
 0x4b4   : > { %5912 = vmatprep.subr.bf16.mxu1 %v7641_v11  ;;  %v7720_v11 = vld [vmem:[%s8698_s8 + $0x1a0] ss:$28 sps:$4 sm:$0xff]  }
 0x4b7   : > { %5913 = vmatpush1.bf16.msra.mxu1 %v7639_v12  ;;  %v5140_v12 = vld [vmem:[#allocation2] sm:$0xff] }
 0x4b8   : > { %5914 = vmatprep.subr.bf16.mxu1 %v7644_v13  ;;  %v5141_v13 = vld [vmem:[#allocation2 + $0x8] sm:$0xff] }
 0x4bb   : > { %5915 = vmatpush1.bf16.msra.mxu1 %v7642_v15 }
 0x4bc   : > { %5916 = vmatprep.subr.bf16.mxu1 %v7647_v16 }
 0x4bf   : > { %5917 = vmatpush1.bf16.msra.mxu1 %v7645_v19 }
 0x4c0   : > { %5918 = vmatprep.subr.bf16.mxu1 %v7650_v21 }
 0x4c3   : > { %5919 = vmatpush1.bf16.msra.mxu1 %v7648_v61 }
 0x4c4   : > { %5920 = vmatprep.subr.bf16.mxu1 %v7653_v22 }
 0x4c7   : > { %5921 = vmatpush1.bf16.msra.mxu1 %v7651_v59  ;;  %v5142_v59 = vld [vmem:[#allocation2 + $0x10] sm:$0xff] }
 0x4c8   : > { %5922 = vmatprep.subr.bf16.mxu1 %v7656_v60  ;;  %v5143_v60 = vld [vmem:[#allocation2 + $0x18] sm:$0xff] }
 0x4cb   : > { %5923 = vmatpush1.bf16.msra.mxu1 %v7654_v25 }
 0x4cc   : > { %5933 = vmatprep.subr.bf16.mxu1 %v7659_v26 }
 0x4ce   : > { %5925 = vmatmul.mubr.bf16.vlgmr.msra.gmra.mrb[12].mxu1 %v9321_v1 }
 0x4cf   : > { %5934 = vmatpush1.bf16.msra.mxu1 %v7657_v28  ;;  %5965 = vmatprep.mubr.bf16.mxu1 %v9318_v58 }
 0x4d0   : > { %5935 = vmatprep.subr.bf16.mxu1 %v7662_v29 }
 0x4d3   : > { %5936 = vmatpush1.bf16.msra.mxu1 %v7660_v30 }
 0x4d4   : > { %5937 = vmatprep.subr.bf16.mxu1 %v7665_v31 }
 0x4d7   : > { %5938 = vmatpush1.bf16.msra.mxu1 %v7663_v7  ;;  %v5145_v7 = vld [vmem:[#allocation2 + $0x28] sm:$0xff] }
 0x4d8   : > { %5939 = vmatprep.subr.bf16.mxu1 %v7668_v33 }
 0x4db   : > { %5940 = vmatpush1.bf16.msra.mxu1 %v7666_v34 }
 0x4dc   : > { %5941 = vmatprep.subr.bf16.mxu1 %v7671_v35 }
 0x4df   : > { %5942 = vmatpush1.bf16.msra.mxu1 %v7669_v36 }
 0x4e0   : > { %5943 = vmatprep.subr.bf16.mxu1 %v7674_v37 }
 0x4e3   : > { %5944 = vmatpush1.bf16.msra.mxu1 %v7672_v38 }
 0x4e4   : > { %5945 = vmatprep.subr.bf16.mxu1 %v7677_v40 }
 0x4e7   : > { %5946 = vmatpush1.bf16.msra.mxu1 %v7675_v42  ;;  %v5146_v42 = vld [vmem:[#allocation2 + $0x30] sm:$0xff] }
 0x4e8   : > { %5947 = vmatprep.subr.bf16.mxu1 %v7680_v43 }
 0x4eb   : > { %5948 = vmatpush1.bf16.msra.mxu1 %v7678_v44 }
 0x4ec   : > { %5949 = vmatprep.subr.bf16.mxu1 %v7683_v45 }
 0x4ef   : > { %5950 = vmatpush1.bf16.msra.mxu1 %v7681_v47 }
 0x4f0   : > { %5951 = vmatprep.subr.bf16.mxu1 %v7686_v48 }
 0x4f3   : > { %5952 = vmatpush1.bf16.msra.mxu1 %v7684_v20  ;;  %v6051_v20 = vsub.s32 (!%p6826_p12), 2, %v8724_v32 }
 0x4f4   : > { %5953 = vmatprep.subr.bf16.mxu1 %v7689_v49  ;;  %v6055_v49 = vsub.s32 (!%p6826_p12), 3, %v8724_v32 }
 0x4f7   : > { %5954 = vmatpush1.bf16.msra.mxu1 %v7687_v52 }
 0x4f8   : > { %5955 = vmatprep.subr.bf16.mxu1 %v7692_v53  ;;  %v6059_v53 = vsub.s32 (!%p6826_p12), 4, %v8724_v32 }
 0x4fb   : > { %5956 = vmatpush1.bf16.msra.mxu1 %v7690_v54 }
 0x4fc   : > { %5957 = vmatprep.subr.bf16.mxu1 %v7695_v55 }
 0x4ff   : > { %5958 = vmatpush1.bf16.msra.mxu1 %v7693_v56  ;;  %v6039_v56 = vld [vmem:[%s9482_s4] sm:$0xff] (!%p6826_p12) }
 0x500   : > { %5959 = vmatprep.subr.bf16.mxu1 %v7698_v57  ;;  %v6063_v57 = vsub.s32 (!%p6826_p12), 5, %v8724_v32 }
 0x503   : > { %5960 = vmatpush1.bf16.msra.mxu1 %v7696_v0  ;;  %v6067_v0 = vsub.s32 (!%p6826_p12), 6, %v8724_v32 }
 0x504   : > { %5961 = vmatprep.subr.bf16.mxu1 %v7701_v39  ;;  %v6044_v39 = vrot.slane (!%p6826_p12), %v6039_v56, %v2363_v23 }
 0x507   : > { %5962 = vmatpush1.bf16.msra.mxu1 %v7699_v62  ;;  %v6048_v62 = vrot.slane (!%p6826_p12), %v6039_v56, %v2367_v41 }
 0x508   : > { %5963 = vmatprep.subr.bf16.mxu1 %v7704_v63  ;;  %v6052_v63 = vrot.slane (!%p6826_p12), %v6039_v56, %v6051_v20 }
 0x50b   : > { %5964 = vmatpush1.bf16.msra.mxu1 %v7702_v17  ;;  %v6056_v17 = vrot.slane (!%p6826_p12), %v6039_v56, %v6055_v49 }
 0x50c   : > { %6833 = vmatprep.subr.bf16.mxu1 %v7705_v50 }
 0x50e   : > { %5966 = vmatmul.mubr.bf16.vlgmr.msra.gmra.mrb[16].mxu1 %v9321_v1 }
 0x50f   : > { %6834 = vmatpush3.bf16.msra.mxu1 %v7706_v2  ;;  %6006 = vmatprep.mubr.bf16.mxu1 %v9318_v58  ;;  %v7715_v58 = vld [vmem:[%s8698_s8 + $0x2f0] ss:$28 sps:$4 sm:$0xff]   ;;  %v6060_v2 = vrot.slane (!%p6826_p12), %v6039_v56, %v6059_v53 }
 0x510   : > { %6835 = vmatprep.subr.bf16.mxu1 %v7707_v18 }
 0x513   : > { %6836 = vmatpush3.bf16.msra.mxu1 %v7708_v51 }
 0x514   : > { %6837 = vmatprep.subr.bf16.mxu1 %v7709_v10 }
 0x517   : > { %6838 = vmatpush3.bf16.msra.mxu1 %v7710_v14 }
 0x518   : > { %6839 = vmatprep.subr.bf16.mxu1 %v7711_v27  ;;  %v6068_v27 = vrot.slane (!%p6826_p12), %v6039_v56, %v6067_v0 }
 0x51b   : > { %6840 = vmatpush3.bf16.msra.mxu1 %v7712_v46 }
 0x51c   : > { %6841 = vmatprep.subr.bf16.mxu1 %v7713_v3  ;;  %v6064_v3 = vrot.slane (!%p6826_p12), %v6039_v56, %v6063_v57 }
 0x51f   : > { %6842 = vmatpush3.bf16.msra.mxu1 %v7714_v4 }
 0x520   : > { %6843 = vmatprep.subr.bf16.mxu1 %v7715_v58 }
 0x523   : > { %6844 = vmatpush3.bf16.msra.mxu1 %v7716_v5 }
 0x524   : > { %6845 = vmatprep.subr.bf16.mxu1 %v7717_v6 }
 0x527   : > { %6846 = vmatpush3.bf16.msra.mxu1 %v7718_v8 }
 0x528   : > { %6847 = vmatprep.subr.bf16.mxu1 %v7719_v9 }
 0x52b   : > { %6848 = vmatpush3.bf16.msra.mxu1 %v7720_v11  ;;  %v9423_v11 = vand.u32 (!%p6826_p12), 127, %v2361_v24 }
 0x52d   : > { %vm6091_vm1 = vcmp.lt.s32.totalorder (!%p6826_p12), %v9423_v11, 51  ;;  %vm6114_vm2 = vcmp.eq.s32.totalorder (!%p6826_p12), %v9423_v11, 0  ;;  %vm6131_vm3 = vcmp.eq.s32.totalorder (!%p6826_p12), %v9423_v11, 1  ;;  %vm6148_vm4 = vcmp.eq.s32.totalorder (!%p6826_p12), %v9423_v11, 2 }
 0x52e   : > { %6007 = vmatmul.mubr.bf16.vlgmr.msra.gmra.mrb[20].mxu1 %v9321_v1  ;;  %v5144_v1 = vld [vmem:[#allocation2 + $0x20] sm:$0xff]  ;;  %vm6165_vm5 = vcmp.eq.s32.totalorder (!%p6826_p12), %v9423_v11, 3  ;;  %vm6182_vm6 = vcmp.eq.s32.totalorder (!%p6826_p12), %v9423_v11, 4  ;;  %vm6199_vm7 = vcmp.eq.s32.totalorder (!%p6826_p12), %v9423_v11, 5 }
 0x561   : > { %v5885_v15 = vpop.f32.mrb[8].mxu1 }
 0x562   : > { %v6014_v16 = vadd.f32 %v5885_v15, %v5140_v12  ;;  %v5887_v19 = vpop.f32.mrb[9].mxu1 }
 0x563   : > { %v6015_v21 = vadd.f32 %v5887_v19, %v5141_v13  ;;  %v5889_v61 = vpop.f32.mrb[10].mxu1 }
 0x564   : > { %6021 = vst [vmem:[#allocation2] sm:$0xff] %v6014_v16  ;;  %v5890_v22 = vpop.f32.mrb[11].mxu1 }
 0x565   : > { %6022 = vst [vmem:[#allocation2 + $0x8] sm:$0xff] %v6015_v21 }
 0x56b   : > { %v6032_v52 = vld [vmem:[#allocation2] sm:$0xff] (!%p6826_p12) }
 0x56c   : > { %v6033_v54 = vld [vmem:[#allocation2 + $0x8] sm:$0xff] (!%p6826_p12)  ;;  %v6076_v18 = vadd.f32 (!%p6826_p12), %v6044_v39, %v6032_v52 }
 0x56d   : > { %v6077_v51 = vadd.f32 (!%p6826_p12), %v6048_v62, %v6033_v54 }
 0x56f   : > { %v6083_v58 = vadd.f32 (!%p6826_p12), %v6077_v51, %v6076_v18 }
 0x5a1   : > { %v5926_v25 = vpop.f32.mrb[12].mxu1 }
 0x5a2   : > { %v6016_v26 = vadd.f32 %v5926_v25, %v5142_v59  ;;  %v5928_v28 = vpop.f32.mrb[13].mxu1 }
 0x5a3   : > { %v6017_v29 = vadd.f32 %v5928_v28, %v5143_v60  ;;  %v5930_v30 = vpop.f32.mrb[14].mxu1 }
 0x5a4   : > { %6023 = vst [vmem:[#allocation2 + $0x10] sm:$0xff] %v6016_v26  ;;  %v5931_v31 = vpop.f32.mrb[15].mxu1 }
 0x5a5   : > { %6024 = vst [vmem:[#allocation2 + $0x18] sm:$0xff] %v6017_v29 }
 0x5ab   : > { %v6034_v55 = vld [vmem:[#allocation2 + $0x10] sm:$0xff] (!%p6826_p12) }
 0x5ac   : > { %v6035_v50 = vld [vmem:[#allocation2 + $0x18] sm:$0xff] (!%p6826_p12)  ;;  %v6078_v10 = vadd.f32 (!%p6826_p12), %v6052_v63, %v6034_v55  ;;  %v6827_v63 = vld [vmem:[%s9483_s5] ss:$0 sm:$0xff] (!%p6826_p12) }
 0x5ad   : > { %v6079_v4 = vadd.f32 (!%p6826_p12), %v6056_v17, %v6035_v50 }
 0x5ae   : > { %v6084_v8 = vadd.f32 (!%p6826_p12), %v6083_v58, %v6078_v10 }
 0x5b0   : > { %v6085_v32 = vadd.f32 (!%p6826_p12), %v6084_v8, %v6079_v4 }
 0x5e1   : > { %v5967_v33 = vpop.f32.mrb[16].mxu1 }
 0x5e2   : > { %v6018_v34 = vadd.f32 %v5967_v33, %v5144_v1  ;;  %v5969_v35 = vpop.f32.mrb[17].mxu1 }
 0x5e3   : > { %v6019_v36 = vadd.f32 %v5969_v35, %v5145_v7  ;;  %v5971_v37 = vpop.f32.mrb[18].mxu1 }
 0x5e4   : > { %6025 = vst [vmem:[#allocation2 + $0x20] sm:$0xff] %v6018_v34  ;;  %v5972_v38 = vpop.f32.mrb[19].mxu1 }
 0x5e5   : > { %6026 = vst [vmem:[#allocation2 + $0x28] sm:$0xff] %v6019_v36 }
 0x5eb   : > { %v6036_v14 = vld [vmem:[#allocation2 + $0x20] sm:$0xff] (!%p6826_p12) }
 0x5ec   : > { %v6037_v5 = vld [vmem:[#allocation2 + $0x28] sm:$0xff] (!%p6826_p12)  ;;  %v6080_v6 = vadd.f32 (!%p6826_p12), %v6060_v2, %v6036_v14 }
 0x5ed   : > { %v6081_v9 = vadd.f32 (!%p6826_p12), %v6064_v3, %v6037_v5 }
 0x5ee   : > { %v6086_v41 = vadd.f32 (!%p6826_p12), %v6085_v32, %v6080_v6 }
 0x5f0   : > { %v6087_v13 = vadd.f32 (!%p6826_p12), %v6086_v41, %v6081_v9 }
 0x5f2   : > { %v6088_v21 = vmul.f32 (!%p6826_p12), 0.16666667, %v6087_v13 }
 0x601   : > { %v6849_v40 = vpop.f32.mrb[20].mxu1  ;;  %6031 = sbr.rel (%p6826_p12) target bundleno = 1885 (0x75d), region = 90 }
 0x602   : > { %v6850_v43 = vpop.f32.mrb[21].mxu1 }
 0x603   : > { %v6851_v44 = vadd.f32 %v6850_v43, %v6849_v40  ;;  %v6852_v45 = vpop.f32.mrb[22].mxu1 }
 0x604   : > { %v6853_v47 = vpop.f32.mrb[23].mxu1 }
 0x605   : > { %v6020_v48 = vadd.f32 %v6851_v44, %v5146_v42 }
 0x607   : > { %6027 = vst [vmem:[#allocation2 + $0x30] sm:$0xff] %v6020_v48 }
 0x60e   : > { %v6038_v46 = vld [vmem:[#allocation2 + $0x30] sm:$0xff] }
 0x60f   : > { %v6082_v23 = vadd.f32 %v6068_v27, %v6038_v46 }
 0x611   : > { %v6093_v12 = vadd.f32 %v6082_v23, %v6076_v18  ;;  %v6133_v15 = vadd.f32 %v6082_v23, %v6078_v10  ;;  %v6116_v16 = vadd.f32 %v6082_v23, %v6077_v51  ;;  %v6150_v19 = vadd.f32 %v6082_v23, %v6079_v4 }
 0x612   : > { %v6167_v61 = vadd.f32 %v6082_v23, %v6080_v6  ;;  %v6184_v22 = vadd.f32 %v6082_v23, %v6081_v9 }
 0x613   : > { %v6094_v59 = vsub.f32 %v6093_v12, %v6088_v21  ;;  %v6134_v60 = vsub.f32 %v6133_v15, %v6088_v21  ;;  %v6117_v25 = vsub.f32 %v6116_v16, %v6088_v21  ;;  %v6151_v26 = vsub.f32 %v6150_v19, %v6088_v21 }
 0x614   : > { %v6168_v31 = vsub.f32 %v6167_v61, %v6088_v21  ;;  %v6185_v1 = vsub.f32 %v6184_v22, %v6088_v21 }
 0x615   : > { %v6095_v28 = vsel %vm6091_vm1, %v6094_v59, -1e+30  ;;  %v6135_v24 = vsel %vm6091_vm1, %v6134_v60, -1e+30  ;;  %v6118_v29 = vsel %vm6091_vm1, %v6117_v25, -1e+30 }
 0x616   : > { %6096 = vmax.xlane.f32.xlu0 %v6095_v28  ;;  %6136 = vmax.xlane.f32.xlu1 %v6135_v24  ;;  %v6152_v30 = vsel %vm6091_vm1, %v6151_v26, -1e+30  ;;  %v6169_v7 = vsel %vm6091_vm1, %v6168_v31, -1e+30  ;;  %v6186_v33 = vsel %vm6091_vm1, %v6185_v1, -1e+30 }
 0x61a   : > { %6119 = vmax.xlane.f32.xlu0 %v6118_v29  ;;  %6153 = vmax.xlane.f32.xlu1 %v6152_v30 }
 0x61e   : > { %6170 = vmax.xlane.f32.xlu0 %v6169_v7  ;;  %6187 = vmax.xlane.f32.xlu1 %v6186_v33 }
 0x6a3   : > { %v6097_v34 = vpop.xlane.xlu0 %6096  ;;  %v6137_v35 = vpop.xlane.xlu1 %6136 }
 0x6a4   : > { %v6098_v36 = vsub.f32 %v6095_v28, %v6097_v34  ;;  %v6138_v37 = vsub.f32 %v6135_v24, %v6137_v35 }
 0x6a6   : > { %v6099_v38 = vmul.f32 1.442695, %v6098_v36  ;;  %v6139_v40 = vmul.f32 1.442695, %v6138_v37 }
 0x6a7   : > { %v6120_v42 = vpop.xlane.xlu0 %6119  ;;  %v6154_v43 = vpop.xlane.xlu1 %6153 }
 0x6a8   : > { %7721 = vpow2.f32 %v6099_v38  ;;  %v6121_v44 = vsub.f32 %v6118_v29, %v6120_v42  ;;  %v6155_v45 = vsub.f32 %v6152_v30, %v6154_v43 }
 0x6a9   : > { %7723 = vpow2.f32 %v6139_v40 }
 0x6aa   : > { %v6122_v47 = vmul.f32 1.442695, %v6121_v44  ;;  %v6156_v48 = vmul.f32 1.442695, %v6155_v45 }
 0x6ab   : > { %v6171_v20 = vpop.xlane.xlu0 %6170  ;;  %v6188_v49 = vpop.xlane.xlu1 %6187 }
 0x6ac   : > { %7725 = vpow2.f32 %v6122_v47  ;;  %v6172_v52 = vsub.f32 %v6169_v7, %v6171_v20  ;;  %v6189_v53 = vsub.f32 %v6186_v33, %v6188_v49 }
 0x6ad   : > { %7727 = vpow2.f32 %v6156_v48 }
 0x6ae   : > { %v6173_v54 = vmul.f32 1.442695, %v6172_v52  ;;  %v6190_v55 = vmul.f32 1.442695, %v6189_v53 }
 0x6b0   : > { %7729 = vpow2.f32 %v6173_v54 }
 0x6b1   : > { %7731 = vpow2.f32 %v6190_v55 }
 0x6b2   : > { %v7722_v56 = vpop.eup %7721 }
 0x6b3   : > { %6110 = vadd.xlane.f32.xlu0 %v7722_v56  ;;  %v7724_v57 = vpop.eup %7723  ;;  %v6107_v50 = vmul.f32 %v7722_v56, %v6827_v63 }
 0x6b4   : > { %v6141_v18 = vmul.f32 %v7724_v57, %v6827_v63 }
 0x6b6   : > { %v7726_v0 = vpop.eup %7725 }
 0x6b7   : > { %6144 = vadd.xlane.f32.xlu0 %v7724_v57  ;;  %6127 = vadd.xlane.f32.xlu1 %v7726_v0  ;;  %v7728_v39 = vpop.eup %7727  ;;  %v6124_v2 = vmul.f32 %v7726_v0, %v6827_v63 }
 0x6b8   : > { %v6158_v51 = vmul.f32 %v7728_v39, %v6827_v63 }
 0x6ba   : > { %v7730_v62 = vpop.eup %7729 }
 0x6bb   : > { %6161 = vadd.xlane.f32.xlu1 %v7728_v39  ;;  %6178 = vadd.xlane.f32.xlu0 %v7730_v62  ;;  %v7732_v17 = vpop.eup %7731  ;;  %v6175_v10 = vmul.f32 %v7730_v62, %v6827_v63 }
 0x6bc   : > { %v6192_v14 = vmul.f32 %v7732_v17, %v6827_v63 }
 0x6bf   : > { %6195 = vadd.xlane.f32.xlu1 %v7732_v17  ;;  %6108 = vadd.xlane.f32.xlu0 %v6107_v50 }
 0x6c3   : > { %6125 = vadd.xlane.f32.xlu1 %v6124_v2  ;;  %6142 = vadd.xlane.f32.xlu0 %v6141_v18 }
 0x6c7   : > { %6159 = vadd.xlane.f32.xlu1 %v6158_v51  ;;  %6176 = vadd.xlane.f32.xlu0 %v6175_v10 }
 0x6cb   : > { %6193 = vadd.xlane.f32.xlu1 %v6192_v14 }
 0x740   : > { %v6111_v27 = vpop.xlane.xlu0 %6110 }
 0x741   : > { %7733 = vrcp.f32 %v6111_v27 }
 0x744   : > { %v6128_v46 = vpop.xlane.xlu1 %6127  ;;  %v6145_v3 = vpop.xlane.xlu0 %6144 }
 0x745   : > { %7735 = vrcp.f32 %v6128_v46 }
 0x746   : > { %7737 = vrcp.f32 %v6145_v3 }
 0x748   : > { %v6162_v4 = vpop.xlane.xlu1 %6161  ;;  %v6179_v58 = vpop.xlane.xlu0 %6178 }
 0x749   : > { %7739 = vrcp.f32 %v6162_v4 }
 0x74a   : > { %7741 = vrcp.f32 %v6179_v58 }
 0x74b   : > { %v7734_v5 = vpop.eup %7733 }
 0x74c   : > { %v6196_v6 = vpop.xlane.xlu1 %6195  ;;  %v6109_v8 = vpop.xlane.xlu0 %6108 }
 0x74d   : > { %7743 = vrcp.f32 %v6196_v6  ;;  %v6113_v23 = vmul.f32 %v7734_v5, %v6109_v8 }
 0x74f   : > { %v7736_v9 = vpop.eup %7735  ;;  %v6115_v15 = vsel %vm6114_vm2, %v6113_v23, 0.0 }
 0x750   : > { %v7738_v32 = vpop.eup %7737  ;;  %v6126_v41 = vpop.xlane.xlu1 %6125 }
 0x751   : > { %v6143_v12 = vpop.xlane.xlu0 %6142  ;;  %v6130_v13 = vmul.f32 %v7736_v9, %v6126_v41 }
 0x752   : > { %v6147_v16 = vmul.f32 %v7738_v32, %v6143_v12 }
 0x753   : > { %v7740_v19 = vpop.eup %7739  ;;  %v6132_v21 = vsel %vm6131_vm3, %v6130_v13, %v6115_v15 }
 0x754   : > { %v7742_v61 = vpop.eup %7741  ;;  %v6160_v22 = vpop.xlane.xlu1 %6159  ;;  %v6149_v25 = vsel %vm6148_vm4, %v6147_v16, %v6132_v21 }
 0x755   : > { %v6177_v59 = vpop.xlane.xlu0 %6176  ;;  %v6164_v60 = vmul.f32 %v7740_v19, %v6160_v22 }
 0x756   : > { %v6181_v26 = vmul.f32 %v7742_v61, %v6177_v59 }
 0x757   : > { %v7744_v28 = vpop.eup %7743  ;;  %v6166_v24 = vsel %vm6165_vm5, %v6164_v60, %v6149_v25 }
 0x758   : > { %v6194_v29 = vpop.xlane.xlu1 %6193  ;;  %v6183_v31 = vsel %vm6182_vm6, %v6181_v26, %v6166_v24 }
 0x759   : > { %v6198_v30 = vmul.f32 %v7744_v28, %v6194_v29 }
 0x75b   : > { %v6200_v1 = vsel %vm6199_vm7, %v6198_v30, %v6183_v31 }
 0x75c   : > { %6201 = vst [vmem:[#allocation4] sm:$0xff] %v6200_v1 }
 0x75d PF: > { %p6828_p13 = scmp.ne.s32.totalorder %s6310_s26, 3 }
 0x75f   : > { %6204 = sbr.rel (%p6828_p13) target bundleno = 1913 (0x779), region = 94 }
 0x766   : > { %6210 = vsyncadd [#allocation5], 96  ;;  %s7814_s12 = smov [#allocation4]  }
 0x767   : > { %s6215_s13 = sshll.u32 %s7814_s12, 4  ;;  %s6216_s13 = int_to_ptr.vmem [resolvable:$true] %s6215_s13 }
 0x768   : > { %s7745_s14 = scalar_lea.vmem %s6216_s13, 32  ;;  %s7749_s16 = scalar_lea.vmem %s6216_s13, 128 }
 0x769   : > { %p7746_p0 = scmp.ne.s32.totalorder %s6216_s13, %s7745_s14  ;;  %p7750_p1 = scmp.lt.s32.totalorder %s6216_s13, %s6216_s13 }
 0x76a   : > { %p7751_p2 = scmp.lt.s32.totalorder %s7749_s16, %s7745_s14 }
 0x76c   : > { %p7752_p3 = por %p7751_p2, %p7750_p1 }
 0x76e   : > { %p7753_p4 = pnand %p7752_p3, %p7746_p0 }
 0x770   : > { %7756 = shalt.err (!%p7753_p4)
}
 0x771   : > { %s7757_s19 = scalar_lea.hbm %s9484_s6, 32 }
 0x772   : > { %p7758_p5 = scmp.ne.s32.totalorder %s9484_s6, %s7757_s19  ;;  %p7761_p6 = scmp.lt.u32.totalorder %s7757_s19, %s9484_s6 }
 0x774   : > { %p7763_p7 = pnand %p7761_p6, %p7758_p5 }
 0x776   : > { %7766 = shalt.err (!%p7763_p7)
}
 0x777   : > { %s7815_s10 = smov 32   ;;  %s7816_s21 = smov 2  }
 0x778   : > { %6221 = dma.vmem_to_hbm [thread:$0]  %s6216_s13, 32, %s9484_s6, [#allocation5], %s7815_s10, %s7815_s10, %s7816_s21  }
 0x779 PF: > { %p6906_p8 = scmp.eq.s32.totalorder %s6310_s26, 3 }
 0x77b   : > { %7788 = dma.done.wait (%p6906_p8), [#allocation5], 128  }
 0x77c   : > { %7790 = vsyncadd (%p6906_p8), [#allocation5], 4294967168 }
 0x77d PF: > { %s17_s25 = sadd.s32 1, %s7809_s25   ;;  %s9485_s21 = smov %s7797_s22 }
 0x77e   : > { %p14_p9 = scmp.ge.s32.totalorder %s17_s25, 6   ;;  %s9486_s22 = smov %s7888_s30 }
 0x77f   : > { %s9487_s23 = smov %s7805_s24  ;;  %s9488_s24 = smov %s9490_s27 }
 0x780   :  { %16 = sbr.rel (!%p14_p9) target bundleno = 3 (0x3), region = 132 }
 0x787   :  { %6231 = vsyncpa [#allocation5], 1 }
 0x788   :  { %6233 = vsyncpa [#allocation5 + $0x1], 1 }

</bundles_post_ra>
